<compile_context>
chip_gen: v6e
topology: v6e:2x2x1
jax: 0.10.0
libtpu: 0.0.40
codegen_flags: <defaults>
</compile_context>

<pallas_src>
import functools
import math

import jax
import jax.numpy as jnp
from jax.experimental import pallas as pl
from jax.experimental.pallas import tpu as pltpu


# ----------------------------------------------------------------------------
# Small helpers
# ----------------------------------------------------------------------------
_VMEM_LIMIT_BYTES = 48 * 1024 * 1024  # fits v7x (64 MiB) with headroom; > v5e/v6e defaults


def _round_up(n, m):
    return ((n + m - 1) // m) * m


def _pad_rows_tile(M, max_tile=256):
    """cdiv row tiling, rounded to multiples of 16 (bf16 sublane packing)."""
    Mp = _round_up(M, 16)
    if Mp <= max_tile:
        return Mp, Mp
    tm = max_tile
    return _round_up(Mp, tm), tm


def _divisor_tile(n, max_tile, align=16):
    """Largest divisor of n <= max_tile, preferring multiples of `align`;
    falls back to the whole axis (full-dim blocks are always legal)."""
    fallback = None
    for t in range(min(n, max_tile), 0, -1):
        if n % t == 0:
            if t % align == 0:
                return t
            if fallback is None:
                fallback = t
    if fallback is not None and fallback % 8 == 0:
        return fallback
    return n


def _cparams(*dims):
    return pltpu.CompilerParams(dimension_semantics=dims,
                                vmem_limit_bytes=_VMEM_LIMIT_BYTES)


def _probe_buffered1():
    """Feature-probe pl.Buffered(1) (single-buffered resident blocks)."""
    try:
        def _k(x_ref, o_ref):
            o_ref[...] = x_ref[...] + 1.0
        x = jnp.zeros((8, 128), jnp.float32)
        y = pl.pallas_call(
            _k,
            out_shape=jax.ShapeDtypeStruct((8, 128), jnp.float32),
            grid=(1,),
            in_specs=[pl.BlockSpec((8, 128), lambda i: (0, 0),
                                   pipeline_mode=pl.Buffered(1))],
            out_specs=pl.BlockSpec((8, 128), lambda i: (0, 0)),
        )(x)
        jax.block_until_ready(y)
        return True
    except Exception:
        return False


_BUFFERED1_OK = _probe_buffered1()


def _resident_spec(shape, index_map):
    """BlockSpec for blocks whose index_map is constant over the grid: single buffer
    (halves resident VMEM) when supported, plain BlockSpec otherwise."""
    if _BUFFERED1_OK:
        return pl.BlockSpec(shape, index_map, pipeline_mode=pl.Buffered(1))
    return pl.BlockSpec(shape, index_map)


# ----------------------------------------------------------------------------
# Generic matmul + bias (used by the patchify convs): M/N/K tiled, f32 accumulator.
# ----------------------------------------------------------------------------
def _matmul_bias_kernel(a_ref, w_ref, b_ref, o_ref, acc_ref):
    @pl.when(pl.program_id(2) == 0)
    def _():
        acc_ref[...] = jnp.zeros_like(acc_ref)

    acc_ref[...] += jnp.dot(a_ref[...], w_ref[...],
                            preferred_element_type=jnp.float32)

    @pl.when(pl.program_id(2) == pl.num_programs(2) - 1)
    def _():
        o_ref[...] = (acc_ref[...] + b_ref[...]).astype(o_ref.dtype)


def pallas_matmul_bias(a, w, bias, out_dtype=jnp.bfloat16,
                       max_tm=256, max_tn=512, max_tk=512):
    """(M, K) @ (K, N) + bias[N].  bf16 MXU operands, f32 accumulation, tiled M/N/K."""
    M, K = a.shape
    K2, N = w.shape
    assert K == K2, (a.shape, w.shape)
    a = a.astype(jnp.bfloat16)
    w = w.astype(jnp.bfloat16)
    bias2 = bias.reshape(1, N).astype(jnp.float32)

    Mp, tm = _pad_rows_tile(M, max_tm)
    tn = max_tn if N >= max_tn else _round_up(N, 128)
    Np = _round_up(N, tn)
    tk = max_tk if K >= max_tk else _round_up(K, 128)
    Kp = _round_up(K, tk)

    if (Mp, Kp) != (M, K):
        a = jnp.pad(a, ((0, Mp - M), (0, Kp - K)))
    if (Kp, Np) != (K, N):
        w = jnp.pad(w, ((0, Kp - K), (0, Np - N)))
        bias2 = jnp.pad(bias2, ((0, 0), (0, Np - N)))

    grid = (Mp // tm, Np // tn, Kp // tk)
    out = pl.pallas_call(
        _matmul_bias_kernel,
        out_shape=jax.ShapeDtypeStruct((Mp, Np), out_dtype),
        grid=grid,
        in_specs=[
            pl.BlockSpec((tm, tk), lambda i, j, k: (i, k)),
            pl.BlockSpec((tk, tn), lambda i, j, k: (k, j)),
            pl.BlockSpec((1, tn), lambda i, j, k: (0, j)),
        ],
        out_specs=pl.BlockSpec((tm, tn), lambda i, j, k: (i, j)),
        scratch_shapes=[pltpu.VMEM((tm, tn), jnp.float32)],
        compiler_params=_cparams("parallel", "parallel", "arbitrary"),
    )(a, w, bias2)
    if (Mp, Np) != (M, N):
        out = out[:M, :N]
    return out


# ----------------------------------------------------------------------------
# Transformer block, kernel A: (posemb add) + LN1 + QKV projection.
# ----------------------------------------------------------------------------
def _qkv_kernel(x_ref, *refs, eps, has_pe):
    if has_pe:
        pe_ref, g_ref, b_ref, w_ref, bias_ref, q_ref, k_ref, v_ref = refs
    else:
        g_ref, b_ref, w_ref, bias_ref, q_ref, k_ref, v_ref = refs
        pe_ref = None

    x = x_ref[0].astype(jnp.float32)                       # (tm, C)
    if has_pe:
        x = x + pe_ref[...]                                # fused sincos posemb add
    mu = jnp.mean(x, axis=-1, keepdims=True)
    xc = x - mu
    var = jnp.mean(xc * xc, axis=-1, keepdims=True)
    h = xc * jax.lax.rsqrt(var + eps) * g_ref[...] + b_ref[...]

    # 1/sqrt(dh) is pre-folded into the q columns of the weight (prep_params).
    qkv = jnp.dot(h.astype(jnp.bfloat16), w_ref[...],
                  preferred_element_type=jnp.float32) + bias_ref[...]   # (tm, 3C)
    C = x_ref.shape[-1]
    q_ref[0] = qkv[:, :C].astype(q_ref.dtype)
    k_ref[0] = qkv[:, C:2 * C].astype(k_ref.dtype)
    v_ref[0] = qkv[:, 2 * C:].astype(v_ref.dtype)


def pallas_qkv(x, bp, pe=None):
    """x: (B, S, C) bf16 -> q, k, v each (B, S, C) bf16 (lane-dense slabs)."""
    B, S, C = x.shape
    tm = _divisor_tile(S, 256)
    grid = (B, S // tm)
    kern = functools.partial(_qkv_kernel, eps=1e-5, has_pe=pe is not None)

    in_specs = [pl.BlockSpec((1, tm, C), lambda b, i: (b, i, 0))]
    args = [x]
    if pe is not None:
        in_specs.append(pl.BlockSpec((tm, C), lambda b, i: (i, 0)))
        args.append(pe)
    in_specs += [
        _resident_spec((1, C), lambda b, i: (0, 0)),
        _resident_spec((1, C), lambda b, i: (0, 0)),
        _resident_spec((C, 3 * C), lambda b, i: (0, 0)),
        _resident_spec((1, 3 * C), lambda b, i: (0, 0)),
    ]
    args += [bp["ln1_g"], bp["ln1_b"], bp["qkv_w"], bp["qkv_b"]]

    out_shape = tuple(jax.ShapeDtypeStruct((B, S, C), jnp.bfloat16) for _ in range(3))
    out_specs = tuple(pl.BlockSpec((1, tm, C), lambda b, i: (b, i, 0)) for _ in range(3))
    return pl.pallas_call(
        kern, out_shape=out_shape, grid=grid,
        in_specs=in_specs, out_specs=out_specs,
        compiler_params=_cparams("parallel", "parallel"),
    )(*args)


# ----------------------------------------------------------------------------
# Transformer block, kernel B: q-tiled attention (heads batched) + out proj + residual.
# ----------------------------------------------------------------------------
def _flash_attn_kernel(x_ref, *refs, num_heads, has_pe):
    if has_pe:
        pe_ref, q_ref, k_ref, v_ref, pw_ref, pb_ref, o_ref = refs
    else:
        q_ref, k_ref, v_ref, pw_ref, pb_ref, o_ref = refs
        pe_ref = None

    C = x_ref.shape[-1]
    dh = C // num_heads
    q2 = q_ref[0]                                          # (tq, C) bf16
    k2 = k_ref[0]                                          # (S, C)  bf16, resident per batch
    v2 = v_ref[0]                                          # (S, C)  bf16

    # Head-major assembly via static lane slices + leading-axis stack (once per tile).
    qh = jnp.stack([q2[:, h * dh:(h + 1) * dh] for h in range(num_heads)], axis=0)  # (H, tq, dh)
    kh = jnp.stack([k2[:, h * dh:(h + 1) * dh] for h in range(num_heads)], axis=0)  # (H, S, dh)
    vh = jnp.stack([v2[:, h * dh:(h + 1) * dh] for h in range(num_heads)], axis=0)  # (H, S, dh)

    # All heads in one batched dot_general (scale already folded into q).
    s = jnp.einsum('hqd,hkd->hqk', qh, kh,
                   preferred_element_type=jnp.float32)     # (H, tq, S)
    m = jnp.max(s, axis=-1, keepdims=True)
    p = jnp.exp(s - m)
    l = jnp.sum(p, axis=-1, keepdims=True)
    p = p * pl.reciprocal(l, approx=True)                  # EUP reciprocal
    o = jnp.einsum('hqk,hkd->hqd', p.astype(jnp.bfloat16), vh,
                   preferred_element_type=jnp.float32)     # (H, tq, dh)
    # TODO(synk): add a KV grid axis with online-softmax scratch when full K/V no longer
    # fits VMEM (very long sequences).
    o = jnp.concatenate([o[h] for h in range(num_heads)], axis=-1)  # (tq, C)

    proj = jnp.dot(o.astype(jnp.bfloat16), pw_ref[...],
                   preferred_element_type=jnp.float32) + pb_ref[...]
    xres = x_ref[0].astype(jnp.float32)
    if has_pe:
        xres = xres + pe_ref[...]                          # posemb stays in the residual stream
    o_ref[0] = (xres + proj).astype(o_ref.dtype)


def pallas_flash_attn(x, q, k, v, bp, num_heads, pe=None):
    B, S, C = x.shape
    tq = _divisor_tile(S, 128)
    grid = (B, S // tq)
    kern = functools.partial(_flash_attn_kernel, num_heads=num_heads,
                             has_pe=pe is not None)

    in_specs = [pl.BlockSpec((1, tq, C), lambda b, i: (b, i, 0))]
    args = [x]
    if pe is not None:
        in_specs.append(pl.BlockSpec((tq, C), lambda b, i: (i, 0)))
        args.append(pe)
    in_specs += [
        pl.BlockSpec((1, tq, C), lambda b, i: (b, i, 0)),   # q tile
        pl.BlockSpec((1, S, C), lambda b, i: (b, 0, 0)),    # K resident per batch element
        pl.BlockSpec((1, S, C), lambda b, i: (b, 0, 0)),    # V resident per batch element
        _resident_spec((C, C), lambda b, i: (0, 0)),
        _resident_spec((1, C), lambda b, i: (0, 0)),
    ]
    args += [q, k, v, bp["proj_w"], bp["proj_b"]]

    return pl.pallas_call(
        kern, out_shape=jax.ShapeDtypeStruct((B, S, C), x.dtype),
        grid=grid, in_specs=in_specs,
        out_specs=pl.BlockSpec((1, tq, C), lambda b, i: (b, i, 0)),
        compiler_params=_cparams("parallel", "parallel"),
    )(*args)


def pallas_attn_block(x, bp, num_heads, pe=None):
    q, k, v = pallas_qkv(x, bp, pe=pe)
    return pallas_flash_attn(x, q, k, v, bp, num_heads, pe=pe)


# ----------------------------------------------------------------------------
# Transformer block, kernel C: LN2 + FC1 + GELU + FC2 + residual.
# ----------------------------------------------------------------------------
def _mlp_block_kernel(x_ref, g_ref, b_ref, fc1_w_ref, fc1_b_ref,
                      fc2_w_ref, fc2_b_ref, o_ref, *, eps):
    x = x_ref[...].astype(jnp.float32)                     # (tm, C)
    mu = jnp.mean(x, axis=-1, keepdims=True)
    xc = x - mu
    var = jnp.mean(xc * xc, axis=-1, keepdims=True)        # padded rows: var=0, finite, discarded
    h = xc * jax.lax.rsqrt(var + eps) * g_ref[...] + b_ref[...]
    a = jnp.dot(h.astype(jnp.bfloat16), fc1_w_ref[...],
                preferred_element_type=jnp.float32) + fc1_b_ref[...]
    # TODO(synk): PyTorch nn.GELU default is exact erf; tanh approximation used here
    # (erf lowering in Mosaic is not guaranteed).
    a = jax.nn.gelu(a)
    y = jnp.dot(a.astype(jnp.bfloat16), fc2_w_ref[...],
                preferred_element_type=jnp.float32) + fc2_b_ref[...]
    o_ref[...] = (x + y).astype(o_ref.dtype)


def pallas_mlp_block(x, bp):
    """x: (B, S, C) bf16 -> (B, S, C) bf16."""
    B, S, C = x.shape
    M = B * S
    hidden = bp["fc1_w"].shape[1]
    xf = x.reshape(M, C)
    Mp, tm = _pad_rows_tile(M, max_tile=256)
    if Mp != M:
        xf = jnp.pad(xf, ((0, Mp - M), (0, 0)))
    out = pl.pallas_call(
        functools.partial(_mlp_block_kernel, eps=1e-5),
        out_shape=jax.ShapeDtypeStruct((Mp, C), x.dtype),
        grid=(Mp // tm,),
        in_specs=[
            pl.BlockSpec((tm, C), lambda i: (i, 0)),
            _resident_spec((1, C), lambda i: (0, 0)),
            _resident_spec((1, C), lambda i: (0, 0)),
            _resident_spec((C, hidden), lambda i: (0, 0)),
            _resident_spec((1, hidden), lambda i: (0, 0)),
            _resident_spec((hidden, C), lambda i: (0, 0)),
            _resident_spec((1, C), lambda i: (0, 0)),
        ],
        out_specs=pl.BlockSpec((tm, C), lambda i: (i, 0)),
        compiler_params=_cparams("parallel"),
    )(xf, bp["ln2_g"], bp["ln2_b"], bp["fc1_w"], bp["fc1_b"], bp["fc2_w"], bp["fc2_b"])
    out = out[:M] if Mp != M else out
    return out.reshape(B, S, C)


# ----------------------------------------------------------------------------
# Channels-last patchify convs (kernel_size == stride): im2col rows -> MXU matmul.
# TODO(synk): fold the patch-extraction transpose into the matmul BlockSpecs to avoid
# the XLA staging copy (memory-bandwidth win flagged as secondary in the review).
# ----------------------------------------------------------------------------
def conv3d_pr_patch(xpr, w_mat, b, ks):
    """xpr: (B, Nlat, Nlon, Cin=n_pr, n_lev); conv3d over (lev, lat, lon)."""
    B, H, W, Cin, D = xpr.shape
    kd, kh, kw = ks
    Dp, Hp, Wp = D // kd, H // kh, W // kw
    xp = xpr.reshape(B, Hp, kh, Wp, kw, Cin, Dp, kd)
    xp = jnp.transpose(xp, (0, 6, 1, 3, 2, 4, 5, 7))      # (B, Dp, Hp, Wp, kh, kw, Cin, kd)
    rows = xp.reshape(B * Dp * Hp * Wp, kh * kw * Cin * kd)
    out = pallas_matmul_bias(rows, w_mat, b)              # (Npatch, Cout) bf16
    return out.reshape(B, Dp, Hp, Wp, w_mat.shape[1])


def conv2d_sfc_patch(xsfc, w_mat, b, ks):
    """xsfc: (B, Nlat, Nlon, Cin)."""
    B, H, W, Cin = xsfc.shape
    kh, kw = ks
    Hp, Wp = H // kh, W // kw
    xp = xsfc.reshape(B, Hp, kh, Wp, kw, Cin)
    xp = jnp.transpose(xp, (0, 1, 3, 2, 4, 5))            # (B, Hp, Wp, kh, kw, Cin)
    rows = xp.reshape(B * Hp * Wp, kh * kw * Cin)
    out = pallas_matmul_bias(rows, w_mat, b)
    return out.reshape(B, Hp, Wp, w_mat.shape[1])


def conv3d_cl_patch(x, w_mat, b, ks):
    """x: (B, D, H, W, C) channels-last; conv3d kernel==stride over (D, H, W)."""
    B, D, H, W, C = x.shape
    kd, kh, kw = ks
    Dp, Hp, Wp = D // kd, H // kh, W // kw
    xp = x.reshape(B, Dp, kd, Hp, kh, Wp, kw, C)
    xp = jnp.transpose(xp, (0, 1, 3, 5, 2, 4, 6, 7))      # (B, Dp, Hp, Wp, kd, kh, kw, C)
    rows = xp.reshape(B * Dp * Hp * Wp, kd * kh * kw * C)
    out = pallas_matmul_bias(rows, w_mat, b)
    return out.reshape(B, Dp, Hp, Wp, w_mat.shape[1])


# ----------------------------------------------------------------------------
# Glue: pad_lon, posemb, breakup, forward
# ----------------------------------------------------------------------------
def pad_lon(x, pad):
    """x: (B, D, H, W, C). Matches reference pad_lon exactly:
    left wraps columns [W-pad:W], right wraps columns [pad:2*pad]."""
    B, D, H, W, C = x.shape
    left = x[:, :, :, W - pad:W, :]
    right = x[:, :, :, pad:2 * pad, :]
    return jnp.concatenate([left, x, right], axis=3)


def posemb_sincos_3d(D, H, W, dim, temperature=10000, dtype=jnp.float32):
    z, y, x = jnp.meshgrid(jnp.arange(D), jnp.arange(H), jnp.arange(W), indexing="ij")
    fourier_dim = dim // 6
    omega = jnp.arange(fourier_dim) / (fourier_dim - 1)
    omega = 1.0 / temperature ** omega
    z = z.flatten()[:, None] * omega[None, :]
    y = y.flatten()[:, None] * omega[None, :]
    x = x.flatten()[:, None] * omega[None, :]
    pe = jnp.concatenate([jnp.sin(x), jnp.cos(x), jnp.sin(y), jnp.cos(y),
                          jnp.sin(z), jnp.cos(z)], axis=1)
    pe = jnp.pad(pe, ((0, 0), (0, dim - fourier_dim * 6)))
    return pe.astype(dtype)


def breakup_pr_sfc(x, addl_vars, const_data, cfg):
    """ForecastStepBase.breakup_pr_sfc, kept channels-last (no NCHW permutes)."""
    B, Nlat, Nlon, _ = x.shape
    x = jnp.concatenate([x, addl_vars], axis=-1)          # add_additional_vars (synthetic)
    total_pr = cfg["n_pr_vars"] * cfg["n_levels"]
    xpr = x[..., :total_pr].reshape(B, Nlat, Nlon, cfg["n_pr_vars"], cfg["n_levels"])
    xsfc = x[..., total_pr:]
    const = jnp.broadcast_to(const_data[None], (B, Nlat, Nlon, cfg["n_const_vars"]))
    xsfc = jnp.concatenate([xsfc, const], axis=-1)        # (B, Nlat, Nlon, total_sfc)
    xsfc = jnp.nan_to_num(xsfc)                           # reference sanitizes xsfc only
    return xpr, xsfc


def uencoder_forward(x, t0s, addl_vars, const_data, kp, cfg):
    del t0s  # TODO(synk): radiation/timeofday from disk consts; supplied via addl_vars instead
    xpr, xsfc = breakup_pr_sfc(x, addl_vars, const_data, cfg)
    cd0 = cfg["conv_dim"][0]
    kd, kh, kw = cfg["conv_sz"][0]

    xpr_conv = conv3d_pr_patch(xpr, kp["conv_pr_w"], kp["conv_pr_b"], (kd, kh, kw))   # (B, Dp, Hp, Wp, cd0)
    xsfc_conv = conv2d_sfc_patch(xsfc, kp["conv_sfc_w"], kp["conv_sfc_b"], (kh, kw))  # (B, Hp, Wp, 2*cd0)
    B, Hp, Wp, _ = xsfc_conv.shape
    # Matches reference NCHW view([B, C//2, 2, H, W]): channel c -> (feature c//2, layer c%2).
    xsfc_conv = xsfc_conv.reshape(B, Hp, Wp, cd0, 2)
    xsfc_conv = jnp.transpose(xsfc_conv, (0, 4, 1, 2, 3))  # (B, 2, Hp, Wp, cd0)
    x = jnp.concatenate([xpr_conv, xsfc_conv], axis=1)    # (B, D, H, W, C) channels-last, bf16

    winpad = cfg["tr_win"][2] // 2 * 2
    pad = winpad // 2
    x = pad_lon(x, pad)
    B, D, H, W, C = x.shape

    n_stage = len(cfg["conv_sz"])
    for i in range(n_stage):
        x = x.reshape(B, D * H * W, C)
        pe = posemb_sincos_3d(D, H, W, C) if cfg["sincos"] else None
        heads = cfg["conv_dim"][i] // cfg["tr_headdim"][i]
        blocks = kp["transformers"][i]
        if pe is not None and len(blocks) == 0:
            x = x + pe[None].astype(x.dtype)               # degenerate depth-0 stage
        # TODO(synk): reference uses a Swin-style windowed Transformer (config.Transformer,
        # source unavailable); standard full-attention pre-LN blocks are used here instead.
        for bi, bp in enumerate(blocks):
            x = pallas_attn_block(x, bp, heads, pe=pe if bi == 0 else None)
            x = pallas_mlp_block(x, bp)
        x = x.reshape(B, D, H, W, C)
        if i == n_stage - 1:
            break
        x = x[:, :, :, pad:-pad, :]                       # strip lon pad (channels-last)
        x = conv3d_cl_patch(x, kp["convs"][i]["w"], kp["convs"][i]["b"], cfg["conv_sz"][i + 1])
        x = pad_lon(x, pad)
        B, D, H, W, C = x.shape

    export_pad = cfg["window_size"][2] // 2 - pad
    x = pad_lon(x, export_pad)
    W = W + export_pad * 2
    x = x.reshape(B, D * H * W, C)
    return x.astype(jnp.float32)


# ----------------------------------------------------------------------------
# Deterministic parameter init (PyTorch-default-style uniform bounds, PyTorch layouts)
# and one-time conversion to kernel-ready layouts (bf16, matmul layout, folded scale).
# ----------------------------------------------------------------------------
def _uniform(key, shape, bound):
    return jax.random.uniform(key, shape, jnp.float32, -bound, bound)


def init_conv(key, cout, cin, ks):
    fan_in = cin * math.prod(ks)
    bound = 1.0 / math.sqrt(fan_in)
    k1, k2 = jax.random.split(key)
    return _uniform(k1, (cout, cin) + tuple(ks), bound), _uniform(k2, (cout,), bound)


def init_linear(key, din, dout):
    bound = 1.0 / math.sqrt(din)
    k1, k2 = jax.random.split(key)
    return _uniform(k1, (din, dout), bound), _uniform(k2, (dout,), bound)


def init_block(key, dim):
    ks = jax.random.split(key, 4)
    qkv_w, qkv_b = init_linear(ks[0], dim, 3 * dim)
    proj_w, proj_b = init_linear(ks[1], dim, dim)
    fc1_w, fc1_b = init_linear(ks[2], dim, 4 * dim)
    fc2_w, fc2_b = init_linear(ks[3], 4 * dim, dim)
    return dict(ln1_g=jnp.ones((dim,)), ln1_b=jnp.zeros((dim,)),
                ln2_g=jnp.ones((dim,)), ln2_b=jnp.zeros((dim,)),
                qkv_w=qkv_w, qkv_b=qkv_b, proj_w=proj_w, proj_b=proj_b,
                fc1_w=fc1_w, fc1_b=fc1_b, fc2_w=fc2_w, fc2_b=fc2_b)


def init_params(key, cfg):
    keys = jax.random.split(key, 4)
    cd, csz = cfg["conv_dim"], cfg["conv_sz"]
    total_sfc = cfg["n_sfc_vars"] + cfg["n_addl_vars"] + cfg["n_const_vars"]
    params = {}
    params["conv_pr_w"], params["conv_pr_b"] = init_conv(keys[0], cd[0], cfg["n_pr_vars"], csz[0])
    params["conv_sfc_w"], params["conv_sfc_b"] = init_conv(keys[1], cd[0] * 2, total_sfc, csz[0][1:])
    params["convs"] = []
    kc = jax.random.split(keys[2], max(1, len(csz) - 1))
    for i in range(len(csz) - 1):
        w, b = init_conv(kc[i], cd[i + 1], cd[i], csz[i + 1])
        params["convs"].append({"w": w, "b": b})
    params["transformers"] = []
    kt = jax.random.split(keys[3], len(csz))
    for i in range(len(csz)):
        kb = jax.random.split(kt[i], cfg["tr_depth"][i])
        params["transformers"].append([init_block(kb[d], cd[i]) for d in range(cfg["tr_depth"][i])])
    return params


def prep_params(params, cfg):
    """One-time (outside jit) conversion to kernel layouts: bf16 weights, im2col weight
    ordering matching the channels-last patch extraction, attention scale folded into q."""
    kp = {}
    # conv_pr: (Cout, Cin, kd, kh, kw) -> rows are (kh, kw, Cin, kd)
    w = params["conv_pr_w"]
    kp["conv_pr_w"] = jnp.transpose(w, (3, 4, 1, 2, 0)).reshape(-1, w.shape[0]).astype(jnp.bfloat16)
    kp["conv_pr_b"] = params["conv_pr_b"].astype(jnp.float32)
    # conv_sfc: (Cout, Cin, kh, kw) -> rows are (kh, kw, Cin)
    w = params["conv_sfc_w"]
    kp["conv_sfc_w"] = jnp.transpose(w, (2, 3, 1, 0)).reshape(-1, w.shape[0]).astype(jnp.bfloat16)
    kp["conv_sfc_b"] = params["conv_sfc_b"].astype(jnp.float32)
    # stage convs: (Cout, Cin, kd, kh, kw) -> rows are (kd, kh, kw, Cin)
    kp["convs"] = []
    for cw in params["convs"]:
        w = cw["w"]
        kp["convs"].append({
            "w": jnp.transpose(w, (2, 3, 4, 1, 0)).reshape(-1, w.shape[0]).astype(jnp.bfloat16),
            "b": cw["b"].astype(jnp.float32)})
    kp["transformers"] = []
    for i, blocks in enumerate(params["transformers"]):
        dim = cfg["conv_dim"][i]
        scale = 1.0 / math.sqrt(cfg["tr_headdim"][i])
        col_scale = jnp.concatenate([jnp.full((dim,), scale, jnp.float32),
                                     jnp.ones((2 * dim,), jnp.float32)])
        kblocks = []
        for bp in blocks:
            qkv_w = bp["qkv_w"] * col_scale[None, :]   # fold 1/sqrt(dh) into q columns
            qkv_b = bp["qkv_b"] * col_scale
            kblocks.append(dict(
                ln1_g=bp["ln1_g"].reshape(1, -1).astype(jnp.float32),
                ln1_b=bp["ln1_b"].reshape(1, -1).astype(jnp.float32),
                ln2_g=bp["ln2_g"].reshape(1, -1).astype(jnp.float32),
                ln2_b=bp["ln2_b"].reshape(1, -1).astype(jnp.float32),
                qkv_w=qkv_w.astype(jnp.bfloat16),
                qkv_b=qkv_b.reshape(1, -1).astype(jnp.float32),
                proj_w=bp["proj_w"].astype(jnp.bfloat16),
                proj_b=bp["proj_b"].reshape(1, -1).astype(jnp.float32),
                fc1_w=bp["fc1_w"].astype(jnp.bfloat16),
                fc1_b=bp["fc1_b"].reshape(1, -1).astype(jnp.float32),
                fc2_w=bp["fc2_w"].astype(jnp.bfloat16),
                fc2_b=bp["fc2_b"].reshape(1, -1).astype(jnp.float32)))
        kp["transformers"].append(kblocks)
    return kp


# ----------------------------------------------------------------------------
if __name__ == "__main__":
    cfg = dict(
        n_pr_vars=4, n_levels=8, Nlat=16, Nlon=32,
        n_sfc_vars=3, n_addl_vars=2, n_const_vars=3,
        conv_dim=[16, 32], conv_sz=[(4, 4, 4), (2, 2, 2)],
        tr_win=(2, 2, 4), tr_depth=[1, 1], tr_headdim=[8, 8],
        hidden_dim=32, window_size=(2, 2, 8), sincos=True,
    )
    B = 2

    key = jax.random.PRNGKey(0)
    k_x, k_addl, k_const, k_p = jax.random.split(key, 4)
    D_in = cfg["n_pr_vars"] * cfg["n_levels"] + cfg["n_sfc_vars"]
    x = jax.random.normal(k_x, (B, cfg["Nlat"], cfg["Nlon"], D_in), jnp.float32)
    addl_vars = jax.random.normal(k_addl, (B, cfg["Nlat"], cfg["Nlon"], cfg["n_addl_vars"]), jnp.float32)
    const_data = jax.random.normal(k_const, (cfg["Nlat"], cfg["Nlon"], cfg["n_const_vars"]), jnp.float32)
    t0s = jnp.zeros((B,), jnp.int32)

    params = init_params(k_p, cfg)
    kparams = prep_params(params, cfg)     # one-time weight relayout / bf16 cast (outside jit)

    fwd = jax.jit(lambda x, a, c, p: uencoder_forward(x, t0s, a, c, p, cfg))
    out = fwd(x, addl_vars, const_data, kparams)
    out = jax.block_until_ready(out)

    # expected final resolution (D, H, W) = (2, 2, 12), C = hidden_dim = 32
    assert out.shape == (B, 2 * 2 * 12, cfg["hidden_dim"]), out.shape
    assert bool(jnp.all(jnp.isfinite(out)))
    print("KERNEL_OK")
</pallas_src>

<mosaic_0001>
module attributes {stable_mosaic.version = 11 : i64} {
  func.func @_k(%arg0: i32, %arg1: memref<8x128xf32, #tpu.memory_space<vmem>>, %arg2: memref<8x128xf32, #tpu.memory_space<vmem>>) attributes {dimension_semantics = [#tpu.dimension_semantics<arbitrary>], iteration_bounds = array<i64: 1>, scalar_prefetch = 0 : i64, scratch_operands = 0 : i64, tpu.core_type = #tpu.core_type<tc>, window_params = [{pipeline_mode = #tpu.pipeline_mode<synchronous>, transform_indices = @transform_0, window_bounds = array<i64: 8, 128>}, {pipeline_mode = #tpu.pipeline_mode<synchronous>, transform_indices = @transform_1, window_bounds = array<i64: 8, 128>}]} {
    %c0 = arith.constant 0 : index
    %c0_0 = arith.constant 0 : index
    %0 = vector.load %arg1[%c0, %c0_0] : memref<8x128xf32, #tpu.memory_space<vmem>>, vector<8x128xf32>
    %cst = arith.constant 1.000000e+00 : f32
    %1 = vector.broadcast %cst : f32 to vector<8x128xf32>
    %2 = arith.addf %0, %1 : vector<8x128xf32>
    %c0_1 = arith.constant 0 : index
    %c0_2 = arith.constant 0 : index
    %3 = vector.load %arg2[%c0_1, %c0_2] : memref<8x128xf32, #tpu.memory_space<vmem>>, vector<8x128xf32>
    tpu.vector_store %arg2[%c0_1, %c0_2], %2 {strides = array<i32>} : memref<8x128xf32, #tpu.memory_space<vmem>>, vector<8x128xf32>,
    return
  }
  func.func @transform_0(%arg0: i32) -> (i32, i32) {
    %c0_i32 = arith.constant 0 : i32
    %c0_i32_0 = arith.constant 0 : i32
    %c0_i32_1 = arith.constant 0 : i32
    return %c0_i32, %c0_i32_0 : i32, i32
  }
  func.func @transform_1(%arg0: i32) -> (i32, i32) {
    %c0_i32 = arith.constant 0 : i32
    %c0_i32_0 = arith.constant 0 : i32
    %c0_i32_1 = arith.constant 0 : i32
    return %c0_i32, %c0_i32_0 : i32, i32
  }
}

module attributes {stable_mosaic.version = 11 : i64} {
  func.func @_matmul_bias_kernel(%arg0: i32, %arg1: i32, %arg2: i32, %arg3: memref<64x128xbf16, #tpu.memory_space<vmem>>, %arg4: memref<128x128xbf16, #tpu.memory_space<vmem>>, %arg5: memref<1x128xf32, #tpu.memory_space<vmem>>, %arg6: memref<64x128xbf16, #tpu.memory_space<vmem>>, %arg7: memref<64x128xf32, #tpu.memory_space<vmem>>) attributes {dimension_semantics = [#tpu.dimension_semantics<parallel>, #tpu.dimension_semantics<parallel>, #tpu.dimension_semantics<arbitrary>], iteration_bounds = array<i64: 1, 1, 1>, scalar_prefetch = 0 : i64, scratch_operands = 1 : i64, tpu.core_type = #tpu.core_type<tc>, window_params = [{transform_indices = @transform_0, window_bounds = array<i64: 64, 128>}, {transform_indices = @transform_1, window_bounds = array<i64: 128, 128>}, {transform_indices = @transform_2, window_bounds = array<i64: 1, 128>}, {transform_indices = @transform_3, window_bounds = array<i64: 64, 128>}]} {
    %c0_i32 = arith.constant 0 : i32
    %0 = arith.cmpi eq, %arg2, %c0_i32 : i32
    %1 = arith.extui %0 : i1 to i32
    %c0_i32_0 = arith.constant 0 : i32
    %2 = arith.cmpi ne, %1, %c0_i32_0 : i32
    scf.if %2 {
      %cst_10 = arith.constant 0.000000e+00 : f32
      %12 = vector.broadcast %cst_10 : f32 to vector<64x128xf32>
      %c0_11 = arith.constant 0 : index
      %c0_12 = arith.constant 0 : index
      %13 = vector.load %arg7[%c0_11, %c0_12] : memref<64x128xf32, #tpu.memory_space<vmem>>, vector<64x128xf32>
      tpu.vector_store %arg7[%c0_11, %c0_12], %12 {strides = array<i32>} : memref<64x128xf32, #tpu.memory_space<vmem>>, vector<64x128xf32>,
    } else {
    }
    %c0 = arith.constant 0 : index
    %c0_1 = arith.constant 0 : index
    %3 = vector.load %arg7[%c0, %c0_1] : memref<64x128xf32, #tpu.memory_space<vmem>>, vector<64x128xf32>
    %c0_2 = arith.constant 0 : index
    %c0_3 = arith.constant 0 : index
    %4 = vector.load %arg3[%c0_2, %c0_3] : memref<64x128xbf16, #tpu.memory_space<vmem>>, vector<64x128xbf16>
    %c0_4 = arith.constant 0 : index
    %c0_5 = arith.constant 0 : index
    %5 = vector.load %arg4[%c0_4, %c0_5] : memref<128x128xbf16, #tpu.memory_space<vmem>>, vector<128x128xbf16>
    %cst = arith.constant dense<0.000000e+00> : vector<64x128xf32>
    %6 = tpu.matmul %4, %5, %cst {dimension_numbers = #tpu.dot_dimension_numbers<[1], [0], [0], [1], [0, 0, 1, 1], [], []>} : vector<64x128xbf16>, vector<128x128xbf16>, vector<64x128xf32> -> vector<64x128xf32>
    %7 = arith.addf %3, %6 : vector<64x128xf32>
    %c0_6 = arith.constant 0 : index
    %c0_7 = arith.constant 0 : index
    %8 = vector.load %arg7[%c0_6, %c0_7] : memref<64x128xf32, #tpu.memory_space<vmem>>, vector<64x128xf32>
    tpu.vector_store %arg7[%c0_6, %c0_7], %7 {strides = array<i32>} : memref<64x128xf32, #tpu.memory_space<vmem>>, vector<64x128xf32>,
    %c0_i32_8 = arith.constant 0 : i32
    %9 = arith.cmpi eq, %arg2, %c0_i32_8 : i32
    %10 = arith.extui %9 : i1 to i32
    %c0_i32_9 = arith.constant 0 : i32
    %11 = arith.cmpi ne, %10, %c0_i32_9 : i32
    scf.if %11 {
      %c0_10 = arith.constant 0 : index
      %c0_11 = arith.constant 0 : index
      %12 = vector.load %arg7[%c0_10, %c0_11] : memref<64x128xf32, #tpu.memory_space<vmem>>, vector<64x128xf32>
      %c0_12 = arith.constant 0 : index
      %c0_13 = arith.constant 0 : index
      %13 = vector.load %arg5[%c0_12, %c0_13] : memref<1x128xf32, #tpu.memory_space<vmem>>, vector<1x128xf32>
      %14 = vector.broadcast %13 : vector<1x128xf32> to vector<64x128xf32>
      %15 = arith.addf %12, %14 : vector<64x128xf32>
      %16 = arith.truncf %15 : vector<64x128xf32> to vector<64x128xbf16>
      %c0_14 = arith.constant 0 : index
      %c0_15 = arith.constant 0 : index
      %17 = vector.load %arg6[%c0_14, %c0_15] : memref<64x128xbf16, #tpu.memory_space<vmem>>, vector<64x128xbf16>
      tpu.vector_store %arg6[%c0_14, %c0_15], %16 {strides = array<i32>} : memref<64x128xbf16, #tpu.memory_space<vmem>>, vector<64x128xbf16>,
    } else {
    }
    return
  }
  func.func @transform_0(%arg0: i32, %arg1: i32, %arg2: i32) -> (i32, i32) {
    %c0_i32 = arith.constant 0 : i32
    return %arg0, %arg2 : i32, i32
  }
  func.func @transform_1(%arg0: i32, %arg1: i32, %arg2: i32) -> (i32, i32) {
    %c0_i32 = arith.constant 0 : i32
    return %arg2, %arg1 : i32, i32
  }
  func.func @transform_2(%arg0: i32, %arg1: i32, %arg2: i32) -> (i32, i32) {
    %c0_i32 = arith.constant 0 : i32
    %c0_i32_0 = arith.constant 0 : i32
    return %c0_i32, %arg1 : i32, i32
  }
  func.func @transform_3(%arg0: i32, %arg1: i32, %arg2: i32) -> (i32, i32) {
    %c0_i32 = arith.constant 0 : i32
    return %arg0, %arg1 : i32, i32
  }
}

module attributes {stable_mosaic.version = 11 : i64} {
  func.func @_matmul_bias_kernel(%arg0: i32, %arg1: i32, %arg2: i32, %arg3: memref<128x256xbf16, #tpu.memory_space<vmem>>, %arg4: memref<256x128xbf16, #tpu.memory_space<vmem>>, %arg5: memref<1x128xf32, #tpu.memory_space<vmem>>, %arg6: memref<128x128xbf16, #tpu.memory_space<vmem>>, %arg7: memref<128x128xf32, #tpu.memory_space<vmem>>) attributes {dimension_semantics = [#tpu.dimension_semantics<parallel>, #tpu.dimension_semantics<parallel>, #tpu.dimension_semantics<arbitrary>], iteration_bounds = array<i64: 1, 1, 1>, scalar_prefetch = 0 : i64, scratch_operands = 1 : i64, tpu.core_type = #tpu.core_type<tc>, window_params = [{transform_indices = @transform_0, window_bounds = array<i64: 128, 256>}, {transform_indices = @transform_1, window_bounds = array<i64: 256, 128>}, {transform_indices = @transform_2, window_bounds = array<i64: 1, 128>}, {transform_indices = @transform_3, window_bounds = array<i64: 128, 128>}]} {
    %c0_i32 = arith.constant 0 : i32
    %0 = arith.cmpi eq, %arg2, %c0_i32 : i32
    %1 = arith.extui %0 : i1 to i32
    %c0_i32_0 = arith.constant 0 : i32
    %2 = arith.cmpi ne, %1, %c0_i32_0 : i32
    scf.if %2 {
      %cst_10 = arith.constant 0.000000e+00 : f32
      %12 = vector.broadcast %cst_10 : f32 to vector<128x128xf32>
      %c0_11 = arith.constant 0 : index
      %c0_12 = arith.constant 0 : index
      %13 = vector.load %arg7[%c0_11, %c0_12] : memref<128x128xf32, #tpu.memory_space<vmem>>, vector<128x128xf32>
      tpu.vector_store %arg7[%c0_11, %c0_12], %12 {strides = array<i32>} : memref<128x128xf32, #tpu.memory_space<vmem>>, vector<128x128xf32>,
    } else {
    }
    %c0 = arith.constant 0 : index
    %c0_1 = arith.constant 0 : index
    %3 = vector.load %arg7[%c0, %c0_1] : memref<128x128xf32, #tpu.memory_space<vmem>>, vector<128x128xf32>
    %c0_2 = arith.constant 0 : index
    %c0_3 = arith.constant 0 : index
    %4 = vector.load %arg3[%c0_2, %c0_3] : memref<128x256xbf16, #tpu.memory_space<vmem>>, vector<128x256xbf16>
    %c0_4 = arith.constant 0 : index
    %c0_5 = arith.constant 0 : index
    %5 = vector.load %arg4[%c0_4, %c0_5] : memref<256x128xbf16, #tpu.memory_space<vmem>>, vector<256x128xbf16>
    %cst = arith.constant dense<0.000000e+00> : vector<128x128xf32>
    %6 = tpu.matmul %4, %5, %cst {dimension_numbers = #tpu.dot_dimension_numbers<[1], [0], [0], [1], [0, 0, 1, 1], [], []>} : vector<128x256xbf16>, vector<256x128xbf16>, vector<128x128xf32> -> vector<128x128xf32>
    %7 = arith.addf %3, %6 : vector<128x128xf32>
    %c0_6 = arith.constant 0 : index
    %c0_7 = arith.constant 0 : index
    %8 = vector.load %arg7[%c0_6, %c0_7] : memref<128x128xf32, #tpu.memory_space<vmem>>, vector<128x128xf32>
    tpu.vector_store %arg7[%c0_6, %c0_7], %7 {strides = array<i32>} : memref<128x128xf32, #tpu.memory_space<vmem>>, vector<128x128xf32>,
    %c0_i32_8 = arith.constant 0 : i32
    %9 = arith.cmpi eq, %arg2, %c0_i32_8 : i32
    %10 = arith.extui %9 : i1 to i32
    %c0_i32_9 = arith.constant 0 : i32
    %11 = arith.cmpi ne, %10, %c0_i32_9 : i32
    scf.if %11 {
      %c0_10 = arith.constant 0 : index
      %c0_11 = arith.constant 0 : index
      %12 = vector.load %arg7[%c0_10, %c0_11] : memref<128x128xf32, #tpu.memory_space<vmem>>, vector<128x128xf32>
      %c0_12 = arith.constant 0 : index
      %c0_13 = arith.constant 0 : index
      %13 = vector.load %arg5[%c0_12, %c0_13] : memref<1x128xf32, #tpu.memory_space<vmem>>, vector<1x128xf32>
      %14 = vector.broadcast %13 : vector<1x128xf32> to vector<128x128xf32>
      %15 = arith.addf %12, %14 : vector<128x128xf32>
      %16 = arith.truncf %15 : vector<128x128xf32> to vector<128x128xbf16>
      %c0_14 = arith.constant 0 : index
      %c0_15 = arith.constant 0 : index
      %17 = vector.load %arg6[%c0_14, %c0_15] : memref<128x128xbf16, #tpu.memory_space<vmem>>, vector<128x128xbf16>
      tpu.vector_store %arg6[%c0_14, %c0_15], %16 {strides = array<i32>} : memref<128x128xbf16, #tpu.memory_space<vmem>>, vector<128x128xbf16>,
    } else {
    }
    return
  }
  func.func @transform_0(%arg0: i32, %arg1: i32, %arg2: i32) -> (i32, i32) {
    %c0_i32 = arith.constant 0 : i32
    return %arg0, %arg2 : i32, i32
  }
  func.func @transform_1(%arg0: i32, %arg1: i32, %arg2: i32) -> (i32, i32) {
    %c0_i32 = arith.constant 0 : i32
    return %arg2, %arg1 : i32, i32
  }
  func.func @transform_2(%arg0: i32, %arg1: i32, %arg2: i32) -> (i32, i32) {
    %c0_i32 = arith.constant 0 : i32
    %c0_i32_0 = arith.constant 0 : i32
    return %c0_i32, %arg1 : i32, i32
  }
  func.func @transform_3(%arg0: i32, %arg1: i32, %arg2: i32) -> (i32, i32) {
    %c0_i32 = arith.constant 0 : i32
    return %arg0, %arg1 : i32, i32
  }
}

module attributes {stable_mosaic.version = 11 : i64} {
  func.func @_qkv_kernel(%arg0: i32, %arg1: i32, %arg2: memref<1x192x16xbf16, #tpu.memory_space<vmem>>, %arg3: memref<192x16xf32, #tpu.memory_space<vmem>>, %arg4: memref<1x16xf32, #tpu.memory_space<vmem>>, %arg5: memref<1x16xf32, #tpu.memory_space<vmem>>, %arg6: memref<16x48xbf16, #tpu.memory_space<vmem>>, %arg7: memref<1x48xf32, #tpu.memory_space<vmem>>, %arg8: memref<1x192x16xbf16, #tpu.memory_space<vmem>>, %arg9: memref<1x192x16xbf16, #tpu.memory_space<vmem>>, %arg10: memref<1x192x16xbf16, #tpu.memory_space<vmem>>) attributes {dimension_semantics = [#tpu.dimension_semantics<parallel>, #tpu.dimension_semantics<parallel>], iteration_bounds = array<i64: 2, 1>, scalar_prefetch = 0 : i64, scratch_operands = 0 : i64, tpu.core_type = #tpu.core_type<tc>, window_params = [{transform_indices = @transform_0, window_bounds = array<i64: 1, 192, 16>}, {transform_indices = @transform_1, window_bounds = array<i64: 192, 16>}, {pipeline_mode = #tpu.pipeline_mode<synchronous>, transform_indices = @transform_2, window_bounds = array<i64: 1, 16>}, {pipeline_mode = #tpu.pipeline_mode<synchronous>, transform_indices = @transform_3, window_bounds = array<i64: 1, 16>}, {pipeline_mode = #tpu.pipeline_mode<synchronous>, transform_indices = @transform_4, window_bounds = array<i64: 16, 48>}, {pipeline_mode = #tpu.pipeline_mode<synchronous>, transform_indices = @transform_5, window_bounds = array<i64: 1, 48>}, {transform_indices = @transform_6, window_bounds = array<i64: 1, 192, 16>}, {transform_indices = @transform_7, window_bounds = array<i64: 1, 192, 16>}, {transform_indices = @transform_8, window_bounds = array<i64: 1, 192, 16>}]} {
    %c0 = arith.constant 0 : index
    %c0_0 = arith.constant 0 : index
    %c0_1 = arith.constant 0 : index
    %0 = vector.load %arg2[%c0, %c0_0, %c0_1] : memref<1x192x16xbf16, #tpu.memory_space<vmem>>, vector<1x192x16xbf16>
    %1 = vector.shape_cast %0 : vector<1x192x16xbf16> to vector<192x16xbf16>
    %2 = arith.extf %1 : vector<192x16xbf16> to vector<192x16xf32>
    %c0_2 = arith.constant 0 : index
    %c0_3 = arith.constant 0 : index
    %3 = vector.load %arg3[%c0_2, %c0_3] : memref<192x16xf32, #tpu.memory_space<vmem>>, vector<192x16xf32>
    %4 = arith.addf %2, %3 : vector<192x16xf32>
    %cst = arith.constant dense<0.000000e+00> : vector<192xf32>
    %5 = vector.multi_reduction <add>, %4, %cst [1] : vector<192x16xf32> to vector<192xf32>
    %6 = vector.shape_cast %5 : vector<192xf32> to vector<192x1xf32>
    %cst_4 = arith.constant 1.600000e+01 : f32
    %7 = vector.broadcast %cst_4 : f32 to vector<192x1xf32>
    %8 = arith.divf %6, %7 : vector<192x1xf32>
    %9 = vector.broadcast %8 : vector<192x1xf32> to vector<192x16xf32>
    %10 = arith.subf %4, %9 : vector<192x16xf32>
    %11 = arith.mulf %10, %10 : vector<192x16xf32>
    %cst_5 = arith.constant dense<0.000000e+00> : vector<192xf32>
    %12 = vector.multi_reduction <add>, %11, %cst_5 [1] : vector<192x16xf32> to vector<192xf32>
    %13 = vector.shape_cast %12 : vector<192xf32> to vector<192x1xf32>
    %cst_6 = arith.constant 1.600000e+01 : f32
    %14 = vector.broadcast %cst_6 : f32 to vector<192x1xf32>
    %15 = arith.divf %13, %14 : vector<192x1xf32>
    %cst_7 = arith.constant 9.99999974E-6 : f32
    %16 = vector.broadcast %cst_7 : f32 to vector<192x1xf32>
    %17 = arith.addf %15, %16 : vector<192x1xf32>
    %18 = math.rsqrt %17 : vector<192x1xf32>
    %19 = vector.broadcast %18 : vector<192x1xf32> to vector<192x16xf32>
    %20 = arith.mulf %10, %19 : vector<192x16xf32>
    %c0_8 = arith.constant 0 : index
    %c0_9 = arith.constant 0 : index
    %21 = vector.load %arg4[%c0_8, %c0_9] : memref<1x16xf32, #tpu.memory_space<vmem>>, vector<1x16xf32>
    %22 = vector.broadcast %21 : vector<1x16xf32> to vector<192x16xf32>
    %23 = arith.mulf %20, %22 : vector<192x16xf32>
    %c0_10 = arith.constant 0 : index
    %c0_11 = arith.constant 0 : index
    %24 = vector.load %arg5[%c0_10, %c0_11] : memref<1x16xf32, #tpu.memory_space<vmem>>, vector<1x16xf32>
    %25 = vector.broadcast %24 : vector<1x16xf32> to vector<192x16xf32>
    %26 = arith.addf %23, %25 : vector<192x16xf32>
    %27 = arith.truncf %26 : vector<192x16xf32> to vector<192x16xbf16>
    %c0_12 = arith.constant 0 : index
    %c0_13 = arith.constant 0 : index
    %28 = vector.load %arg6[%c0_12, %c0_13] : memref<16x48xbf16, #tpu.memory_space<vmem>>, vector<16x48xbf16>
    %cst_14 = arith.constant dense<0.000000e+00> : vector<192x48xf32>
    %29 = tpu.matmul %27, %28, %cst_14 {dimension_numbers = #tpu.dot_dimension_numbers<[1], [0], [0], [1], [0, 0, 1, 1], [], []>} : vector<192x16xbf16>, vector<16x48xbf16>, vector<192x48xf32> -> vector<192x48xf32>
    %c0_15 = arith.constant 0 : index
    %c0_16 = arith.constant 0 : index
    %30 = vector.load %arg7[%c0_15, %c0_16] : memref<1x48xf32, #tpu.memory_space<vmem>>, vector<1x48xf32>
    %31 = vector.broadcast %30 : vector<1x48xf32> to vector<192x48xf32>
    %32 = arith.addf %29, %31 : vector<192x48xf32>
    %33 = vector.extract_strided_slice %32 {offsets = [0, 0], sizes = [192, 16], strides = [1, 1]} : vector<192x48xf32> to vector<192x16xf32>
    %34 = arith.truncf %33 : vector<192x16xf32> to vector<192x16xbf16>
    %c0_17 = arith.constant 0 : index
    %c0_18 = arith.constant 0 : index
    %c0_19 = arith.constant 0 : index
    %35 = vector.load %arg8[%c0_17, %c0_18, %c0_19] : memref<1x192x16xbf16, #tpu.memory_space<vmem>>, vector<1x192x16xbf16>
    %36 = vector.shape_cast %35 : vector<1x192x16xbf16> to vector<192x16xbf16>
    %37 = vector.shape_cast %34 : vector<192x16xbf16> to vector<1x192x16xbf16>
    tpu.vector_store %arg8[%c0_17, %c0_18, %c0_19], %37 {strides = array<i32>} : memref<1x192x16xbf16, #tpu.memory_space<vmem>>, vector<1x192x16xbf16>,
    %38 = vector.extract_strided_slice %32 {offsets = [0, 16], sizes = [192, 16], strides = [1, 1]} : vector<192x48xf32> to vector<192x16xf32>
    %39 = arith.truncf %38 : vector<192x16xf32> to vector<192x16xbf16>
    %c0_20 = arith.constant 0 : index
    %c0_21 = arith.constant 0 : index
    %c0_22 = arith.constant 0 : index
    %40 = vector.load %arg9[%c0_20, %c0_21, %c0_22] : memref<1x192x16xbf16, #tpu.memory_space<vmem>>, vector<1x192x16xbf16>
    %41 = vector.shape_cast %40 : vector<1x192x16xbf16> to vector<192x16xbf16>
    %42 = vector.shape_cast %39 : vector<192x16xbf16> to vector<1x192x16xbf16>
    tpu.vector_store %arg9[%c0_20, %c0_21, %c0_22], %42 {strides = array<i32>} : memref<1x192x16xbf16, #tpu.memory_space<vmem>>, vector<1x192x16xbf16>,
    %43 = vector.extract_strided_slice %32 {offsets = [0, 32], sizes = [192, 16], strides = [1, 1]} : vector<192x48xf32> to vector<192x16xf32>
    %44 = arith.truncf %43 : vector<192x16xf32> to vector<192x16xbf16>
    %c0_23 = arith.constant 0 : index
    %c0_24 = arith.constant 0 : index
    %c0_25 = arith.constant 0 : index
    %45 = vector.load %arg10[%c0_23, %c0_24, %c0_25] : memref<1x192x16xbf16, #tpu.memory_space<vmem>>, vector<1x192x16xbf16>
    %46 = vector.shape_cast %45 : vector<1x192x16xbf16> to vector<192x16xbf16>
    %47 = vector.shape_cast %44 : vector<192x16xbf16> to vector<1x192x16xbf16>
    tpu.vector_store %arg10[%c0_23, %c0_24, %c0_25], %47 {strides = array<i32>} : memref<1x192x16xbf16, #tpu.memory_space<vmem>>, vector<1x192x16xbf16>,
    return
  }
  func.func @transform_0(%arg0: i32, %arg1: i32) -> (i32, i32, i32) {
    %c0_i32 = arith.constant 0 : i32
    %c0_i32_0 = arith.constant 0 : i32
    return %arg0, %arg1, %c0_i32 : i32, i32, i32
  }
  func.func @transform_1(%arg0: i32, %arg1: i32) -> (i32, i32) {
    %c0_i32 = arith.constant 0 : i32
    %c0_i32_0 = arith.constant 0 : i32
    return %arg1, %c0_i32 : i32, i32
  }
  func.func @transform_2(%arg0: i32, %arg1: i32) -> (i32, i32) {
    %c0_i32 = arith.constant 0 : i32
    %c0_i32_0 = arith.constant 0 : i32
    %c0_i32_1 = arith.constant 0 : i32
    return %c0_i32, %c0_i32_0 : i32, i32
  }
  func.func @transform_3(%arg0: i32, %arg1: i32) -> (i32, i32) {
    %c0_i32 = arith.constant 0 : i32
    %c0_i32_0 = arith.constant 0 : i32
    %c0_i32_1 = arith.constant 0 : i32
    return %c0_i32, %c0_i32_0 : i32, i32
  }
  func.func @transform_4(%arg0: i32, %arg1: i32) -> (i32, i32) {
    %c0_i32 = arith.constant 0 : i32
    %c0_i32_0 = arith.constant 0 : i32
    %c0_i32_1 = arith.constant 0 : i32
    return %c0_i32, %c0_i32_0 : i32, i32
  }
  func.func @transform_5(%arg0: i32, %arg1: i32) -> (i32, i32) {
    %c0_i32 = arith.constant 0 : i32
    %c0_i32_0 = arith.constant 0 : i32
    %c0_i32_1 = arith.constant 0 : i32
    return %c0_i32, %c0_i32_0 : i32, i32
  }
  func.func @transform_6(%arg0: i32, %arg1: i32) -> (i32, i32, i32) {
    %c0_i32 = arith.constant 0 : i32
    %c0_i32_0 = arith.constant 0 : i32
    return %arg0, %arg1, %c0_i32 : i32, i32, i32
  }
  func.func @transform_7(%arg0: i32, %arg1: i32) -> (i32, i32, i32) {
    %c0_i32 = arith.constant 0 : i32
    %c0_i32_0 = arith.constant 0 : i32
    return %arg0, %arg1, %c0_i32 : i32, i32, i32
  }
  func.func @transform_8(%arg0: i32, %arg1: i32) -> (i32, i32, i32) {
    %c0_i32 = arith.constant 0 : i32
    %c0_i32_0 = arith.constant 0 : i32
    return %arg0, %arg1, %c0_i32 : i32, i32, i32
  }
}

module attributes {stable_mosaic.version = 11 : i64} {
  func.func @_flash_attn_kernel(%arg0: i32, %arg1: i32, %arg2: memref<1x96x16xbf16, #tpu.memory_space<vmem>>, %arg3: memref<96x16xf32, #tpu.memory_space<vmem>>, %arg4: memref<1x96x16xbf16, #tpu.memory_space<vmem>>, %arg5: memref<1x192x16xbf16, #tpu.memory_space<vmem>>, %arg6: memref<1x192x16xbf16, #tpu.memory_space<vmem>>, %arg7: memref<16x16xbf16, #tpu.memory_space<vmem>>, %arg8: memref<1x16xf32, #tpu.memory_space<vmem>>, %arg9: memref<1x96x16xbf16, #tpu.memory_space<vmem>>) attributes {dimension_semantics = [#tpu.dimension_semantics<parallel>, #tpu.dimension_semantics<parallel>], iteration_bounds = array<i64: 2, 2>, scalar_prefetch = 0 : i64, scratch_operands = 0 : i64, tpu.core_type = #tpu.core_type<tc>, window_params = [{transform_indices = @transform_0, window_bounds = array<i64: 1, 96, 16>}, {transform_indices = @transform_1, window_bounds = array<i64: 96, 16>}, {transform_indices = @transform_2, window_bounds = array<i64: 1, 96, 16>}, {transform_indices = @transform_3, window_bounds = array<i64: 1, 192, 16>}, {transform_indices = @transform_4, window_bounds = array<i64: 1, 192, 16>}, {pipeline_mode = #tpu.pipeline_mode<synchronous>, transform_indices = @transform_5, window_bounds = array<i64: 16, 16>}, {pipeline_mode = #tpu.pipeline_mode<synchronous>, transform_indices = @transform_6, window_bounds = array<i64: 1, 16>}, {transform_indices = @transform_7, window_bounds = array<i64: 1, 96, 16>}]} {
    %c0 = arith.constant 0 : index
    %c0_0 = arith.constant 0 : index
    %c0_1 = arith.constant 0 : index
    %0 = vector.load %arg4[%c0, %c0_0, %c0_1] : memref<1x96x16xbf16, #tpu.memory_space<vmem>>, vector<1x96x16xbf16>
    %1 = vector.shape_cast %0 : vector<1x96x16xbf16> to vector<96x16xbf16>
    %c0_2 = arith.constant 0 : index
    %c0_3 = arith.constant 0 : index
    %c0_4 = arith.constant 0 : index
    %2 = vector.load %arg5[%c0_2, %c0_3, %c0_4] : memref<1x192x16xbf16, #tpu.memory_space<vmem>>, vector<1x192x16xbf16>
    %3 = vector.shape_cast %2 : vector<1x192x16xbf16> to vector<192x16xbf16>
    %c0_5 = arith.constant 0 : index
    %c0_6 = arith.constant 0 : index
    %c0_7 = arith.constant 0 : index
    %4 = vector.load %arg6[%c0_5, %c0_6, %c0_7] : memref<1x192x16xbf16, #tpu.memory_space<vmem>>, vector<1x192x16xbf16>
    %5 = vector.shape_cast %4 : vector<1x192x16xbf16> to vector<192x16xbf16>
    %6 = vector.extract_strided_slice %1 {offsets = [0, 0], sizes = [96, 8], strides = [1, 1]} : vector<96x16xbf16> to vector<96x8xbf16>
    %7 = vector.extract_strided_slice %1 {offsets = [0, 8], sizes = [96, 8], strides = [1, 1]} : vector<96x16xbf16> to vector<96x8xbf16>
    %8 = vector.shape_cast %6 : vector<96x8xbf16> to vector<1x96x8xbf16>
    %9 = vector.shape_cast %7 : vector<96x8xbf16> to vector<1x96x8xbf16>
    %10 = tpu.concatenate %8, %9 in 0 : vector<1x96x8xbf16>, vector<1x96x8xbf16> -> vector<2x96x8xbf16>
    %11 = vector.extract_strided_slice %3 {offsets = [0, 0], sizes = [192, 8], strides = [1, 1]} : vector<192x16xbf16> to vector<192x8xbf16>
    %12 = vector.extract_strided_slice %3 {offsets = [0, 8], sizes = [192, 8], strides = [1, 1]} : vector<192x16xbf16> to vector<192x8xbf16>
    %13 = vector.shape_cast %11 : vector<192x8xbf16> to vector<1x192x8xbf16>
    %14 = vector.shape_cast %12 : vector<192x8xbf16> to vector<1x192x8xbf16>
    %15 = tpu.concatenate %13, %14 in 0 : vector<1x192x8xbf16>, vector<1x192x8xbf16> -> vector<2x192x8xbf16>
    %16 = vector.extract_strided_slice %5 {offsets = [0, 0], sizes = [192, 8], strides = [1, 1]} : vector<192x16xbf16> to vector<192x8xbf16>
    %17 = vector.extract_strided_slice %5 {offsets = [0, 8], sizes = [192, 8], strides = [1, 1]} : vector<192x16xbf16> to vector<192x8xbf16>
    %18 = vector.shape_cast %16 : vector<192x8xbf16> to vector<1x192x8xbf16>
    %19 = vector.shape_cast %17 : vector<192x8xbf16> to vector<1x192x8xbf16>
    %20 = tpu.concatenate %18, %19 in 0 : vector<1x192x8xbf16>, vector<1x192x8xbf16> -> vector<2x192x8xbf16>
    "tpu.trace_start"() <{level = 10 : i32, message = "hqd,hkd->hqk"}> : () -> ()
    %cst = arith.constant dense<0.000000e+00> : vector<2x96x192xf32>
    %21 = tpu.matmul %10, %15, %cst {dimension_numbers = #tpu.dot_dimension_numbers<[2], [2], [1], [1], [0, 0, 0, 1, 1, 1], [0], [0]>} : vector<2x96x8xbf16>, vector<2x192x8xbf16>, vector<2x96x192xf32> -> vector<2x96x192xf32>
    "tpu.trace_stop"() : () -> ()
    %cst_8 = arith.constant dense<0xFF800000> : vector<2x96xf32>
    %22 = vector.multi_reduction <maximumf>, %21, %cst_8 [2] : vector<2x96x192xf32> to vector<2x96xf32>
    %23 = vector.shape_cast %22 : vector<2x96xf32> to vector<2x96x1xf32>
    %24 = vector.broadcast %23 : vector<2x96x1xf32> to vector<2x96x192xf32>
    %25 = arith.subf %21, %24 : vector<2x96x192xf32>
    %26 = math.exp %25 : vector<2x96x192xf32>
    %cst_9 = arith.constant dense<0.000000e+00> : vector<2x96xf32>
    %27 = vector.multi_reduction <add>, %26, %cst_9 [2] : vector<2x96x192xf32> to vector<2x96xf32>
    %28 = vector.shape_cast %27 : vector<2x96xf32> to vector<2x96x1xf32>
    %29 = tpu.reciprocal %28 {approx = true} : vector<2x96x1xf32> -> vector<2x96x1xf32>
    %30 = vector.broadcast %29 : vector<2x96x1xf32> to vector<2x96x192xf32>
    %31 = arith.mulf %26, %30 : vector<2x96x192xf32>
    %32 = arith.truncf %31 : vector<2x96x192xf32> to vector<2x96x192xbf16>
    "tpu.trace_start"() <{level = 10 : i32, message = "hqk,hkd->hqd"}> : () -> ()
    %cst_10 = arith.constant dense<0.000000e+00> : vector<2x96x8xf32>
    %33 = tpu.matmul %32, %20, %cst_10 {dimension_numbers = #tpu.dot_dimension_numbers<[2], [1], [1], [2], [0, 0, 0, 1, 1, 2], [0], [0]>} : vector<2x96x192xbf16>, vector<2x192x8xbf16>, vector<2x96x8xf32> -> vector<2x96x8xf32>
    "tpu.trace_stop"() : () -> ()
    %34 = vector.extract_strided_slice %33 {offsets = [0, 0, 0], sizes = [1, 96, 8], strides = [1, 1, 1]} : vector<2x96x8xf32> to vector<1x96x8xf32>
    %35 = vector.shape_cast %34 : vector<1x96x8xf32> to vector<96x8xf32>
    %36 = vector.extract_strided_slice %33 {offsets = [1, 0, 0], sizes = [1, 96, 8], strides = [1, 1, 1]} : vector<2x96x8xf32> to vector<1x96x8xf32>
    %37 = vector.shape_cast %36 : vector<1x96x8xf32> to vector<96x8xf32>
    %38 = tpu.concatenate %35, %37 in 1 : vector<96x8xf32>, vector<96x8xf32> -> vector<96x16xf32>
    %39 = arith.truncf %38 : vector<96x16xf32> to vector<96x16xbf16>
    %c0_11 = arith.constant 0 : index
    %c0_12 = arith.constant 0 : index
    %40 = vector.load %arg7[%c0_11, %c0_12] : memref<16x16xbf16, #tpu.memory_space<vmem>>, vector<16x16xbf16>
    %cst_13 = arith.constant dense<0.000000e+00> : vector<96x16xf32>
    %41 = tpu.matmul %39, %40, %cst_13 {dimension_numbers = #tpu.dot_dimension_numbers<[1], [0], [0], [1], [0, 0, 1, 1], [], []>} : vector<96x16xbf16>, vector<16x16xbf16>, vector<96x16xf32> -> vector<96x16xf32>
    %c0_14 = arith.constant 0 : index
    %c0_15 = arith.constant 0 : index
    %42 = vector.load %arg8[%c0_14, %c0_15] : memref<1x16xf32, #tpu.memory_space<vmem>>, vector<1x16xf32>
    %43 = vector.broadcast %42 : vector<1x16xf32> to vector<96x16xf32>
    %44 = arith.addf %41, %43 : vector<96x16xf32>
    %c0_16 = arith.constant 0 : index
    %c0_17 = arith.constant 0 : index
    %c0_18 = arith.constant 0 : index
    %45 = vector.load %arg2[%c0_16, %c0_17, %c0_18] : memref<1x96x16xbf16, #tpu.memory_space<vmem>>, vector<1x96x16xbf16>
    %46 = vector.shape_cast %45 : vector<1x96x16xbf16> to vector<96x16xbf16>
    %47 = arith.extf %46 : vector<96x16xbf16> to vector<96x16xf32>
    %c0_19 = arith.constant 0 : index
    %c0_20 = arith.constant 0 : index
    %48 = vector.load %arg3[%c0_19, %c0_20] : memref<96x16xf32, #tpu.memory_space<vmem>>, vector<96x16xf32>
    %49 = arith.addf %47, %48 : vector<96x16xf32>
    %50 = arith.addf %49, %44 : vector<96x16xf32>
    %51 = arith.truncf %50 : vector<96x16xf32> to vector<96x16xbf16>
    %c0_21 = arith.constant 0 : index
    %c0_22 = arith.constant 0 : index
    %c0_23 = arith.constant 0 : index
    %52 = vector.load %arg9[%c0_21, %c0_22, %c0_23] : memref<1x96x16xbf16, #tpu.memory_space<vmem>>, vector<1x96x16xbf16>
    %53 = vector.shape_cast %52 : vector<1x96x16xbf16> to vector<96x16xbf16>
    %54 = vector.shape_cast %51 : vector<96x16xbf16> to vector<1x96x16xbf16>
    tpu.vector_store %arg9[%c0_21, %c0_22, %c0_23], %54 {strides = array<i32>} : memref<1x96x16xbf16, #tpu.memory_space<vmem>>, vector<1x96x16xbf16>,
    return
  }
  func.func @transform_0(%arg0: i32, %arg1: i32) -> (i32, i32, i32) {
    %c0_i32 = arith.constant 0 : i32
    %c0_i32_0 = arith.constant 0 : i32
    return %arg0, %arg1, %c0_i32 : i32, i32, i32
  }
  func.func @transform_1(%arg0: i32, %arg1: i32) -> (i32, i32) {
    %c0_i32 = arith.constant 0 : i32
    %c0_i32_0 = arith.constant 0 : i32
    return %arg1, %c0_i32 : i32, i32
  }
  func.func @transform_2(%arg0: i32, %arg1: i32) -> (i32, i32, i32) {
    %c0_i32 = arith.constant 0 : i32
    %c0_i32_0 = arith.constant 0 : i32
    return %arg0, %arg1, %c0_i32 : i32, i32, i32
  }
  func.func @transform_3(%arg0: i32, %arg1: i32) -> (i32, i32, i32) {
    %c0_i32 = arith.constant 0 : i32
    %c0_i32_0 = arith.constant 0 : i32
    %c0_i32_1 = arith.constant 0 : i32
    return %arg0, %c0_i32, %c0_i32_0 : i32, i32, i32
  }
  func.func @transform_4(%arg0: i32, %arg1: i32) -> (i32, i32, i32) {
    %c0_i32 = arith.constant 0 : i32
    %c0_i32_0 = arith.constant 0 : i32
    %c0_i32_1 = arith.constant 0 : i32
    return %arg0, %c0_i32, %c0_i32_0 : i32, i32, i32
  }
  func.func @transform_5(%arg0: i32, %arg1: i32) -> (i32, i32) {
    %c0_i32 = arith.constant 0 : i32
    %c0_i32_0 = arith.constant 0 : i32
    %c0_i32_1 = arith.constant 0 : i32
    return %c0_i32, %c0_i32_0 : i32, i32
  }
  func.func @transform_6(%arg0: i32, %arg1: i32) -> (i32, i32) {
    %c0_i32 = arith.constant 0 : i32
    %c0_i32_0 = arith.constant 0 : i32
    %c0_i32_1 = arith.constant 0 : i32
    return %c0_i32, %c0_i32_0 : i32, i32
  }
  func.func @transform_7(%arg0: i32, %arg1: i32) -> (i32, i32, i32) {
    %c0_i32 = arith.constant 0 : i32
    %c0_i32_0 = arith.constant 0 : i32
    return %arg0, %arg1, %c0_i32 : i32, i32, i32
  }
}

module attributes {stable_mosaic.version = 11 : i64} {
  func.func @_mlp_block_kernel(%arg0: i32, %arg1: memref<256x16xbf16, #tpu.memory_space<vmem>>, %arg2: memref<1x16xf32, #tpu.memory_space<vmem>>, %arg3: memref<1x16xf32, #tpu.memory_space<vmem>>, %arg4: memref<16x64xbf16, #tpu.memory_space<vmem>>, %arg5: memref<1x64xf32, #tpu.memory_space<vmem>>, %arg6: memref<64x16xbf16, #tpu.memory_space<vmem>>, %arg7: memref<1x16xf32, #tpu.memory_space<vmem>>, %arg8: memref<256x16xbf16, #tpu.memory_space<vmem>>) attributes {dimension_semantics = [#tpu.dimension_semantics<parallel>], iteration_bounds = array<i64: 2>, scalar_prefetch = 0 : i64, scratch_operands = 0 : i64, tpu.core_type = #tpu.core_type<tc>, window_params = [{transform_indices = @transform_0, window_bounds = array<i64: 256, 16>}, {pipeline_mode = #tpu.pipeline_mode<synchronous>, transform_indices = @transform_1, window_bounds = array<i64: 1, 16>}, {pipeline_mode = #tpu.pipeline_mode<synchronous>, transform_indices = @transform_2, window_bounds = array<i64: 1, 16>}, {pipeline_mode = #tpu.pipeline_mode<synchronous>, transform_indices = @transform_3, window_bounds = array<i64: 16, 64>}, {pipeline_mode = #tpu.pipeline_mode<synchronous>, transform_indices = @transform_4, window_bounds = array<i64: 1, 64>}, {pipeline_mode = #tpu.pipeline_mode<synchronous>, transform_indices = @transform_5, window_bounds = array<i64: 64, 16>}, {pipeline_mode = #tpu.pipeline_mode<synchronous>, transform_indices = @transform_6, window_bounds = array<i64: 1, 16>}, {transform_indices = @transform_7, window_bounds = array<i64: 256, 16>}]} {
    %c0 = arith.constant 0 : index
    %c0_0 = arith.constant 0 : index
    %0 = vector.load %arg1[%c0, %c0_0] : memref<256x16xbf16, #tpu.memory_space<vmem>>, vector<256x16xbf16>
    %1 = arith.extf %0 : vector<256x16xbf16> to vector<256x16xf32>
    %cst = arith.constant dense<0.000000e+00> : vector<256xf32>
    %2 = vector.multi_reduction <add>, %1, %cst [1] : vector<256x16xf32> to vector<256xf32>
    %3 = vector.shape_cast %2 : vector<256xf32> to vector<256x1xf32>
    %cst_1 = arith.constant 1.600000e+01 : f32
    %4 = vector.broadcast %cst_1 : f32 to vector<256x1xf32>
    %5 = arith.divf %3, %4 : vector<256x1xf32>
    %6 = vector.broadcast %5 : vector<256x1xf32> to vector<256x16xf32>
    %7 = arith.subf %1, %6 : vector<256x16xf32>
    %8 = arith.mulf %7, %7 : vector<256x16xf32>
    %cst_2 = arith.constant dense<0.000000e+00> : vector<256xf32>
    %9 = vector.multi_reduction <add>, %8, %cst_2 [1] : vector<256x16xf32> to vector<256xf32>
    %10 = vector.shape_cast %9 : vector<256xf32> to vector<256x1xf32>
    %cst_3 = arith.constant 1.600000e+01 : f32
    %11 = vector.broadcast %cst_3 : f32 to vector<256x1xf32>
    %12 = arith.divf %10, %11 : vector<256x1xf32>
    %cst_4 = arith.constant 9.99999974E-6 : f32
    %13 = vector.broadcast %cst_4 : f32 to vector<256x1xf32>
    %14 = arith.addf %12, %13 : vector<256x1xf32>
    %15 = math.rsqrt %14 : vector<256x1xf32>
    %16 = vector.broadcast %15 : vector<256x1xf32> to vector<256x16xf32>
    %17 = arith.mulf %7, %16 : vector<256x16xf32>
    %c0_5 = arith.constant 0 : index
    %c0_6 = arith.constant 0 : index
    %18 = vector.load %arg2[%c0_5, %c0_6] : memref<1x16xf32, #tpu.memory_space<vmem>>, vector<1x16xf32>
    %19 = vector.broadcast %18 : vector<1x16xf32> to vector<256x16xf32>
    %20 = arith.mulf %17, %19 : vector<256x16xf32>
    %c0_7 = arith.constant 0 : index
    %c0_8 = arith.constant 0 : index
    %21 = vector.load %arg3[%c0_7, %c0_8] : memref<1x16xf32, #tpu.memory_space<vmem>>, vector<1x16xf32>
    %22 = vector.broadcast %21 : vector<1x16xf32> to vector<256x16xf32>
    %23 = arith.addf %20, %22 : vector<256x16xf32>
    %24 = arith.truncf %23 : vector<256x16xf32> to vector<256x16xbf16>
    %c0_9 = arith.constant 0 : index
    %c0_10 = arith.constant 0 : index
    %25 = vector.load %arg4[%c0_9, %c0_10] : memref<16x64xbf16, #tpu.memory_space<vmem>>, vector<16x64xbf16>
    %cst_11 = arith.constant dense<0.000000e+00> : vector<256x64xf32>
    %26 = tpu.matmul %24, %25, %cst_11 {dimension_numbers = #tpu.dot_dimension_numbers<[1], [0], [0], [1], [0, 0, 1, 1], [], []>} : vector<256x16xbf16>, vector<16x64xbf16>, vector<256x64xf32> -> vector<256x64xf32>
    %c0_12 = arith.constant 0 : index
    %c0_13 = arith.constant 0 : index
    %27 = vector.load %arg5[%c0_12, %c0_13] : memref<1x64xf32, #tpu.memory_space<vmem>>, vector<1x64xf32>
    %28 = vector.broadcast %27 : vector<1x64xf32> to vector<256x64xf32>
    %29 = arith.addf %26, %28 : vector<256x64xf32>
    %30 = arith.mulf %29, %29 : vector<256x64xf32>
    %31 = arith.mulf %29, %30 : vector<256x64xf32>
    %cst_14 = arith.constant 4.471500e-02 : f32
    %32 = vector.broadcast %cst_14 : f32 to vector<256x64xf32>
    %33 = arith.mulf %32, %31 : vector<256x64xf32>
    %34 = arith.addf %29, %33 : vector<256x64xf32>
    %cst_15 = arith.constant 0.797884583 : f32
    %35 = vector.broadcast %cst_15 : f32 to vector<256x64xf32>
    %36 = arith.mulf %35, %34 : vector<256x64xf32>
    %37 = math.tanh %36 : vector<256x64xf32>
    %cst_16 = arith.constant 1.000000e+00 : f32
    %38 = vector.broadcast %cst_16 : f32 to vector<256x64xf32>
    %39 = arith.addf %38, %37 : vector<256x64xf32>
    %cst_17 = arith.constant 5.000000e-01 : f32
    %40 = vector.broadcast %cst_17 : f32 to vector<256x64xf32>
    %41 = arith.mulf %40, %39 : vector<256x64xf32>
    %42 = arith.mulf %29, %41 : vector<256x64xf32>
    %43 = arith.truncf %42 : vector<256x64xf32> to vector<256x64xbf16>
    %c0_18 = arith.constant 0 : index
    %c0_19 = arith.constant 0 : index
    %44 = vector.load %arg6[%c0_18, %c0_19] : memref<64x16xbf16, #tpu.memory_space<vmem>>, vector<64x16xbf16>
    %cst_20 = arith.constant dense<0.000000e+00> : vector<256x16xf32>
    %45 = tpu.matmul %43, %44, %cst_20 {dimension_numbers = #tpu.dot_dimension_numbers<[1], [0], [0], [1], [0, 0, 1, 1], [], []>} : vector<256x64xbf16>, vector<64x16xbf16>, vector<256x16xf32> -> vector<256x16xf32>
    %c0_21 = arith.constant 0 : index
    %c0_22 = arith.constant 0 : index
    %46 = vector.load %arg7[%c0_21, %c0_22] : memref<1x16xf32, #tpu.memory_space<vmem>>, vector<1x16xf32>
    %47 = vector.broadcast %46 : vector<1x16xf32> to vector<256x16xf32>
    %48 = arith.addf %45, %47 : vector<256x16xf32>
    %49 = arith.addf %1, %48 : vector<256x16xf32>
    %50 = arith.truncf %49 : vector<256x16xf32> to vector<256x16xbf16>
    %c0_23 = arith.constant 0 : index
    %c0_24 = arith.constant 0 : index
    %51 = vector.load %arg8[%c0_23, %c0_24] : memref<256x16xbf16, #tpu.memory_space<vmem>>, vector<256x16xbf16>
    tpu.vector_store %arg8[%c0_23, %c0_24], %50 {strides = array<i32>} : memref<256x16xbf16, #tpu.memory_space<vmem>>, vector<256x16xbf16>,
    return
  }
  func.func @transform_0(%arg0: i32) -> (i32, i32) {
    %c0_i32 = arith.constant 0 : i32
    %c0_i32_0 = arith.constant 0 : i32
    return %arg0, %c0_i32 : i32, i32
  }
  func.func @transform_1(%arg0: i32) -> (i32, i32) {
    %c0_i32 = arith.constant 0 : i32
    %c0_i32_0 = arith.constant 0 : i32
    %c0_i32_1 = arith.constant 0 : i32
    return %c0_i32, %c0_i32_0 : i32, i32
  }
  func.func @transform_2(%arg0: i32) -> (i32, i32) {
    %c0_i32 = arith.constant 0 : i32
    %c0_i32_0 = arith.constant 0 : i32
    %c0_i32_1 = arith.constant 0 : i32
    return %c0_i32, %c0_i32_0 : i32, i32
  }
  func.func @transform_3(%arg0: i32) -> (i32, i32) {
    %c0_i32 = arith.constant 0 : i32
    %c0_i32_0 = arith.constant 0 : i32
    %c0_i32_1 = arith.constant 0 : i32
    return %c0_i32, %c0_i32_0 : i32, i32
  }
  func.func @transform_4(%arg0: i32) -> (i32, i32) {
    %c0_i32 = arith.constant 0 : i32
    %c0_i32_0 = arith.constant 0 : i32
    %c0_i32_1 = arith.constant 0 : i32
    return %c0_i32, %c0_i32_0 : i32, i32
  }
  func.func @transform_5(%arg0: i32) -> (i32, i32) {
    %c0_i32 = arith.constant 0 : i32
    %c0_i32_0 = arith.constant 0 : i32
    %c0_i32_1 = arith.constant 0 : i32
    return %c0_i32, %c0_i32_0 : i32, i32
  }
  func.func @transform_6(%arg0: i32) -> (i32, i32) {
    %c0_i32 = arith.constant 0 : i32
    %c0_i32_0 = arith.constant 0 : i32
    %c0_i32_1 = arith.constant 0 : i32
    return %c0_i32, %c0_i32_0 : i32, i32
  }
  func.func @transform_7(%arg0: i32) -> (i32, i32) {
    %c0_i32 = arith.constant 0 : i32
    %c0_i32_0 = arith.constant 0 : i32
    return %arg0, %c0_i32 : i32, i32
  }
}

module attributes {stable_mosaic.version = 11 : i64} {
  func.func @_matmul_bias_kernel(%arg0: i32, %arg1: i32, %arg2: i32, %arg3: memref<32x128xbf16, #tpu.memory_space<vmem>>, %arg4: memref<128x128xbf16, #tpu.memory_space<vmem>>, %arg5: memref<1x128xf32, #tpu.memory_space<vmem>>, %arg6: memref<32x128xbf16, #tpu.memory_space<vmem>>, %arg7: memref<32x128xf32, #tpu.memory_space<vmem>>) attributes {dimension_semantics = [#tpu.dimension_semantics<parallel>, #tpu.dimension_semantics<parallel>, #tpu.dimension_semantics<arbitrary>], iteration_bounds = array<i64: 1, 1, 1>, scalar_prefetch = 0 : i64, scratch_operands = 1 : i64, tpu.core_type = #tpu.core_type<tc>, window_params = [{transform_indices = @transform_0, window_bounds = array<i64: 32, 128>}, {transform_indices = @transform_1, window_bounds = array<i64: 128, 128>}, {transform_indices = @transform_2, window_bounds = array<i64: 1, 128>}, {transform_indices = @transform_3, window_bounds = array<i64: 32, 128>}]} {
    %c0_i32 = arith.constant 0 : i32
    %0 = arith.cmpi eq, %arg2, %c0_i32 : i32
    %1 = arith.extui %0 : i1 to i32
    %c0_i32_0 = arith.constant 0 : i32
    %2 = arith.cmpi ne, %1, %c0_i32_0 : i32
    scf.if %2 {
      %cst_10 = arith.constant 0.000000e+00 : f32
      %12 = vector.broadcast %cst_10 : f32 to vector<32x128xf32>
      %c0_11 = arith.constant 0 : index
      %c0_12 = arith.constant 0 : index
      %13 = vector.load %arg7[%c0_11, %c0_12] : memref<32x128xf32, #tpu.memory_space<vmem>>, vector<32x128xf32>
      tpu.vector_store %arg7[%c0_11, %c0_12], %12 {strides = array<i32>} : memref<32x128xf32, #tpu.memory_space<vmem>>, vector<32x128xf32>,
    } else {
    }
    %c0 = arith.constant 0 : index
    %c0_1 = arith.constant 0 : index
    %3 = vector.load %arg7[%c0, %c0_1] : memref<32x128xf32, #tpu.memory_space<vmem>>, vector<32x128xf32>
    %c0_2 = arith.constant 0 : index
    %c0_3 = arith.constant 0 : index
    %4 = vector.load %arg3[%c0_2, %c0_3] : memref<32x128xbf16, #tpu.memory_space<vmem>>, vector<32x128xbf16>
    %c0_4 = arith.constant 0 : index
    %c0_5 = arith.constant 0 : index
    %5 = vector.load %arg4[%c0_4, %c0_5] : memref<128x128xbf16, #tpu.memory_space<vmem>>, vector<128x128xbf16>
    %cst = arith.constant dense<0.000000e+00> : vector<32x128xf32>
    %6 = tpu.matmul %4, %5, %cst {dimension_numbers = #tpu.dot_dimension_numbers<[1], [0], [0], [1], [0, 0, 1, 1], [], []>} : vector<32x128xbf16>, vector<128x128xbf16>, vector<32x128xf32> -> vector<32x128xf32>
    %7 = arith.addf %3, %6 : vector<32x128xf32>
    %c0_6 = arith.constant 0 : index
    %c0_7 = arith.constant 0 : index
    %8 = vector.load %arg7[%c0_6, %c0_7] : memref<32x128xf32, #tpu.memory_space<vmem>>, vector<32x128xf32>
    tpu.vector_store %arg7[%c0_6, %c0_7], %7 {strides = array<i32>} : memref<32x128xf32, #tpu.memory_space<vmem>>, vector<32x128xf32>,
    %c0_i32_8 = arith.constant 0 : i32
    %9 = arith.cmpi eq, %arg2, %c0_i32_8 : i32
    %10 = arith.extui %9 : i1 to i32
    %c0_i32_9 = arith.constant 0 : i32
    %11 = arith.cmpi ne, %10, %c0_i32_9 : i32
    scf.if %11 {
      %c0_10 = arith.constant 0 : index
      %c0_11 = arith.constant 0 : index
      %12 = vector.load %arg7[%c0_10, %c0_11] : memref<32x128xf32, #tpu.memory_space<vmem>>, vector<32x128xf32>
      %c0_12 = arith.constant 0 : index
      %c0_13 = arith.constant 0 : index
      %13 = vector.load %arg5[%c0_12, %c0_13] : memref<1x128xf32, #tpu.memory_space<vmem>>, vector<1x128xf32>
      %14 = vector.broadcast %13 : vector<1x128xf32> to vector<32x128xf32>
      %15 = arith.addf %12, %14 : vector<32x128xf32>
      %16 = arith.truncf %15 : vector<32x128xf32> to vector<32x128xbf16>
      %c0_14 = arith.constant 0 : index
      %c0_15 = arith.constant 0 : index
      %17 = vector.load %arg6[%c0_14, %c0_15] : memref<32x128xbf16, #tpu.memory_space<vmem>>, vector<32x128xbf16>
      tpu.vector_store %arg6[%c0_14, %c0_15], %16 {strides = array<i32>} : memref<32x128xbf16, #tpu.memory_space<vmem>>, vector<32x128xbf16>,
    } else {
    }
    return
  }
  func.func @transform_0(%arg0: i32, %arg1: i32, %arg2: i32) -> (i32, i32) {
    %c0_i32 = arith.constant 0 : i32
    return %arg0, %arg2 : i32, i32
  }
  func.func @transform_1(%arg0: i32, %arg1: i32, %arg2: i32) -> (i32, i32) {
    %c0_i32 = arith.constant 0 : i32
    return %arg2, %arg1 : i32, i32
  }
  func.func @transform_2(%arg0: i32, %arg1: i32, %arg2: i32) -> (i32, i32) {
    %c0_i32 = arith.constant 0 : i32
    %c0_i32_0 = arith.constant 0 : i32
    return %c0_i32, %arg1 : i32, i32
  }
  func.func @transform_3(%arg0: i32, %arg1: i32, %arg2: i32) -> (i32, i32) {
    %c0_i32 = arith.constant 0 : i32
    return %arg0, %arg1 : i32, i32
  }
}

module attributes {stable_mosaic.version = 11 : i64} {
  func.func @_qkv_kernel(%arg0: i32, %arg1: i32, %arg2: memref<1x32x32xbf16, #tpu.memory_space<vmem>>, %arg3: memref<32x32xf32, #tpu.memory_space<vmem>>, %arg4: memref<1x32xf32, #tpu.memory_space<vmem>>, %arg5: memref<1x32xf32, #tpu.memory_space<vmem>>, %arg6: memref<32x96xbf16, #tpu.memory_space<vmem>>, %arg7: memref<1x96xf32, #tpu.memory_space<vmem>>, %arg8: memref<1x32x32xbf16, #tpu.memory_space<vmem>>, %arg9: memref<1x32x32xbf16, #tpu.memory_space<vmem>>, %arg10: memref<1x32x32xbf16, #tpu.memory_space<vmem>>) attributes {dimension_semantics = [#tpu.dimension_semantics<parallel>, #tpu.dimension_semantics<parallel>], iteration_bounds = array<i64: 2, 1>, scalar_prefetch = 0 : i64, scratch_operands = 0 : i64, tpu.core_type = #tpu.core_type<tc>, window_params = [{transform_indices = @transform_0, window_bounds = array<i64: 1, 32, 32>}, {transform_indices = @transform_1, window_bounds = array<i64: 32, 32>}, {pipeline_mode = #tpu.pipeline_mode<synchronous>, transform_indices = @transform_2, window_bounds = array<i64: 1, 32>}, {pipeline_mode = #tpu.pipeline_mode<synchronous>, transform_indices = @transform_3, window_bounds = array<i64: 1, 32>}, {pipeline_mode = #tpu.pipeline_mode<synchronous>, transform_indices = @transform_4, window_bounds = array<i64: 32, 96>}, {pipeline_mode = #tpu.pipeline_mode<synchronous>, transform_indices = @transform_5, window_bounds = array<i64: 1, 96>}, {transform_indices = @transform_6, window_bounds = array<i64: 1, 32, 32>}, {transform_indices = @transform_7, window_bounds = array<i64: 1, 32, 32>}, {transform_indices = @transform_8, window_bounds = array<i64: 1, 32, 32>}]} {
    %c0 = arith.constant 0 : index
    %c0_0 = arith.constant 0 : index
    %c0_1 = arith.constant 0 : index
    %0 = vector.load %arg2[%c0, %c0_0, %c0_1] : memref<1x32x32xbf16, #tpu.memory_space<vmem>>, vector<1x32x32xbf16>
    %1 = vector.shape_cast %0 : vector<1x32x32xbf16> to vector<32x32xbf16>
    %2 = arith.extf %1 : vector<32x32xbf16> to vector<32x32xf32>
    %c0_2 = arith.constant 0 : index
    %c0_3 = arith.constant 0 : index
    %3 = vector.load %arg3[%c0_2, %c0_3] : memref<32x32xf32, #tpu.memory_space<vmem>>, vector<32x32xf32>
    %4 = arith.addf %2, %3 : vector<32x32xf32>
    %cst = arith.constant dense<0.000000e+00> : vector<32xf32>
    %5 = vector.multi_reduction <add>, %4, %cst [1] : vector<32x32xf32> to vector<32xf32>
    %6 = vector.shape_cast %5 : vector<32xf32> to vector<32x1xf32>
    %cst_4 = arith.constant 3.200000e+01 : f32
    %7 = vector.broadcast %cst_4 : f32 to vector<32x1xf32>
    %8 = arith.divf %6, %7 : vector<32x1xf32>
    %9 = vector.broadcast %8 : vector<32x1xf32> to vector<32x32xf32>
    %10 = arith.subf %4, %9 : vector<32x32xf32>
    %11 = arith.mulf %10, %10 : vector<32x32xf32>
    %cst_5 = arith.constant dense<0.000000e+00> : vector<32xf32>
    %12 = vector.multi_reduction <add>, %11, %cst_5 [1] : vector<32x32xf32> to vector<32xf32>
    %13 = vector.shape_cast %12 : vector<32xf32> to vector<32x1xf32>
    %cst_6 = arith.constant 3.200000e+01 : f32
    %14 = vector.broadcast %cst_6 : f32 to vector<32x1xf32>
    %15 = arith.divf %13, %14 : vector<32x1xf32>
    %cst_7 = arith.constant 9.99999974E-6 : f32
    %16 = vector.broadcast %cst_7 : f32 to vector<32x1xf32>
    %17 = arith.addf %15, %16 : vector<32x1xf32>
    %18 = math.rsqrt %17 : vector<32x1xf32>
    %19 = vector.broadcast %18 : vector<32x1xf32> to vector<32x32xf32>
    %20 = arith.mulf %10, %19 : vector<32x32xf32>
    %c0_8 = arith.constant 0 : index
    %c0_9 = arith.constant 0 : index
    %21 = vector.load %arg4[%c0_8, %c0_9] : memref<1x32xf32, #tpu.memory_space<vmem>>, vector<1x32xf32>
    %22 = vector.broadcast %21 : vector<1x32xf32> to vector<32x32xf32>
    %23 = arith.mulf %20, %22 : vector<32x32xf32>
    %c0_10 = arith.constant 0 : index
    %c0_11 = arith.constant 0 : index
    %24 = vector.load %arg5[%c0_10, %c0_11] : memref<1x32xf32, #tpu.memory_space<vmem>>, vector<1x32xf32>
    %25 = vector.broadcast %24 : vector<1x32xf32> to vector<32x32xf32>
    %26 = arith.addf %23, %25 : vector<32x32xf32>
    %27 = arith.truncf %26 : vector<32x32xf32> to vector<32x32xbf16>
    %c0_12 = arith.constant 0 : index
    %c0_13 = arith.constant 0 : index
    %28 = vector.load %arg6[%c0_12, %c0_13] : memref<32x96xbf16, #tpu.memory_space<vmem>>, vector<32x96xbf16>
    %cst_14 = arith.constant dense<0.000000e+00> : vector<32x96xf32>
    %29 = tpu.matmul %27, %28, %cst_14 {dimension_numbers = #tpu.dot_dimension_numbers<[1], [0], [0], [1], [0, 0, 1, 1], [], []>} : vector<32x32xbf16>, vector<32x96xbf16>, vector<32x96xf32> -> vector<32x96xf32>
    %c0_15 = arith.constant 0 : index
    %c0_16 = arith.constant 0 : index
    %30 = vector.load %arg7[%c0_15, %c0_16] : memref<1x96xf32, #tpu.memory_space<vmem>>, vector<1x96xf32>
    %31 = vector.broadcast %30 : vector<1x96xf32> to vector<32x96xf32>
    %32 = arith.addf %29, %31 : vector<32x96xf32>
    %33 = vector.extract_strided_slice %32 {offsets = [0, 0], sizes = [32, 32], strides = [1, 1]} : vector<32x96xf32> to vector<32x32xf32>
    %34 = arith.truncf %33 : vector<32x32xf32> to vector<32x32xbf16>
    %c0_17 = arith.constant 0 : index
    %c0_18 = arith.constant 0 : index
    %c0_19 = arith.constant 0 : index
    %35 = vector.load %arg8[%c0_17, %c0_18, %c0_19] : memref<1x32x32xbf16, #tpu.memory_space<vmem>>, vector<1x32x32xbf16>
    %36 = vector.shape_cast %35 : vector<1x32x32xbf16> to vector<32x32xbf16>
    %37 = vector.shape_cast %34 : vector<32x32xbf16> to vector<1x32x32xbf16>
    tpu.vector_store %arg8[%c0_17, %c0_18, %c0_19], %37 {strides = array<i32>} : memref<1x32x32xbf16, #tpu.memory_space<vmem>>, vector<1x32x32xbf16>,
    %38 = vector.extract_strided_slice %32 {offsets = [0, 32], sizes = [32, 32], strides = [1, 1]} : vector<32x96xf32> to vector<32x32xf32>
    %39 = arith.truncf %38 : vector<32x32xf32> to vector<32x32xbf16>
    %c0_20 = arith.constant 0 : index
    %c0_21 = arith.constant 0 : index
    %c0_22 = arith.constant 0 : index
    %40 = vector.load %arg9[%c0_20, %c0_21, %c0_22] : memref<1x32x32xbf16, #tpu.memory_space<vmem>>, vector<1x32x32xbf16>
    %41 = vector.shape_cast %40 : vector<1x32x32xbf16> to vector<32x32xbf16>
    %42 = vector.shape_cast %39 : vector<32x32xbf16> to vector<1x32x32xbf16>
    tpu.vector_store %arg9[%c0_20, %c0_21, %c0_22], %42 {strides = array<i32>} : memref<1x32x32xbf16, #tpu.memory_space<vmem>>, vector<1x32x32xbf16>,
    %43 = vector.extract_strided_slice %32 {offsets = [0, 64], sizes = [32, 32], strides = [1, 1]} : vector<32x96xf32> to vector<32x32xf32>
    %44 = arith.truncf %43 : vector<32x32xf32> to vector<32x32xbf16>
    %c0_23 = arith.constant 0 : index
    %c0_24 = arith.constant 0 : index
    %c0_25 = arith.constant 0 : index
    %45 = vector.load %arg10[%c0_23, %c0_24, %c0_25] : memref<1x32x32xbf16, #tpu.memory_space<vmem>>, vector<1x32x32xbf16>
    %46 = vector.shape_cast %45 : vector<1x32x32xbf16> to vector<32x32xbf16>
    %47 = vector.shape_cast %44 : vector<32x32xbf16> to vector<1x32x32xbf16>
    tpu.vector_store %arg10[%c0_23, %c0_24, %c0_25], %47 {strides = array<i32>} : memref<1x32x32xbf16, #tpu.memory_space<vmem>>, vector<1x32x32xbf16>,
    return
  }
  func.func @transform_0(%arg0: i32, %arg1: i32) -> (i32, i32, i32) {
    %c0_i32 = arith.constant 0 : i32
    %c0_i32_0 = arith.constant 0 : i32
    return %arg0, %arg1, %c0_i32 : i32, i32, i32
  }
  func.func @transform_1(%arg0: i32, %arg1: i32) -> (i32, i32) {
    %c0_i32 = arith.constant 0 : i32
    %c0_i32_0 = arith.constant 0 : i32
    return %arg1, %c0_i32 : i32, i32
  }
  func.func @transform_2(%arg0: i32, %arg1: i32) -> (i32, i32) {
    %c0_i32 = arith.constant 0 : i32
    %c0_i32_0 = arith.constant 0 : i32
    %c0_i32_1 = arith.constant 0 : i32
    return %c0_i32, %c0_i32_0 : i32, i32
  }
  func.func @transform_3(%arg0: i32, %arg1: i32) -> (i32, i32) {
    %c0_i32 = arith.constant 0 : i32
    %c0_i32_0 = arith.constant 0 : i32
    %c0_i32_1 = arith.constant 0 : i32
    return %c0_i32, %c0_i32_0 : i32, i32
  }
  func.func @transform_4(%arg0: i32, %arg1: i32) -> (i32, i32) {
    %c0_i32 = arith.constant 0 : i32
    %c0_i32_0 = arith.constant 0 : i32
    %c0_i32_1 = arith.constant 0 : i32
    return %c0_i32, %c0_i32_0 : i32, i32
  }
  func.func @transform_5(%arg0: i32, %arg1: i32) -> (i32, i32) {
    %c0_i32 = arith.constant 0 : i32
    %c0_i32_0 = arith.constant 0 : i32
    %c0_i32_1 = arith.constant 0 : i32
    return %c0_i32, %c0_i32_0 : i32, i32
  }
  func.func @transform_6(%arg0: i32, %arg1: i32) -> (i32, i32, i32) {
    %c0_i32 = arith.constant 0 : i32
    %c0_i32_0 = arith.constant 0 : i32
    return %arg0, %arg1, %c0_i32 : i32, i32, i32
  }
  func.func @transform_7(%arg0: i32, %arg1: i32) -> (i32, i32, i32) {
    %c0_i32 = arith.constant 0 : i32
    %c0_i32_0 = arith.constant 0 : i32
    return %arg0, %arg1, %c0_i32 : i32, i32, i32
  }
  func.func @transform_8(%arg0: i32, %arg1: i32) -> (i32, i32, i32) {
    %c0_i32 = arith.constant 0 : i32
    %c0_i32_0 = arith.constant 0 : i32
    return %arg0, %arg1, %c0_i32 : i32, i32, i32
  }
}

module attributes {stable_mosaic.version = 11 : i64} {
  func.func @_flash_attn_kernel(%arg0: i32, %arg1: i32, %arg2: memref<1x32x32xbf16, #tpu.memory_space<vmem>>, %arg3: memref<32x32xf32, #tpu.memory_space<vmem>>, %arg4: memref<1x32x32xbf16, #tpu.memory_space<vmem>>, %arg5: memref<1x32x32xbf16, #tpu.memory_space<vmem>>, %arg6: memref<1x32x32xbf16, #tpu.memory_space<vmem>>, %arg7: memref<32x32xbf16, #tpu.memory_space<vmem>>, %arg8: memref<1x32xf32, #tpu.memory_space<vmem>>, %arg9: memref<1x32x32xbf16, #tpu.memory_space<vmem>>) attributes {dimension_semantics = [#tpu.dimension_semantics<parallel>, #tpu.dimension_semantics<parallel>], iteration_bounds = array<i64: 2, 1>, scalar_prefetch = 0 : i64, scratch_operands = 0 : i64, tpu.core_type = #tpu.core_type<tc>, window_params = [{transform_indices = @transform_0, window_bounds = array<i64: 1, 32, 32>}, {transform_indices = @transform_1, window_bounds = array<i64: 32, 32>}, {transform_indices = @transform_2, window_bounds = array<i64: 1, 32, 32>}, {transform_indices = @transform_3, window_bounds = array<i64: 1, 32, 32>}, {transform_indices = @transform_4, window_bounds = array<i64: 1, 32, 32>}, {pipeline_mode = #tpu.pipeline_mode<synchronous>, transform_indices = @transform_5, window_bounds = array<i64: 32, 32>}, {pipeline_mode = #tpu.pipeline_mode<synchronous>, transform_indices = @transform_6, window_bounds = array<i64: 1, 32>}, {transform_indices = @transform_7, window_bounds = array<i64: 1, 32, 32>}]} {
    %c0 = arith.constant 0 : index
    %c0_0 = arith.constant 0 : index
    %c0_1 = arith.constant 0 : index
    %0 = vector.load %arg4[%c0, %c0_0, %c0_1] : memref<1x32x32xbf16, #tpu.memory_space<vmem>>, vector<1x32x32xbf16>
    %1 = vector.shape_cast %0 : vector<1x32x32xbf16> to vector<32x32xbf16>
    %c0_2 = arith.constant 0 : index
    %c0_3 = arith.constant 0 : index
    %c0_4 = arith.constant 0 : index
    %2 = vector.load %arg5[%c0_2, %c0_3, %c0_4] : memref<1x32x32xbf16, #tpu.memory_space<vmem>>, vector<1x32x32xbf16>
    %3 = vector.shape_cast %2 : vector<1x32x32xbf16> to vector<32x32xbf16>
    %c0_5 = arith.constant 0 : index
    %c0_6 = arith.constant 0 : index
    %c0_7 = arith.constant 0 : index
    %4 = vector.load %arg6[%c0_5, %c0_6, %c0_7] : memref<1x32x32xbf16, #tpu.memory_space<vmem>>, vector<1x32x32xbf16>
    %5 = vector.shape_cast %4 : vector<1x32x32xbf16> to vector<32x32xbf16>
    %6 = vector.extract_strided_slice %1 {offsets = [0, 0], sizes = [32, 8], strides = [1, 1]} : vector<32x32xbf16> to vector<32x8xbf16>
    %7 = vector.extract_strided_slice %1 {offsets = [0, 8], sizes = [32, 8], strides = [1, 1]} : vector<32x32xbf16> to vector<32x8xbf16>
    %8 = vector.extract_strided_slice %1 {offsets = [0, 16], sizes = [32, 8], strides = [1, 1]} : vector<32x32xbf16> to vector<32x8xbf16>
    %9 = vector.extract_strided_slice %1 {offsets = [0, 24], sizes = [32, 8], strides = [1, 1]} : vector<32x32xbf16> to vector<32x8xbf16>
    %10 = vector.shape_cast %6 : vector<32x8xbf16> to vector<1x32x8xbf16>
    %11 = vector.shape_cast %7 : vector<32x8xbf16> to vector<1x32x8xbf16>
    %12 = vector.shape_cast %8 : vector<32x8xbf16> to vector<1x32x8xbf16>
    %13 = vector.shape_cast %9 : vector<32x8xbf16> to vector<1x32x8xbf16>
    %14 = tpu.concatenate %10, %11, %12, %13 in 0 : vector<1x32x8xbf16>, vector<1x32x8xbf16>, vector<1x32x8xbf16>, vector<1x32x8xbf16> -> vector<4x32x8xbf16>
    %15 = vector.extract_strided_slice %3 {offsets = [0, 0], sizes = [32, 8], strides = [1, 1]} : vector<32x32xbf16> to vector<32x8xbf16>
    %16 = vector.extract_strided_slice %3 {offsets = [0, 8], sizes = [32, 8], strides = [1, 1]} : vector<32x32xbf16> to vector<32x8xbf16>
    %17 = vector.extract_strided_slice %3 {offsets = [0, 16], sizes = [32, 8], strides = [1, 1]} : vector<32x32xbf16> to vector<32x8xbf16>
    %18 = vector.extract_strided_slice %3 {offsets = [0, 24], sizes = [32, 8], strides = [1, 1]} : vector<32x32xbf16> to vector<32x8xbf16>
    %19 = vector.shape_cast %15 : vector<32x8xbf16> to vector<1x32x8xbf16>
    %20 = vector.shape_cast %16 : vector<32x8xbf16> to vector<1x32x8xbf16>
    %21 = vector.shape_cast %17 : vector<32x8xbf16> to vector<1x32x8xbf16>
    %22 = vector.shape_cast %18 : vector<32x8xbf16> to vector<1x32x8xbf16>
    %23 = tpu.concatenate %19, %20, %21, %22 in 0 : vector<1x32x8xbf16>, vector<1x32x8xbf16>, vector<1x32x8xbf16>, vector<1x32x8xbf16> -> vector<4x32x8xbf16>
    %24 = vector.extract_strided_slice %5 {offsets = [0, 0], sizes = [32, 8], strides = [1, 1]} : vector<32x32xbf16> to vector<32x8xbf16>
    %25 = vector.extract_strided_slice %5 {offsets = [0, 8], sizes = [32, 8], strides = [1, 1]} : vector<32x32xbf16> to vector<32x8xbf16>
    %26 = vector.extract_strided_slice %5 {offsets = [0, 16], sizes = [32, 8], strides = [1, 1]} : vector<32x32xbf16> to vector<32x8xbf16>
    %27 = vector.extract_strided_slice %5 {offsets = [0, 24], sizes = [32, 8], strides = [1, 1]} : vector<32x32xbf16> to vector<32x8xbf16>
    %28 = vector.shape_cast %24 : vector<32x8xbf16> to vector<1x32x8xbf16>
    %29 = vector.shape_cast %25 : vector<32x8xbf16> to vector<1x32x8xbf16>
    %30 = vector.shape_cast %26 : vector<32x8xbf16> to vector<1x32x8xbf16>
    %31 = vector.shape_cast %27 : vector<32x8xbf16> to vector<1x32x8xbf16>
    %32 = tpu.concatenate %28, %29, %30, %31 in 0 : vector<1x32x8xbf16>, vector<1x32x8xbf16>, vector<1x32x8xbf16>, vector<1x32x8xbf16> -> vector<4x32x8xbf16>
    "tpu.trace_start"() <{level = 10 : i32, message = "hqd,hkd->hqk"}> : () -> ()
    %cst = arith.constant dense<0.000000e+00> : vector<4x32x32xf32>
    %33 = tpu.matmul %14, %23, %cst {dimension_numbers = #tpu.dot_dimension_numbers<[2], [2], [1], [1], [0, 0, 0, 1, 1, 1], [0], [0]>} : vector<4x32x8xbf16>, vector<4x32x8xbf16>, vector<4x32x32xf32> -> vector<4x32x32xf32>
    "tpu.trace_stop"() : () -> ()
    %cst_8 = arith.constant dense<0xFF800000> : vector<4x32xf32>
    %34 = vector.multi_reduction <maximumf>, %33, %cst_8 [2] : vector<4x32x32xf32> to vector<4x32xf32>
    %35 = vector.shape_cast %34 : vector<4x32xf32> to vector<4x32x1xf32>
    %36 = vector.broadcast %35 : vector<4x32x1xf32> to vector<4x32x32xf32>
    %37 = arith.subf %33, %36 : vector<4x32x32xf32>
    %38 = math.exp %37 : vector<4x32x32xf32>
    %cst_9 = arith.constant dense<0.000000e+00> : vector<4x32xf32>
    %39 = vector.multi_reduction <add>, %38, %cst_9 [2] : vector<4x32x32xf32> to vector<4x32xf32>
    %40 = vector.shape_cast %39 : vector<4x32xf32> to vector<4x32x1xf32>
    %41 = tpu.reciprocal %40 {approx = true} : vector<4x32x1xf32> -> vector<4x32x1xf32>
    %42 = vector.broadcast %41 : vector<4x32x1xf32> to vector<4x32x32xf32>
    %43 = arith.mulf %38, %42 : vector<4x32x32xf32>
    %44 = arith.truncf %43 : vector<4x32x32xf32> to vector<4x32x32xbf16>
    "tpu.trace_start"() <{level = 10 : i32, message = "hqk,hkd->hqd"}> : () -> ()
    %cst_10 = arith.constant dense<0.000000e+00> : vector<4x32x8xf32>
    %45 = tpu.matmul %44, %32, %cst_10 {dimension_numbers = #tpu.dot_dimension_numbers<[2], [1], [1], [2], [0, 0, 0, 1, 1, 2], [0], [0]>} : vector<4x32x32xbf16>, vector<4x32x8xbf16>, vector<4x32x8xf32> -> vector<4x32x8xf32>
    "tpu.trace_stop"() : () -> ()
    %46 = vector.extract_strided_slice %45 {offsets = [0, 0, 0], sizes = [1, 32, 8], strides = [1, 1, 1]} : vector<4x32x8xf32> to vector<1x32x8xf32>
    %47 = vector.shape_cast %46 : vector<1x32x8xf32> to vector<32x8xf32>
    %48 = vector.extract_strided_slice %45 {offsets = [1, 0, 0], sizes = [1, 32, 8], strides = [1, 1, 1]} : vector<4x32x8xf32> to vector<1x32x8xf32>
    %49 = vector.shape_cast %48 : vector<1x32x8xf32> to vector<32x8xf32>
    %50 = vector.extract_strided_slice %45 {offsets = [2, 0, 0], sizes = [1, 32, 8], strides = [1, 1, 1]} : vector<4x32x8xf32> to vector<1x32x8xf32>
    %51 = vector.shape_cast %50 : vector<1x32x8xf32> to vector<32x8xf32>
    %52 = vector.extract_strided_slice %45 {offsets = [3, 0, 0], sizes = [1, 32, 8], strides = [1, 1, 1]} : vector<4x32x8xf32> to vector<1x32x8xf32>
    %53 = vector.shape_cast %52 : vector<1x32x8xf32> to vector<32x8xf32>
    %54 = tpu.concatenate %47, %49, %51, %53 in 1 : vector<32x8xf32>, vector<32x8xf32>, vector<32x8xf32>, vector<32x8xf32> -> vector<32x32xf32>
    %55 = arith.truncf %54 : vector<32x32xf32> to vector<32x32xbf16>
    %c0_11 = arith.constant 0 : index
    %c0_12 = arith.constant 0 : index
    %56 = vector.load %arg7[%c0_11, %c0_12] : memref<32x32xbf16, #tpu.memory_space<vmem>>, vector<32x32xbf16>
    %cst_13 = arith.constant dense<0.000000e+00> : vector<32x32xf32>
    %57 = tpu.matmul %55, %56, %cst_13 {dimension_numbers = #tpu.dot_dimension_numbers<[1], [0], [0], [1], [0, 0, 1, 1], [], []>} : vector<32x32xbf16>, vector<32x32xbf16>, vector<32x32xf32> -> vector<32x32xf32>
    %c0_14 = arith.constant 0 : index
    %c0_15 = arith.constant 0 : index
    %58 = vector.load %arg8[%c0_14, %c0_15] : memref<1x32xf32, #tpu.memory_space<vmem>>, vector<1x32xf32>
    %59 = vector.broadcast %58 : vector<1x32xf32> to vector<32x32xf32>
    %60 = arith.addf %57, %59 : vector<32x32xf32>
    %c0_16 = arith.constant 0 : index
    %c0_17 = arith.constant 0 : index
    %c0_18 = arith.constant 0 : index
    %61 = vector.load %arg2[%c0_16, %c0_17, %c0_18] : memref<1x32x32xbf16, #tpu.memory_space<vmem>>, vector<1x32x32xbf16>
    %62 = vector.shape_cast %61 : vector<1x32x32xbf16> to vector<32x32xbf16>
    %63 = arith.extf %62 : vector<32x32xbf16> to vector<32x32xf32>
    %c0_19 = arith.constant 0 : index
    %c0_20 = arith.constant 0 : index
    %64 = vector.load %arg3[%c0_19, %c0_20] : memref<32x32xf32, #tpu.memory_space<vmem>>, vector<32x32xf32>
    %65 = arith.addf %63, %64 : vector<32x32xf32>
    %66 = arith.addf %65, %60 : vector<32x32xf32>
    %67 = arith.truncf %66 : vector<32x32xf32> to vector<32x32xbf16>
    %c0_21 = arith.constant 0 : index
    %c0_22 = arith.constant 0 : index
    %c0_23 = arith.constant 0 : index
    %68 = vector.load %arg9[%c0_21, %c0_22, %c0_23] : memref<1x32x32xbf16, #tpu.memory_space<vmem>>, vector<1x32x32xbf16>
    %69 = vector.shape_cast %68 : vector<1x32x32xbf16> to vector<32x32xbf16>
    %70 = vector.shape_cast %67 : vector<32x32xbf16> to vector<1x32x32xbf16>
    tpu.vector_store %arg9[%c0_21, %c0_22, %c0_23], %70 {strides = array<i32>} : memref<1x32x32xbf16, #tpu.memory_space<vmem>>, vector<1x32x32xbf16>,
    return
  }
  func.func @transform_0(%arg0: i32, %arg1: i32) -> (i32, i32, i32) {
    %c0_i32 = arith.constant 0 : i32
    %c0_i32_0 = arith.constant 0 : i32
    return %arg0, %arg1, %c0_i32 : i32, i32, i32
  }
  func.func @transform_1(%arg0: i32, %arg1: i32) -> (i32, i32) {
    %c0_i32 = arith.constant 0 : i32
    %c0_i32_0 = arith.constant 0 : i32
    return %arg1, %c0_i32 : i32, i32
  }
  func.func @transform_2(%arg0: i32, %arg1: i32) -> (i32, i32, i32) {
    %c0_i32 = arith.constant 0 : i32
    %c0_i32_0 = arith.constant 0 : i32
    return %arg0, %arg1, %c0_i32 : i32, i32, i32
  }
  func.func @transform_3(%arg0: i32, %arg1: i32) -> (i32, i32, i32) {
    %c0_i32 = arith.constant 0 : i32
    %c0_i32_0 = arith.constant 0 : i32
    %c0_i32_1 = arith.constant 0 : i32
    return %arg0, %c0_i32, %c0_i32_0 : i32, i32, i32
  }
  func.func @transform_4(%arg0: i32, %arg1: i32) -> (i32, i32, i32) {
    %c0_i32 = arith.constant 0 : i32
    %c0_i32_0 = arith.constant 0 : i32
    %c0_i32_1 = arith.constant 0 : i32
    return %arg0, %c0_i32, %c0_i32_0 : i32, i32, i32
  }
  func.func @transform_5(%arg0: i32, %arg1: i32) -> (i32, i32) {
    %c0_i32 = arith.constant 0 : i32
    %c0_i32_0 = arith.constant 0 : i32
    %c0_i32_1 = arith.constant 0 : i32
    return %c0_i32, %c0_i32_0 : i32, i32
  }
  func.func @transform_6(%arg0: i32, %arg1: i32) -> (i32, i32) {
    %c0_i32 = arith.constant 0 : i32
    %c0_i32_0 = arith.constant 0 : i32
    %c0_i32_1 = arith.constant 0 : i32
    return %c0_i32, %c0_i32_0 : i32, i32
  }
  func.func @transform_7(%arg0: i32, %arg1: i32) -> (i32, i32, i32) {
    %c0_i32 = arith.constant 0 : i32
    %c0_i32_0 = arith.constant 0 : i32
    return %arg0, %arg1, %c0_i32 : i32, i32, i32
  }
}

module attributes {stable_mosaic.version = 11 : i64} {
  func.func @_mlp_block_kernel(%arg0: i32, %arg1: memref<64x32xbf16, #tpu.memory_space<vmem>>, %arg2: memref<1x32xf32, #tpu.memory_space<vmem>>, %arg3: memref<1x32xf32, #tpu.memory_space<vmem>>, %arg4: memref<32x128xbf16, #tpu.memory_space<vmem>>, %arg5: memref<1x128xf32, #tpu.memory_space<vmem>>, %arg6: memref<128x32xbf16, #tpu.memory_space<vmem>>, %arg7: memref<1x32xf32, #tpu.memory_space<vmem>>, %arg8: memref<64x32xbf16, #tpu.memory_space<vmem>>) attributes {dimension_semantics = [#tpu.dimension_semantics<parallel>], iteration_bounds = array<i64: 1>, scalar_prefetch = 0 : i64, scratch_operands = 0 : i64, tpu.core_type = #tpu.core_type<tc>, window_params = [{transform_indices = @transform_0, window_bounds = array<i64: 64, 32>}, {pipeline_mode = #tpu.pipeline_mode<synchronous>, transform_indices = @transform_1, window_bounds = array<i64: 1, 32>}, {pipeline_mode = #tpu.pipeline_mode<synchronous>, transform_indices = @transform_2, window_bounds = array<i64: 1, 32>}, {pipeline_mode = #tpu.pipeline_mode<synchronous>, transform_indices = @transform_3, window_bounds = array<i64: 32, 128>}, {pipeline_mode = #tpu.pipeline_mode<synchronous>, transform_indices = @transform_4, window_bounds = array<i64: 1, 128>}, {pipeline_mode = #tpu.pipeline_mode<synchronous>, transform_indices = @transform_5, window_bounds = array<i64: 128, 32>}, {pipeline_mode = #tpu.pipeline_mode<synchronous>, transform_indices = @transform_6, window_bounds = array<i64: 1, 32>}, {transform_indices = @transform_7, window_bounds = array<i64: 64, 32>}]} {
    %c0 = arith.constant 0 : index
    %c0_0 = arith.constant 0 : index
    %0 = vector.load %arg1[%c0, %c0_0] : memref<64x32xbf16, #tpu.memory_space<vmem>>, vector<64x32xbf16>
    %1 = arith.extf %0 : vector<64x32xbf16> to vector<64x32xf32>
    %cst = arith.constant dense<0.000000e+00> : vector<64xf32>
    %2 = vector.multi_reduction <add>, %1, %cst [1] : vector<64x32xf32> to vector<64xf32>
    %3 = vector.shape_cast %2 : vector<64xf32> to vector<64x1xf32>
    %cst_1 = arith.constant 3.200000e+01 : f32
    %4 = vector.broadcast %cst_1 : f32 to vector<64x1xf32>
    %5 = arith.divf %3, %4 : vector<64x1xf32>
    %6 = vector.broadcast %5 : vector<64x1xf32> to vector<64x32xf32>
    %7 = arith.subf %1, %6 : vector<64x32xf32>
    %8 = arith.mulf %7, %7 : vector<64x32xf32>
    %cst_2 = arith.constant dense<0.000000e+00> : vector<64xf32>
    %9 = vector.multi_reduction <add>, %8, %cst_2 [1] : vector<64x32xf32> to vector<64xf32>
    %10 = vector.shape_cast %9 : vector<64xf32> to vector<64x1xf32>
    %cst_3 = arith.constant 3.200000e+01 : f32
    %11 = vector.broadcast %cst_3 : f32 to vector<64x1xf32>
    %12 = arith.divf %10, %11 : vector<64x1xf32>
    %cst_4 = arith.constant 9.99999974E-6 : f32
    %13 = vector.broadcast %cst_4 : f32 to vector<64x1xf32>
    %14 = arith.addf %12, %13 : vector<64x1xf32>
    %15 = math.rsqrt %14 : vector<64x1xf32>
    %16 = vector.broadcast %15 : vector<64x1xf32> to vector<64x32xf32>
    %17 = arith.mulf %7, %16 : vector<64x32xf32>
    %c0_5 = arith.constant 0 : index
    %c0_6 = arith.constant 0 : index
    %18 = vector.load %arg2[%c0_5, %c0_6] : memref<1x32xf32, #tpu.memory_space<vmem>>, vector<1x32xf32>
    %19 = vector.broadcast %18 : vector<1x32xf32> to vector<64x32xf32>
    %20 = arith.mulf %17, %19 : vector<64x32xf32>
    %c0_7 = arith.constant 0 : index
    %c0_8 = arith.constant 0 : index
    %21 = vector.load %arg3[%c0_7, %c0_8] : memref<1x32xf32, #tpu.memory_space<vmem>>, vector<1x32xf32>
    %22 = vector.broadcast %21 : vector<1x32xf32> to vector<64x32xf32>
    %23 = arith.addf %20, %22 : vector<64x32xf32>
    %24 = arith.truncf %23 : vector<64x32xf32> to vector<64x32xbf16>
    %c0_9 = arith.constant 0 : index
    %c0_10 = arith.constant 0 : index
    %25 = vector.load %arg4[%c0_9, %c0_10] : memref<32x128xbf16, #tpu.memory_space<vmem>>, vector<32x128xbf16>
    %cst_11 = arith.constant dense<0.000000e+00> : vector<64x128xf32>
    %26 = tpu.matmul %24, %25, %cst_11 {dimension_numbers = #tpu.dot_dimension_numbers<[1], [0], [0], [1], [0, 0, 1, 1], [], []>} : vector<64x32xbf16>, vector<32x128xbf16>, vector<64x128xf32> -> vector<64x128xf32>
    %c0_12 = arith.constant 0 : index
    %c0_13 = arith.constant 0 : index
    %27 = vector.load %arg5[%c0_12, %c0_13] : memref<1x128xf32, #tpu.memory_space<vmem>>, vector<1x128xf32>
    %28 = vector.broadcast %27 : vector<1x128xf32> to vector<64x128xf32>
    %29 = arith.addf %26, %28 : vector<64x128xf32>
    %30 = arith.mulf %29, %29 : vector<64x128xf32>
    %31 = arith.mulf %29, %30 : vector<64x128xf32>
    %cst_14 = arith.constant 4.471500e-02 : f32
    %32 = vector.broadcast %cst_14 : f32 to vector<64x128xf32>
    %33 = arith.mulf %32, %31 : vector<64x128xf32>
    %34 = arith.addf %29, %33 : vector<64x128xf32>
    %cst_15 = arith.constant 0.797884583 : f32
    %35 = vector.broadcast %cst_15 : f32 to vector<64x128xf32>
    %36 = arith.mulf %35, %34 : vector<64x128xf32>
    %37 = math.tanh %36 : vector<64x128xf32>
    %cst_16 = arith.constant 1.000000e+00 : f32
    %38 = vector.broadcast %cst_16 : f32 to vector<64x128xf32>
    %39 = arith.addf %38, %37 : vector<64x128xf32>
    %cst_17 = arith.constant 5.000000e-01 : f32
    %40 = vector.broadcast %cst_17 : f32 to vector<64x128xf32>
    %41 = arith.mulf %40, %39 : vector<64x128xf32>
    %42 = arith.mulf %29, %41 : vector<64x128xf32>
    %43 = arith.truncf %42 : vector<64x128xf32> to vector<64x128xbf16>
    %c0_18 = arith.constant 0 : index
    %c0_19 = arith.constant 0 : index
    %44 = vector.load %arg6[%c0_18, %c0_19] : memref<128x32xbf16, #tpu.memory_space<vmem>>, vector<128x32xbf16>
    %cst_20 = arith.constant dense<0.000000e+00> : vector<64x32xf32>
    %45 = tpu.matmul %43, %44, %cst_20 {dimension_numbers = #tpu.dot_dimension_numbers<[1], [0], [0], [1], [0, 0, 1, 1], [], []>} : vector<64x128xbf16>, vector<128x32xbf16>, vector<64x32xf32> -> vector<64x32xf32>
    %c0_21 = arith.constant 0 : index
    %c0_22 = arith.constant 0 : index
    %46 = vector.load %arg7[%c0_21, %c0_22] : memref<1x32xf32, #tpu.memory_space<vmem>>, vector<1x32xf32>
    %47 = vector.broadcast %46 : vector<1x32xf32> to vector<64x32xf32>
    %48 = arith.addf %45, %47 : vector<64x32xf32>
    %49 = arith.addf %1, %48 : vector<64x32xf32>
    %50 = arith.truncf %49 : vector<64x32xf32> to vector<64x32xbf16>
    %c0_23 = arith.constant 0 : index
    %c0_24 = arith.constant 0 : index
    %51 = vector.load %arg8[%c0_23, %c0_24] : memref<64x32xbf16, #tpu.memory_space<vmem>>, vector<64x32xbf16>
    tpu.vector_store %arg8[%c0_23, %c0_24], %50 {strides = array<i32>} : memref<64x32xbf16, #tpu.memory_space<vmem>>, vector<64x32xbf16>,
    return
  }
  func.func @transform_0(%arg0: i32) -> (i32, i32) {
    %c0_i32 = arith.constant 0 : i32
    %c0_i32_0 = arith.constant 0 : i32
    return %arg0, %c0_i32 : i32, i32
  }
  func.func @transform_1(%arg0: i32) -> (i32, i32) {
    %c0_i32 = arith.constant 0 : i32
    %c0_i32_0 = arith.constant 0 : i32
    %c0_i32_1 = arith.constant 0 : i32
    return %c0_i32, %c0_i32_0 : i32, i32
  }
  func.func @transform_2(%arg0: i32) -> (i32, i32) {
    %c0_i32 = arith.constant 0 : i32
    %c0_i32_0 = arith.constant 0 : i32
    %c0_i32_1 = arith.constant 0 : i32
    return %c0_i32, %c0_i32_0 : i32, i32
  }
  func.func @transform_3(%arg0: i32) -> (i32, i32) {
    %c0_i32 = arith.constant 0 : i32
    %c0_i32_0 = arith.constant 0 : i32
    %c0_i32_1 = arith.constant 0 : i32
    return %c0_i32, %c0_i32_0 : i32, i32
  }
  func.func @transform_4(%arg0: i32) -> (i32, i32) {
    %c0_i32 = arith.constant 0 : i32
    %c0_i32_0 = arith.constant 0 : i32
    %c0_i32_1 = arith.constant 0 : i32
    return %c0_i32, %c0_i32_0 : i32, i32
  }
  func.func @transform_5(%arg0: i32) -> (i32, i32) {
    %c0_i32 = arith.constant 0 : i32
    %c0_i32_0 = arith.constant 0 : i32
    %c0_i32_1 = arith.constant 0 : i32
    return %c0_i32, %c0_i32_0 : i32, i32
  }
  func.func @transform_6(%arg0: i32) -> (i32, i32) {
    %c0_i32 = arith.constant 0 : i32
    %c0_i32_0 = arith.constant 0 : i32
    %c0_i32_1 = arith.constant 0 : i32
    return %c0_i32, %c0_i32_0 : i32, i32
  }
  func.func @transform_7(%arg0: i32) -> (i32, i32) {
    %c0_i32 = arith.constant 0 : i32
    %c0_i32_0 = arith.constant 0 : i32
    return %arg0, %c0_i32 : i32, i32
  }
}

</mosaic_0001>

<bundles_post_ra>
// kernel: tpu_custom_call.1
= control target key start
LH: loop header
LB: loop body
LE: loop exit
PB: predicated region body
PF: predicated region fallthrough
CT: control target
= control target key end

     0   :  { %6 = vsyncpa [#allocation3], 0  ;;  %s103_s0 = inlined_call_operand.hbm [shape: f32[8,128], index: 0, kind: input, shape index: {}]   ;;  %s104_s1 = inlined_call_operand.hbm [shape: f32[8,128], index: 1, kind: output, shape index: {}]  }
   0x1   :  { %7 = vsyncpa [#allocation4], 0  ;;  %s85_s6 = smov [#allocation2]  }
   0x2   :  { %s14_s7 = sshll.u32 %s85_s6, 4  ;;  %s15_s7 = int_to_ptr.vmem [resolvable:$true] %s14_s7 }
   0x3   :  { %s49_s8 = scalar_lea.vmem %s15_s7, 128  ;;  %p54_p1 = scmp.lt.s32.totalorder %s15_s7, %s15_s7 }
   0x4   :  { %p50_p0 = scmp.ne.s32.totalorder %s15_s7, %s49_s8  ;;  %p55_p2 = scmp.lt.s32.totalorder %s49_s8, %s49_s8 }
   0x6   :  { %p56_p3 = por %p55_p2, %p54_p1 }
   0x8   :  { %p57_p4 = pnand %p56_p3, %p50_p0 }
   0xa   :  { %60 = shalt.err (!%p57_p4)
}
   0xb   :  { %17 = dma.hbm_to_vmem [thread:$0]  %s103_s0, 128, %s15_s7, [#allocation3]  }
   0xc   :  { %81 = dma.done.wait [#allocation3], 128  }
   0xd   :  { %82 = vsyncadd [#allocation3], 4294967168  ;;  %s86_s11 = smov [#allocation5]   ;;  %v21_v0 = vld [vmem:[#allocation2] sm:$0xff] }
   0xe   :  { %s30_s12 = sshll.u32 %s86_s11, 4  ;;  %v22_v1 = vadd.f32 1.0, %v21_v0  ;;  %s31_s12 = int_to_ptr.vmem [resolvable:$true] %s30_s12 }
   0xf   :  { %s61_s13 = scalar_lea.vmem %s31_s12, 128  ;;  %p66_p6 = scmp.lt.s32.totalorder %s31_s12, %s31_s12 }
  0x10   :  { %23 = vst [vmem:[#allocation5] sm:$0xff] %v22_v1  ;;  %p62_p5 = scmp.ne.s32.totalorder %s31_s12, %s61_s13  ;;  %p67_p7 = scmp.lt.s32.totalorder %s61_s13, %s61_s13 }
  0x12   :  { %p68_p8 = por %p67_p7, %p66_p6 }
  0x14   :  { %p69_p9 = pnand %p68_p8, %p62_p5 }
  0x16   :  { %72 = shalt.err (!%p69_p9)
}
  0x17   :  { %33 = dma.vmem_to_hbm [thread:$0]  %s31_s12, 128, %s104_s1, [#allocation4]  }
  0x18   :  { %83 = dma.done.wait [#allocation4], 128  }
  0x19   :  { %84 = vsyncadd [#allocation4], 4294967168 }
  0x1a   :  { %37 = vsyncpa [#allocation3], 1 }
  0x1b   :  { %38 = vsyncpa [#allocation4], 1 }

// kernel: _lambda_.10
= control target key start
LH: loop header
LB: loop body
LE: loop exit
PB: predicated region body
PF: predicated region fallthrough
CT: control target
= control target key end

     0   :  { %s469_s1 = inlined_call_operand.vmem [shape: bf16[128,128], index: 1, kind: input, shape index: {}]   ;;  %s470_s0 = inlined_call_operand.vmem [shape: bf16[64,128], index: 0, kind: input, shape index: {}]   ;;  %s471_s2 = inlined_call_operand.vmem [shape: f32[1,128], index: 2, kind: input, shape index: {}]   ;;  %s472_s3 = inlined_call_operand.vmem [shape: bf16[64,128], index: 3, kind: output, shape index: {}]  }
   0x1   :  { %v386_v0 = vld [vmem:[%s469_s1 + $0x38] sm:$0xff]   ;;  %v387_v1 = vld [vmem:[%s469_s1 + $0x30] sm:$0xff]   ;;  %v388_v2 = vld [vmem:[%s469_s1 + $0x28] sm:$0xff]  }
   0x2   :  { %346 = vmatprep.subr.bf16.mxu0 %v386_v0  ;;  %370 = vmatprep.subr.bf16.mxu1 %v386_v0  ;;  %v389_v3 = vld [vmem:[%s469_s1 + $0x20] sm:$0xff]   ;;  %v395_v5 = vld [vmem:[%s470_s0 + $0x10] sm:$0xff]   ;;  %v390_v6 = vld [vmem:[%s469_s1 + $0x18] sm:$0xff]  }
   0x3   :  { %347 = vmatpush3.bf16.msra.mxu0 %v386_v0  ;;  %378 = vmatpush3.bf16.msra.mxu1 %v386_v0  ;;  %v394_v4 = vld [vmem:[%s470_s0] sm:$0xff]   ;;  %v391_v7 = vld [vmem:[%s469_s1 + $0x10] sm:$0xff]   ;;  %v392_v8 = vld [vmem:[%s469_s1 + $0x8] sm:$0xff]  }
   0x4   :  { %348 = vmatprep.subr.bf16.mxu0 %v387_v1  ;;  %371 = vmatprep.subr.bf16.mxu1 %v387_v1  ;;  %v393_v9 = vld [vmem:[%s469_s1] sm:$0xff]   ;;  %v396_v10 = vld [vmem:[%s470_s0 + $0x8] sm:$0xff]   ;;  %v397_v11 = vld [vmem:[%s470_s0 + $0x18] sm:$0xff]  }
   0x5   :  { %362 = vmatprep.mubr.bf16.mxu0 %v394_v4  ;;  %366 = vmatprep.mubr.bf16.mxu1 %v395_v5  ;;  %v294_v14 = vld [vmem:[%s471_s2] ss:$0 sm:$0xff] }
   0x7   :  { %349 = vmatpush3.bf16.msra.mxu0 %v387_v1  ;;  %379 = vmatpush3.bf16.msra.mxu1 %v387_v1 }
   0x8   :  { %350 = vmatprep.subr.bf16.mxu0 %v388_v2  ;;  %372 = vmatprep.subr.bf16.mxu1 %v388_v2 }
   0xb   :  { %351 = vmatpush3.bf16.msra.mxu0 %v388_v2  ;;  %380 = vmatpush3.bf16.msra.mxu1 %v388_v2 }
   0xc   :  { %352 = vmatprep.subr.bf16.mxu0 %v389_v3  ;;  %373 = vmatprep.subr.bf16.mxu1 %v389_v3 }
   0xf   :  { %353 = vmatpush3.bf16.msra.mxu0 %v389_v3  ;;  %381 = vmatpush3.bf16.msra.mxu1 %v389_v3 }
  0x10   :  { %354 = vmatprep.subr.bf16.mxu0 %v390_v6  ;;  %374 = vmatprep.subr.bf16.mxu1 %v390_v6 }
  0x13   :  { %355 = vmatpush3.bf16.msra.mxu0 %v390_v6  ;;  %382 = vmatpush3.bf16.msra.mxu1 %v390_v6 }
  0x14   :  { %356 = vmatprep.subr.bf16.mxu0 %v391_v7  ;;  %375 = vmatprep.subr.bf16.mxu1 %v391_v7 }
  0x17   :  { %357 = vmatpush3.bf16.msra.mxu0 %v391_v7  ;;  %383 = vmatpush3.bf16.msra.mxu1 %v391_v7 }
  0x18   :  { %358 = vmatprep.subr.bf16.mxu0 %v392_v8  ;;  %376 = vmatprep.subr.bf16.mxu1 %v392_v8 }
  0x1b   :  { %359 = vmatpush3.bf16.msra.mxu0 %v392_v8  ;;  %384 = vmatpush3.bf16.msra.mxu1 %v392_v8 }
  0x1c   :  { %360 = vmatprep.subr.bf16.mxu0 %v393_v9  ;;  %377 = vmatprep.subr.bf16.mxu1 %v393_v9 }
  0x1f   :  { %361 = vmatpush3.bf16.msra.mxu0 %v393_v9  ;;  %385 = vmatpush3.bf16.msra.mxu1 %v393_v9 }
  0x22   :  { %363 = vmatmul.mubr.bf16.vlgmr.msra.gmra.mxu0 %v396_v10  ;;  %367 = vmatmul.mubr.bf16.vlgmr.msra.gmra.mxu1 %v397_v11 }
  0xe2   :  { %v364_v12 = vpop.f32.mrf.mxu0  ;;  %v368_v13 = vpop.f32.mrf.mxu1 }
  0xe3   :  { %v232_v19 = vadd.f32 %v364_v12, %v294_v14  ;;  %v236_v20 = vadd.f32 %v368_v13, %v294_v14 }
  0xe4   :  { %v165_v15 = vpop.f32.mrf.mxu0  ;;  %v181_v16 = vpop.f32.mrf.mxu1 }
  0xe5   :  { %v230_v23 = vadd.f32 %v294_v14, %v165_v15  ;;  %v234_v24 = vadd.f32 %v294_v14, %v181_v16 }
  0xe6   :  { %v365_v17 = vpop.f32.mrf.mxu0  ;;  %v369_v18 = vpop.f32.mrf.mxu1 }
  0xe7   :  { %v233_v21 = vadd.f32 %v365_v17, %v294_v14  ;;  %v237_v22 = vadd.f32 %v369_v18, %v294_v14 }
  0xe8   :  { %v168_v25 = vpop.f32.mrf.mxu0  ;;  %v184_v26 = vpop.f32.mrf.mxu1 }
  0xe9   :  { %v319_v27 = vpack.c.bf16 %v233_v21, %v232_v19  ;;  %v329_v28 = vpack.c.bf16 %v237_v22, %v236_v20  ;;  %v231_v29 = vadd.f32 %v294_v14, %v168_v25  ;;  %v235_v30 = vadd.f32 %v294_v14, %v184_v26 }
  0xeb   :  { %331 = vst [vmem:[%s472_s3 + $0x8] sm:$0xff] %v319_v27   ;;  %333 = vst [vmem:[%s472_s3 + $0x18] sm:$0xff] %v329_v28   ;;  %v314_v31 = vpack.c.bf16 %v231_v29, %v230_v23  ;;  %v324_v32 = vpack.c.bf16 %v235_v30, %v234_v24 }
  0xed   :  { %315 = vst [vmem:[%s472_s3] sm:$0xff] %v314_v31   ;;  %332 = vst [vmem:[%s472_s3 + $0x10] sm:$0xff] %v324_v32  }

// kernel: _lambda_.9
= control target key start
LH: loop header
LB: loop body
LE: loop exit
PB: predicated region body
PF: predicated region fallthrough
CT: control target
= control target key end

     0   :  { %s923_s1 = inlined_call_operand.vmem [shape: bf16[256,128], index: 1, kind: input, shape index: {}]   ;;  %s924_s0 = inlined_call_operand.vmem [shape: bf16[128,256], index: 0, kind: input, shape index: {}]   ;;  %s925_s2 = inlined_call_operand.vmem [shape: f32[1,128], index: 2, kind: input, shape index: {}]   ;;  %s926_s3 = inlined_call_operand.vmem [shape: bf16[128,128], index: 3, kind: output, shape index: {}]  }
   0x1   :  { %v722_v0 = vld [vmem:[%s923_s1 + $0x78] sm:$0xff]   ;;  %v724_v2 = vld [vmem:[%s923_s1 + $0x70] sm:$0xff]   ;;  %v726_v4 = vld [vmem:[%s923_s1 + $0x68] sm:$0xff]  }
   0x2   :  { %v723_v1 = vld [vmem:[%s923_s1 + $0x38] sm:$0xff]   ;;  %642 = vmatprep.subr.bf16.mxu0 %v722_v0  ;;  %706 = vmatprep.subr.bf16.mxu1 %v722_v0  ;;  %v725_v3 = vld [vmem:[%s923_s1 + $0x30] sm:$0xff]   ;;  %v727_v5 = vld [vmem:[%s923_s1 + $0x28] sm:$0xff]  }
   0x3   :  { %643 = vmatpush3.bf16.msra.mxu0 %v723_v1  ;;  %714 = vmatpush3.bf16.msra.mxu1 %v723_v1  ;;  %v728_v6 = vld [vmem:[%s923_s1 + $0x60] sm:$0xff]   ;;  %v730_v8 = vld [vmem:[%s923_s1 + $0x58] sm:$0xff]   ;;  %v732_v10 = vld [vmem:[%s923_s1 + $0x50] sm:$0xff]  }
   0x4   :  { %644 = vmatprep.subr.bf16.mxu0 %v724_v2  ;;  %707 = vmatprep.subr.bf16.mxu1 %v724_v2  ;;  %v729_v7 = vld [vmem:[%s923_s1 + $0x20] sm:$0xff]   ;;  %v731_v9 = vld [vmem:[%s923_s1 + $0x18] sm:$0xff]   ;;  %v733_v13 = vld [vmem:[%s923_s1 + $0x10] sm:$0xff]  }
   0x5   :  { %v740_v11 = vld [vmem:[%s924_s0 + $0x4] ss:$8 sps:$4 sm:$0xff]   ;;  %v738_v18 = vld [vmem:[%s924_s0] ss:$8 sps:$4 sm:$0xff]   ;;  %v744_v20 = vld [vmem:[%s924_s0 + $0x14] ss:$8 sps:$4 sm:$0xff]  }
   0x6   :  { %v743_v12 = vld [vmem:[%s924_s0 + $0x44] ss:$8 sps:$4 sm:$0xff]   ;;  %307 = vmatprep.mubr.bf16.mxu0 %v740_v11  ;;  %v741_v19 = vld [vmem:[%s924_s0 + $0x40] ss:$8 sps:$4 sm:$0xff]   ;;  %v746_v21 = vld [vmem:[%s924_s0 + $0x54] ss:$8 sps:$4 sm:$0xff]  }
   0x7   :  { %645 = vmatpush3.bf16.msra.mxu0 %v725_v3  ;;  %715 = vmatpush3.bf16.msra.mxu1 %v725_v3  ;;  %v734_v14 = vld [vmem:[%s923_s1 + $0x48] sm:$0xff]   ;;  %v736_v16 = vld [vmem:[%s923_s1 + $0x40] sm:$0xff]   ;;  %v748_v22 = vld [vmem:[%s924_s0 + $0x10] ss:$8 sps:$4 sm:$0xff]  }
   0x8   :  { %646 = vmatprep.subr.bf16.mxu0 %v726_v4  ;;  %708 = vmatprep.subr.bf16.mxu1 %v726_v4  ;;  %v735_v15 = vld [vmem:[%s923_s1 + $0x8] sm:$0xff]   ;;  %v737_v17 = vld [vmem:[%s923_s1] sm:$0xff]   ;;  %v749_v23 = vld [vmem:[%s924_s0 + $0x50] ss:$8 sps:$4 sm:$0xff]  }
   0x9   :  { %339 = vmatprep.mubr.bf16.mxu1 %v743_v12  ;;  %v750_v24 = vld [vmem:[%s924_s0 + $0x24] ss:$8 sps:$4 sm:$0xff]   ;;  %v754_v26 = vld [vmem:[%s924_s0 + $0x20] ss:$8 sps:$4 sm:$0xff]   ;;  %v756_v28 = vld [vmem:[%s924_s0 + $0x34] ss:$8 sps:$4 sm:$0xff]  }
   0xa   :  { %v752_v25 = vld [vmem:[%s924_s0 + $0x64] ss:$8 sps:$4 sm:$0xff]   ;;  %v755_v27 = vld [vmem:[%s924_s0 + $0x60] ss:$8 sps:$4 sm:$0xff]   ;;  %v758_v29 = vld [vmem:[%s924_s0 + $0x74] ss:$8 sps:$4 sm:$0xff]  }
   0xb   :  { %647 = vmatpush3.bf16.msra.mxu0 %v727_v5  ;;  %716 = vmatpush3.bf16.msra.mxu1 %v727_v5  ;;  %v760_v30 = vld [vmem:[%s924_s0 + $0x30] ss:$8 sps:$4 sm:$0xff]   ;;  %v881_v40 = vld [vmem:[%s925_s2] ss:$0 sm:$0xff] }
   0xc   :  { %648 = vmatprep.subr.bf16.mxu0 %v728_v6  ;;  %709 = vmatprep.subr.bf16.mxu1 %v728_v6  ;;  %v761_v31 = vld [vmem:[%s924_s0 + $0x70] ss:$8 sps:$4 sm:$0xff]  }
   0xf   :  { %649 = vmatpush3.bf16.msra.mxu0 %v729_v7  ;;  %717 = vmatpush3.bf16.msra.mxu1 %v729_v7 }
  0x10   :  { %650 = vmatprep.subr.bf16.mxu0 %v730_v8  ;;  %710 = vmatprep.subr.bf16.mxu1 %v730_v8 }
  0x13   :  { %651 = vmatpush3.bf16.msra.mxu0 %v731_v9  ;;  %718 = vmatpush3.bf16.msra.mxu1 %v731_v9 }
  0x14   :  { %652 = vmatprep.subr.bf16.mxu0 %v732_v10  ;;  %711 = vmatprep.subr.bf16.mxu1 %v732_v10 }
  0x17   :  { %653 = vmatpush3.bf16.msra.mxu0 %v733_v13  ;;  %719 = vmatpush3.bf16.msra.mxu1 %v733_v13 }
  0x18   :  { %654 = vmatprep.subr.bf16.mxu0 %v734_v14  ;;  %712 = vmatprep.subr.bf16.mxu1 %v734_v14 }
  0x1b   :  { %655 = vmatpush3.bf16.msra.mxu0 %v735_v15  ;;  %720 = vmatpush3.bf16.msra.mxu1 %v735_v15 }
  0x1c   :  { %656 = vmatprep.subr.bf16.mxu0 %v736_v16  ;;  %713 = vmatprep.subr.bf16.mxu1 %v736_v16 }
  0x1f   :  { %657 = vmatpush3.bf16.msra.mxu0 %v737_v17  ;;  %721 = vmatpush3.bf16.msra.mxu1 %v737_v17 }
  0x22   :  { %308 = vmatmul.mubr.bf16.vlgmr.msra.gmra.mxu0 %v738_v18  ;;  %340 = vmatmul.mubr.bf16.vlgmr.msra.gmra.mxu1 %v741_v19 }
  0x23   :  { %315 = vmatprep.mubr.bf16.mxu0 %v744_v20  ;;  %347 = vmatprep.mubr.bf16.mxu1 %v746_v21 }
  0x2a   :  { %316 = vmatmul.mubr.bf16.gmra.mxu0 %v748_v22  ;;  %348 = vmatmul.mubr.bf16.gmra.mxu1 %v749_v23 }
  0x2b   :  { %323 = vmatprep.mubr.bf16.mxu0 %v750_v24  ;;  %355 = vmatprep.mubr.bf16.mxu1 %v752_v25 }
  0x32   :  { %324 = vmatmul.mubr.bf16.gmra.mxu0 %v754_v26  ;;  %356 = vmatmul.mubr.bf16.gmra.mxu1 %v755_v27 }
  0x33   :  { %331 = vmatprep.mubr.bf16.mxu0 %v756_v28  ;;  %363 = vmatprep.mubr.bf16.mxu1 %v758_v29 }
  0x3a   :  { %332 = vmatmul.mubr.bf16.gmra.mxu0 %v760_v30  ;;  %364 = vmatmul.mubr.bf16.gmra.mxu1 %v761_v31 }
  0xe2   :  { %v658_v32 = vpop.f32.mrf.mxu0  ;;  %v682_v33 = vpop.f32.mrf.mxu1 }
  0xe4   :  { %v659_v34 = vpop.f32.mrf.mxu0  ;;  %v683_v35 = vpop.f32.mrf.mxu1 }
  0xe5   :  { %v660_v38 = vadd.f32 %v659_v34, %v658_v32  ;;  %v684_v39 = vadd.f32 %v683_v35, %v682_v33 }
  0xe6   :  { %v661_v36 = vpop.f32.mrf.mxu0  ;;  %v685_v37 = vpop.f32.mrf.mxu1 }
  0xe7   :  { %v430_v47 = vadd.f32 %v660_v38, %v881_v40  ;;  %v438_v48 = vadd.f32 %v684_v39, %v881_v40 }
  0xe8   :  { %v662_v41 = vpop.f32.mrf.mxu0  ;;  %v686_v42 = vpop.f32.mrf.mxu1 }
  0xe9   :  { %v663_v43 = vadd.f32 %v662_v41, %v661_v36  ;;  %v687_v44 = vadd.f32 %v686_v42, %v685_v37 }
  0xea   :  { %v664_v45 = vpop.f32.mrf.mxu0  ;;  %v688_v46 = vpop.f32.mrf.mxu1 }
  0xeb   :  { %v431_v49 = vadd.f32 %v663_v43, %v881_v40  ;;  %v439_v50 = vadd.f32 %v687_v44, %v881_v40 }
  0xec   :  { %v665_v51 = vpop.f32.mrf.mxu0  ;;  %v689_v52 = vpop.f32.mrf.mxu1 }
  0xed   :  { %v598_v53 = vpack.c.bf16 %v431_v49, %v430_v47  ;;  %v618_v54 = vpack.c.bf16 %v439_v50, %v438_v48  ;;  %v666_v57 = vadd.f32 %v665_v51, %v664_v45  ;;  %v690_v58 = vadd.f32 %v689_v52, %v688_v46 }
  0xee   :  { %v667_v55 = vpop.f32.mrf.mxu0  ;;  %v691_v56 = vpop.f32.mrf.mxu1 }
  0xef   :  { %599 = vst [vmem:[%s926_s3] sm:$0xff] %v598_v53   ;;  %638 = vst [vmem:[%s926_s3 + $0x20] sm:$0xff] %v618_v54   ;;  %v432_v1 = vadd.f32 %v666_v57, %v881_v40  ;;  %v440_v2 = vadd.f32 %v690_v58, %v881_v40 }
  0xf0   :  { %v668_v59 = vpop.f32.mrf.mxu0  ;;  %v692_v60 = vpop.f32.mrf.mxu1 }
  0xf1   :  { %v669_v61 = vadd.f32 %v668_v59, %v667_v55  ;;  %v693_v62 = vadd.f32 %v692_v60, %v691_v56 }
  0xf2   :  { %v670_v63 = vpop.f32.mrf.mxu0  ;;  %v694_v0 = vpop.f32.mrf.mxu1 }
  0xf3   :  { %v433_v3 = vadd.f32 %v669_v61, %v881_v40  ;;  %v441_v4 = vadd.f32 %v693_v62, %v881_v40 }
  0xf4   :  { %v671_v5 = vpop.f32.mrf.mxu0  ;;  %v695_v6 = vpop.f32.mrf.mxu1 }
  0xf5   :  { %v603_v7 = vpack.c.bf16 %v433_v3, %v432_v1  ;;  %v623_v8 = vpack.c.bf16 %v441_v4, %v440_v2  ;;  %v672_v11 = vadd.f32 %v671_v5, %v670_v63  ;;  %v696_v12 = vadd.f32 %v695_v6, %v694_v0 }
  0xf6   :  { %v673_v9 = vpop.f32.mrf.mxu0  ;;  %v697_v10 = vpop.f32.mrf.mxu1 }
  0xf7   :  { %635 = vst [vmem:[%s926_s3 + $0x8] sm:$0xff] %v603_v7   ;;  %639 = vst [vmem:[%s926_s3 + $0x28] sm:$0xff] %v623_v8   ;;  %v434_v19 = vadd.f32 %v672_v11, %v881_v40  ;;  %v442_v20 = vadd.f32 %v696_v12, %v881_v40 }
  0xf8   :  { %v674_v13 = vpop.f32.mrf.mxu0  ;;  %v698_v14 = vpop.f32.mrf.mxu1 }
  0xf9   :  { %v675_v15 = vadd.f32 %v674_v13, %v673_v9  ;;  %v699_v16 = vadd.f32 %v698_v14, %v697_v10 }
  0xfa   :  { %v676_v17 = vpop.f32.mrf.mxu0  ;;  %v700_v18 = vpop.f32.mrf.mxu1 }
  0xfb   :  { %v435_v21 = vadd.f32 %v675_v15, %v881_v40  ;;  %v443_v22 = vadd.f32 %v699_v16, %v881_v40 }
  0xfc   :  { %v677_v23 = vpop.f32.mrf.mxu0  ;;  %v701_v24 = vpop.f32.mrf.mxu1 }
  0xfd   :  { %v608_v25 = vpack.c.bf16 %v435_v21, %v434_v19  ;;  %v628_v26 = vpack.c.bf16 %v443_v22, %v442_v20  ;;  %v678_v29 = vadd.f32 %v677_v23, %v676_v17  ;;  %v702_v30 = vadd.f32 %v701_v24, %v700_v18 }
  0xfe   :  { %v679_v27 = vpop.f32.mrf.mxu0  ;;  %v703_v28 = vpop.f32.mrf.mxu1 }
  0xff   :  { %636 = vst [vmem:[%s926_s3 + $0x10] sm:$0xff] %v608_v25   ;;  %640 = vst [vmem:[%s926_s3 + $0x30] sm:$0xff] %v628_v26   ;;  %v436_v35 = vadd.f32 %v678_v29, %v881_v40  ;;  %v444_v36 = vadd.f32 %v702_v30, %v881_v40 }
 0x100   :  { %v680_v31 = vpop.f32.mrf.mxu0  ;;  %v704_v32 = vpop.f32.mrf.mxu1 }
 0x101   :  { %v681_v33 = vadd.f32 %v680_v31, %v679_v27  ;;  %v705_v34 = vadd.f32 %v704_v32, %v703_v28 }
 0x103   :  { %v437_v37 = vadd.f32 %v681_v33, %v881_v40  ;;  %v445_v38 = vadd.f32 %v705_v34, %v881_v40 }
 0x105   :  { %v613_v39 = vpack.c.bf16 %v437_v37, %v436_v35  ;;  %v633_v41 = vpack.c.bf16 %v445_v38, %v444_v36 }
 0x107   :  { %637 = vst [vmem:[%s926_s3 + $0x18] sm:$0xff] %v613_v39   ;;  %641 = vst [vmem:[%s926_s3 + $0x38] sm:$0xff] %v633_v41  }

// kernel: _lambda_.11
= control target key start
LH: loop header
LB: loop body
LE: loop exit
PB: predicated region body
PF: predicated region fallthrough
CT: control target
= control target key end

     0   :  { %s1917_s27 = smov 0   ;;  %s1919_s28 = smov 0   ;;  %s2627_s0 = inlined_call_operand.vmem [shape: bf16[2,192,16], index: 0, kind: input, shape index: {}]   ;;  %s2628_s1 = inlined_call_operand.vmem [shape: f32[192,16], index: 1, kind: input, shape index: {}]   ;;  %s2629_s2 = inlined_call_operand.vmem [shape: f32[1,16], index: 2, kind: input, shape index: {}]   ;;  %s2630_s3 = inlined_call_operand.vmem [shape: f32[1,16], index: 3, kind: input, shape index: {}]   ;;  %s2631_s4 = inlined_call_operand.vmem [shape: bf16[16,48], index: 4, kind: input, shape index: {}]   ;;  %s2632_s5 = inlined_call_operand.vmem [shape: f32[1,48], index: 5, kind: input, shape index: {}]   ;;  %s2633_s6 = inlined_call_operand.vmem [shape: bf16[2,192,16], index: 6, kind: output, shape index: {0}]   ;;  %s2634_s7 = inlined_call_operand.vmem [shape: bf16[2,192,16], index: 7, kind: output, shape index: {1}]   ;;  %s2635_s8 = inlined_call_operand.vmem [shape: bf16[2,192,16], index: 8, kind: output, shape index: {2}]  }
   0x1   :  { %s1921_s29 = smov 0  }
   0x2 LB: > { %s31_s30 = sadd.s32 1, %s1864_s28  ;;  %p1599_p0 = scmp.ge.s32.totalorder %s1868_s29, 1  ;;  %s1868_s29 = sphi %s1921_s29, %s19_s29   ;;  %s1864_s28 = sphi %s1919_s28, %s2637_s28   ;;  %s1860_s27 = sphi %s1917_s27, %s2636_s27  }
   0x3   : > { %p33_p1 = scmp.ge.s32.totalorder %s31_s30, 2  ;;  %p303_p2 = scmp.lt.s32.totalorder %s1868_s29, 3 }
   0x5   : > { %s2639_s30 = smov (%p33_p1, %s31_s30), 0  ;;  %p304_p3 = pnand %p1599_p0, %p303_p2 }
   0x6   : > { %p369_p4 = scmp.lt.s32.totalorder (!%p304_p3), %s1860_s27, 1  ;;  %s1870_s20 = smov (!%p304_p3), 112  }
   0x7   : > { %307 = sbr.rel (%p304_p3) target bundleno = 753 (0x2f1), region = 44  ;;  %s1871_s21 = smov (!%p304_p3), 96  }
   0xc   : > { %s2641_s27 = smov (!%p369_p4, %s1860_s27), 1  ;;  %v463_v0 = vld [vmem:[%s2628_s1] sm:$0xff]  ;;  %v464_v2 = vld [vmem:[%s2628_s1 + $0x8] sm:$0xff]  ;;  %vm511_vm0 = vcmask 130048   ;;  %v465_v18 = vld [vmem:[%s2628_s1 + $0x10] sm:$0xff]  ;;  %vm1175_vm1 = vcmask 125952  }
   0xd   : > { %s1935_s9 = smul.u32 96, %s2641_s27  ;;  %v475_v1 = vld [vmem:[%s2628_s1 + $0x60] sm:$0xff]  ;;  %v476_v3 = vld [vmem:[%s2628_s1 + $0x68] sm:$0xff]  ;;  %v466_v19 = vld [vmem:[%s2628_s1 + $0x18] sm:$0xff] }
   0xe   : > { %v477_v28 = vld [vmem:[%s2628_s1 + $0x70] sm:$0xff]  ;;  %v478_v29 = vld [vmem:[%s2628_s1 + $0x78] sm:$0xff]  ;;  %v467_v37 = vld [vmem:[%s2628_s1 + $0x20] sm:$0xff] }
   0xf   : > { %s1944_s14 = scalar_lea.vmem %s2627_s0, %s1935_s9  ;;  %v468_v38 = vld [vmem:[%s2628_s1 + $0x28] sm:$0xff]  ;;  %v479_v47 = vld [vmem:[%s2628_s1 + $0x80] sm:$0xff]  ;;  %v469_v56 = vld [vmem:[%s2628_s1 + $0x30] sm:$0xff]  ;;  %s2374_s19 = scalar_lea.vmem %s2633_s6, %s1935_s9 }
  0x10   : > { %v1671_v4 = vld [vmem:[%s1944_s14] sm:$0xff]   ;;  %v1723_v5 = vld [vmem:[%s1944_s14 + $0x30] sm:$0xff]   ;;  %v1718_v6 = vld [vmem:[%s1944_s14 + $0x8] sm:$0xff]   ;;  %s2526_s26 = scalar_lea.vmem %s2635_s8, %s1935_s9 }
  0x11   : > { %v1672_v7 = vunpack.c.l.bf16 %v1671_v4  ;;  %v1696_v8 = vunpack.c.l.bf16 %v1723_v5  ;;  %v1673_v9 = vunpack.c.h.bf16 %v1671_v4  ;;  %v1697_v10 = vunpack.c.h.bf16 %v1723_v5  ;;  %v1724_v17 = vld [vmem:[%s1944_s14 + $0x38] sm:$0xff]   ;;  %v1719_v30 = vld [vmem:[%s1944_s14 + $0x10] sm:$0xff]   ;;  %v1725_v39 = vld [vmem:[%s1944_s14 + $0x40] sm:$0xff]  }
  0x12   : > { %v1676_v11 = vunpack.c.l.bf16 %v1718_v6  ;;  %v1677_v12 = vunpack.c.h.bf16 %v1718_v6  ;;  %v1700_v22 = vunpack.c.l.bf16 %v1724_v17  ;;  %v1701_v23 = vunpack.c.h.bf16 %v1724_v17  ;;  %v1720_v46 = vld [vmem:[%s1944_s14 + $0x18] sm:$0xff]   ;;  %v480_v48 = vld [vmem:[%s2628_s1 + $0x88] sm:$0xff] }
  0x13   : > { %v1958_v13 = vadd.f32 %v1672_v7, %v463_v0  ;;  %v1960_v14 = vadd.f32 %v1696_v8, %v475_v1  ;;  %v1962_v15 = vadd.f32 %v1673_v9, %v464_v2  ;;  %v1964_v16 = vadd.f32 %v1697_v10, %v476_v3  ;;  %v1726_v55 = vld [vmem:[%s1944_s14 + $0x48] sm:$0xff]   ;;  %v470_v57 = vld [vmem:[%s2628_s1 + $0x38] sm:$0xff]  ;;  %v481_v0 = vld [vmem:[%s2628_s1 + $0x90] sm:$0xff] }
  0x14   : > { %v1981_v26 = vadd.f32 %v1676_v11, %v465_v18  ;;  %v1983_v27 = vadd.f32 %v1677_v12, %v466_v19  ;;  %v1992_v31 = vadd.f32 %v1700_v22, %v477_v28  ;;  %v1994_v32 = vadd.f32 %v1701_v23, %v478_v29  ;;  %v1721_v1 = vld [vmem:[%s1944_s14 + $0x20] sm:$0xff]   ;;  %v482_v2 = vld [vmem:[%s2628_s1 + $0x98] sm:$0xff]  ;;  %v472_v10 = vld [vmem:[%s2628_s1 + $0x48] sm:$0xff] }
  0x15   : > { %v512_v20 = vsel %vm511_vm0, %v1958_v13, 0.0  ;;  %v548_v21 = vsel %vm511_vm0, %v1960_v14, 0.0  ;;  %v515_v24 = vsel %vm511_vm0, %v1962_v15, 0.0  ;;  %v551_v25 = vsel %vm511_vm0, %v1964_v16, 0.0  ;;  %v471_v8 = vld [vmem:[%s2628_s1 + $0x40] sm:$0xff]  ;;  %v1727_v11 = vld [vmem:[%s1944_s14 + $0x50] sm:$0xff]  }
  0x16   : > { %513 = vadd.xlane.f32.xlu0 %v512_v20  ;;  %549 = vadd.xlane.f32.xlu1 %v548_v21  ;;  %v518_v33 = vsel %vm511_vm0, %v1981_v26, 0.0  ;;  %v521_v34 = vsel %vm511_vm0, %v1983_v27, 0.0  ;;  %v1680_v35 = vunpack.c.l.bf16 %v1719_v30  ;;  %v1681_v36 = vunpack.c.h.bf16 %v1719_v30  ;;  %v1722_v22 = vld [vmem:[%s1944_s14 + $0x28] sm:$0xff]   ;;  %v483_v23 = vld [vmem:[%s2628_s1 + $0xa0] sm:$0xff] }
  0x17   : > { %v554_v40 = vsel %vm511_vm0, %v1992_v31, 0.0  ;;  %v557_v41 = vsel %vm511_vm0, %v1994_v32, 0.0  ;;  %v1704_v44 = vunpack.c.l.bf16 %v1725_v39  ;;  %v1705_v45 = vunpack.c.h.bf16 %v1725_v39 }
  0x18   : > { %v2011_v42 = vadd.f32 %v1680_v35, %v467_v37  ;;  %v2013_v43 = vadd.f32 %v1681_v36, %v468_v38  ;;  %v1684_v49 = vunpack.c.l.bf16 %v1720_v46  ;;  %v1685_v50 = vunpack.c.h.bf16 %v1720_v46  ;;  %v473_v35 = vld [vmem:[%s2628_s1 + $0x50] sm:$0xff]  ;;  %v1728_v36 = vld [vmem:[%s1944_s14 + $0x58] sm:$0xff]   ;;  %s2514_s14 = scalar_lea.vmem %s2634_s7, %s1935_s9 }
  0x19   : > { %v2026_v53 = vadd.f32 %v1704_v44, %v479_v47  ;;  %v2028_v54 = vadd.f32 %v1705_v45, %v480_v48  ;;  %v1708_v58 = vunpack.c.l.bf16 %v1726_v55  ;;  %v1709_v59 = vunpack.c.h.bf16 %v1726_v55  ;;  %v474_v37 = vld [vmem:[%s2628_s1 + $0x58] sm:$0xff]  ;;  %v485_v46 = vld [vmem:[%s2628_s1 + $0xb0] sm:$0xff] }
  0x1a   : > { %516 = vadd.xlane.f32.xlu0 %v515_v24  ;;  %552 = vadd.xlane.f32.xlu1 %v551_v25  ;;  %v524_v51 = vsel %vm511_vm0, %v2011_v42, 0.0  ;;  %v527_v52 = vsel %vm511_vm0, %v2013_v43, 0.0  ;;  %v2041_v62 = vadd.f32 %v1684_v49, %v469_v56  ;;  %v2043_v63 = vadd.f32 %v1685_v50, %v470_v57  ;;  %v484_v24 = vld [vmem:[%s2628_s1 + $0xa8] sm:$0xff]  ;;  %v486_v47 = vld [vmem:[%s2628_s1 + $0xb8] sm:$0xff] }
  0x1b   : > { %v560_v60 = vsel %vm511_vm0, %v2026_v53, 0.0  ;;  %v563_v61 = vsel %vm511_vm0, %v2028_v54, 0.0  ;;  %v2052_v3 = vadd.f32 %v1708_v58, %v481_v0  ;;  %v1688_v4 = vunpack.c.l.bf16 %v1721_v1 }
  0x1c   : > { %v530_v5 = vsel %vm511_vm0, %v2041_v62, 0.0  ;;  %v533_v6 = vsel %vm511_vm0, %v2043_v63, 0.0  ;;  %v2058_v7 = vadd.f32 %v1709_v59, %v482_v2  ;;  %v1689_v9 = vunpack.c.h.bf16 %v1721_v1 }
  0x1d   : > { %v566_v12 = vsel %vm511_vm0, %v2052_v3, 0.0  ;;  %v2069_v17 = vadd.f32 %v1688_v4, %v471_v8  ;;  %v1712_v20 = vunpack.c.l.bf16 %v1727_v11  ;;  %v1713_v21 = vunpack.c.h.bf16 %v1727_v11 }
  0x1e   : > { %519 = vadd.xlane.f32.xlu0 %v518_v33  ;;  %522 = vadd.xlane.f32.xlu1 %v521_v34  ;;  %v569_v18 = vsel %vm511_vm0, %v2058_v7, 0.0  ;;  %v2073_v19 = vadd.f32 %v1689_v9, %v472_v10  ;;  %v1692_v25 = vunpack.c.l.bf16 %v1722_v22  ;;  %v1693_v28 = vunpack.c.h.bf16 %v1722_v22 }
  0x1f   : > { %v536_v29 = vsel %vm511_vm0, %v2069_v17, 0.0  ;;  %v2086_v33 = vadd.f32 %v1712_v20, %v483_v23  ;;  %v2088_v34 = vadd.f32 %v1713_v21, %v484_v24  ;;  %v1716_v39 = vunpack.c.l.bf16 %v1728_v36 }
  0x20   : > { %v539_v30 = vsel %vm511_vm0, %v2073_v19, 0.0  ;;  %v2097_v38 = vadd.f32 %v1692_v25, %v473_v35  ;;  %v2103_v44 = vadd.f32 %v1693_v28, %v474_v37  ;;  %v1717_v45 = vunpack.c.h.bf16 %v1728_v36 }
  0x21   : > { %v2115_v50 = vadd.f32 %v1716_v39, %v485_v46 }
  0x22   : > { %555 = vadd.xlane.f32.xlu0 %v554_v40  ;;  %558 = vadd.xlane.f32.xlu1 %v557_v41  ;;  %v572_v40 = vsel %vm511_vm0, %v2086_v33, 0.0  ;;  %v575_v41 = vsel %vm511_vm0, %v2088_v34, 0.0  ;;  %v542_v48 = vsel %vm511_vm0, %v2097_v38, 0.0  ;;  %v545_v49 = vsel %vm511_vm0, %v2103_v44, 0.0 }
  0x26   : > { %525 = vadd.xlane.f32.xlu0 %v524_v51  ;;  %528 = vadd.xlane.f32.xlu1 %v527_v52  ;;  %v2117_v51 = vadd.f32 %v1717_v45, %v486_v47  ;;  %v578_v52 = vsel %vm511_vm0, %v2115_v50, 0.0 }
  0x28   : > { %v581_v55 = vsel %vm511_vm0, %v2117_v51, 0.0 }
  0x2a   : > { %561 = vadd.xlane.f32.xlu0 %v560_v60  ;;  %564 = vadd.xlane.f32.xlu1 %v563_v61 }
  0x2e   : > { %531 = vadd.xlane.f32.xlu0 %v530_v5  ;;  %534 = vadd.xlane.f32.xlu1 %v533_v6 }
  0x32   : > { %567 = vadd.xlane.f32.xlu0 %v566_v12  ;;  %570 = vadd.xlane.f32.xlu1 %v569_v18 }
  0x36   : > { %537 = vadd.xlane.f32.xlu0 %v536_v29  ;;  %540 = vadd.xlane.f32.xlu1 %v539_v30 }
  0x3a   : > { %573 = vadd.xlane.f32.xlu0 %v572_v40  ;;  %576 = vadd.xlane.f32.xlu1 %v575_v41 }
  0x3e   : > { %543 = vadd.xlane.f32.xlu0 %v542_v48  ;;  %546 = vadd.xlane.f32.xlu1 %v545_v49 }
  0x42   : > { %579 = vadd.xlane.f32.xlu0 %v578_v52  ;;  %582 = vadd.xlane.f32.xlu1 %v581_v55 }
  0x9f   : > { %v514_v56 = vpop.xlane.xlu0 %513  ;;  %v550_v57 = vpop.xlane.xlu1 %549 }
  0xa0   : > { %v585_v58 = vmul.f32 0.0625, %v514_v56  ;;  %v597_v59 = vmul.f32 0.0625, %v550_v57 }
  0xa2   : > { %v2124_v60 = vsub.f32 %v1958_v13, %v585_v58  ;;  %v2127_v61 = vsub.f32 %v1960_v14, %v597_v59 }
  0xa3   : > { %v517_v0 = vpop.xlane.xlu0 %516  ;;  %v553_v1 = vpop.xlane.xlu1 %552 }
  0xa4   : > { %v586_v2 = vmul.f32 0.0625, %v517_v0  ;;  %v598_v4 = vmul.f32 0.0625, %v553_v1  ;;  %v633_v5 = vmul.f32 %v2124_v60, %v2124_v60  ;;  %v645_v6 = vmul.f32 %v2127_v61, %v2127_v61 }
  0xa6   : > { %v2134_v8 = vsub.f32 %v1962_v15, %v586_v2  ;;  %v2137_v9 = vsub.f32 %v1964_v16, %v598_v4  ;;  %v657_v13 = vsel %vm511_vm0, %v633_v5, 0.0  ;;  %v693_v11 = vsel %vm511_vm0, %v645_v6, 0.0 }
  0xa7   : > { %658 = vadd.xlane.f32.xlu0 %v657_v13  ;;  %v520_v14 = vpop.xlane.xlu0 %519  ;;  %v523_v10 = vpop.xlane.xlu1 %522 }
  0xa8   : > { %v587_v12 = vmul.f32 0.0625, %v520_v14  ;;  %v588_v18 = vmul.f32 0.0625, %v523_v10  ;;  %v634_v20 = vmul.f32 %v2134_v8, %v2134_v8  ;;  %v646_v21 = vmul.f32 %v2137_v9, %v2137_v9 }
  0xaa   : > { %v2146_v15 = vsub.f32 %v1981_v26, %v587_v12  ;;  %v2149_v16 = vsub.f32 %v1983_v27, %v588_v18  ;;  %v660_v22 = vsel %vm511_vm0, %v634_v20, 0.0  ;;  %v696_v25 = vsel %vm511_vm0, %v646_v21, 0.0 }
  0xab   : > { %694 = vadd.xlane.f32.xlu0 %v693_v11  ;;  %661 = vadd.xlane.f32.xlu1 %v660_v22  ;;  %v556_v23 = vpop.xlane.xlu0 %555  ;;  %v559_v24 = vpop.xlane.xlu1 %558 }
  0xac   : > { %v599_v28 = vmul.f32 0.0625, %v556_v23  ;;  %v600_v29 = vmul.f32 0.0625, %v559_v24  ;;  %v635_v30 = vmul.f32 %v2146_v15, %v2146_v15  ;;  %v636_v26 = vmul.f32 %v2149_v16, %v2149_v16 }
  0xae   : > { %v2158_v35 = vsub.f32 %v1992_v31, %v599_v28  ;;  %v2161_v27 = vsub.f32 %v1994_v32, %v600_v29  ;;  %v663_v36 = vsel %vm511_vm0, %v635_v30, 0.0  ;;  %v666_v40 = vsel %vm511_vm0, %v636_v26, 0.0 }
  0xaf   : > { %697 = vadd.xlane.f32.xlu1 %v696_v25  ;;  %664 = vadd.xlane.f32.xlu0 %v663_v36  ;;  %v526_v37 = vpop.xlane.xlu0 %525  ;;  %v529_v39 = vpop.xlane.xlu1 %528 }
  0xb0   : > { %v589_v41 = vmul.f32 0.0625, %v526_v37  ;;  %v590_v45 = vmul.f32 0.0625, %v529_v39  ;;  %v647_v46 = vmul.f32 %v2158_v35, %v2158_v35  ;;  %v648_v31 = vmul.f32 %v2161_v27, %v2161_v27 }
  0xb2   : > { %v2170_v47 = vsub.f32 %v2011_v42, %v589_v41  ;;  %v2173_v32 = vsub.f32 %v2013_v43, %v590_v45  ;;  %v699_v48 = vsel %vm511_vm0, %v647_v46, 0.0  ;;  %v702_v55 = vsel %vm511_vm0, %v648_v31, 0.0 }
  0xb3   : > { %667 = vadd.xlane.f32.xlu1 %v666_v40  ;;  %700 = vadd.xlane.f32.xlu0 %v699_v48  ;;  %v562_v49 = vpop.xlane.xlu0 %561  ;;  %v565_v52 = vpop.xlane.xlu1 %564 }
  0xb4   : > { %v601_v56 = vmul.f32 0.0625, %v562_v49  ;;  %v602_v57 = vmul.f32 0.0625, %v565_v52  ;;  %v637_v58 = vmul.f32 %v2170_v47, %v2170_v47  ;;  %v638_v42 = vmul.f32 %v2173_v32, %v2173_v32 }
  0xb6   : > { %v2182_v59 = vsub.f32 %v2026_v53, %v601_v56  ;;  %v2185_v43 = vsub.f32 %v2028_v54, %v602_v57  ;;  %v669_v0 = vsel %vm511_vm0, %v637_v58, 0.0  ;;  %v672_v4 = vsel %vm511_vm0, %v638_v42, 0.0 }
  0xb7   : > { %703 = vadd.xlane.f32.xlu1 %v702_v55  ;;  %670 = vadd.xlane.f32.xlu0 %v669_v0  ;;  %v532_v1 = vpop.xlane.xlu0 %531  ;;  %v535_v2 = vpop.xlane.xlu1 %534 }
  0xb8   : > { %v591_v5 = vmul.f32 0.0625, %v532_v1  ;;  %v592_v6 = vmul.f32 0.0625, %v535_v2  ;;  %v649_v13 = vmul.f32 %v2182_v59, %v2182_v59  ;;  %v650_v53 = vmul.f32 %v2185_v43, %v2185_v43 }
  0xba   : > { %v2194_v14 = vsub.f32 %v2041_v62, %v591_v5  ;;  %v2197_v54 = vsub.f32 %v2043_v63, %v592_v6  ;;  %v705_v10 = vsel %vm511_vm0, %v649_v13, 0.0  ;;  %v708_v18 = vsel %vm511_vm0, %v650_v53, 0.0 }
  0xbb   : > { %673 = vadd.xlane.f32.xlu1 %v672_v4  ;;  %706 = vadd.xlane.f32.xlu0 %v705_v10  ;;  %v568_v11 = vpop.xlane.xlu0 %567  ;;  %v571_v12 = vpop.xlane.xlu1 %570 }
  0xbc   : > { %v603_v20 = vmul.f32 0.0625, %v568_v11  ;;  %v604_v21 = vmul.f32 0.0625, %v571_v12  ;;  %v639_v22 = vmul.f32 %v2194_v14, %v2194_v14  ;;  %v640_v62 = vmul.f32 %v2197_v54, %v2197_v54 }
  0xbe   : > { %v2206_v23 = vsub.f32 %v2052_v3, %v603_v20  ;;  %v2209_v63 = vsub.f32 %v2058_v7, %v604_v21  ;;  %v675_v24 = vsel %vm511_vm0, %v639_v22, 0.0  ;;  %v678_v29 = vsel %vm511_vm0, %v640_v62, 0.0 }
  0xbf   : > { %709 = vadd.xlane.f32.xlu1 %v708_v18  ;;  %676 = vadd.xlane.f32.xlu0 %v675_v24  ;;  %v538_v25 = vpop.xlane.xlu0 %537  ;;  %v541_v28 = vpop.xlane.xlu1 %540 }
  0xc0   : > { %v593_v30 = vmul.f32 0.0625, %v538_v25  ;;  %v594_v26 = vmul.f32 0.0625, %v541_v28  ;;  %v651_v36 = vmul.f32 %v2206_v23, %v2206_v23  ;;  %v652_v3 = vmul.f32 %v2209_v63, %v2209_v63 }
  0xc2   : > { %v2218_v37 = vsub.f32 %v2069_v17, %v593_v30  ;;  %v2221_v7 = vsub.f32 %v2073_v19, %v594_v26  ;;  %v711_v39 = vsel %vm511_vm0, %v651_v36, 0.0  ;;  %v714_v45 = vsel %vm511_vm0, %v652_v3, 0.0 }
  0xc3   : > { %679 = vadd.xlane.f32.xlu1 %v678_v29  ;;  %712 = vadd.xlane.f32.xlu0 %v711_v39  ;;  %v574_v40 = vpop.xlane.xlu0 %573  ;;  %v577_v41 = vpop.xlane.xlu1 %576 }
  0xc4   : > { %v605_v46 = vmul.f32 0.0625, %v574_v40  ;;  %v606_v31 = vmul.f32 0.0625, %v577_v41  ;;  %v641_v48 = vmul.f32 %v2218_v37, %v2218_v37  ;;  %v642_v17 = vmul.f32 %v2221_v7, %v2221_v7 }
  0xc6   : > { %v2230_v49 = vsub.f32 %v2086_v33, %v605_v46  ;;  %v2233_v19 = vsub.f32 %v2088_v34, %v606_v31  ;;  %v681_v52 = vsel %vm511_vm0, %v641_v48, 0.0  ;;  %v684_v57 = vsel %vm511_vm0, %v642_v17, 0.0 }
  0xc7   : > { %715 = vadd.xlane.f32.xlu1 %v714_v45  ;;  %682 = vadd.xlane.f32.xlu0 %v681_v52  ;;  %v544_v55 = vpop.xlane.xlu0 %543  ;;  %v547_v56 = vpop.xlane.xlu1 %546 }
  0xc8   : > { %v595_v58 = vmul.f32 0.0625, %v544_v55  ;;  %v596_v42 = vmul.f32 0.0625, %v547_v56  ;;  %v653_v0 = vmul.f32 %v2230_v49, %v2230_v49  ;;  %v654_v33 = vmul.f32 %v2233_v19, %v2233_v19 }
  0xca   : > { %v2242_v1 = vsub.f32 %v2097_v38, %v595_v58  ;;  %v2245_v34 = vsub.f32 %v2103_v44, %v596_v42  ;;  %v717_v2 = vsel %vm511_vm0, %v653_v0, 0.0  ;;  %v720_v6 = vsel %vm511_vm0, %v654_v33, 0.0 }
  0xcb   : > { %685 = vadd.xlane.f32.xlu1 %v684_v57  ;;  %718 = vadd.xlane.f32.xlu0 %v717_v2  ;;  %v580_v4 = vpop.xlane.xlu0 %579  ;;  %v583_v5 = vpop.xlane.xlu1 %582 }
  0xcc   : > { %v607_v13 = vmul.f32 0.0625, %v580_v4  ;;  %v608_v53 = vmul.f32 0.0625, %v583_v5  ;;  %v643_v10 = vmul.f32 %v2242_v1, %v2242_v1  ;;  %v644_v38 = vmul.f32 %v2245_v34, %v2245_v34 }
  0xce   : > { %v2254_v11 = vsub.f32 %v2115_v50, %v607_v13  ;;  %v2257_v44 = vsub.f32 %v2117_v51, %v608_v53  ;;  %v687_v12 = vsel %vm511_vm0, %v643_v10, 0.0  ;;  %v690_v18 = vsel %vm511_vm0, %v644_v38, 0.0  ;;  %v1797_v50 = vld [vmem:[%s2631_s4] sm:$0xff]  }
  0xcf   : > { %721 = vadd.xlane.f32.xlu1 %v720_v6  ;;  %688 = vadd.xlane.f32.xlu0 %v687_v12  ;;  %v2274_v13 = vld [vmem:[%s2629_s2] ss:$0 sm:$0xff] }
  0xd0   : > { %v655_v20 = vmul.f32 %v2254_v11, %v2254_v11  ;;  %v656_v21 = vmul.f32 %v2257_v44, %v2257_v44  ;;  %1742 = vmatprep.subr.bf16.mxu0 %v1797_v50  ;;  %1768 = vmatprep.subr.bf16.mxu1 %v1797_v50 }
  0xd1   : > { %1743 = vmatpush3.bf16.msra.mxu0 %v1797_v50  ;;  %1769 = vmatpush3.bf16.msra.mxu1 %v1797_v50 }
  0xd2   : > { %v723_v22 = vsel %vm511_vm0, %v655_v20, 0.0  ;;  %v726_v51 = vsel %vm511_vm0, %v656_v21, 0.0 }
  0xd3   : > { %691 = vadd.xlane.f32.xlu1 %v690_v18  ;;  %724 = vadd.xlane.f32.xlu0 %v723_v22 }
  0xd7   : > { %727 = vadd.xlane.f32.xlu1 %v726_v51 }
 0x130   : > { %v659_v62 = vpop.xlane.xlu0 %658 }
 0x131   : > { %v729_v24 = vmul.f32 0.0625, %v659_v62 }
 0x133   : > { %v753_v25 = vadd.f32 1e-05, %v729_v24 }
 0x134   : > { %v662_v28 = vpop.xlane.xlu1 %661  ;;  %v695_v29 = vpop.xlane.xlu0 %694 }
 0x135   : > { %1798 = vrsqrt.f32 %v753_v25  ;;  %v730_v30 = vmul.f32 0.0625, %v662_v28  ;;  %v741_v26 = vmul.f32 0.0625, %v695_v29 }
 0x137   : > { %v754_v36 = vadd.f32 1e-05, %v730_v30  ;;  %v765_v3 = vadd.f32 1e-05, %v741_v26 }
 0x138   : > { %v698_v39 = vpop.xlane.xlu1 %697  ;;  %v665_v40 = vpop.xlane.xlu0 %664 }
 0x139   : > { %1800 = vrsqrt.f32 %v754_v36  ;;  %v742_v41 = vmul.f32 0.0625, %v698_v39  ;;  %v731_v45 = vmul.f32 0.0625, %v665_v40 }
 0x13a   : > { %1802 = vrsqrt.f32 %v765_v3 }
 0x13b   : > { %v766_v46 = vadd.f32 1e-05, %v742_v41  ;;  %v755_v31 = vadd.f32 1e-05, %v731_v45 }
 0x13c   : > { %v668_v48 = vpop.xlane.xlu1 %667  ;;  %v701_v17 = vpop.xlane.xlu0 %700 }
 0x13d   : > { %1804 = vrsqrt.f32 %v766_v46  ;;  %v732_v52 = vmul.f32 0.0625, %v668_v48  ;;  %v743_v55 = vmul.f32 0.0625, %v701_v17 }
 0x13e   : > { %1806 = vrsqrt.f32 %v755_v31 }
 0x13f   : > { %v756_v56 = vadd.f32 1e-05, %v732_v52  ;;  %v767_v57 = vadd.f32 1e-05, %v743_v55 }
 0x140   : > { %v704_v58 = vpop.xlane.xlu1 %703  ;;  %v671_v42 = vpop.xlane.xlu0 %670 }
 0x141   : > { %1808 = vrsqrt.f32 %v756_v56  ;;  %v744_v0 = vmul.f32 0.0625, %v704_v58  ;;  %v733_v33 = vmul.f32 0.0625, %v671_v42 }
 0x142   : > { %v1799_v2 = vpop.eup %1798  ;;  %1810 = vrsqrt.f32 %v767_v57 }
 0x143   : > { %v768_v4 = vadd.f32 1e-05, %v744_v0  ;;  %v757_v5 = vadd.f32 1e-05, %v733_v33  ;;  %v801_v6 = vmul.f32 %v1799_v2, %v2124_v60  ;;  %v2281_v60 = vld [vmem:[%s2630_s3] ss:$0 sm:$0xff] }
 0x144   : > { %v674_v53 = vpop.xlane.xlu1 %673  ;;  %v707_v10 = vpop.xlane.xlu0 %706 }
 0x145   : > { %1812 = vrsqrt.f32 %v768_v4  ;;  %v734_v38 = vmul.f32 0.0625, %v674_v53  ;;  %v745_v12 = vmul.f32 0.0625, %v707_v10  ;;  %v832_v20 = vmul.f32 %v2274_v13, %v801_v6 }
 0x146   : > { %v1801_v18 = vpop.eup %1800  ;;  %1814 = vrsqrt.f32 %v757_v5 }
 0x147   : > { %v1803_v21 = vpop.eup %1802  ;;  %v758_v22 = vadd.f32 1e-05, %v734_v38  ;;  %v769_v50 = vadd.f32 1e-05, %v745_v12  ;;  %v802_v51 = vmul.f32 %v1801_v18, %v2134_v8  ;;  %v863_v36 = vadd.f32 %v2281_v60, %v832_v20 }
 0x148   : > { %v710_v62 = vpop.xlane.xlu1 %709  ;;  %v677_v24 = vpop.xlane.xlu0 %676  ;;  %v813_v25 = vmul.f32 %v1803_v21, %v2127_v61 }
 0x149   : > { %1816 = vrsqrt.f32 %v758_v22  ;;  %v746_v28 = vmul.f32 0.0625, %v710_v62  ;;  %v735_v29 = vmul.f32 0.0625, %v677_v24  ;;  %v833_v30 = vmul.f32 %v2274_v13, %v802_v51 }
 0x14a   : > { %v1805_v26 = vpop.eup %1804  ;;  %1818 = vrsqrt.f32 %v769_v50  ;;  %v844_v61 = vmul.f32 %v2274_v13, %v813_v25 }
 0x14b   : > { %v1807_v3 = vpop.eup %1806  ;;  %v770_v8 = vadd.f32 1e-05, %v746_v28  ;;  %v759_v39 = vadd.f32 1e-05, %v735_v29  ;;  %v864_v40 = vadd.f32 %v2281_v60, %v833_v30  ;;  %v814_v41 = vmul.f32 %v1805_v26, %v2137_v9 }
 0x14c   : > { %v680_v45 = vpop.xlane.xlu1 %679  ;;  %v713_v46 = vpop.xlane.xlu0 %712  ;;  %v803_v31 = vmul.f32 %v1807_v3, %v2146_v15  ;;  %v875_v15 = vadd.f32 %v2281_v60, %v844_v61 }
 0x14d   : > { %1820 = vrsqrt.f32 %v770_v8  ;;  %v736_v48 = vmul.f32 0.0625, %v680_v45  ;;  %v747_v17 = vmul.f32 0.0625, %v713_v46  ;;  %v887_v52 = vpack.c.bf16 %v864_v40, %v863_v36 }
 0x14e   : > { %v1809_v55 = vpop.eup %1808  ;;  %1822 = vrsqrt.f32 %v759_v39  ;;  %v845_v56 = vmul.f32 %v2274_v13, %v814_v41  ;;  %v834_v57 = vmul.f32 %v2274_v13, %v803_v31 }
 0x14f   : > { %v1811_v58 = vpop.eup %1810  ;;  %v760_v42 = vadd.f32 1e-05, %v736_v48  ;;  %v771_v0 = vadd.f32 1e-05, %v747_v17  ;;  %1744 = vmatprep.mubr.msk.bf16.mxu0 %vm511_vm0, %v887_v52  ;;  %v804_v9 = vmul.f32 %v1809_v55, %v2149_v16 }
 0x150   : > { %v716_v33 = vpop.xlane.xlu1 %715  ;;  %v683_v2 = vpop.xlane.xlu0 %682  ;;  %v876_v4 = vadd.f32 %v2281_v60, %v845_v56  ;;  %v815_v5 = vmul.f32 %v1811_v58, %v2158_v35  ;;  %v865_v18 = vadd.f32 %v2281_v60, %v834_v57 }
 0x151   : > { %1824 = vrsqrt.f32 %v760_v42  ;;  %v748_v6 = vmul.f32 0.0625, %v716_v33  ;;  %v737_v53 = vmul.f32 0.0625, %v683_v2  ;;  %v835_v10 = vmul.f32 %v2274_v13, %v804_v9 }
 0x152   : > { %v1813_v38 = vpop.eup %1812  ;;  %1826 = vrsqrt.f32 %v771_v0  ;;  %v893_v12 = vpack.c.bf16 %v876_v4, %v875_v15  ;;  %v846_v62 = vmul.f32 %v2274_v13, %v815_v5 }
 0x153   : > { %v1815_v20 = vpop.eup %1814  ;;  %v772_v16 = vadd.f32 1e-05, %v748_v6  ;;  %v761_v21 = vadd.f32 1e-05, %v737_v53  ;;  %v866_v22 = vadd.f32 %v2281_v60, %v835_v10  ;;  %v816_v50 = vmul.f32 %v1813_v38, %v2161_v27 }
 0x154   : > { %1756 = vmatprep.mubr.msk.bf16.mxu1 %vm511_vm0, %v893_v12  ;;  %v686_v35 = vpop.xlane.xlu1 %685  ;;  %v719_v51 = vpop.xlane.xlu0 %718  ;;  %v805_v24 = vmul.f32 %v1815_v20, %v2170_v47  ;;  %v877_v47 = vadd.f32 %v2281_v60, %v846_v62 }
 0x155   : > { %1828 = vrsqrt.f32 %v772_v16  ;;  %v738_v25 = vmul.f32 0.0625, %v686_v35  ;;  %v749_v28 = vmul.f32 0.0625, %v719_v51  ;;  %v888_v29 = vpack.c.bf16 %v866_v22, %v865_v18 }
 0x156   : > { %v1817_v30 = vpop.eup %1816  ;;  %1830 = vrsqrt.f32 %v761_v21  ;;  %v847_v26 = vmul.f32 %v2274_v13, %v816_v50  ;;  %v836_v36 = vmul.f32 %v2274_v13, %v805_v24 }
 0x157   : > { %v1819_v3 = vpop.eup %1818  ;;  %v762_v27 = vadd.f32 1e-05, %v738_v25  ;;  %v773_v8 = vadd.f32 1e-05, %v749_v28  ;;  %1745 = vmatmul.mubr.msk.bf16.vlgmr.msra.gmra.mxu0 %vm511_vm0, %v888_v29  ;;  %v806_v39 = vmul.f32 %v1817_v30, %v2173_v32 }
 0x158   : > { %v722_v40 = vpop.xlane.xlu1 %721  ;;  %v689_v41 = vpop.xlane.xlu0 %688  ;;  %v878_v45 = vadd.f32 %v2281_v60, %v847_v26  ;;  %v817_v46 = vmul.f32 %v1819_v3, %v2182_v59  ;;  %v867_v55 = vadd.f32 %v2281_v60, %v836_v36 }
 0x159   : > { %1832 = vrsqrt.f32 %v762_v27  ;;  %v750_v61 = vmul.f32 0.0625, %v722_v40  ;;  %v739_v31 = vmul.f32 0.0625, %v689_v41  ;;  %v837_v48 = vmul.f32 %v2274_v13, %v806_v39 }
 0x15a   : > { %v1821_v17 = vpop.eup %1820  ;;  %1834 = vrsqrt.f32 %v773_v8  ;;  %v894_v52 = vpack.c.bf16 %v878_v45, %v877_v47  ;;  %v848_v9 = vmul.f32 %v2274_v13, %v817_v46 }
 0x15b   : > { %v1823_v56 = vpop.eup %1822  ;;  %v774_v32 = vadd.f32 1e-05, %v750_v61  ;;  %v763_v57 = vadd.f32 1e-05, %v739_v31  ;;  %v868_v58 = vadd.f32 %v2281_v60, %v837_v48  ;;  %v818_v42 = vmul.f32 %v1821_v17, %v2185_v43 }
 0x15c   : > { %1757 = vmatmul.mubr.msk.bf16.vlgmr.msra.gmra.mxu1 %vm511_vm0, %v894_v52  ;;  %v692_v59 = vpop.xlane.xlu1 %691  ;;  %v725_v0 = vpop.xlane.xlu0 %724  ;;  %v807_v33 = vmul.f32 %v1823_v56, %v2194_v14  ;;  %v879_v14 = vadd.f32 %v2281_v60, %v848_v9 }
 0x15d   : > { %1836 = vrsqrt.f32 %v774_v32  ;;  %v740_v2 = vmul.f32 0.0625, %v692_v59  ;;  %v751_v15 = vmul.f32 0.0625, %v725_v0  ;;  %v889_v4 = vpack.c.bf16 %v868_v58, %v867_v55 }
 0x15e   : > { %v1825_v5 = vpop.eup %1824  ;;  %1838 = vrsqrt.f32 %v763_v57  ;;  %v849_v6 = vmul.f32 %v2274_v13, %v818_v42  ;;  %v838_v53 = vmul.f32 %v2274_v13, %v807_v33 }
 0x15f   : > { %v1827_v10 = vpop.eup %1826  ;;  %v764_v43 = vadd.f32 1e-05, %v740_v2  ;;  %v775_v38 = vadd.f32 1e-05, %v751_v15  ;;  %1748 = vmatprep.mubr.msk.bf16.mxu0 %vm511_vm0, %v889_v4  ;;  %v808_v12 = vmul.f32 %v1825_v5, %v2197_v54  ;;  %v2367_v5 = vld [vmem:[%s2632_s5] ss:$0 sm:$0xff] }
 0x160   : > { %v728_v18 = vpop.xlane.xlu1 %727  ;;  %v880_v20 = vadd.f32 %v2281_v60, %v849_v6  ;;  %v819_v16 = vmul.f32 %v1827_v10, %v2206_v23  ;;  %v869_v51 = vadd.f32 %v2281_v60, %v838_v53 }
 0x161   : > { %1840 = vrsqrt.f32 %v764_v43  ;;  %v752_v21 = vmul.f32 0.0625, %v728_v18  ;;  %v839_v22 = vmul.f32 %v2274_v13, %v808_v12 }
 0x162   : > { %v1829_v50 = vpop.eup %1828  ;;  %1842 = vrsqrt.f32 %v775_v38  ;;  %v895_v35 = vpack.c.bf16 %v880_v20, %v879_v14  ;;  %v850_v28 = vmul.f32 %v2274_v13, %v819_v16 }
 0x163   : > { %v1831_v62 = vpop.eup %1830  ;;  %v776_v24 = vadd.f32 1e-05, %v752_v21  ;;  %v870_v54 = vadd.f32 %v2281_v60, %v839_v22  ;;  %v820_v25 = vmul.f32 %v1829_v50, %v2209_v63 }
 0x164   : > { %1760 = vmatprep.mubr.msk.bf16.mxu1 %vm511_vm0, %v895_v35  ;;  %v809_v23 = vmul.f32 %v1831_v62, %v2218_v37  ;;  %v881_v3 = vadd.f32 %v2281_v60, %v850_v28 }
 0x165   : > { %1844 = vrsqrt.f32 %v776_v24  ;;  %v890_v29 = vpack.c.bf16 %v870_v54, %v869_v51  ;;  %v851_v30 = vmul.f32 %v2274_v13, %v820_v25 }
 0x166   : > { %v1833_v26 = vpop.eup %1832  ;;  %v840_v8 = vmul.f32 %v2274_v13, %v809_v23 }
 0x167   : > { %v1835_v36 = vpop.eup %1834  ;;  %1749 = vmatmul.mubr.msk.bf16.gmra.mxu0 %vm511_vm0, %v890_v29  ;;  %v882_v27 = vadd.f32 %v2281_v60, %v851_v30  ;;  %v810_v63 = vmul.f32 %v1833_v26, %v2221_v7 }
 0x168   : > { %v821_v39 = vmul.f32 %v1835_v36, %v2230_v49  ;;  %v871_v45 = vadd.f32 %v2281_v60, %v840_v8 }
 0x169   : > { %v896_v40 = vpack.c.bf16 %v882_v27, %v881_v3  ;;  %v841_v37 = vmul.f32 %v2274_v13, %v810_v63 }
 0x16a   : > { %v1837_v41 = vpop.eup %1836  ;;  %v852_v31 = vmul.f32 %v2274_v13, %v821_v39 }
 0x16b   : > { %v1839_v47 = vpop.eup %1838  ;;  %1761 = vmatmul.mubr.msk.bf16.gmra.mxu1 %vm511_vm0, %v896_v40  ;;  %v872_v46 = vadd.f32 %v2281_v60, %v841_v37  ;;  %v822_v61 = vmul.f32 %v1837_v41, %v2233_v19 }
 0x16c   : > { %v811_v7 = vmul.f32 %v1839_v47, %v2242_v1  ;;  %v883_v55 = vadd.f32 %v2281_v60, %v852_v31 }
 0x16d   : > { %v891_v48 = vpack.c.bf16 %v872_v46, %v871_v45  ;;  %v853_v49 = vmul.f32 %v2274_v13, %v822_v61 }
 0x16e   : > { %v1841_v17 = vpop.eup %1840  ;;  %v842_v57 = vmul.f32 %v2274_v13, %v811_v7 }
 0x16f   : > { %v1843_v52 = vpop.eup %1842  ;;  %1752 = vmatprep.mubr.msk.bf16.mxu0 %vm511_vm0, %v891_v48  ;;  %v884_v56 = vadd.f32 %v2281_v60, %v853_v49  ;;  %v812_v32 = vmul.f32 %v1841_v17, %v2245_v34 }
 0x170   : > { %v823_v19 = vmul.f32 %v1843_v52, %v2254_v11  ;;  %v873_v59 = vadd.f32 %v2281_v60, %v842_v57 }
 0x171   : > { %v897_v58 = vpack.c.bf16 %v884_v56, %v883_v55  ;;  %v843_v1 = vmul.f32 %v2274_v13, %v812_v32 }
 0x172   : > { %v1845_v42 = vpop.eup %1844  ;;  %v854_v33 = vmul.f32 %v2274_v13, %v823_v19 }
 0x173   : > { %1764 = vmatprep.mubr.msk.bf16.mxu1 %vm511_vm0, %v897_v58  ;;  %v874_v0 = vadd.f32 %v2281_v60, %v843_v1  ;;  %v824_v9 = vmul.f32 %v1845_v42, %v2257_v44 }
 0x174   : > { %v885_v11 = vadd.f32 %v2281_v60, %v854_v33 }
 0x175   : > { %v892_v34 = vpack.c.bf16 %v874_v0, %v873_v59  ;;  %v855_v2 = vmul.f32 %v2274_v13, %v824_v9 }
 0x177   : > { %1753 = vmatmul.mubr.msk.bf16.gmra.mxu0 %vm511_vm0, %v892_v34  ;;  %v886_v15 = vadd.f32 %v2281_v60, %v855_v2 }
 0x179   : > { %v898_v4 = vpack.c.bf16 %v886_v15, %v885_v11 }
 0x17b   : > { %1765 = vmatmul.mubr.msk.bf16.gmra.mxu1 %vm511_vm0, %v898_v4 }
 0x217   : > { %v1746_v44 = vpop.f32.mrf.mxu0 }
 0x218   : > { %v993_v6 = vadd.f32 %v1746_v44, %v2367_v5 }
 0x219   : > { %v984_v13 = vpop.f32.mrf.mxu0 }
 0x21a   : > { %v1648_v60 = vpack.c.bf16 %v993_v6, %v993_v6  ;;  %v985_v53 = vadd.f32 %v2367_v5, %v984_v13 }
 0x21b   : > { %v1747_v10 = vpop.f32.mrf.mxu0 }
 0x21c   : > { %1178 = vst.msk [vmem:[%s2374_s19 + $0x8] sm:$0xf] %vm1175_vm1, %v1648_v60  ;;  %v2379_v43 = vpack.c.bf16 %v985_v53, %v985_v53  ;;  %v996_v38 = vadd.f32 %v1747_v10, %v2367_v5  ;;  %v1758_v12 = vpop.f32.mrf.mxu1  ;;  %1204 = vrot.lane.b32.xlu1 %v1648_v60, %s1870_s20 }
 0x21d   : > { %v1041_v18 = vadd.f32 %v1758_v12, %v2367_v5  ;;  %v987_v14 = vpop.f32.mrf.mxu0 }
 0x21e   : > { %1176 = vst.msk [vmem:[%s2374_s19] sm:$0xf] %vm1175_vm1, %v2379_v43  ;;  %v1649_v20 = vpack.c.bf16 %v996_v38, %v996_v38  ;;  %v988_v16 = vadd.f32 %v2367_v5, %v987_v14  ;;  %v1032_v21 = vpop.f32.mrf.mxu1 }
 0x21f   : > { %v1660_v22 = vpack.c.bf16 %v1041_v18, %v1041_v18  ;;  %v1033_v50 = vadd.f32 %v2367_v5, %v1032_v21 }
 0x220   : > { %1179 = vst.msk [vmem:[%s2374_s19 + $0xc] sm:$0xf] %vm1175_vm1, %v1649_v20  ;;  %v1647_v35 = vpack.c.bf16 %v988_v16, %v988_v16  ;;  %v1759_v51 = vpop.f32.mrf.mxu1  ;;  %1206 = vrot.lane.b32.xlu1 %v1649_v20, %s1870_s20 }
 0x221   : > { %1190 = vst.msk [vmem:[%s2374_s19 + $0x38] sm:$0xf] %vm1175_vm1, %v1660_v22  ;;  %v1658_v62 = vpack.c.bf16 %v1033_v50, %v1033_v50  ;;  %v1044_v24 = vadd.f32 %v1759_v51, %v2367_v5  ;;  %1228 = vrot.lane.b32.xlu0 %v1660_v22, %s1870_s20 }
 0x222   : > { %1177 = vst.msk [vmem:[%s2374_s19 + $0x4] sm:$0xf] %vm1175_vm1, %v1647_v35  ;;  %v1035_v54 = vpop.f32.mrf.mxu1 }
 0x223   : > { %1188 = vst.msk [vmem:[%s2374_s19 + $0x30] sm:$0xf] %vm1175_vm1, %v1658_v62  ;;  %v1661_v25 = vpack.c.bf16 %v1044_v24, %v1044_v24  ;;  %v1036_v28 = vadd.f32 %v2367_v5, %v1035_v54 }
 0x225   : > { %1191 = vst.msk [vmem:[%s2374_s19 + $0x3c] sm:$0xf] %vm1175_vm1, %v1661_v25  ;;  %v1659_v23 = vpack.c.bf16 %v1036_v28, %v1036_v28  ;;  %1300 = vrot.lane.b32.xlu0 %v1648_v60, %s1871_s21  ;;  %1230 = vrot.lane.b32.xlu1 %v1661_v25, %s1870_s20 }
 0x227   : > { %1189 = vst.msk [vmem:[%s2374_s19 + $0x34] sm:$0xf] %vm1175_vm1, %v1659_v23  ;;  %v1750_v29 = vpop.f32.mrf.mxu0 }
 0x228   : > { %v1009_v30 = vadd.f32 %v1750_v29, %v2367_v5 }
 0x229   : > { %1324 = vrot.lane.b32.xlu0 %v1660_v22, %s1871_s21  ;;  %1302 = vrot.lane.b32.xlu1 %v1649_v20, %s1871_s21  ;;  %v1000_v26 = vpop.f32.mrf.mxu0 }
 0x22a   : > { %v2410_v36 = vpack.c.bf16 %v1009_v30, %v1009_v30  ;;  %v1001_v3 = vadd.f32 %v2367_v5, %v1000_v26 }
 0x22b   : > { %v1751_v27 = vpop.f32.mrf.mxu0  ;;  %v1762_v63 = vpop.f32.mrf.mxu1 }
 0x22c   : > { %1182 = vst.msk [vmem:[%s2374_s19 + $0x18] sm:$0xf] %vm1175_vm1, %v2410_v36  ;;  %v2416_v8 = vpack.c.bf16 %v1001_v3, %v1001_v3  ;;  %v1012_v39 = vadd.f32 %v1751_v27, %v2367_v5  ;;  %v1057_v40 = vadd.f32 %v1762_v63, %v2367_v5 }
 0x22d   : > { %1200 = vrot.lane.b32.xlu0 %v2379_v43, %s1870_s20  ;;  %1326 = vrot.lane.b32.xlu1 %v1661_v25, %s1871_s21  ;;  %v1003_v37 = vpop.f32.mrf.mxu0  ;;  %v1048_v41 = vpop.f32.mrf.mxu1 }
 0x22e   : > { %1180 = vst.msk [vmem:[%s2374_s19 + $0x10] sm:$0xf] %vm1175_vm1, %v2416_v8  ;;  %v1653_v47 = vpack.c.bf16 %v1012_v39, %v1012_v39  ;;  %v1664_v45 = vpack.c.bf16 %v1057_v40, %v1057_v40  ;;  %v1004_v46 = vadd.f32 %v2367_v5, %v1003_v37  ;;  %v1049_v61 = vadd.f32 %v2367_v5, %v1048_v41 }
 0x22f   : > { %v1763_v31 = vpop.f32.mrf.mxu1 }
 0x230   : > { %1183 = vst.msk [vmem:[%s2374_s19 + $0x1c] sm:$0xf] %vm1175_vm1, %v1653_v47  ;;  %1194 = vst.msk [vmem:[%s2374_s19 + $0x48] sm:$0xf] %vm1175_vm1, %v1664_v45  ;;  %v1651_v7 = vpack.c.bf16 %v1004_v46, %v1004_v46  ;;  %v1662_v48 = vpack.c.bf16 %v1049_v61, %v1049_v61  ;;  %v1060_v49 = vadd.f32 %v1763_v31, %v2367_v5 }
 0x231   : > { %1202 = vrot.lane.b32.xlu1 %v1647_v35, %s1870_s20  ;;  %1224 = vrot.lane.b32.xlu0 %v1658_v62, %s1870_s20  ;;  %v1051_v17 = vpop.f32.mrf.mxu1 }
 0x232   : > { %1181 = vst.msk [vmem:[%s2374_s19 + $0x14] sm:$0xf] %vm1175_vm1, %v1651_v7  ;;  %1192 = vst.msk [vmem:[%s2374_s19 + $0x40] sm:$0xf] %vm1175_vm1, %v1662_v48  ;;  %v1665_v52 = vpack.c.bf16 %v1060_v49, %v1060_v49  ;;  %v1052_v55 = vadd.f32 %v2367_v5, %v1051_v17 }
 0x234   : > { %1195 = vst.msk [vmem:[%s2374_s19 + $0x4c] sm:$0xf] %vm1175_vm1, %v1665_v52  ;;  %v1663_v56 = vpack.c.bf16 %v1052_v55, %v1052_v55 }
 0x235   : > { %1226 = vrot.lane.b32.xlu1 %v1659_v23, %s1870_s20  ;;  %1296 = vrot.lane.b32.xlu0 %v2379_v43, %s1871_s21 }
 0x236   : > { %1193 = vst.msk [vmem:[%s2374_s19 + $0x44] sm:$0xf] %vm1175_vm1, %v1663_v56 }
 0x237   : > { %v1754_v32 = vpop.f32.mrf.mxu0 }
 0x238   : > { %v1025_v57 = vadd.f32 %v1754_v32, %v2367_v5 }
 0x239   : > { %1298 = vrot.lane.b32.xlu1 %v1647_v35, %s1871_s21  ;;  %1320 = vrot.lane.b32.xlu0 %v1658_v62, %s1871_s21  ;;  %v1016_v19 = vpop.f32.mrf.mxu0 }
 0x23a   : > { %v1656_v58 = vpack.c.bf16 %v1025_v57, %v1025_v57  ;;  %v1017_v1 = vadd.f32 %v2367_v5, %v1016_v19 }
 0x23b   : > { %v1755_v42 = vpop.f32.mrf.mxu0  ;;  %v1766_v59 = vpop.f32.mrf.mxu1 }
 0x23c   : > { %1186 = vst.msk [vmem:[%s2374_s19 + $0x28] sm:$0xf] %vm1175_vm1, %v1656_v58  ;;  %v1654_v0 = vpack.c.bf16 %v1017_v1, %v1017_v1  ;;  %v1028_v9 = vadd.f32 %v1755_v42, %v2367_v5  ;;  %v1073_v33 = vadd.f32 %v1766_v59, %v2367_v5 }
 0x23d   : > { %1322 = vrot.lane.b32.xlu1 %v1659_v23, %s1871_s21  ;;  %1212 = vrot.lane.b32.xlu0 %v2410_v36, %s1870_s20  ;;  %v1019_v34 = vpop.f32.mrf.mxu0  ;;  %v1064_v2 = vpop.f32.mrf.mxu1 }
 0x23e   : > { %1184 = vst.msk [vmem:[%s2374_s19 + $0x20] sm:$0xf] %vm1175_vm1, %v1654_v0  ;;  %v1657_v11 = vpack.c.bf16 %v1028_v9, %v1028_v9  ;;  %v1668_v15 = vpack.c.bf16 %v1073_v33, %v1073_v33  ;;  %v1020_v4 = vadd.f32 %v2367_v5, %v1019_v34  ;;  %v1065_v44 = vadd.f32 %v2367_v5, %v1064_v2 }
 0x23f   : > { %v1767_v6 = vpop.f32.mrf.mxu1 }
 0x240   : > { %1187 = vst.msk [vmem:[%s2374_s19 + $0x2c] sm:$0xf] %vm1175_vm1, %v1657_v11  ;;  %1198 = vst.msk [vmem:[%s2374_s19 + $0x58] sm:$0xf] %vm1175_vm1, %v1668_v15  ;;  %v1655_v13 = vpack.c.bf16 %v1020_v4, %v1020_v4  ;;  %v1666_v60 = vpack.c.bf16 %v1065_v44, %v1065_v44  ;;  %v1076_v53 = vadd.f32 %v1767_v6, %v2367_v5 }
 0x241   : > { %1214 = vrot.lane.b32.xlu1 %v1653_v47, %s1870_s20  ;;  %1236 = vrot.lane.b32.xlu0 %v1664_v45, %s1870_s20  ;;  %v1067_v10 = vpop.f32.mrf.mxu1 }
 0x242   : > { %1185 = vst.msk [vmem:[%s2374_s19 + $0x24] sm:$0xf] %vm1175_vm1, %v1655_v13  ;;  %1196 = vst.msk [vmem:[%s2374_s19 + $0x50] sm:$0xf] %vm1175_vm1, %v1666_v60  ;;  %v1669_v43 = vpack.c.bf16 %v1076_v53, %v1076_v53  ;;  %v1068_v38 = vadd.f32 %v2367_v5, %v1067_v10 }
 0x244   : > { %1199 = vst.msk [vmem:[%s2374_s19 + $0x5c] sm:$0xf] %vm1175_vm1, %v1669_v43  ;;  %v1667_v12 = vpack.c.bf16 %v1068_v38, %v1068_v38 }
 0x245   : > { %1308 = vrot.lane.b32.xlu0 %v2410_v36, %s1871_s21  ;;  %1238 = vrot.lane.b32.xlu1 %v1665_v52, %s1870_s20 }
 0x246   : > { %1197 = vst.msk [vmem:[%s2374_s19 + $0x54] sm:$0xf] %vm1175_vm1, %v1667_v12 }
 0x249   : > { %1332 = vrot.lane.b32.xlu0 %v1664_v45, %s1871_s21  ;;  %1310 = vrot.lane.b32.xlu1 %v1653_v47, %s1871_s21 }
 0x24d   : > { %1208 = vrot.lane.b32.xlu0 %v2416_v8, %s1870_s20  ;;  %1334 = vrot.lane.b32.xlu1 %v1665_v52, %s1871_s21 }
 0x251   : > { %1210 = vrot.lane.b32.xlu1 %v1651_v7, %s1870_s20  ;;  %1232 = vrot.lane.b32.xlu0 %v1662_v48, %s1870_s20 }
 0x255   : > { %1234 = vrot.lane.b32.xlu1 %v1663_v56, %s1870_s20  ;;  %1304 = vrot.lane.b32.xlu0 %v2416_v8, %s1871_s21 }
 0x259   : > { %1306 = vrot.lane.b32.xlu1 %v1651_v7, %s1871_s21  ;;  %1328 = vrot.lane.b32.xlu0 %v1662_v48, %s1871_s21 }
 0x25d   : > { %1330 = vrot.lane.b32.xlu1 %v1663_v56, %s1871_s21  ;;  %1220 = vrot.lane.b32.xlu0 %v1656_v58, %s1870_s20 }
 0x261   : > { %1222 = vrot.lane.b32.xlu1 %v1657_v11, %s1870_s20  ;;  %1244 = vrot.lane.b32.xlu0 %v1668_v15, %s1870_s20 }
 0x265   : > { %1316 = vrot.lane.b32.xlu0 %v1656_v58, %s1871_s21  ;;  %1246 = vrot.lane.b32.xlu1 %v1669_v43, %s1870_s20 }
 0x269   : > { %1216 = vrot.lane.b32.xlu0 %v1654_v0, %s1870_s20  ;;  %1318 = vrot.lane.b32.xlu1 %v1657_v11, %s1871_s21 }
 0x26d   : > { %1218 = vrot.lane.b32.xlu1 %v1655_v13, %s1870_s20  ;;  %1240 = vrot.lane.b32.xlu0 %v1666_v60, %s1870_s20 }
 0x271   : > { %1242 = vrot.lane.b32.xlu1 %v1667_v12, %s1870_s20  ;;  %1312 = vrot.lane.b32.xlu0 %v1654_v0, %s1871_s21 }
 0x275   : > { %1314 = vrot.lane.b32.xlu1 %v1655_v13, %s1871_s21  ;;  %1336 = vrot.lane.b32.xlu0 %v1666_v60, %s1871_s21 }
 0x279   : > { %1338 = vrot.lane.b32.xlu1 %v1667_v12, %s1871_s21  ;;  %1340 = vrot.lane.b32.xlu0 %v1668_v15, %s1871_s21 }
 0x27d   : > { %1342 = vrot.lane.b32.xlu1 %v1669_v43, %s1871_s21 }
 0x28e   : > { %v1205_v5 = vpop.permute.xlu1 %1204 }
 0x28f   : > { %1274 = vst.msk [vmem:[%s2514_s14 + $0x8] sm:$0xf] %vm1175_vm1, %v1205_v5 }
 0x292   : > { %v1207_v18 = vpop.permute.xlu1 %1206 }
 0x293   : > { %1275 = vst.msk [vmem:[%s2514_s14 + $0xc] sm:$0xf] %vm1175_vm1, %v1207_v18  ;;  %v1229_v14 = vpop.permute.xlu0 %1228 }
 0x294   : > { %1286 = vst.msk [vmem:[%s2514_s14 + $0x38] sm:$0xf] %vm1175_vm1, %v1229_v14 }
 0x297   : > { %v1231_v20 = vpop.permute.xlu1 %1230  ;;  %v1301_v16 = vpop.permute.xlu0 %1300 }
 0x298   : > { %1287 = vst.msk [vmem:[%s2514_s14 + $0x3c] sm:$0xf] %vm1175_vm1, %v1231_v20  ;;  %1370 = vst.msk [vmem:[%s2526_s26 + $0x8] sm:$0xf] %vm1175_vm1, %v1301_v16 }
 0x29b   : > { %v1303_v21 = vpop.permute.xlu1 %1302  ;;  %v1325_v22 = vpop.permute.xlu0 %1324 }
 0x29c   : > { %1371 = vst.msk [vmem:[%s2526_s26 + $0xc] sm:$0xf] %vm1175_vm1, %v1303_v21  ;;  %1382 = vst.msk [vmem:[%s2526_s26 + $0x38] sm:$0xf] %vm1175_vm1, %v1325_v22 }
 0x29f   : > { %v1327_v50 = vpop.permute.xlu1 %1326  ;;  %v1201_v35 = vpop.permute.xlu0 %1200 }
 0x2a0   : > { %1383 = vst.msk [vmem:[%s2526_s26 + $0x3c] sm:$0xf] %vm1175_vm1, %v1327_v50  ;;  %1272 = vst.msk [vmem:[%s2514_s14] sm:$0xf] %vm1175_vm1, %v1201_v35 }
 0x2a3   : > { %v1203_v51 = vpop.permute.xlu1 %1202  ;;  %v1225_v62 = vpop.permute.xlu0 %1224 }
 0x2a4   : > { %1273 = vst.msk [vmem:[%s2514_s14 + $0x4] sm:$0xf] %vm1175_vm1, %v1203_v51  ;;  %1284 = vst.msk [vmem:[%s2514_s14 + $0x30] sm:$0xf] %vm1175_vm1, %v1225_v62 }
 0x2a7   : > { %v1227_v24 = vpop.permute.xlu1 %1226  ;;  %v1297_v54 = vpop.permute.xlu0 %1296 }
 0x2a8   : > { %1285 = vst.msk [vmem:[%s2514_s14 + $0x34] sm:$0xf] %vm1175_vm1, %v1227_v24  ;;  %1368 = vst.msk [vmem:[%s2526_s26] sm:$0xf] %vm1175_vm1, %v1297_v54 }
 0x2ab   : > { %v1299_v25 = vpop.permute.xlu1 %1298  ;;  %v1321_v28 = vpop.permute.xlu0 %1320 }
 0x2ac   : > { %1369 = vst.msk [vmem:[%s2526_s26 + $0x4] sm:$0xf] %vm1175_vm1, %v1299_v25  ;;  %1380 = vst.msk [vmem:[%s2526_s26 + $0x30] sm:$0xf] %vm1175_vm1, %v1321_v28 }
 0x2af   : > { %v1323_v23 = vpop.permute.xlu1 %1322  ;;  %v1213_v29 = vpop.permute.xlu0 %1212 }
 0x2b0   : > { %1381 = vst.msk [vmem:[%s2526_s26 + $0x34] sm:$0xf] %vm1175_vm1, %v1323_v23  ;;  %1278 = vst.msk [vmem:[%s2514_s14 + $0x18] sm:$0xf] %vm1175_vm1, %v1213_v29 }
 0x2b3   : > { %v1215_v30 = vpop.permute.xlu1 %1214  ;;  %v1237_v26 = vpop.permute.xlu0 %1236 }
 0x2b4   : > { %1279 = vst.msk [vmem:[%s2514_s14 + $0x1c] sm:$0xf] %vm1175_vm1, %v1215_v30  ;;  %1290 = vst.msk [vmem:[%s2514_s14 + $0x48] sm:$0xf] %vm1175_vm1, %v1237_v26 }
 0x2b7   : > { %v1239_v36 = vpop.permute.xlu1 %1238  ;;  %v1309_v3 = vpop.permute.xlu0 %1308 }
 0x2b8   : > { %1291 = vst.msk [vmem:[%s2514_s14 + $0x4c] sm:$0xf] %vm1175_vm1, %v1239_v36  ;;  %1374 = vst.msk [vmem:[%s2526_s26 + $0x18] sm:$0xf] %vm1175_vm1, %v1309_v3 }
 0x2bb   : > { %v1311_v27 = vpop.permute.xlu1 %1310  ;;  %v1333_v63 = vpop.permute.xlu0 %1332 }
 0x2bc   : > { %1375 = vst.msk [vmem:[%s2526_s26 + $0x1c] sm:$0xf] %vm1175_vm1, %v1311_v27  ;;  %1386 = vst.msk [vmem:[%s2526_s26 + $0x48] sm:$0xf] %vm1175_vm1, %v1333_v63 }
 0x2bf   : > { %v1335_v8 = vpop.permute.xlu1 %1334  ;;  %v1209_v39 = vpop.permute.xlu0 %1208 }
 0x2c0   : > { %1387 = vst.msk [vmem:[%s2526_s26 + $0x4c] sm:$0xf] %vm1175_vm1, %v1335_v8  ;;  %1276 = vst.msk [vmem:[%s2514_s14 + $0x10] sm:$0xf] %vm1175_vm1, %v1209_v39 }
 0x2c3   : > { %v1211_v40 = vpop.permute.xlu1 %1210  ;;  %v1233_v37 = vpop.permute.xlu0 %1232 }
 0x2c4   : > { %1277 = vst.msk [vmem:[%s2514_s14 + $0x14] sm:$0xf] %vm1175_vm1, %v1211_v40  ;;  %1288 = vst.msk [vmem:[%s2514_s14 + $0x40] sm:$0xf] %vm1175_vm1, %v1233_v37 }
 0x2c7   : > { %v1235_v41 = vpop.permute.xlu1 %1234  ;;  %v1305_v47 = vpop.permute.xlu0 %1304 }
 0x2c8   : > { %1289 = vst.msk [vmem:[%s2514_s14 + $0x44] sm:$0xf] %vm1175_vm1, %v1235_v41  ;;  %1372 = vst.msk [vmem:[%s2526_s26 + $0x10] sm:$0xf] %vm1175_vm1, %v1305_v47 }
 0x2cb   : > { %v1307_v45 = vpop.permute.xlu1 %1306  ;;  %v1329_v46 = vpop.permute.xlu0 %1328 }
 0x2cc   : > { %1373 = vst.msk [vmem:[%s2526_s26 + $0x14] sm:$0xf] %vm1175_vm1, %v1307_v45  ;;  %1384 = vst.msk [vmem:[%s2526_s26 + $0x40] sm:$0xf] %vm1175_vm1, %v1329_v46 }
 0x2cf   : > { %v1331_v61 = vpop.permute.xlu1 %1330  ;;  %v1221_v31 = vpop.permute.xlu0 %1220 }
 0x2d0   : > { %1385 = vst.msk [vmem:[%s2526_s26 + $0x44] sm:$0xf] %vm1175_vm1, %v1331_v61  ;;  %1282 = vst.msk [vmem:[%s2514_s14 + $0x28] sm:$0xf] %vm1175_vm1, %v1221_v31 }
 0x2d3   : > { %v1223_v7 = vpop.permute.xlu1 %1222  ;;  %v1245_v48 = vpop.permute.xlu0 %1244 }
 0x2d4   : > { %1283 = vst.msk [vmem:[%s2514_s14 + $0x2c] sm:$0xf] %vm1175_vm1, %v1223_v7  ;;  %1294 = vst.msk [vmem:[%s2514_s14 + $0x58] sm:$0xf] %vm1175_vm1, %v1245_v48 }
 0x2d7   : > { %v1247_v49 = vpop.permute.xlu1 %1246  ;;  %v1317_v17 = vpop.permute.xlu0 %1316 }
 0x2d8   : > { %1295 = vst.msk [vmem:[%s2514_s14 + $0x5c] sm:$0xf] %vm1175_vm1, %v1247_v49  ;;  %1378 = vst.msk [vmem:[%s2526_s26 + $0x28] sm:$0xf] %vm1175_vm1, %v1317_v17 }
 0x2db   : > { %v1319_v52 = vpop.permute.xlu1 %1318  ;;  %v1217_v55 = vpop.permute.xlu0 %1216 }
 0x2dc   : > { %1379 = vst.msk [vmem:[%s2526_s26 + $0x2c] sm:$0xf] %vm1175_vm1, %v1319_v52  ;;  %1280 = vst.msk [vmem:[%s2514_s14 + $0x20] sm:$0xf] %vm1175_vm1, %v1217_v55 }
 0x2df   : > { %v1219_v56 = vpop.permute.xlu1 %1218  ;;  %v1241_v32 = vpop.permute.xlu0 %1240 }
 0x2e0   : > { %1281 = vst.msk [vmem:[%s2514_s14 + $0x24] sm:$0xf] %vm1175_vm1, %v1219_v56  ;;  %1292 = vst.msk [vmem:[%s2514_s14 + $0x50] sm:$0xf] %vm1175_vm1, %v1241_v32 }
 0x2e3   : > { %v1243_v57 = vpop.permute.xlu1 %1242  ;;  %v1313_v19 = vpop.permute.xlu0 %1312 }
 0x2e4   : > { %1293 = vst.msk [vmem:[%s2514_s14 + $0x54] sm:$0xf] %vm1175_vm1, %v1243_v57  ;;  %1376 = vst.msk [vmem:[%s2526_s26 + $0x20] sm:$0xf] %vm1175_vm1, %v1313_v19 }
 0x2e7   : > { %v1315_v58 = vpop.permute.xlu1 %1314  ;;  %v1337_v1 = vpop.permute.xlu0 %1336 }
 0x2e8   : > { %1377 = vst.msk [vmem:[%s2526_s26 + $0x24] sm:$0xf] %vm1175_vm1, %v1315_v58  ;;  %1388 = vst.msk [vmem:[%s2526_s26 + $0x50] sm:$0xf] %vm1175_vm1, %v1337_v1 }
 0x2eb   : > { %v1339_v42 = vpop.permute.xlu1 %1338  ;;  %v1341_v59 = vpop.permute.xlu0 %1340 }
 0x2ec   : > { %1389 = vst.msk [vmem:[%s2526_s26 + $0x54] sm:$0xf] %vm1175_vm1, %v1339_v42  ;;  %1390 = vst.msk [vmem:[%s2526_s26 + $0x58] sm:$0xf] %vm1175_vm1, %v1341_v59 }
 0x2ef   : > { %v1343_v0 = vpop.permute.xlu1 %1342 }
 0x2f0   : > { %1391 = vst.msk [vmem:[%s2526_s26 + $0x5c] sm:$0xf] %vm1175_vm1, %v1343_v0 }
 0x2f1 PF: > { %s19_s29 = sadd.s32 1, %s1868_s29   ;;  %s2636_s27 = smov %s1864_s28 }
 0x2f2   : > { %p16_p5 = scmp.ge.s32.totalorder %s19_s29, 4   ;;  %s2637_s28 = smov %s2639_s30 }
 0x2f4   :  { %18 = sbr.rel (!%p16_p5) target bundleno = 2 (0x2), region = 101 }

// kernel: _lambda_.12
= control target key start
LH: loop header
LB: loop body
LE: loop exit
PB: predicated region body
PF: predicated region fallthrough
CT: control target
= control target key end

     0   :  { %s2747_s24 = smov 0   ;;  %s2749_s25 = smov 0   ;;  %s3697_s0 = inlined_call_operand.vmem [shape: bf16[2,192,16], index: 0, kind: input, shape index: {}]   ;;  %s3698_s1 = inlined_call_operand.vmem [shape: f32[192,16], index: 1, kind: input, shape index: {}]   ;;  %s3699_s2 = inlined_call_operand.vmem [shape: bf16[2,192,16], index: 2, kind: input, shape index: {}]   ;;  %s3700_s3 = inlined_call_operand.vmem [shape: bf16[2,192,16], index: 3, kind: input, shape index: {}]   ;;  %s3701_s4 = inlined_call_operand.vmem [shape: bf16[2,192,16], index: 4, kind: input, shape index: {}]   ;;  %s3702_s5 = inlined_call_operand.vmem [shape: bf16[16,16], index: 5, kind: input, shape index: {}]   ;;  %s3703_s6 = inlined_call_operand.vmem [shape: f32[1,16], index: 6, kind: input, shape index: {}]   ;;  %s3704_s7 = inlined_call_operand.vmem [shape: bf16[2,192,16], index: 7, kind: output, shape index: {}]  }
   0x1   :  { %s2751_s26 = smov 0   ;;  %s2753_s27 = smov 0  }
   0x2   :  { %s2755_s28 = smov 0  }
   0x3 LB: > { %s26_s29 = sadd.s32 1, %s2694_s26  ;;  %s29_s30 = sadd.s32 1, %s2698_s27  ;;  %s2702_s28 = sphi %s2755_s28, %s17_s28   ;;  %s2698_s27 = sphi %s2753_s27, %s3746_s27   ;;  %s2694_s26 = sphi %s2751_s26, %s3745_s26   ;;  %s2690_s25 = sphi %s2749_s25, %s3744_s25   ;;  %s2686_s24 = sphi %s2747_s24, %s3743_s24  }
   0x4   : > { %p27_p0 = scmp.ge.s32.totalorder %s26_s29, 2  ;;  %p2237_p1 = scmp.ge.s32.totalorder %s2702_s28, 1 }
   0x5   : > { %p306_p2 = scmp.lt.s32.totalorder %s2702_s28, 5 }
   0x6   : > { %s3748_s29 = smov (%p27_p0, %s26_s29), 0  ;;  %s3750_s30 = smov (!%p27_p0, %s29_s30), %s2698_s27 }
   0x7   : > { %p307_p3 = pnand %p2237_p1, %p306_p2  ;;  %p31_p4 = scmp.ge.s32.totalorder %s3750_s30, 2 }
   0x9   : > { %s3752_s30 = smov (%p31_p4, %s3750_s30), 0  ;;  %310 = sbr.rel (%p307_p3) target bundleno = 1367 (0x557), region = 48 }
   0xe   : > { %p371_p5 = scmp.lt.s32.totalorder %s2690_s25, 1  ;;  %v3707_v0 = vmov 0   ;;  %s370_s8 = smul.u32 12, %s2686_s24  ;;  %vm711_vm0 = vcmask 64512   ;;  %vm1060_vm1 = vcmask 523264   ;;  %vm1868_vm2 = vcmask 130048  }
   0xf   : > { %766 = vmatprep.subr.bf16.mxu0 %v3707_v0  ;;  %798 = vmatprep.mubr.bf16.mxu0 %v3707_v0  ;;  %s2705_s13 = smov 120   ;;  %vm2076_vm3 = vcmask 125952  }
  0x10   : > { %s3754_s25 = smov (!%p371_p5, %s2690_s25), 1  ;;  %967 = vmatprep.subr.bf16.mxu1 %v3707_v0  ;;  %999 = vmatprep.mubr.bf16.mxu1 %v3707_v0  ;;  %p373_p6 = scmp.lt.s32.totalorder %s370_s8, 23 }
  0x11   : > { %s2415_s9 = smul.u32 96, %s3754_s25 }
  0x12   : > { %s3756_s8 = smov (!%p373_p6, %s370_s8), 23  ;;  %s2414_s14 = smul.u32 24, %s3754_s25 }
  0x13   : > { %s2792_s12 = scalar_lea.vmem %s3700_s3, %s2415_s9  ;;  %s2924_s22 = scalar_lea.vmem %s3701_s4, %s2415_s9 }
  0x14   : > { %v443_v1 = vld [vmem:[%s2792_s12 + $0x38] sm:$0xf]  ;;  %v444_v2 = vld [vmem:[%s2792_s12 + $0x3c] sm:$0xf]  ;;  %v441_v3 = vld [vmem:[%s2792_s12 + $0x30] sm:$0xf]  ;;  %s376_s15 = sadd.s32 %s2414_s14, %s3756_s8 }
  0x15   : > { %565 = vrot.lane.b32.xlu0 %v443_v1, %s2705_s13  ;;  %v2257_v4 = vcombine.low %v443_v1, %v444_v2  ;;  %561 = vrot.lane.b32.xlu1 %v441_v3, %s2705_s13  ;;  %v442_v5 = vld [vmem:[%s2792_s12 + $0x34] sm:$0xf]  ;;  %v439_v8 = vld [vmem:[%s2792_s12 + $0x28] sm:$0xf]  ;;  %s2813_s16 = sshll.u32 %s376_s15, 2  ;;  %s2706_s25 = smov 8  }
  0x16   : > { %v2256_v7 = vcombine.low %v441_v3, %v442_v5  ;;  %v440_v9 = vld [vmem:[%s2792_s12 + $0x2c] sm:$0xf]  ;;  %v438_v11 = vld [vmem:[%s2792_s12 + $0x24] sm:$0xf]  ;;  %v437_v13 = vld [vmem:[%s2792_s12 + $0x20] sm:$0xf]  ;;  %s2824_s19 = scalar_lea.vmem %s3699_s2, %s2813_s16  ;;  %s3609_s11 = scalar_lea.vmem %s3697_s0, %s2813_s16 }
  0x17   : > { %v752_v6 = vsel %vm711_vm0, %v2257_v4, 0  ;;  %v2255_v12 = vcombine.low %v439_v8, %v440_v9  ;;  %v2827_v14 = vld [vmem:[%s2824_s19 + $0x28] sm:$0xf]  ;;  %v2830_v15 = vld [vmem:[%s2824_s19 + $0x2c] sm:$0xf]  ;;  %v2254_v21 = vcombine.low %v437_v13, %v438_v11  ;;  %s3639_s20 = scalar_lea.vmem %s3704_s7, %s2813_s16 }
  0x18   : > { %767 = vmatpush1.bf16.xpose.msra.mxu0 %v752_v6  ;;  %v749_v10 = vsel %vm711_vm0, %v2256_v7, 0  ;;  %v436_v16 = vld [vmem:[%s2792_s12 + $0x1c] sm:$0xf]  ;;  %v2249_v17 = vcombine.low %v2827_v14, %v2830_v15  ;;  %v435_v19 = vld [vmem:[%s2792_s12 + $0x18] sm:$0xf] }
  0x19   : > { %567 = vrot.lane.b32.xlu0 %v444_v2, %s2705_s13  ;;  %563 = vrot.lane.b32.xlu1 %v442_v5, %s2705_s13  ;;  %v746_v18 = vsel %vm711_vm0, %v2255_v12, 0  ;;  %v434_v20 = vld [vmem:[%s2792_s12 + $0x14] sm:$0xf]  ;;  %v433_v22 = vld [vmem:[%s2792_s12 + $0x10] sm:$0xf]  ;;  %v743_v24 = vsel %vm711_vm0, %v2254_v21, 0  ;;  %v2253_v27 = vcombine.low %v435_v19, %v436_v16 }
  0x1a   : > { %768 = vmatprep.subr.bf16.mxu0 %v3707_v0  ;;  %v432_v23 = vld [vmem:[%s2792_s12 + $0xc] sm:$0xf]  ;;  %v431_v25 = vld [vmem:[%s2792_s12 + $0x8] sm:$0xf]  ;;  %v430_v26 = vld [vmem:[%s2792_s12 + $0x4] sm:$0xf]  ;;  %v2252_v33 = vcombine.low %v433_v22, %v434_v20 }
  0x1b   : > { %v429_v28 = vld [vmem:[%s2792_s12] sm:$0xf]  ;;  %v452_v29 = vld [vmem:[%s2792_s12 + $0x5c] sm:$0xf]  ;;  %v740_v30 = vsel %vm711_vm0, %v2253_v27, 0  ;;  %v2251_v39 = vcombine.low %v431_v25, %v432_v23 }
  0x1c   : > { %v451_v31 = vld [vmem:[%s2792_s12 + $0x58] sm:$0xf]  ;;  %v450_v32 = vld [vmem:[%s2792_s12 + $0x54] sm:$0xf]  ;;  %v449_v34 = vld [vmem:[%s2792_s12 + $0x50] sm:$0xf]  ;;  %v2250_v45 = vcombine.low %v429_v28, %v430_v26 }
  0x1d   : > { %559 = vrot.lane.b32.xlu1 %v440_v9, %s2705_s13  ;;  %557 = vrot.lane.b32.xlu0 %v439_v8, %s2705_s13  ;;  %v448_v35 = vld [vmem:[%s2792_s12 + $0x4c] sm:$0xf]  ;;  %v737_v36 = vsel %vm711_vm0, %v2252_v33, 0  ;;  %v447_v37 = vld [vmem:[%s2792_s12 + $0x48] sm:$0xf]  ;;  %v734_v42 = vsel %vm711_vm0, %v2251_v39, 0  ;;  %v2261_v51 = vcombine.low %v451_v31, %v452_v29  ;;  %v2260_v56 = vcombine.low %v449_v34, %v450_v32 }
  0x1e   : > { %v446_v38 = vld [vmem:[%s2792_s12 + $0x44] sm:$0xf]  ;;  %v445_v40 = vld [vmem:[%s2792_s12 + $0x40] sm:$0xf]  ;;  %v420_v44 = vld [vmem:[%s2824_s19 + $0xc] sm:$0xf]  ;;  %v2259_v58 = vcombine.low %v447_v37, %v448_v35 }
  0x1f   : > { %v418_v41 = vld [vmem:[%s2824_s19 + $0x4] sm:$0xf]  ;;  %v417_v43 = vld [vmem:[%s2824_s19] sm:$0xf]  ;;  %v419_v46 = vld [vmem:[%s2824_s19 + $0x8] sm:$0xf]  ;;  %v2258_v61 = vcombine.low %v445_v40, %v446_v38 }
  0x20   : > { %769 = vmatpush1.bf16.xpose.msra.mxu0 %v749_v10  ;;  %v422_v47 = vld [vmem:[%s2824_s19 + $0x14] sm:$0xf]  ;;  %v731_v48 = vsel %vm711_vm0, %v2250_v45, 0  ;;  %v421_v49 = vld [vmem:[%s2824_s19 + $0x10] sm:$0xf]  ;;  %v764_v54 = vsel %vm711_vm0, %v2261_v51, 0  ;;  %v2244_v2 = vcombine.low %v417_v43, %v418_v41  ;;  %v2245_v5 = vcombine.low %v419_v46, %v420_v44 }
  0x21   : > { %770 = vmatprep.subr.bf16.mxu0 %v3707_v0  ;;  %555 = vrot.lane.b32.xlu1 %v438_v11, %s2705_s13  ;;  %v2890_v50 = vld [vmem:[%s2824_s19 + $0x1c] sm:$0xf]  ;;  %v2894_v52 = vld [vmem:[%s2824_s19 + $0x18] sm:$0xf]  ;;  %v2901_v53 = vld [vmem:[%s2824_s19 + $0x24] sm:$0xf]  ;;  %v2246_v8 = vcombine.low %v421_v49, %v422_v47 }
  0x22   : > { %553 = vrot.lane.b32.xlu0 %v437_v13, %s2705_s13  ;;  %v2905_v55 = vld [vmem:[%s2824_s19 + $0x20] sm:$0xf]  ;;  %v761_v57 = vsel %vm711_vm0, %v2260_v56, 0  ;;  %v758_v59 = vsel %vm711_vm0, %v2259_v58, 0  ;;  %v467_v60 = vld [vmem:[%s2924_s22 + $0x38] sm:$0xf]  ;;  %v2247_v21 = vcombine.low %v2894_v52, %v2890_v50 }
  0x23   : > { %v755_v62 = vsel %vm711_vm0, %v2258_v61, 0  ;;  %v465_v63 = vld [vmem:[%s2924_s22 + $0x30] sm:$0xf]  ;;  %v463_v1 = vld [vmem:[%s2924_s22 + $0x28] sm:$0xf]  ;;  %s2239_s12 = sshll.u32 %s3756_s8, 3 }
  0x24   : > { %v464_v3 = vld [vmem:[%s2924_s22 + $0x2c] sm:$0xf]  ;;  %v462_v4 = vld [vmem:[%s2924_s22 + $0x24] sm:$0xf]  ;;  %v2942_v6 = vld [vmem:[%s2924_s22 + $0x1c] sm:$0xf]  ;;  %s3616_s15 = scalar_lea.vmem %s3698_s1, %s2239_s12 }
  0x25   : > { %551 = vrot.lane.b32.xlu1 %v436_v16, %s2705_s13  ;;  %v2949_v7 = vld [vmem:[%s2924_s22 + $0x10] sm:$0xf]  ;;  %v2954_v9 = vld [vmem:[%s2924_s22 + $0x8] sm:$0xf]  ;;  %v468_v10 = vld [vmem:[%s2924_s22 + $0x3c] sm:$0xf] }
  0x26   : > { %549 = vrot.lane.b32.xlu0 %v435_v19, %s2705_s13  ;;  %v2299_v12 = vcombine.low %v467_v60, %v468_v10  ;;  %v2963_v13 = vld [vmem:[%s2924_s22 + $0xc] sm:$0xf]  ;;  %v466_v16 = vld [vmem:[%s2924_s22 + $0x34] sm:$0xf]  ;;  %v3004_v45 = vld [vmem:[%s2924_s22 + $0x50] sm:$0xf] }
  0x27   : > { %v2298_v19 = vcombine.low %v465_v63, %v466_v16 }
  0x28   : > { %771 = vmatpush1.bf16.xpose.msra.mxu0 %v746_v18 }
  0x29   : > { %772 = vmatprep.subr.bf16.mxu0 %v3707_v0  ;;  %547 = vrot.lane.b32.xlu1 %v434_v20, %s2705_s13 }
  0x2a   : > { %545 = vrot.lane.b32.xlu0 %v433_v22, %s2705_s13 }
  0x2d   : > { %543 = vrot.lane.b32.xlu1 %v432_v23, %s2705_s13 }
  0x2e   : > { %541 = vrot.lane.b32.xlu0 %v431_v25, %s2705_s13  ;;  %v453_v25 = vld [vmem:[%s2924_s22] sm:$0xf] }
  0x30   : > { %773 = vmatpush1.bf16.xpose.msra.mxu0 %v743_v24  ;;  %v2297_v24 = vcombine.low %v463_v1, %v464_v3 }
  0x31   : > { %774 = vmatprep.subr.bf16.mxu0 %v3707_v0  ;;  %539 = vrot.lane.b32.xlu1 %v430_v26, %s2705_s13  ;;  %v461_v26 = vld [vmem:[%s2924_s22 + $0x20] sm:$0xf] }
  0x32   : > { %537 = vrot.lane.b32.xlu0 %v429_v28, %s2705_s13 }
  0x35   : > { %583 = vrot.lane.b32.xlu1 %v452_v29, %s2705_s13  ;;  %v2296_v29 = vcombine.low %v461_v26, %v462_v4 }
  0x36   : > { %581 = vrot.lane.b32.xlu0 %v451_v31, %s2705_s13  ;;  %v459_v31 = vld [vmem:[%s2924_s22 + $0x18] sm:$0xf] }
  0x38   : > { %775 = vmatpush1.bf16.xpose.msra.mxu0 %v740_v30  ;;  %v475_v30 = vld [vmem:[%s2924_s22 + $0x58] sm:$0xf] }
  0x39   : > { %776 = vmatprep.subr.bf16.mxu0 %v3707_v0  ;;  %579 = vrot.lane.b32.xlu1 %v450_v32, %s2705_s13  ;;  %v2248_v32 = vcombine.low %v2905_v55, %v2901_v53 }
  0x3a   : > { %577 = vrot.lane.b32.xlu0 %v449_v34, %s2705_s13 }
  0x3d   : > { %575 = vrot.lane.b32.xlu1 %v448_v35, %s2705_s13 }
  0x3e   : > { %573 = vrot.lane.b32.xlu0 %v447_v37, %s2705_s13  ;;  %v458_v37 = vld [vmem:[%s2924_s22 + $0x14] sm:$0xf] }
  0x40   : > { %777 = vmatpush1.bf16.xpose.msra.mxu0 %v737_v36  ;;  %v476_v36 = vld [vmem:[%s2924_s22 + $0x5c] sm:$0xf] }
  0x41   : > { %778 = vmatprep.subr.bf16.mxu0 %v3707_v0  ;;  %571 = vrot.lane.b32.xlu1 %v446_v38, %s2705_s13  ;;  %v2295_v38 = vcombine.low %v459_v31, %v2942_v6 }
  0x42   : > { %569 = vrot.lane.b32.xlu0 %v445_v40, %s2705_s13  ;;  %v454_v40 = vld [vmem:[%s2924_s22 + $0x4] sm:$0xf] }
  0x45   : > { %491 = vrot.lane.b32.xlu1 %v418_v41, %s2705_s13 }
  0x46   : > { %489 = vrot.lane.b32.xlu0 %v417_v43, %s2705_s13 }
  0x48   : > { %779 = vmatpush1.bf16.xpose.msra.mxu0 %v734_v42  ;;  %v2294_v42 = vcombine.low %v2949_v7, %v458_v37 }
  0x49   : > { %780 = vmatprep.subr.bf16.mxu0 %v3707_v0  ;;  %495 = vrot.lane.b32.xlu1 %v420_v44, %s2705_s13 }
  0x4a   : > { %493 = vrot.lane.b32.xlu0 %v419_v46, %s2705_s13 }
  0x4d   : > { %499 = vrot.lane.b32.xlu1 %v422_v47, %s2705_s13  ;;  %v2293_v47 = vcombine.low %v2954_v9, %v2963_v13 }
  0x4e   : > { %497 = vrot.lane.b32.xlu0 %v421_v49, %s2705_s13  ;;  %v2292_v49 = vcombine.low %v453_v25, %v454_v40 }
  0x50   : > { %781 = vmatpush1.bf16.xpose.msra.mxu0 %v731_v48 }
  0x51   : > { %790 = vmatprep.subr.bf16.mxu0 %v3707_v0  ;;  %503 = vrot.lane.b32.xlu1 %v2890_v50, %s2705_s13  ;;  %v2303_v50 = vcombine.low %v475_v30, %v476_v36 }
  0x52   : > { %501 = vrot.lane.b32.xlu0 %v2894_v52, %s2705_s13 }
  0x55   : > { %507 = vrot.lane.b32.xlu1 %v2901_v53, %s2705_s13 }
  0x56   : > { %505 = vrot.lane.b32.xlu0 %v2905_v55, %s2705_s13 }
  0x58   : > { %791 = vmatpush2.bf16.xpose.msra.mxu0 %v764_v54 }
  0x59   : > { %792 = vmatprep.subr.bf16.mxu0 %v3707_v0  ;;  %511 = vrot.lane.b32.xlu1 %v2830_v15, %s2705_s13 }
  0x5a   : > { %509 = vrot.lane.b32.xlu0 %v2827_v14, %s2705_s13 }
  0x5d   : > { %637 = vrot.lane.b32.xlu1 %v467_v60, %s2705_s13 }
  0x5e   : > { %639 = vrot.lane.b32.xlu0 %v468_v10, %s2705_s13 }
  0x60   : > { %793 = vmatpush2.bf16.xpose.msra.mxu0 %v761_v57 }
  0x61   : > { %794 = vmatprep.subr.bf16.mxu0 %v3707_v0  ;;  %633 = vrot.lane.b32.xlu1 %v465_v63, %s2705_s13 }
  0x62   : > { %635 = vrot.lane.b32.xlu0 %v466_v16, %s2705_s13 }
  0x65   : > { %629 = vrot.lane.b32.xlu1 %v463_v1, %s2705_s13 }
  0x66   : > { %625 = vrot.lane.b32.xlu0 %v461_v26, %s2705_s13 }
  0x68   : > { %795 = vmatpush2.bf16.xpose.msra.mxu0 %v758_v59 }
  0x69   : > { %796 = vmatprep.subr.bf16.mxu0 %v3707_v0  ;;  %631 = vrot.lane.b32.xlu1 %v464_v3, %s2705_s13 }
  0x6a   : > { %621 = vrot.lane.b32.xlu0 %v459_v31, %s2705_s13 }
  0x6d   : > { %627 = vrot.lane.b32.xlu1 %v462_v4, %s2705_s13 }
  0x6e   : > { %619 = vrot.lane.b32.xlu0 %v458_v37, %s2705_s13 }
  0x70   : > { %797 = vmatpush2.bf16.xpose.msra.mxu0 %v755_v62 }
  0x71   : > { %1559 = vmatprep.subr.bf16.mxu0 %v3707_v0  ;;  %623 = vrot.lane.b32.xlu1 %v2942_v6, %s2705_s13 }
  0x72   : > { %611 = vrot.lane.b32.xlu0 %v454_v40, %s2705_s13 }
  0x75   : > { %617 = vrot.lane.b32.xlu1 %v2949_v7, %s2705_s13 }
  0x76   : > { %649 = vrot.lane.b32.xlu0 %v3004_v45, %s2705_s13 }
  0x77   : > { %2262 = vmatmul.mubr.msk.bf16.vlgmr.msra.gmra.mxu0 %vm711_vm0, %v2244_v2 }
  0x78   : > { %808 = vmatprep.mubr.bf16.mxu0 %v3707_v0  ;;  %1560 = vmatpush1.bf16.msra.mxu0 %v2299_v12 }
  0x79   : > { %613 = vrot.lane.b32.xlu1 %v2954_v9, %s2705_s13  ;;  %1561 = vmatprep.subr.bf16.mxu0 %v3707_v0 }
  0x7c   : > { %1562 = vmatpush1.bf16.msra.mxu0 %v2298_v19 }
  0x7d   : > { %615 = vrot.lane.b32.xlu1 %v2963_v13, %s2705_s13  ;;  %1563 = vmatprep.subr.bf16.mxu0 %v3707_v0 }
  0x7f   : > { %2263 = vmatmul.mubr.msk.bf16.gmra.mxu0 %vm711_vm0, %v2245_v5 }
  0x80   : > { %818 = vmatprep.mubr.bf16.mxu0 %v3707_v0  ;;  %1564 = vmatpush1.bf16.msra.mxu0 %v2297_v24  ;;  %v3038_v24 = vld [vmem:[%s2924_s22 + $0x54] sm:$0xf] }
  0x81   : > { %609 = vrot.lane.b32.xlu1 %v453_v25, %s2705_s13  ;;  %1565 = vmatprep.subr.bf16.mxu0 %v3707_v0 }
  0x84   : > { %1566 = vmatpush1.bf16.msra.mxu0 %v2296_v29 }
  0x85   : > { %653 = vrot.lane.b32.xlu1 %v475_v30, %s2705_s13  ;;  %1567 = vmatprep.subr.bf16.mxu0 %v3707_v0 }
  0x87   : > { %v566_v11 = vpop.permute.xlu0 %565  ;;  %2264 = vmatmul.mubr.msk.bf16.gmra.mxu0 %vm711_vm0, %v2246_v8  ;;  %v562_v18 = vpop.permute.xlu1 %561 }
  0x88   : > { %828 = vmatprep.mubr.bf16.mxu0 %v3707_v0  ;;  %1568 = vmatpush1.bf16.msra.mxu0 %v2295_v38 }
  0x89   : > { %655 = vrot.lane.b32.xlu1 %v476_v36, %s2705_s13  ;;  %1569 = vmatprep.subr.bf16.mxu0 %v3707_v0 }
  0x8b   : > { %v568_v20 = vpop.permute.xlu0 %567  ;;  %v564_v27 = vpop.permute.xlu1 %563 }
  0x8c   : > { %v2281_v22 = vcombine.low %v566_v11, %v568_v20  ;;  %v2280_v28 = vcombine.low %v562_v18, %v564_v27  ;;  %1570 = vmatpush1.bf16.msra.mxu0 %v2294_v42 }
  0x8d   : > { %1571 = vmatprep.subr.bf16.mxu0 %v3707_v0 }
  0x8e   : > { %v953_v23 = vsel %vm711_vm0, %v2281_v22, 0  ;;  %v950_v35 = vsel %vm711_vm0, %v2280_v28, 0  ;;  %v2302_v28 = vcombine.low %v3004_v45, %v3038_v24 }
  0x8f   : > { %968 = vmatpush1.bf16.xpose.msra.mxu1 %v953_v23  ;;  %2265 = vmatmul.mubr.msk.bf16.gmra.mxu0 %vm711_vm0, %v2247_v21  ;;  %v560_v33 = vpop.permute.xlu1 %559  ;;  %v558_v34 = vpop.permute.xlu0 %557 }
  0x90   : > { %838 = vmatprep.mubr.bf16.mxu0 %v3707_v0  ;;  %969 = vmatprep.subr.bf16.mxu1 %v3707_v0  ;;  %v2279_v39 = vcombine.low %v558_v34, %v560_v33 }
  0x91   : > { %1572 = vmatpush1.bf16.msra.mxu0 %v2293_v47 }
  0x92   : > { %v947_v41 = vsel %vm711_vm0, %v2279_v39, 0  ;;  %1573 = vmatprep.subr.bf16.mxu0 %v3707_v0 }
  0x93   : > { %v556_v43 = vpop.permute.xlu1 %555 }
  0x94   : > { %v554_v44 = vpop.permute.xlu0 %553 }
  0x95   : > { %v2278_v46 = vcombine.low %v554_v44, %v556_v43  ;;  %1574 = vmatpush1.bf16.msra.mxu0 %v2292_v49 }
  0x96   : > { %1583 = vmatprep.subr.bf16.mxu0 %v3707_v0 }
  0x97   : > { %2266 = vmatmul.mubr.msk.bf16.gmra.mxu0 %vm711_vm0, %v2248_v32  ;;  %970 = vmatpush1.bf16.xpose.msra.mxu1 %v950_v35  ;;  %v944_v48 = vsel %vm711_vm0, %v2278_v46, 0  ;;  %v552_v14 = vpop.permute.xlu1 %551 }
  0x98   : > { %848 = vmatprep.mubr.bf16.mxu0 %v3707_v0  ;;  %971 = vmatprep.subr.bf16.mxu1 %v3707_v0  ;;  %v550_v15 = vpop.permute.xlu0 %549 }
  0x99   : > { %1584 = vmatpush2.bf16.msra.mxu0 %v2303_v50 }
  0x9a   : > { %1585 = vmatprep.subr.bf16.mxu0 %v3707_v0 }
  0x9b   : > { %v548_v52 = vpop.permute.xlu1 %547 }
  0x9c   : > { %v546_v53 = vpop.permute.xlu0 %545 }
  0x9d   : > { %v2276_v54 = vcombine.low %v546_v53, %v548_v52  ;;  %1586 = vmatpush2.bf16.msra.mxu0 %v2302_v28 }
  0x9e   : > { %1587 = vmatprep.subr.bf16.mxu0 %v3707_v0 }
  0x9f   : > { %2267 = vmatmul.mubr.msk.bf16.gmra.mxu0 %vm711_vm0, %v2249_v17  ;;  %972 = vmatpush1.bf16.xpose.msra.mxu1 %v947_v41  ;;  %v2277_v17 = vcombine.low %v550_v15, %v552_v14  ;;  %v938_v55 = vsel %vm711_vm0, %v2276_v54, 0  ;;  %v544_v56 = vpop.permute.xlu1 %543 }
  0xa0   : > { %973 = vmatprep.subr.bf16.mxu1 %v3707_v0  ;;  %v542_v57 = vpop.permute.xlu0 %541 }
  0xa1   : > { %v941_v51 = vsel %vm711_vm0, %v2277_v17, 0  ;;  %v2275_v58 = vcombine.low %v542_v57, %v544_v56 }
  0xa3   : > { %v935_v59 = vsel %vm711_vm0, %v2275_v58, 0  ;;  %v540_v60 = vpop.permute.xlu1 %539 }
  0xa4   : > { %v538_v61 = vpop.permute.xlu0 %537 }
  0xa5   : > { %v2274_v62 = vcombine.low %v538_v61, %v540_v60 }
  0xa7   : > { %974 = vmatpush1.bf16.xpose.msra.mxu1 %v944_v48  ;;  %v932_v63 = vsel %vm711_vm0, %v2274_v62, 0  ;;  %v584_v1 = vpop.permute.xlu1 %583 }
  0xa8   : > { %975 = vmatprep.subr.bf16.mxu1 %v3707_v0  ;;  %v582_v2 = vpop.permute.xlu0 %581 }
  0xa9   : > { %v2285_v3 = vcombine.low %v582_v2, %v584_v1 }
  0xab   : > { %v965_v4 = vsel %vm711_vm0, %v2285_v3, 0  ;;  %v580_v5 = vpop.permute.xlu1 %579 }
  0xac   : > { %v578_v6 = vpop.permute.xlu0 %577 }
  0xad   : > { %v2284_v7 = vcombine.low %v578_v6, %v580_v5 }
  0xaf   : > { %976 = vmatpush1.bf16.xpose.msra.mxu1 %v941_v51  ;;  %v962_v8 = vsel %vm711_vm0, %v2284_v7, 0  ;;  %v576_v9 = vpop.permute.xlu1 %575 }
  0xb0   : > { %977 = vmatprep.subr.bf16.mxu1 %v3707_v0  ;;  %v574_v10 = vpop.permute.xlu0 %573 }
  0xb1   : > { %v2283_v11 = vcombine.low %v574_v10, %v576_v9 }
  0xb3   : > { %v959_v12 = vsel %vm711_vm0, %v2283_v11, 0  ;;  %v572_v13 = vpop.permute.xlu1 %571 }
  0xb4   : > { %v570_v16 = vpop.permute.xlu0 %569 }
  0xb5   : > { %v2282_v18 = vcombine.low %v570_v16, %v572_v13 }
  0xb7   : > { %978 = vmatpush1.bf16.xpose.msra.mxu1 %v938_v55  ;;  %v492_v19 = vpop.permute.xlu1 %491  ;;  %v956_v21 = vsel %vm711_vm0, %v2282_v18, 0 }
  0xb8   : > { %979 = vmatprep.subr.bf16.mxu1 %v3707_v0  ;;  %v490_v20 = vpop.permute.xlu0 %489 }
  0xb9   : > { %v2268_v25 = vcombine.low %v490_v20, %v492_v19 }
  0xbb   : > { %v496_v22 = vpop.permute.xlu1 %495 }
  0xbc   : > { %v494_v23 = vpop.permute.xlu0 %493 }
  0xbd   : > { %v2269_v31 = vcombine.low %v494_v23, %v496_v22 }
  0xbf   : > { %980 = vmatpush1.bf16.xpose.msra.mxu1 %v935_v59  ;;  %v500_v26 = vpop.permute.xlu1 %499 }
  0xc0   : > { %981 = vmatprep.subr.bf16.mxu1 %v3707_v0  ;;  %v498_v27 = vpop.permute.xlu0 %497 }
  0xc1   : > { %v2270_v36 = vcombine.low %v498_v27, %v500_v26 }
  0xc3   : > { %v504_v29 = vpop.permute.xlu1 %503 }
  0xc4   : > { %v502_v30 = vpop.permute.xlu0 %501 }
  0xc5   : > { %v2271_v43 = vcombine.low %v502_v30, %v504_v29 }
  0xc7   : > { %982 = vmatpush1.bf16.xpose.msra.mxu1 %v932_v63  ;;  %v508_v32 = vpop.permute.xlu1 %507 }
  0xc8   : > { %991 = vmatprep.subr.bf16.mxu1 %v3707_v0  ;;  %v506_v33 = vpop.permute.xlu0 %505 }
  0xc9   : > { %v2272_v48 = vcombine.low %v506_v33, %v508_v32 }
  0xcb   : > { %v512_v34 = vpop.permute.xlu1 %511 }
  0xcc   : > { %v510_v35 = vpop.permute.xlu0 %509 }
  0xcd   : > { %v2273_v51 = vcombine.low %v510_v35, %v512_v34 }
  0xcf   : > { %992 = vmatpush2.bf16.xpose.msra.mxu1 %v965_v4  ;;  %v638_v37 = vpop.permute.xlu1 %637 }
  0xd0   : > { %993 = vmatprep.subr.bf16.mxu1 %v3707_v0  ;;  %v640_v38 = vpop.permute.xlu0 %639 }
  0xd1   : > { %v2317_v39 = vcombine.low %v638_v37, %v640_v38 }
  0xd3   : > { %v634_v40 = vpop.permute.xlu1 %633 }
  0xd4   : > { %v636_v41 = vpop.permute.xlu0 %635 }
  0xd5   : > { %v2316_v42 = vcombine.low %v634_v40, %v636_v41 }
  0xd7   : > { %994 = vmatpush2.bf16.xpose.msra.mxu1 %v962_v8  ;;  %v630_v44 = vpop.permute.xlu1 %629 }
  0xd8   : > { %995 = vmatprep.subr.bf16.mxu1 %v3707_v0  ;;  %v626_v46 = vpop.permute.xlu0 %625 }
  0xdb   : > { %v632_v45 = vpop.permute.xlu1 %631 }
  0xdc   : > { %v2315_v47 = vcombine.low %v630_v44, %v632_v45  ;;  %v622_v15 = vpop.permute.xlu0 %621 }
  0xdf   : > { %996 = vmatpush2.bf16.xpose.msra.mxu1 %v959_v12  ;;  %v628_v49 = vpop.permute.xlu1 %627 }
  0xe0   : > { %997 = vmatprep.subr.bf16.mxu1 %v3707_v0  ;;  %v2314_v14 = vcombine.low %v626_v46, %v628_v49  ;;  %v620_v54 = vpop.permute.xlu0 %619 }
  0xe3   : > { %v624_v17 = vpop.permute.xlu1 %623 }
  0xe4   : > { %v2313_v50 = vcombine.low %v622_v15, %v624_v17  ;;  %v612_v4 = vpop.permute.xlu0 %611 }
  0xe7   : > { %998 = vmatpush2.bf16.xpose.msra.mxu1 %v956_v21  ;;  %v618_v52 = vpop.permute.xlu1 %617 }
  0xe8   : > { %1706 = vmatprep.subr.bf16.mxu1 %v3707_v0  ;;  %v2312_v55 = vcombine.low %v618_v52, %v620_v54 }
  0xeb   : > { %v614_v53 = vpop.permute.xlu1 %613 }
  0xee   : > { %2286 = vmatmul.mubr.msk.bf16.vlgmr.msra.gmra.mxu1 %vm711_vm0, %v2268_v25 }
  0xef   : > { %1009 = vmatprep.mubr.bf16.mxu1 %v3707_v0  ;;  %1707 = vmatpush1.bf16.msra.mxu1 %v2317_v39  ;;  %v616_v56 = vpop.permute.xlu1 %615 }
  0xf0   : > { %1708 = vmatprep.subr.bf16.mxu1 %v3707_v0  ;;  %v2311_v57 = vcombine.low %v614_v53, %v616_v56 }
  0xf3   : > { %1709 = vmatpush1.bf16.msra.mxu1 %v2316_v42  ;;  %v610_v60 = vpop.permute.xlu1 %609 }
  0xf4   : > { %1710 = vmatprep.subr.bf16.mxu1 %v3707_v0  ;;  %v2310_v7 = vcombine.low %v610_v60, %v612_v4 }
  0xf6   : > { %2287 = vmatmul.mubr.msk.bf16.gmra.mxu1 %vm711_vm0, %v2269_v31 }
  0xf7   : > { %1019 = vmatprep.mubr.bf16.mxu1 %v3707_v0  ;;  %1711 = vmatpush1.bf16.msra.mxu1 %v2315_v47  ;;  %v654_v2 = vpop.permute.xlu1 %653 }
  0xf8   : > { %1712 = vmatprep.subr.bf16.mxu1 %v3707_v0 }
  0xfb   : > { %1713 = vmatpush1.bf16.msra.mxu1 %v2314_v14  ;;  %v656_v9 = vpop.permute.xlu1 %655 }
  0xfc   : > { %1714 = vmatprep.subr.bf16.mxu1 %v3707_v0  ;;  %v2321_v11 = vcombine.low %v654_v2, %v656_v9 }
  0xfe   : > { %2288 = vmatmul.mubr.msk.bf16.gmra.mxu1 %vm711_vm0, %v2270_v36 }
  0xff   : > { %1029 = vmatprep.mubr.bf16.mxu1 %v3707_v0  ;;  %1715 = vmatpush1.bf16.msra.mxu1 %v2313_v50  ;;  %v3148_v50 = vld [vmem:[%s2924_s22 + $0x48] sm:$0xf] }
 0x100   : > { %1716 = vmatprep.subr.bf16.mxu1 %v3707_v0 }
 0x103   : > { %1717 = vmatpush1.bf16.msra.mxu1 %v2312_v55 }
 0x104   : > { %1718 = vmatprep.subr.bf16.mxu1 %v3707_v0 }
 0x106   : > { %2289 = vmatmul.mubr.msk.bf16.gmra.mxu1 %vm711_vm0, %v2271_v43 }
 0x107   : > { %1039 = vmatprep.mubr.bf16.mxu1 %v3707_v0  ;;  %1719 = vmatpush1.bf16.msra.mxu1 %v2311_v57 }
 0x108   : > { %1720 = vmatprep.subr.bf16.mxu1 %v3707_v0 }
 0x10b   : > { %1721 = vmatpush1.bf16.msra.mxu1 %v2310_v7 }
 0x10c   : > { %1730 = vmatprep.subr.bf16.mxu1 %v3707_v0 }
 0x10e   : > { %2290 = vmatmul.mubr.msk.bf16.gmra.mxu1 %vm711_vm0, %v2272_v48 }
 0x10f   : > { %1049 = vmatprep.mubr.bf16.mxu1 %v3707_v0  ;;  %1731 = vmatpush2.bf16.msra.mxu1 %v2321_v11 }
 0x110   : > { %1732 = vmatprep.subr.bf16.mxu1 %v3707_v0 }
 0x116   : > { %2291 = vmatmul.mubr.msk.bf16.gmra.mxu1 %vm711_vm0, %v2273_v51  ;;  %v3151_v51 = vld [vmem:[%s2924_s22 + $0x4c] sm:$0xf] }
 0x117   : > { %v2301_v52 = vcombine.low %v3148_v50, %v3151_v51 }
 0x119   : > { %1588 = vmatpush2.bf16.msra.mxu0 %v2301_v52 }
 0x11a   : > { %1589 = vmatprep.subr.bf16.mxu0 %v3707_v0 }
 0x137   : > { %v3060_v58 = vpop.f32.mrf.mxu0 }
 0x139   : > { %v3062_v59 = vpop.f32.mrf.mxu0 }
 0x13a   : > { %v1061_v61 = vsel %vm1060_vm1, %v3062_v59, -inf }
 0x13b   : > { %v3067_v62 = vpop.f32.mrf.mxu0  ;;  %v1062_v63 = vmax.f32 %v3060_v58, %v1061_v61 }
 0x13d   : > { %1063 = vmax.xlane.f32.xlu1 %v1062_v63  ;;  %v3070_v1 = vpop.f32.mrf.mxu0 }
 0x13e   : > { %v1065_v3 = vsel %vm1060_vm1, %v3070_v1, -inf }
 0x13f   : > { %v3074_v5 = vpop.f32.mrf.mxu0  ;;  %v1066_v6 = vmax.f32 %v3067_v62, %v1065_v3 }
 0x141   : > { %1067 = vmax.xlane.f32.xlu0 %v1066_v6  ;;  %v3077_v8 = vpop.f32.mrf.mxu0 }
 0x142   : > { %v1069_v10 = vsel %vm1060_vm1, %v3077_v8, -inf }
 0x143   : > { %v3082_v12 = vpop.f32.mrf.mxu0  ;;  %v1070_v13 = vmax.f32 %v3074_v5, %v1069_v10 }
 0x145   : > { %1071 = vmax.xlane.f32.xlu1 %v1070_v13  ;;  %v3085_v16 = vpop.f32.mrf.mxu0 }
 0x146   : > { %v1073_v18 = vsel %vm1060_vm1, %v3085_v16, -inf }
 0x147   : > { %v3090_v19 = vpop.f32.mrf.mxu0  ;;  %v1074_v20 = vmax.f32 %v3082_v12, %v1073_v18 }
 0x149   : > { %1075 = vmax.xlane.f32.xlu0 %v1074_v20  ;;  %v3093_v21 = vpop.f32.mrf.mxu0 }
 0x14a   : > { %v1077_v22 = vsel %vm1060_vm1, %v3093_v21, -inf }
 0x14b   : > { %v3097_v23 = vpop.f32.mrf.mxu0  ;;  %v1078_v25 = vmax.f32 %v3090_v19, %v1077_v22 }
 0x14d   : > { %1079 = vmax.xlane.f32.xlu1 %v1078_v25  ;;  %v3100_v26 = vpop.f32.mrf.mxu0 }
 0x14e   : > { %v1081_v27 = vsel %vm1060_vm1, %v3100_v26, -inf }
 0x14f   : > { %v3104_v28 = vpop.f32.mrf.mxu0  ;;  %v1082_v29 = vmax.f32 %v3097_v23, %v1081_v27 }
 0x151   : > { %1083 = vmax.xlane.f32.xlu0 %v1082_v29  ;;  %v3107_v30 = vpop.f32.mrf.mxu0 }
 0x152   : > { %v1085_v31 = vsel %vm1060_vm1, %v3107_v30, -inf }
 0x153   : > { %v3111_v32 = vpop.f32.mrf.mxu0  ;;  %v1086_v33 = vmax.f32 %v3104_v28, %v1085_v31 }
 0x154   : > { %3718 = vst [vmem:[#allocation2_spill] sm:$0xff] %v3111_v32 }
 0x155   : > { %1087 = vmax.xlane.f32.xlu0 %v1086_v33  ;;  %v3114_v34 = vpop.f32.mrf.mxu0 }
 0x156   : > { %v1089_v35 = vsel %vm1060_vm1, %v3114_v34, -inf }
 0x157   : > { %v3118_v36 = vpop.f32.mrf.mxu0  ;;  %v1090_v37 = vmax.f32 %v3111_v32, %v1089_v35 }
 0x158   : > { %3719 = vst [vmem:[#allocation3_spill] sm:$0xff] %v3118_v36 }
 0x159   : > { %1091 = vmax.xlane.f32.xlu1 %v1090_v37  ;;  %v3121_v38 = vpop.f32.mrf.mxu0 }
 0x15a   : > { %v1093_v39 = vsel %vm1060_vm1, %v3121_v38, -inf }
 0x15b   : > { %v3125_v40 = vpop.f32.mrf.mxu0  ;;  %v1094_v41 = vmax.f32 %v3118_v36, %v1093_v39 }
 0x15c   : > { %3720 = vst [vmem:[#allocation4_spill] sm:$0xff] %v3125_v40 }
 0x15d   : > { %1095 = vmax.xlane.f32.xlu0 %v1094_v41  ;;  %v3128_v42 = vpop.f32.mrf.mxu0 }
 0x15e   : > { %3721 = vst [vmem:[#allocation5_spill] sm:$0xff] %v3128_v42  ;;  %v1097_v43 = vsel %vm1060_vm1, %v3128_v42, -inf }
 0x15f   : > { %v3132_v44 = vpop.f32.mrf.mxu0  ;;  %v1098_v45 = vmax.f32 %v3125_v40, %v1097_v43 }
 0x160   : > { %3722 = vst [vmem:[#allocation6_spill] sm:$0xff] %v3132_v44 }
 0x161   : > { %1099 = vmax.xlane.f32.xlu1 %v1098_v45  ;;  %v3135_v46 = vpop.f32.mrf.mxu0 }
 0x162   : > { %3723 = vst [vmem:[#allocation7_spill] sm:$0xff] %v3135_v46  ;;  %v1101_v47 = vsel %vm1060_vm1, %v3135_v46, -inf }
 0x163   : > { %v3139_v48 = vpop.f32.mrf.mxu0  ;;  %v1102_v49 = vmax.f32 %v3132_v44, %v1101_v47 }
 0x164   : > { %3724 = vst [vmem:[#allocation8_spill] sm:$0xff] %v3139_v48 }
 0x165   : > { %1103 = vmax.xlane.f32.xlu0 %v1102_v49  ;;  %v3142_v14 = vpop.f32.mrf.mxu0 }
 0x166   : > { %3725 = vst [vmem:[#allocation9_spill] sm:$0xff] %v3142_v14  ;;  %v1105_v15 = vsel %vm1060_vm1, %v3142_v14, -inf }
 0x167   : > { %v1106_v17 = vmax.f32 %v3139_v48, %v1105_v15 }
 0x169   : > { %1107 = vmax.xlane.f32.xlu1 %v1106_v17 }
 0x17a   : > { %651 = vrot.lane.b32.xlu1 %v3038_v24, %s2705_s13 }
 0x1ae   : > { %v3158_v53 = vpop.f32.mrf.mxu1 }
 0x1b0   : > { %v3160_v54 = vpop.f32.mrf.mxu1 }
 0x1b1   : > { %v1109_v55 = vsel %vm1060_vm1, %v3160_v54, -inf }
 0x1b2   : > { %v3164_v56 = vpop.f32.mrf.mxu1  ;;  %v1110_v57 = vmax.f32 %v3158_v53, %v1109_v55 }
 0x1b4   : > { %v3167_v60 = vpop.f32.mrf.mxu1  ;;  %1111 = vmax.xlane.f32.xlu0 %v1110_v57 }
 0x1b5   : > { %v1113_v24 = vsel %vm1060_vm1, %v3167_v60, -inf }
 0x1b6   : > { %v3171_v61 = vpop.f32.mrf.mxu1  ;;  %v1114_v63 = vmax.f32 %v3164_v56, %v1113_v24 }
 0x1b8   : > { %v3174_v2 = vpop.f32.mrf.mxu1  ;;  %1115 = vmax.xlane.f32.xlu1 %v1114_v63 }
 0x1b9   : > { %v1117_v3 = vsel %vm1060_vm1, %v3174_v2, -inf }
 0x1ba   : > { %v3178_v4 = vpop.f32.mrf.mxu1  ;;  %v1118_v6 = vmax.f32 %v3171_v61, %v1117_v3 }
 0x1bc   : > { %v3181_v7 = vpop.f32.mrf.mxu1  ;;  %1119 = vmax.xlane.f32.xlu0 %v1118_v6 }
 0x1bd   : > { %v1121_v9 = vsel %vm1060_vm1, %v3181_v7, -inf }
 0x1be   : > { %v3185_v10 = vpop.f32.mrf.mxu1  ;;  %v1122_v11 = vmax.f32 %v3178_v4, %v1121_v9 }
 0x1c0   : > { %v3188_v13 = vpop.f32.mrf.mxu1  ;;  %1123 = vmax.xlane.f32.xlu0 %v1122_v11 }
 0x1c1   : > { %v1125_v18 = vsel %vm1060_vm1, %v3188_v13, -inf }
 0x1c2   : > { %v3192_v20 = vpop.f32.mrf.mxu1  ;;  %v1126_v22 = vmax.f32 %v3185_v10, %v1125_v18 }
 0x1c4   : > { %v3195_v25 = vpop.f32.mrf.mxu1  ;;  %1127 = vmax.xlane.f32.xlu1 %v1126_v22 }
 0x1c5   : > { %v1129_v27 = vsel %vm1060_vm1, %v3195_v25, -inf }
 0x1c6   : > { %v3199_v29 = vpop.f32.mrf.mxu1  ;;  %v1130_v31 = vmax.f32 %v3192_v20, %v1129_v27  ;;  %v3241_v27 = vpop.xlane.xlu1 %1063 }
 0x1c8   : > { %v3202_v33 = vpop.f32.mrf.mxu1  ;;  %1131 = vmax.xlane.f32.xlu0 %v1130_v31 }
 0x1c9   : > { %v1133_v35 = vsel %vm1060_vm1, %v3202_v33, -inf }
 0x1ca   : > { %v3206_v37 = vpop.f32.mrf.mxu1  ;;  %v1134_v39 = vmax.f32 %v3199_v29, %v1133_v35 }
 0x1cc   : > { %v3209_v41 = vpop.f32.mrf.mxu1  ;;  %1135 = vmax.xlane.f32.xlu1 %v1134_v39 }
 0x1cd   : > { %v1137_v43 = vsel %vm1060_vm1, %v3209_v41, -inf }
 0x1ce   : > { %v3213_v45 = vpop.f32.mrf.mxu1  ;;  %v1138_v47 = vmax.f32 %v3206_v37, %v1137_v43  ;;  %v3244_v35 = vpop.xlane.xlu1 %1071 }
 0x1d0   : > { %v3216_v49 = vpop.f32.mrf.mxu1  ;;  %1139 = vmax.xlane.f32.xlu0 %v1138_v47 }
 0x1d1   : > { %v1141_v15 = vsel %vm1060_vm1, %v3216_v49, -inf }
 0x1d2   : > { %v3220_v17 = vpop.f32.mrf.mxu1  ;;  %v1142_v52 = vmax.f32 %v3213_v45, %v1141_v15 }
 0x1d4   : > { %v3223_v55 = vpop.f32.mrf.mxu1  ;;  %1143 = vmax.xlane.f32.xlu1 %v1142_v52  ;;  %v650_v52 = vpop.permute.xlu0 %649 }
 0x1d5   : > { %v1145_v57 = vsel %vm1060_vm1, %v3223_v55, -inf }
 0x1d6   : > { %v3227_v24 = vpop.f32.mrf.mxu1  ;;  %v1146_v63 = vmax.f32 %v3220_v17, %v1145_v57  ;;  %v3246_v39 = vpop.xlane.xlu1 %1079 }
 0x1d8   : > { %v3230_v3 = vpop.f32.mrf.mxu1  ;;  %1147 = vmax.xlane.f32.xlu0 %v1146_v63 }
 0x1d9   : > { %v1149_v6 = vsel %vm1060_vm1, %v3230_v3, -inf }
 0x1da   : > { %v3234_v9 = vpop.f32.mrf.mxu1  ;;  %v1150_v11 = vmax.f32 %v3227_v24, %v1149_v6  ;;  %v3260_v6 = vld [vmem:[%s2924_s22 + $0x44] sm:$0xf] }
 0x1dc   : > { %v3237_v18 = vpop.f32.mrf.mxu1  ;;  %1151 = vmax.xlane.f32.xlu1 %v1150_v11  ;;  %v3263_v11 = vld [vmem:[%s2924_s22 + $0x40] sm:$0xf] }
 0x1dd   : > { %v1153_v22 = vsel %vm1060_vm1, %v3237_v18, -inf }
 0x1de   : > { %v1154_v31 = vmax.f32 %v3234_v9, %v1153_v22  ;;  %v3267_v22 = vpop.xlane.xlu0 %1067 }
 0x1e0   : > { %1155 = vmax.xlane.f32.xlu0 %v1154_v31 }
 0x1e2   : > { %v3248_v43 = vpop.xlane.xlu1 %1091  ;;  %v3269_v31 = vpop.xlane.xlu0 %1075 }
 0x1e6   : > { %v3271_v48 = vpop.xlane.xlu0 %1083 }
 0x1ea   : > { %v3252_v47 = vpop.xlane.xlu1 %1099  ;;  %v3273_v14 = vpop.xlane.xlu0 %1087 }
 0x1eb   : > { %3726 = vst [vmem:[#allocation10_spill] sm:$0xff] %v3252_v47 }
 0x1ed   : > { %647 = vrot.lane.b32.xlu1 %v3151_v51, %s2705_s13  ;;  %v2300_v51 = vcombine.low %v3263_v11, %v3260_v6 }
 0x1ef   : > { %1590 = vmatpush2.bf16.msra.mxu0 %v2300_v51 }
 0x1f2   : > { %v3254_v15 = vpop.xlane.xlu1 %1107 }
 0x1f3   : > { %3727 = vst [vmem:[#allocation11_spill] sm:$0xff] %v3254_v15 }
 0x1f6   : > { %v652_v57 = vpop.permute.xlu1 %651  ;;  %645 = vrot.lane.b32.xlu0 %v3148_v50, %s2705_s13  ;;  %v3275_v50 = vpop.xlane.xlu0 %1095 }
 0x1f7   : > { %v2320_v63 = vcombine.low %v650_v52, %v652_v57 }
 0x1f9   : > { %1733 = vmatpush2.bf16.msra.mxu1 %v2320_v63 }
 0x1fa   : > { %1734 = vmatprep.subr.bf16.mxu1 %v3707_v0  ;;  %v3277_v52 = vpop.xlane.xlu0 %1103 }
 0x1fb   : > { %3728 = vst [vmem:[#allocation12_spill] sm:$0xff] %v3277_v52 }
 0x23d   : > { %v1112_v57 = vpop.xlane.xlu0 %1111 }
 0x23e   : > { %v1181_v63 = vsub.f32 %v3158_v53, %v1112_v57  ;;  %v1182_v0 = vsub.f32 %v3160_v54, %v1112_v57 }
 0x240   : > { %v1253_v15 = vmul.f32 1.442695, %v1181_v63  ;;  %v1255_v44 = vmul.f32 1.442695, %v1182_v0 }
 0x241   : > { %v1116_v51 = vpop.xlane.xlu1 %1115 }
 0x242   : > { %2520 = vpow2.f32 %v1253_v15  ;;  %v1183_v40 = vsub.f32 %v3164_v56, %v1116_v51  ;;  %v1184_v46 = vsub.f32 %v3167_v60, %v1116_v51 }
 0x243   : > { %2522 = vpow2.f32 %v1255_v44 }
 0x244   : > { %v1257_v42 = vmul.f32 1.442695, %v1183_v40  ;;  %v1259_v47 = vmul.f32 1.442695, %v1184_v46 }
 0x245   : > { %v1120_v36 = vpop.xlane.xlu0 %1119 }
 0x246   : > { %2524 = vpow2.f32 %v1257_v42  ;;  %v1185_v52 = vsub.f32 %v3171_v61, %v1120_v36  ;;  %v1186_v32 = vsub.f32 %v3174_v2, %v1120_v36 }
 0x247   : > { %2526 = vpow2.f32 %v1259_v47 }
 0x248   : > { %v1261_v53 = vmul.f32 1.442695, %v1185_v52  ;;  %v1263_v54 = vmul.f32 1.442695, %v1186_v32 }
 0x249   : > { %v1124_v57 = vpop.xlane.xlu0 %1123 }
 0x24a   : > { %2528 = vpow2.f32 %v1261_v53  ;;  %v1187_v0 = vsub.f32 %v3178_v4, %v1124_v57  ;;  %v1188_v56 = vsub.f32 %v3181_v7, %v1124_v57 }
 0x24b   : > { %2530 = vpow2.f32 %v1263_v54 }
 0x24c   : > { %v1265_v60 = vmul.f32 1.442695, %v1187_v0  ;;  %v1267_v44 = vmul.f32 1.442695, %v1188_v56 }
 0x24d   : > { %v1128_v40 = vpop.xlane.xlu1 %1127 }
 0x24e   : > { %2532 = vpow2.f32 %v1265_v60  ;;  %v1189_v42 = vsub.f32 %v3185_v10, %v1128_v40  ;;  %v1190_v46 = vsub.f32 %v3188_v13, %v1128_v40 }
 0x24f   : > { %v3289_v61 = vpop.eup %2520  ;;  %2534 = vpow2.f32 %v1267_v44 }
 0x250   : > { %v3291_v36 = vpop.eup %2522  ;;  %v1269_v32 = vmul.f32 1.442695, %v1189_v42  ;;  %v1271_v2 = vmul.f32 1.442695, %v1190_v46 }
 0x251   : > { %v1132_v47 = vpop.xlane.xlu0 %1131  ;;  %v1349_v4 = vsel %vm1060_vm1, %v3291_v36, 0.0 }
 0x252   : > { %2536 = vpow2.f32 %v1269_v32  ;;  %v1191_v7 = vsub.f32 %v3192_v20, %v1132_v47  ;;  %v1192_v15 = vsub.f32 %v3195_v25, %v1132_v47  ;;  %v1350_v10 = vadd.f32 %v3289_v61, %v1349_v4 }
 0x253   : > { %v3298_v52 = vpop.eup %2524  ;;  %2538 = vpow2.f32 %v1271_v2 }
 0x254   : > { %v3300_v13 = vpop.eup %2526  ;;  %v1273_v63 = vmul.f32 1.442695, %v1191_v7  ;;  %v1275_v51 = vmul.f32 1.442695, %v1192_v15  ;;  %1351 = vadd.xlane.f32.xlu0 %v1350_v10 }
 0x255   : > { %v1136_v53 = vpop.xlane.xlu1 %1135  ;;  %v1353_v54 = vsel %vm1060_vm1, %v3300_v13, 0.0 }
 0x256   : > { %2540 = vpow2.f32 %v1273_v63  ;;  %v1193_v57 = vsub.f32 %v3199_v29, %v1136_v53  ;;  %v1194_v20 = vsub.f32 %v3202_v33, %v1136_v53  ;;  %v1354_v25 = vadd.f32 %v3298_v52, %v1353_v54 }
 0x257   : > { %v3307_v0 = vpop.eup %2528  ;;  %2542 = vpow2.f32 %v1275_v51 }
 0x258   : > { %v3309_v56 = vpop.eup %2530  ;;  %v1277_v60 = vmul.f32 1.442695, %v1193_v57  ;;  %v1279_v44 = vmul.f32 1.442695, %v1194_v20  ;;  %1355 = vadd.xlane.f32.xlu0 %v1354_v25 }
 0x259   : > { %v1140_v40 = vpop.xlane.xlu0 %1139  ;;  %v1357_v42 = vsel %vm1060_vm1, %v3309_v56, 0.0 }
 0x25a   : > { %2544 = vpow2.f32 %v1277_v60  ;;  %v1195_v46 = vsub.f32 %v3206_v37, %v1140_v40  ;;  %v1196_v29 = vsub.f32 %v3209_v41, %v1140_v40  ;;  %v1358_v33 = vadd.f32 %v3307_v0, %v1357_v42 }
 0x25b   : > { %v3316_v32 = vpop.eup %2532  ;;  %2546 = vpow2.f32 %v1279_v44 }
 0x25c   : > { %v3318_v2 = vpop.eup %2534  ;;  %v1281_v47 = vmul.f32 1.442695, %v1195_v46  ;;  %v1283_v4 = vmul.f32 1.442695, %v1196_v29  ;;  %1359 = vadd.xlane.f32.xlu0 %v1358_v33 }
 0x25d   : > { %v1361_v7 = vsel %vm1060_vm1, %v3318_v2, 0.0  ;;  %v1144_v53 = vpop.xlane.xlu1 %1143 }
 0x25e   : > { %2548 = vpow2.f32 %v1281_v47  ;;  %v1362_v15 = vadd.f32 %v3316_v32, %v1361_v7 }
 0x25f   : > { %v3323_v10 = vpop.eup %2536  ;;  %2550 = vpow2.f32 %v1283_v4 }
 0x260   : > { %v3325_v37 = vpop.eup %2538  ;;  %1363 = vadd.xlane.f32.xlu0 %v1362_v15 }
 0x261   : > { %v1365_v41 = vsel %vm1060_vm1, %v3325_v37, 0.0  ;;  %v1148_v57 = vpop.xlane.xlu0 %1147 }
 0x262   : > { %v1366_v63 = vadd.f32 %v3323_v10, %v1365_v41 }
 0x263   : > { %v3330_v51 = vpop.eup %2540 }
 0x264   : > { %v3332_v54 = vpop.eup %2542  ;;  %1367 = vadd.xlane.f32.xlu0 %v1366_v63 }
 0x265   : > { %v1369_v20 = vsel %vm1060_vm1, %v3332_v54, 0.0  ;;  %v1152_v44 = vpop.xlane.xlu1 %1151 }
 0x266   : > { %v1370_v25 = vadd.f32 %v3330_v51, %v1369_v20  ;;  %v3730_v20 = vmov 0  }
 0x267   : > { %v3337_v60 = vpop.eup %2544 }
 0x268   : > { %3729 = vst [vmem:[#allocation13_spill] sm:$0xff] %v3337_v60  ;;  %v3339_v40 = vpop.eup %2546  ;;  %1371 = vadd.xlane.f32.xlu1 %v1370_v25  ;;  %v1157_v25 = vsub.f32 %v3060_v58, %v3241_v27  ;;  %v1199_v58 = vsub.f32 %v3220_v17, %v1148_v57 }
 0x269   : > { %v1156_v42 = vpop.xlane.xlu0 %1155  ;;  %v1373_v46 = vsel %vm1060_vm1, %v3339_v40, 0.0  ;;  %v648_v47 = vpop.permute.xlu1 %647 }
 0x26a   : > { %v1374_v29 = vadd.f32 %v3337_v60, %v1373_v46  ;;  %v1198_v46 = vsub.f32 %v3216_v49, %v1144_v53  ;;  %v1201_v60 = vsub.f32 %v3227_v24, %v1152_v44  ;;  %v1162_v24 = vsub.f32 %v3077_v8, %v3244_v35 }
 0x26b   : > { %v3344_v33 = vpop.eup %2548  ;;  %v1166_v8 = vsub.f32 %v3093_v21, %v3246_v39 }
 0x26c   : > { %v3346_v4 = vpop.eup %2550  ;;  %1375 = vadd.xlane.f32.xlu0 %v1374_v29  ;;  %v1158_v29 = vsub.f32 %v3062_v59, %v3241_v27  ;;  %v1161_v27 = vsub.f32 %v3074_v5, %v3244_v35  ;;  %v1293_v17 = vmul.f32 1.442695, %v1201_v60  ;;  %v1164_v5 = vsub.f32 %v3085_v16, %v3269_v31 }
 0x26d   : > { %v1377_v7 = vsel %vm1060_vm1, %v3346_v4, 0.0  ;;  %v646_v15 = vpop.permute.xlu0 %645  ;;  %v1165_v60 = vsub.f32 %v3090_v19, %v3246_v39  ;;  %v1168_v16 = vsub.f32 %v3100_v26, %v3271_v48  ;;  %v1170_v19 = vsub.f32 %v3107_v30, %v3273_v14 }
 0x26e   : > { %v1378_v41 = vadd.f32 %v3344_v33, %v1377_v7  ;;  %v2319_v63 = vcombine.low %v646_v15, %v648_v47  ;;  %v1197_v47 = vsub.f32 %v3213_v45, %v1144_v53  ;;  %v1205_v7 = vmul.f32 1.442695, %v1157_v25 }
 0x26f   : > { %v1200_v15 = vsub.f32 %v3223_v55, %v1148_v57  ;;  %v1204_v45 = vsub.f32 %v3237_v18, %v1156_v42  ;;  %v1160_v55 = vsub.f32 %v3070_v1, %v3267_v22  ;;  %v1203_v53 = vsub.f32 %v3234_v9, %v1156_v42 }
 0x270   : > { %1379 = vadd.xlane.f32.xlu1 %v1378_v41  ;;  %1735 = vmatpush2.bf16.msra.mxu1 %v2319_v63  ;;  %v1287_v41 = vmul.f32 1.442695, %v1198_v46  ;;  %v1202_v63 = vsub.f32 %v3230_v3, %v1152_v44  ;;  %2552 = vpow2.f32 %v1205_v7  ;;  %v1163_v1 = vsub.f32 %v3082_v12, %v3269_v31 }
 0x271   : > { %1736 = vmatprep.subr.bf16.mxu1 %v3730_v20  ;;  %v1285_v20 = vmul.f32 1.442695, %v1197_v47  ;;  %v1291_v49 = vmul.f32 1.442695, %v1200_v15  ;;  %v1299_v57 = vmul.f32 1.442695, %v1204_v45  ;;  %v1167_v12 = vsub.f32 %v3097_v23, %v3271_v48 }
 0x272   : > { %2554 = vpow2.f32 %v1287_v41  ;;  %v1295_v59 = vmul.f32 1.442695, %v1202_v63  ;;  %v1211_v18 = vmul.f32 1.442695, %v1160_v55  ;;  %v1297_v9 = vmul.f32 1.442695, %v1203_v53 }
 0x273   : > { %v1215_v44 = vmul.f32 1.442695, %v1162_v24  ;;  %v1217_v35 = vmul.f32 1.442695, %v1163_v1  ;;  %v1219_v42 = vmul.f32 1.442695, %v1164_v5  ;;  %v1169_v23 = vsub.f32 %v3104_v28, %v3273_v14 }
 0x274   : > { %v1221_v31 = vmul.f32 1.442695, %v1165_v60  ;;  %v1223_v21 = vmul.f32 1.442695, %v1166_v8  ;;  %v1225_v46 = vmul.f32 1.442695, %v1167_v12  ;;  %v1172_v48 = vsub.f32 %v3114_v34, %v3248_v43 }
 0x275   : > { %v1227_v26 = vmul.f32 1.442695, %v1168_v16  ;;  %v1231_v47 = vmul.f32 1.442695, %v1170_v19  ;;  %v1174_v15 = vsub.f32 %v3121_v38, %v3275_v50  ;;  %v1229_v41 = vmul.f32 1.442695, %v1169_v23 }
 0x276   : > { %v3731_v63 = vld [vmem:[#allocation2_spill] sm:$0xff]  ;;  %v3739_v19 = vld [vmem:[#allocation11_spill] sm:$0xff] }
 0x277   : > { %v1171_v34 = vsub.f32 %v3731_v63, %v3248_v43  ;;  %v3733_v38 = vld [vmem:[#allocation10_spill] sm:$0xff]  ;;  %v3736_v43 = vld [vmem:[#allocation7_spill] sm:$0xff]  ;;  %v3741_v63 = vld [vmem:[#allocation8_spill] sm:$0xff] }
 0x278   : > { %v3738_v8 = vld [vmem:[#allocation6_spill] sm:$0xff] }
 0x27d   : > { %v3390_v25 = vpop.eup %2552 }
 0x27f   : > { %v3392_v39 = vpop.eup %2554 }
 0x280   : > { %v1381_v28 = vsel %vm1060_vm1, %v3392_v39, 0.0 }
 0x281   : > { %643 = vrot.lane.b32.xlu1 %v3260_v6, %s2705_s13  ;;  %v1207_v6 = vmul.f32 1.442695, %v1158_v29 }
 0x282   : > { %641 = vrot.lane.b32.xlu0 %v3263_v11, %s2705_s13  ;;  %v1159_v11 = vsub.f32 %v3067_v62, %v3267_v22  ;;  %v1289_v62 = vmul.f32 1.442695, %v1199_v58  ;;  %v1213_v22 = vmul.f32 1.442695, %v1161_v27  ;;  %v1239_v27 = vmul.f32 1.442695, %v1174_v15 }
 0x283   : > { %2556 = vpow2.f32 %v1207_v6 }
 0x284   : > { %v1209_v3 = vmul.f32 1.442695, %v1159_v11  ;;  %2558 = vpow2.f32 %v1285_v20  ;;  %v1235_v11 = vmul.f32 1.442695, %v1172_v48  ;;  %v3732_v20 = vld [vmem:[#allocation3_spill] sm:$0xff] }
 0x285   : > { %2560 = vpow2.f32 %v1291_v49  ;;  %v1173_v58 = vsub.f32 %v3732_v20, %v3275_v50 }
 0x286   : > { %2562 = vpow2.f32 %v1295_v59  ;;  %v3734_v59 = vld [vmem:[#allocation5_spill] sm:$0xff] }
 0x287   : > { %2564 = vpow2.f32 %v1209_v3  ;;  %v1176_v45 = vsub.f32 %v3734_v59, %v3733_v38  ;;  %v1237_v1 = vmul.f32 1.442695, %v1173_v58 }
 0x288   : > { %2566 = vpow2.f32 %v1289_v62  ;;  %v3735_v62 = vld [vmem:[#allocation12_spill] sm:$0xff] }
 0x289   : > { %2568 = vpow2.f32 %v1293_v17  ;;  %v1178_v17 = vsub.f32 %v3736_v43, %v3735_v62 }
 0x28a   : > { %2570 = vpow2.f32 %v1299_v57  ;;  %v1233_v57 = vmul.f32 1.442695, %v1171_v34  ;;  %v1179_v34 = vsub.f32 %v3741_v63, %v3739_v19 }
 0x28b   : > { %2572 = vpow2.f32 %v1211_v18 }
 0x28c   : > { %2574 = vpow2.f32 %v1213_v22  ;;  %v3737_v22 = vld [vmem:[#allocation4_spill] sm:$0xff] }
 0x28d   : > { %2576 = vpow2.f32 %v1297_v9  ;;  %v1175_v5 = vsub.f32 %v3737_v22, %v3733_v38 }
 0x28e   : > { %2578 = vpow2.f32 %v1215_v44  ;;  %v1243_v44 = vmul.f32 1.442695, %v1176_v45 }
 0x28f   : > { %2580 = vpow2.f32 %v1217_v35  ;;  %v1177_v35 = vsub.f32 %v3738_v8, %v3735_v62  ;;  %v1249_v62 = vmul.f32 1.442695, %v1179_v34 }
 0x290   : > { %v3396_v29 = vpop.eup %2556  ;;  %2582 = vpow2.f32 %v1219_v42 }
 0x291   : > { %v3400_v30 = vpop.eup %2558  ;;  %2584 = vpow2.f32 %v1221_v31  ;;  %v1301_v60 = vsel %vm1060_vm1, %v3396_v29, 0.0  ;;  %v1247_v31 = vmul.f32 1.442695, %v1178_v17 }
 0x292   : > { %v3402_v7 = vpop.eup %2560  ;;  %2586 = vpow2.f32 %v1223_v21  ;;  %v1382_v55 = vadd.f32 %v3400_v30, %v1381_v28  ;;  %v3740_v21 = vld [vmem:[#allocation9_spill] sm:$0xff]  ;;  %v1302_v15 = vadd.f32 %v3390_v25, %v1301_v60 }
 0x293   : > { %v3408_v14 = vpop.eup %2562  ;;  %2588 = vpow2.f32 %v1225_v46  ;;  %v1385_v53 = vsel %vm1060_vm1, %v3402_v7, 0.0  ;;  %v1180_v46 = vsub.f32 %v3740_v21, %v3739_v19 }
 0x294   : > { %v3412_v6 = vpop.eup %2564  ;;  %2590 = vpow2.f32 %v1227_v26  ;;  %v1389_v50 = vsel %vm1060_vm1, %v3408_v14, 0.0 }
 0x295   : > { %v3416_v49 = vpop.eup %2566  ;;  %2592 = vpow2.f32 %v1231_v47  ;;  %v1241_v47 = vmul.f32 1.442695, %v1175_v5  ;;  %v1251_v58 = vmul.f32 1.442695, %v1180_v46 }
 0x296   : > { %v3421_v3 = vpop.eup %2568  ;;  %2594 = vpow2.f32 %v1229_v41  ;;  %v1386_v12 = vadd.f32 %v3416_v49, %v1385_v53  ;;  %v1245_v41 = vmul.f32 1.442695, %v1177_v35 }
 0x297   : > { %v3429_v24 = vpop.eup %2570  ;;  %2596 = vpow2.f32 %v1235_v11  ;;  %v1390_v42 = vadd.f32 %v3421_v3, %v1389_v50 }
 0x298   : > { %v3431_v18 = vpop.eup %2572  ;;  %2598 = vpow2.f32 %v1239_v27  ;;  %v1393_v23 = vsel %vm1060_vm1, %v3429_v24, 0.0 }
 0x299   : > { %v3437_v9 = vpop.eup %2574  ;;  %2600 = vpow2.f32 %v1233_v57  ;;  %v1305_v59 = vsel %vm1060_vm1, %v3431_v18, 0.0 }
 0x29a   : > { %v3443_v16 = vpop.eup %2576  ;;  %2602 = vpow2.f32 %v1237_v1  ;;  %v1306_v17 = vadd.f32 %v3412_v6, %v1305_v59 }
 0x29b   : > { %v3449_v26 = vpop.eup %2578  ;;  %2604 = vpow2.f32 %v1243_v44  ;;  %v1394_v11 = vadd.f32 %v3443_v16, %v1393_v23 }
 0x29c   : > { %v3451_v48 = vpop.eup %2580  ;;  %2606 = vpow2.f32 %v1247_v31  ;;  %v1309_v38 = vsel %vm1060_vm1, %v3449_v26, 0.0 }
 0x29d   : > { %v3454_v28 = vpop.eup %2582  ;;  %2608 = vpow2.f32 %v1241_v47  ;;  %v1310_v43 = vadd.f32 %v3437_v9, %v1309_v38 }
 0x29e   : > { %v3459_v20 = vpop.eup %2584  ;;  %2610 = vpow2.f32 %v1245_v41  ;;  %v1313_v57 = vsel %vm1060_vm1, %v3454_v28, 0.0 }
 0x29f   : > { %v3465_v45 = vpop.eup %2586  ;;  %2612 = vpow2.f32 %v1251_v58  ;;  %v1314_v60 = vadd.f32 %v3451_v48, %v1313_v57 }
 0x2a0   : > { %v1317_v50 = vsel %vm1060_vm1, %v3465_v45, 0.0  ;;  %2614 = vpow2.f32 %v1249_v62 }
 0x2a1   : > { %1383 = vadd.xlane.f32.xlu0 %v1382_v55  ;;  %v3467_v55 = vpop.eup %2588  ;;  %v1318_v5 = vadd.f32 %v3459_v20, %v1317_v50 }
 0x2a2   : > { %v3469_v27 = vpop.eup %2590 }
 0x2a3   : > { %v3473_v53 = vpop.eup %2592  ;;  %v1321_v8 = vsel %vm1060_vm1, %v3469_v27, 0.0 }
 0x2a4   : > { %v3479_v1 = vpop.eup %2594  ;;  %v1325_v44 = vsel %vm1060_vm1, %v3473_v53, 0.0  ;;  %v1322_v19 = vadd.f32 %v3467_v55, %v1321_v8 }
 0x2a5   : > { %1387 = vadd.xlane.f32.xlu1 %v1386_v12  ;;  %1391 = vadd.xlane.f32.xlu0 %v1390_v42  ;;  %v3481_v22 = vpop.eup %2596  ;;  %v1326_v31 = vadd.f32 %v3479_v1, %v1325_v44 }
 0x2a6   : > { %v3489_v35 = vpop.eup %2598  ;;  %v1329_v23 = vsel %vm1060_vm1, %v3481_v22, 0.0 }
 0x2a7   : > { %v3491_v12 = vpop.eup %2600  ;;  %v1333_v46 = vsel %vm1060_vm1, %v3489_v35, 0.0 }
 0x2a8   : > { %v3493_v42 = vpop.eup %2602  ;;  %v1330_v63 = vadd.f32 %v3491_v12, %v1329_v23 }
 0x2a9   : > { %1303 = vadd.xlane.f32.xlu1 %v1302_v15  ;;  %1395 = vadd.xlane.f32.xlu0 %v1394_v11  ;;  %v3497_v21 = vpop.eup %2604  ;;  %v1334_v41 = vadd.f32 %v3493_v42, %v1333_v46 }
 0x2aa   : > { %v3503_v47 = vpop.eup %2606  ;;  %v1337_v58 = vsel %vm1060_vm1, %v3497_v21, 0.0 }
 0x2ab   : > { %v3505_v15 = vpop.eup %2608  ;;  %v1341_v11 = vsel %vm1060_vm1, %v3503_v47, 0.0 }
 0x2ac   : > { %v3509_v34 = vpop.eup %2610  ;;  %v1338_v62 = vadd.f32 %v3505_v15, %v1337_v58 }
 0x2ad   : > { %1311 = vadd.xlane.f32.xlu1 %v1310_v43  ;;  %1307 = vadd.xlane.f32.xlu0 %v1306_v17  ;;  %v3515_v38 = vpop.eup %2612  ;;  %v1342_v59 = vadd.f32 %v3509_v34, %v1341_v11 }
 0x2ae   : > { %v3519_v43 = vpop.eup %2614  ;;  %v1345_v17 = vsel %vm1060_vm1, %v3515_v38, 0.0 }
 0x2af   : > { %v1346_v50 = vadd.f32 %v3519_v43, %v1345_v17 }
 0x2b1   : > { %1319 = vadd.xlane.f32.xlu1 %v1318_v5  ;;  %1315 = vadd.xlane.f32.xlu0 %v1314_v60 }
 0x2b5   : > { %1327 = vadd.xlane.f32.xlu1 %v1326_v31  ;;  %1323 = vadd.xlane.f32.xlu0 %v1322_v19 }
 0x2b9   : > { %1335 = vadd.xlane.f32.xlu1 %v1334_v41  ;;  %1331 = vadd.xlane.f32.xlu0 %v1330_v63 }
 0x2bd   : > { %1343 = vadd.xlane.f32.xlu1 %v1342_v59  ;;  %1339 = vadd.xlane.f32.xlu0 %v1338_v62 }
 0x2c1   : > { %1347 = vadd.xlane.f32.xlu0 %v1346_v50 }
 0x2dd   : > { %v1352_v57 = vpop.xlane.xlu0 %1351 }
 0x2de   : > { %2616 = vrcp.f32 %v1352_v57 }
 0x2e1   : > { %v1356_v5 = vpop.xlane.xlu0 %1355 }
 0x2e2   : > { %2618 = vrcp.f32 %v1356_v5 }
 0x2e5   : > { %v1360_v60 = vpop.xlane.xlu0 %1359 }
 0x2e9   : > { %v1364_v44 = vpop.xlane.xlu0 %1363 }
 0x2ea   : > { %2620 = vrcp.f32 %v1364_v44 }
 0x2eb   : > { %v2617_v8 = vpop.eup %2616  ;;  %2622 = vrcp.f32 %v1360_v60 }
 0x2ec   : > { %v1446_v19 = vmul.f32 %v2617_v8, %v3291_v36 }
 0x2ed   : > { %v1368_v41 = vpop.xlane.xlu0 %1367 }
 0x2ef   : > { %v2619_v31 = vpop.eup %2618 }
 0x2f0   : > { %v1448_v46 = vmul.f32 %v2619_v31, %v3300_v13  ;;  %v1447_v57 = vmul.f32 %v2619_v31, %v3298_v52  ;;  %v1445_v13 = vmul.f32 %v2617_v8, %v3289_v61 }
 0x2f1   : > { %v1372_v63 = vpop.xlane.xlu1 %1371 }
 0x2f2   : > { %v1482_v23 = vpack.c.bf16 %v1448_v46, %v1446_v19  ;;  %2624 = vrcp.f32 %v1372_v63  ;;  %v1481_v44 = vpack.c.bf16 %v1447_v57, %v1445_v13 }
 0x2f3   : > { %2626 = vrcp.f32 %v1368_v41 }
 0x2f4   : > { %2322 = vmatprep.mubr.msk.bf16.mxu1 %vm1060_vm1, %v1482_v23 }
 0x2f5   : > { %v1376_v11 = vpop.xlane.xlu0 %1375 }
 0x2f7   : > { %v2621_v59 = vpop.eup %2620 }
 0x2f8   : > { %v2623_v62 = vpop.eup %2622  ;;  %v1452_v36 = vmul.f32 %v2621_v59, %v3318_v2  ;;  %v1451_v41 = vmul.f32 %v2621_v59, %v3316_v32 }
 0x2f9   : > { %v1380_v58 = vpop.xlane.xlu1 %1379  ;;  %v642_v17 = vpop.permute.xlu0 %641  ;;  %v1450_v60 = vmul.f32 %v2623_v62, %v3309_v56  ;;  %v1449_v31 = vmul.f32 %v2623_v62, %v3307_v0 }
 0x2fa   : > { %2628 = vrcp.f32 %v1380_v58 }
 0x2fb   : > { %2630 = vrcp.f32 %v1376_v11  ;;  %v1484_v19 = vpack.c.bf16 %v1452_v36, %v1450_v60  ;;  %v1483_v61 = vpack.c.bf16 %v1451_v41, %v1449_v31 }
 0x2fd   : > { %v644_v50 = vpop.permute.xlu1 %643 }
 0x2fe   : > { %v2318_v5 = vcombine.low %v642_v17, %v644_v50 }
 0x2ff   : > { %v2625_v46 = vpop.eup %2624 }
 0x300   : > { %1737 = vmatpush2.bf16.msra.mxu1 %v2318_v5  ;;  %v2627_v23 = vpop.eup %2626  ;;  %v1456_v52 = vmul.f32 %v2625_v46, %v3332_v54  ;;  %v1455_v11 = vmul.f32 %v2625_v46, %v3330_v51 }
 0x301   : > { %v1454_v2 = vmul.f32 %v2627_v23, %v3325_v37  ;;  %v1453_v17 = vmul.f32 %v2627_v23, %v3323_v10  ;;  %v3742_v37 = vld [vmem:[#allocation13_spill] sm:$0xff] }
 0x303   : > { %1739 = vmatmul.mubr.bf16.vlgmr.msra.gmra.mxu1 %v1481_v44  ;;  %v1486_v8 = vpack.c.bf16 %v1456_v52, %v1454_v2  ;;  %v1485_v54 = vpack.c.bf16 %v1455_v11, %v1453_v17 }
 0x304   : > { %2323 = vmatprep.mubr.msk.bf16.mxu1 %vm1060_vm1, %v1484_v19 }
 0x307   : > { %v2629_v63 = vpop.eup %2628 }
 0x308   : > { %v2631_v56 = vpop.eup %2630  ;;  %v1460_v58 = vmul.f32 %v2629_v63, %v3346_v4  ;;  %v1459_v0 = vmul.f32 %v2629_v63, %v3344_v33 }
 0x309   : > { %v1458_v32 = vmul.f32 %v2631_v56, %v3339_v40  ;;  %v1457_v62 = vmul.f32 %v2631_v56, %v3742_v37 }
 0x30b   : > { %1747 = vmatmul.mubr.bf16.gmra.mxu1 %v1483_v61  ;;  %v1488_v59 = vpack.c.bf16 %v1460_v58, %v1458_v32  ;;  %v1487_v50 = vpack.c.bf16 %v1459_v0, %v1457_v62 }
 0x30c   : > { %2324 = vmatprep.mubr.msk.bf16.mxu1 %vm1060_vm1, %v1486_v8 }
 0x313   : > { %1755 = vmatmul.mubr.bf16.gmra.mxu1 %v1485_v54 }
 0x314   : > { %2325 = vmatprep.mubr.msk.bf16.mxu1 %vm1060_vm1, %v1488_v59 }
 0x31b   : > { %1763 = vmatmul.mubr.bf16.gmra.mxu1 %v1487_v50 }
 0x32a   : > { %v1384_v57 = vpop.xlane.xlu0 %1383 }
 0x32b   : > { %2632 = vrcp.f32 %v1384_v57 }
 0x32e   : > { %v1392_v51 = vpop.xlane.xlu0 %1391  ;;  %v1388_v5 = vpop.xlane.xlu1 %1387 }
 0x32f   : > { %2634 = vrcp.f32 %v1388_v5 }
 0x330   : > { %2636 = vrcp.f32 %v1392_v51 }
 0x332   : > { %v1396_v10 = vpop.xlane.xlu0 %1395  ;;  %v1304_v4 = vpop.xlane.xlu1 %1303 }
 0x333   : > { %2638 = vrcp.f32 %v1396_v10 }
 0x334   : > { %2640 = vrcp.f32 %v1304_v4 }
 0x336   : > { %v1308_v40 = vpop.xlane.xlu0 %1307  ;;  %v1312_v36 = vpop.xlane.xlu1 %1311 }
 0x337   : > { %2642 = vrcp.f32 %v1308_v40 }
 0x338   : > { %2644 = vrcp.f32 %v1312_v36  ;;  %v2633_v13 = vpop.eup %2632 }
 0x339   : > { %v1462_v19 = vmul.f32 %v2633_v13, %v3392_v39  ;;  %v1461_v52 = vmul.f32 %v2633_v13, %v3400_v30 }
 0x33a   : > { %v1316_v33 = vpop.xlane.xlu0 %1315  ;;  %v1320_v60 = vpop.xlane.xlu1 %1319 }
 0x33b   : > { %2646 = vrcp.f32 %v1316_v33 }
 0x33c   : > { %v2635_v44 = vpop.eup %2634  ;;  %2648 = vrcp.f32 %v1320_v60 }
 0x33d   : > { %v2637_v46 = vpop.eup %2636  ;;  %v1464_v41 = vmul.f32 %v2635_v44, %v3402_v7  ;;  %v1463_v31 = vmul.f32 %v2635_v44, %v3416_v49 }
 0x33e   : > { %v1324_v23 = vpop.xlane.xlu0 %1323  ;;  %v1466_v56 = vmul.f32 %v2637_v46, %v3408_v14  ;;  %v1328_v7 = vpop.xlane.xlu1 %1327  ;;  %v1465_v37 = vmul.f32 %v2637_v46, %v3421_v3 }
 0x33f   : > { %2650 = vrcp.f32 %v1324_v23  ;;  %v1490_v61 = vpack.c.bf16 %v1464_v41, %v1462_v19  ;;  %v1489_v8 = vpack.c.bf16 %v1463_v31, %v1461_v52 }
 0x340   : > { %v2639_v2 = vpop.eup %2638 }
 0x341   : > { %v2641_v63 = vpop.eup %2640  ;;  %v1468_v11 = vmul.f32 %v2639_v2, %v3429_v24  ;;  %2326 = vmatprep.mubr.msk.bf16.mxu1 %vm1060_vm1, %v1490_v61  ;;  %v1467_v49 = vmul.f32 %v2639_v2, %v3443_v16 }
 0x342   : > { %v1332_v39 = vpop.xlane.xlu0 %1331  ;;  %1771 = vmatmul.mubr.bf16.gmra.mxu1 %v1489_v8  ;;  %v1422_v30 = vmul.f32 %v2641_v63, %v3396_v29  ;;  %v1421_v14 = vmul.f32 %v2641_v63, %v3390_v25  ;;  %v1336_v51 = vpop.xlane.xlu1 %1335 }
 0x343   : > { %v1492_v58 = vpack.c.bf16 %v1468_v11, %v1466_v56  ;;  %2652 = vrcp.f32 %v1332_v39  ;;  %v1491_v29 = vpack.c.bf16 %v1467_v49, %v1465_v37 }
 0x344   : > { %v2643_v17 = vpop.eup %2642  ;;  %2654 = vrcp.f32 %v1328_v7 }
 0x345   : > { %2327 = vmatprep.mubr.msk.bf16.mxu1 %vm1060_vm1, %v1492_v58  ;;  %v1424_v32 = vmul.f32 %v2643_v17, %v3431_v18  ;;  %v1423_v24 = vmul.f32 %v2643_v17, %v3412_v6  ;;  %v2645_v54 = vpop.eup %2644 }
 0x346   : > { %v1426_v16 = vmul.f32 %v2645_v54, %v3449_v26  ;;  %v1340_v57 = vpop.xlane.xlu0 %1339  ;;  %v1425_v10 = vmul.f32 %v2645_v54, %v3437_v9  ;;  %v1344_v33 = vpop.xlane.xlu1 %1343 }
 0x347   : > { %v1470_v59 = vpack.c.bf16 %v1424_v32, %v1422_v30  ;;  %v1469_v0 = vpack.c.bf16 %v1423_v24, %v1421_v14  ;;  %2656 = vrcp.f32 %v1340_v57 }
 0x348   : > { %v2647_v62 = vpop.eup %2646  ;;  %2658 = vrcp.f32 %v1336_v51 }
 0x349   : > { %2304 = vmatprep.mubr.msk.bf16.mxu0 %vm1060_vm1, %v1470_v59  ;;  %v1428_v50 = vmul.f32 %v2647_v62, %v3454_v28  ;;  %v2649_v18 = vpop.eup %2648  ;;  %v1427_v5 = vmul.f32 %v2647_v62, %v3451_v48 }
 0x34a   : > { %1592 = vmatmul.mubr.bf16.vlgmr.msra.gmra.mxu0 %v1469_v0  ;;  %1779 = vmatmul.mubr.bf16.gmra.mxu1 %v1491_v29  ;;  %v1430_v26 = vmul.f32 %v2649_v18, %v3465_v45  ;;  %v1348_v36 = vpop.xlane.xlu0 %1347 }
 0x34b   : > { %v1472_v25 = vpack.c.bf16 %v1428_v50, %v1426_v16  ;;  %v1471_v28 = vpack.c.bf16 %v1427_v5, %v1425_v10  ;;  %2660 = vrcp.f32 %v1348_v36 }
 0x34c   : > { %v2651_v6 = vpop.eup %2650  ;;  %2662 = vrcp.f32 %v1344_v33 }
 0x34d   : > { %2305 = vmatprep.mubr.msk.bf16.mxu0 %vm1060_vm1, %v1472_v25  ;;  %v1432_v3 = vmul.f32 %v2651_v6, %v3469_v27  ;;  %v1431_v48 = vmul.f32 %v2651_v6, %v3467_v55  ;;  %v1429_v27 = vmul.f32 %v2649_v18, %v3459_v20 }
 0x34f   : > { %v1474_v4 = vpack.c.bf16 %v1432_v3, %v1430_v26  ;;  %v1473_v45 = vpack.c.bf16 %v1431_v48, %v1429_v27 }
 0x350   : > { %v2653_v40 = vpop.eup %2652 }
 0x351   : > { %v2655_v13 = vpop.eup %2654  ;;  %v1436_v60 = vmul.f32 %v2653_v40, %v3481_v22  ;;  %v1435_v23 = vmul.f32 %v2653_v40, %v3491_v12 }
 0x352   : > { %1600 = vmatmul.mubr.bf16.gmra.mxu0 %v1471_v28  ;;  %v1434_v9 = vmul.f32 %v2655_v13, %v3473_v53  ;;  %v1433_v55 = vmul.f32 %v2655_v13, %v3479_v1 }
 0x353   : > { %2306 = vmatprep.mubr.msk.bf16.mxu0 %vm1060_vm1, %v1474_v4 }
 0x354   : > { %v1476_v44 = vpack.c.bf16 %v1436_v60, %v1434_v9  ;;  %v2657_v19 = vpop.eup %2656  ;;  %v1475_v52 = vpack.c.bf16 %v1435_v23, %v1433_v55 }
 0x355   : > { %v2659_v46 = vpop.eup %2658  ;;  %v1440_v41 = vmul.f32 %v2657_v19, %v3497_v21  ;;  %v1439_v2 = vmul.f32 %v2657_v19, %v3505_v15 }
 0x356   : > { %v1438_v22 = vmul.f32 %v2659_v46, %v3489_v35  ;;  %v1437_v8 = vmul.f32 %v2659_v46, %v3493_v42 }
 0x358   : > { %v1478_v20 = vpack.c.bf16 %v1440_v41, %v1438_v22  ;;  %v2661_v31 = vpop.eup %2660  ;;  %v1477_v21 = vpack.c.bf16 %v1439_v2, %v1437_v8 }
 0x359   : > { %v2663_v53 = vpop.eup %2662  ;;  %v1444_v61 = vmul.f32 %v2661_v31, %v3515_v38  ;;  %v1443_v1 = vmul.f32 %v2661_v31, %v3519_v43 }
 0x35a   : > { %1608 = vmatmul.mubr.bf16.gmra.mxu0 %v1473_v45  ;;  %v1442_v12 = vmul.f32 %v2663_v53, %v3503_v47  ;;  %v1441_v35 = vmul.f32 %v2663_v53, %v3509_v34  ;;  %v2519_v47 = vld [vmem:[%s3702_s5] sm:$0xff]  }
 0x35b   : > { %2307 = vmatprep.mubr.msk.bf16.mxu0 %vm1060_vm1, %v1476_v44  ;;  %2412 = vmatprep.subr.bf16.mxu1 %v2519_v47 }
 0x35c   : > { %v1480_v63 = vpack.c.bf16 %v1444_v61, %v1442_v12  ;;  %v1479_v56 = vpack.c.bf16 %v1443_v1, %v1441_v35  ;;  %2398 = vmatprep.subr.bf16.mxu0 %v2519_v47  ;;  %2413 = vmatpush3.bf16.msra.mxu1 %v2519_v47 }
 0x35d   : > { %2399 = vmatpush3.bf16.msra.mxu0 %v2519_v47 }
 0x362   : > { %1616 = vmatmul.mubr.bf16.gmra.mxu0 %v1475_v52 }
 0x363   : > { %2308 = vmatprep.mubr.msk.bf16.mxu0 %vm1060_vm1, %v1478_v20 }
 0x36a   : > { %1624 = vmatmul.mubr.bf16.gmra.mxu0 %v1477_v21 }
 0x36b   : > { %2309 = vmatprep.mubr.msk.bf16.mxu0 %vm1060_vm1, %v1480_v63 }
 0x372   : > { %1632 = vmatmul.mubr.bf16.gmra.mxu0 %v1479_v56 }
 0x3c3   : > { %v1740_v11 = vpop.f32.mrf.mxu1 }
 0x3c5   : > { %v1742_v39 = vpop.f32.mrf.mxu1 }
 0x3c7   : > { %v1743_v15 = vpop.f32.mrf.mxu1 }
 0x3c8   : > { %v2469_v24 = vpack.i.bf16 %v1743_v15, %v1740_v11 }
 0x3c9   : > { %v1745_v58 = vpop.f32.mrf.mxu1 }
 0x3cb   : > { %v1748_v38 = vpop.f32.mrf.mxu1 }
 0x3cd   : > { %v1750_v17 = vpop.f32.mrf.mxu1 }
 0x3cf   : > { %v1751_v42 = vpop.f32.mrf.mxu1 }
 0x3d0   : > { %v2479_v62 = vpack.i.bf16 %v1751_v42, %v1748_v38 }
 0x3d1   : > { %v1753_v7 = vpop.f32.mrf.mxu1 }
 0x3d3   : > { %v1756_v30 = vpop.f32.mrf.mxu1 }
 0x3d5   : > { %v1758_v34 = vpop.f32.mrf.mxu1 }
 0x3d7   : > { %v1759_v43 = vpop.f32.mrf.mxu1 }
 0x3d8   : > { %v2459_v49 = vpack.i.bf16 %v1759_v43, %v1756_v30 }
 0x3d9   : > { %v1761_v32 = vpop.f32.mrf.mxu1 }
 0x3da   : > { %2460 = vrot.lane.b32.xlu1 %v2459_v49, %s2706_s25 }
 0x3db   : > { %v1764_v14 = vpop.f32.mrf.mxu1 }
 0x3dd   : > { %v1766_v54 = vpop.f32.mrf.mxu1 }
 0x3de   : > { %2470 = vrot.lane.b32.xlu1 %v2469_v24, %s2706_s25 }
 0x3df   : > { %v1767_v59 = vpop.f32.mrf.mxu1 }
 0x3e0   : > { %v2464_v0 = vpack.i.bf16 %v1767_v59, %v1764_v14 }
 0x3e1   : > { %v1769_v37 = vpop.f32.mrf.mxu1 }
 0x3e2   : > { %2465 = vrot.lane.b32.xlu0 %v2464_v0, %s2706_s25 }
 0x3e6   : > { %2480 = vrot.lane.b32.xlu0 %v2479_v62, %s2706_s25 }
 0x402   : > { %v1772_v29 = vpop.f32.mrf.mxu1 }
 0x404   : > { %v1774_v16 = vpop.f32.mrf.mxu1 }
 0x406   : > { %v1775_v50 = vpop.f32.mrf.mxu1 }
 0x407   : > { %v2474_v57 = vpack.i.bf16 %v1775_v50, %v1772_v29 }
 0x408   : > { %v1777_v18 = vpop.f32.mrf.mxu1 }
 0x409   : > { %2475 = vrot.lane.b32.xlu1 %v2474_v57, %s2706_s25 }
 0x40a   : > { %v1593_v25 = vpop.f32.mrf.mxu0  ;;  %v1780_v6 = vpop.f32.mrf.mxu1 }
 0x40c   : > { %v1595_v51 = vpop.f32.mrf.mxu0  ;;  %v1782_v5 = vpop.f32.mrf.mxu1 }
 0x40d   : > { %v2387_v51 = vld [vmem:[%s3609_s11 + $0x10] sm:$0xff]  }
 0x40e   : > { %v1596_v3 = vpop.f32.mrf.mxu0  ;;  %v1783_v10 = vpop.f32.mrf.mxu1 }
 0x40f   : > { %v2484_v26 = vpack.i.bf16 %v1783_v10, %v1780_v6  ;;  %v2388_v6 = vld [vmem:[%s3609_s11 + $0x18] sm:$0xff]   ;;  %v2386_v10 = vld [vmem:[%s3609_s11 + $0x8] sm:$0xff]  }
 0x410   : > { %v1598_v28 = vpop.f32.mrf.mxu0  ;;  %v1785_v4 = vpop.f32.mrf.mxu1  ;;  %v2376_v5 = vunpack.c.l.bf16 %v2388_v6 }
 0x411   : > { %2485 = vrot.lane.b32.xlu1 %v2484_v26, %s2706_s25  ;;  %v2372_v26 = vunpack.c.l.bf16 %v2387_v51  ;;  %v2363_v28 = vld [vmem:[%s3609_s11] sm:$0xff]  }
 0x412   : > { %v1601_v40 = vpop.f32.mrf.mxu0  ;;  %v3625_v4 = vld [vmem:[%s3703_s6] ss:$0 sm:$0xff] }
 0x414   : > { %v1603_v36 = vpop.f32.mrf.mxu0 }
 0x416   : > { %v1604_v13 = vpop.f32.mrf.mxu0 }
 0x418   : > { %v1606_v33 = vpop.f32.mrf.mxu0 }
 0x419   : > { %v2377_v33 = vunpack.c.h.bf16 %v2388_v6  ;;  %v2002_v6 = vld [vmem:[%s3616_s15 + $0x50] sm:$0xff] }
 0x41a   : > { %v1609_v48 = vpop.f32.mrf.mxu0 }
 0x41c   : > { %v1611_v60 = vpop.f32.mrf.mxu0 }
 0x41d   : > { %v1994_v60 = vld [vmem:[%s3616_s15 + $0x10] sm:$0xff] }
 0x41e   : > { %v1612_v27 = vpop.f32.mrf.mxu0 }
 0x420   : > { %v1614_v9 = vpop.f32.mrf.mxu0 }
 0x421   : > { %v2364_v9 = vunpack.c.l.bf16 %v2363_v28 }
 0x422   : > { %v1617_v45 = vpop.f32.mrf.mxu0 }
 0x424   : > { %v1619_v44 = vpop.f32.mrf.mxu0 }
 0x426   : > { %v1620_v19 = vpop.f32.mrf.mxu0 }
 0x428   : > { %v1622_v46 = vpop.f32.mrf.mxu0 }
 0x42a   : > { %v1625_v23 = vpop.f32.mrf.mxu0 }
 0x42c   : > { %v1627_v41 = vpop.f32.mrf.mxu0 }
 0x42d   : > { %v2369_v41 = vunpack.c.h.bf16 %v2386_v10 }
 0x42e   : > { %v1628_v55 = vpop.f32.mrf.mxu0 }
 0x430   : > { %v1630_v22 = vpop.f32.mrf.mxu0 }
 0x432   : > { %v1633_v52 = vpop.f32.mrf.mxu0 }
 0x434   : > { %v1635_v20 = vpop.f32.mrf.mxu0 }
 0x436   : > { %v1636_v31 = vpop.f32.mrf.mxu0 }
 0x438   : > { %v1638_v53 = vpop.f32.mrf.mxu0 }
 0x439   : > { %v1995_v53 = vld [vmem:[%s3616_s15 + $0x18] sm:$0xff] }
 0x44c   : > { %v2461_v2 = vpop.permute.xlu1 %2460 }
 0x44d   : > { %v2463_v61 = vunpack.i.h.bf16 %v2461_v2  ;;  %v2462_v8 = vunpack.i.l.bf16 %v2461_v2 }
 0x44f   : > { %v1840_v12 = vsel %vm711_vm0, %v1612_v27, %v2463_v61  ;;  %v1839_v21 = vsel %vm711_vm0, %v1609_v48, %v2462_v8  ;;  %v1999_v27 = vld [vmem:[%s3616_s15 + $0x38] sm:$0xff] }
 0x450   : > { %v1849_v63 = vpack.c.bf16 %v1840_v12, %v1839_v21  ;;  %v2471_v1 = vpop.permute.xlu1 %2470  ;;  %v2011_v20 = vadd.f32 %v2377_v33, %v1999_v27  ;;  %v2365_v12 = vunpack.c.h.bf16 %v2363_v28  ;;  %v2003_v28 = vld [vmem:[%s3616_s15 + $0x58] sm:$0xff] }
 0x451   : > { %v2473_v35 = vunpack.i.h.bf16 %v2471_v1  ;;  %v2472_v56 = vunpack.i.l.bf16 %v2471_v1 }
 0x452   : > { %2404 = vmatprep.mubr.msk.bf16.mxu1 %vm1868_vm2, %v1849_v63 }
 0x453   : > { %v1836_v11 = vsel %vm711_vm0, %v1596_v3, %v2473_v35  ;;  %v1835_v39 = vsel %vm711_vm0, %v1593_v25, %v2472_v56  ;;  %v1998_v3 = vld [vmem:[%s3616_s15 + $0x30] sm:$0xff]  ;;  %v1993_v56 = vld [vmem:[%s3616_s15 + $0x8] sm:$0xff] }
 0x454   : > { %v1847_v15 = vpack.c.bf16 %v1836_v11, %v1835_v39  ;;  %v2466_v58 = vpop.permute.xlu0 %2465  ;;  %v2010_v36 = vadd.f32 %v2376_v5, %v1998_v3  ;;  %v2000_v5 = vld [vmem:[%s3616_s15 + $0x40] sm:$0xff] }
 0x455   : > { %v2468_v38 = vunpack.i.h.bf16 %v2466_v58  ;;  %v2467_v17 = vunpack.i.l.bf16 %v2466_v58  ;;  %v2007_v58 = vadd.f32 %v2369_v41, %v1995_v53 }
 0x456   : > { %2400 = vmatprep.mubr.msk.bf16.mxu0 %vm1868_vm2, %v1847_v15 }
 0x457   : > { %v1841_v42 = vsel %vm711_vm0, %v1617_v45, %v2467_v17  ;;  %v1842_v47 = vsel %vm711_vm0, %v1620_v19, %v2468_v38  ;;  %v1992_v19 = vld [vmem:[%s3616_s15] sm:$0xff] }
 0x458   : > { %v1850_v7 = vpack.c.bf16 %v1842_v47, %v1841_v42  ;;  %v2481_v30 = vpop.permute.xlu0 %2480  ;;  %v2004_v8 = vadd.f32 %v2364_v9, %v1992_v19 }
 0x459   : > { %v2483_v34 = vunpack.i.h.bf16 %v2481_v30  ;;  %v2482_v43 = vunpack.i.l.bf16 %v2481_v30 }
 0x45a   : > { %2405 = vmatmul.mubr.msk.bf16.vlgmr.msra.gmra.mxu1 %vm1868_vm2, %v1850_v7 }
 0x45b   : > { %v1837_v49 = vsel %vm711_vm0, %v1601_v40, %v2482_v43  ;;  %v1838_v32 = vsel %vm711_vm0, %v1604_v13, %v2483_v34  ;;  %v1996_v40 = vld [vmem:[%s3616_s15 + $0x20] sm:$0xff]  ;;  %v2368_v13 = vunpack.c.l.bf16 %v2386_v10  ;;  %v2005_v34 = vadd.f32 %v2365_v12, %v1993_v56 }
 0x45c   : > { %v1848_v14 = vpack.c.bf16 %v1838_v32, %v1837_v49  ;;  %v2008_v44 = vadd.f32 %v2372_v26, %v1996_v40 }
 0x45e   : > { %2401 = vmatmul.mubr.msk.bf16.vlgmr.msra.gmra.mxu0 %vm1868_vm2, %v1848_v14 }
 0x47b   : > { %v2476_v24 = vpop.permute.xlu1 %2475 }
 0x47c   : > { %v2478_v54 = vunpack.i.h.bf16 %v2476_v24  ;;  %v2477_v59 = vunpack.i.l.bf16 %v2476_v24 }
 0x47e   : > { %v1844_v0 = vsel %vm711_vm0, %v1628_v55, %v2478_v54  ;;  %v1843_v37 = vsel %vm711_vm0, %v1625_v23, %v2477_v59  ;;  %v2373_v23 = vunpack.c.h.bf16 %v2387_v51 }
 0x47f   : > { %v1851_v62 = vpack.c.bf16 %v1844_v0, %v1843_v37 }
 0x481   : > { %2408 = vmatprep.mubr.msk.bf16.mxu1 %vm1868_vm2, %v1851_v62 }
 0x483   : > { %v2486_v29 = vpop.permute.xlu1 %2485 }
 0x484   : > { %v2488_v16 = vunpack.i.h.bf16 %v2486_v29  ;;  %v2487_v50 = vunpack.i.l.bf16 %v2486_v29 }
 0x486   : > { %v1846_v57 = vsel %vm711_vm0, %v1636_v31, %v2488_v16  ;;  %v1845_v18 = vsel %vm711_vm0, %v1633_v52, %v2487_v50  ;;  %v2006_v52 = vadd.f32 %v2368_v13, %v1994_v60  ;;  %v1997_v31 = vld [vmem:[%s3616_s15 + $0x28] sm:$0xff] }
 0x487   : > { %v1852_v25 = vpack.c.bf16 %v1846_v57, %v1845_v18  ;;  %v2009_v15 = vadd.f32 %v2373_v23, %v1997_v31  ;;  %v2390_v57 = vld [vmem:[%s3609_s11 + $0x28] sm:$0xff]   ;;  %v2389_v18 = vld [vmem:[%s3609_s11 + $0x20] sm:$0xff]  }
 0x488   : > { %v2380_v51 = vunpack.c.l.bf16 %v2389_v18  ;;  %v2385_v10 = vunpack.c.h.bf16 %v2390_v57  ;;  %v2381_v13 = vunpack.c.h.bf16 %v2389_v18 }
 0x489   : > { %2409 = vmatmul.mubr.msk.bf16.gmra.mxu1 %vm1868_vm2, %v1852_v25  ;;  %v2384_v25 = vunpack.c.l.bf16 %v2390_v57 }
 0x48a   : > { %v2015_v9 = vadd.f32 %v2385_v10, %v2003_v28 }
 0x48b   : > { %v2014_v3 = vadd.f32 %v2384_v25, %v2002_v6 }
 0x51a   : > { %v2406_v48 = vpop.f32.mrf.mxu1 }
 0x51b   : > { %v1946_v45 = vadd.f32 %v2406_v48, %v3625_v4  ;;  %v2001_v48 = vld [vmem:[%s3616_s15 + $0x48] sm:$0xff] }
 0x51c   : > { %v1937_v46 = vpop.f32.mrf.mxu1  ;;  %v2013_v23 = vadd.f32 %v2381_v13, %v2001_v48 }
 0x51d   : > { %v2022_v55 = vadd.f32 %v2010_v36, %v1946_v45  ;;  %v1938_v22 = vadd.f32 %v3625_v4, %v1937_v46  ;;  %v2012_v36 = vadd.f32 %v2380_v51, %v2000_v5 }
 0x51e   : > { %v2402_v2 = vpop.f32.mrf.mxu0  ;;  %v2407_v61 = vpop.f32.mrf.mxu1 }
 0x51f   : > { %v2356_v21 = vpack.c.bf16 %v2022_v55, %v2022_v55  ;;  %v2020_v63 = vadd.f32 %v2008_v44, %v1938_v22  ;;  %v1930_v1 = vadd.f32 %v2402_v2, %v3625_v4  ;;  %v1949_v35 = vadd.f32 %v2407_v61, %v3625_v4 }
 0x520   : > { %v1921_v11 = vpop.f32.mrf.mxu0  ;;  %v1940_v39 = vpop.f32.mrf.mxu1 }
 0x521   : > { %2083 = vst.msk [vmem:[%s3639_s20 + $0x18] sm:$0xf] %vm2076_vm3, %v2356_v21  ;;  %v2354_v38 = vpack.c.bf16 %v2020_v63, %v2020_v63  ;;  %v2018_v17 = vadd.f32 %v2006_v52, %v1930_v1  ;;  %v2023_v42 = vadd.f32 %v2011_v20, %v1949_v35  ;;  %v1922_v47 = vadd.f32 %v3625_v4, %v1921_v11 }
 0x522   : > { %v1941_v7 = vadd.f32 %v3625_v4, %v1940_v39  ;;  %v2403_v30 = vpop.f32.mrf.mxu0 }
 0x523   : > { %2081 = vst.msk [vmem:[%s3639_s20 + $0x10] sm:$0xf] %vm2076_vm3, %v2354_v38  ;;  %v2352_v43 = vpack.c.bf16 %v2018_v17, %v2018_v17  ;;  %v2357_v49 = vpack.c.bf16 %v2023_v42, %v2023_v42  ;;  %v2016_v32 = vadd.f32 %v2004_v8, %v1922_v47  ;;  %v1933_v14 = vadd.f32 %v2403_v30, %v3625_v4 }
 0x524   : > { %v2021_v24 = vadd.f32 %v2009_v15, %v1941_v7  ;;  %v1924_v54 = vpop.f32.mrf.mxu0 }
 0x525   : > { %2079 = vst.msk [vmem:[%s3639_s20 + $0x8] sm:$0xf] %vm2076_vm3, %v2352_v43  ;;  %2084 = vst.msk [vmem:[%s3639_s20 + $0x1c] sm:$0xf] %vm2076_vm3, %v2357_v49  ;;  %v2350_v59 = vpack.c.bf16 %v2016_v32, %v2016_v32  ;;  %v2019_v0 = vadd.f32 %v2007_v58, %v1933_v14  ;;  %v1925_v37 = vadd.f32 %v3625_v4, %v1924_v54 }
 0x526   : > { %v2355_v62 = vpack.c.bf16 %v2021_v24, %v2021_v24 }
 0x527   : > { %2077 = vst.msk [vmem:[%s3639_s20] sm:$0xf] %vm2076_vm3, %v2350_v59  ;;  %v2353_v29 = vpack.c.bf16 %v2019_v0, %v2019_v0  ;;  %v2017_v16 = vadd.f32 %v2005_v34, %v1925_v37 }
 0x528   : > { %2082 = vst.msk [vmem:[%s3639_s20 + $0x14] sm:$0xf] %vm2076_vm3, %v2355_v62 }
 0x529   : > { %2080 = vst.msk [vmem:[%s3639_s20 + $0xc] sm:$0xf] %vm2076_vm3, %v2353_v29  ;;  %v2351_v50 = vpack.c.bf16 %v2017_v16, %v2017_v16 }
 0x52b   : > { %2078 = vst.msk [vmem:[%s3639_s20 + $0x4] sm:$0xf] %vm2076_vm3, %v2351_v50 }
 0x549   : > { %v2410_v26 = vpop.f32.mrf.mxu1 }
 0x54a   : > { %v1962_v40 = vadd.f32 %v2410_v26, %v3625_v4 }
 0x54b   : > { %v1953_v33 = vpop.f32.mrf.mxu1 }
 0x54c   : > { %v2026_v60 = vadd.f32 %v2014_v3, %v1962_v40  ;;  %v1954_v27 = vadd.f32 %v3625_v4, %v1953_v33 }
 0x54d   : > { %v2411_v45 = vpop.f32.mrf.mxu1 }
 0x54e   : > { %v2360_v44 = vpack.c.bf16 %v2026_v60, %v2026_v60  ;;  %v2024_v19 = vadd.f32 %v2012_v36, %v1954_v27  ;;  %v1965_v46 = vadd.f32 %v2411_v45, %v3625_v4 }
 0x54f   : > { %v1956_v41 = vpop.f32.mrf.mxu1 }
 0x550   : > { %2087 = vst.msk [vmem:[%s3639_s20 + $0x28] sm:$0xf] %vm2076_vm3, %v2360_v44  ;;  %v2358_v55 = vpack.c.bf16 %v2024_v19, %v2024_v19  ;;  %v2027_v22 = vadd.f32 %v2015_v9, %v1965_v46  ;;  %v1957_v52 = vadd.f32 %v3625_v4, %v1956_v41 }
 0x552   : > { %2085 = vst.msk [vmem:[%s3639_s20 + $0x20] sm:$0xf] %vm2076_vm3, %v2358_v55  ;;  %v2361_v20 = vpack.c.bf16 %v2027_v22, %v2027_v22  ;;  %v2025_v31 = vadd.f32 %v2013_v23, %v1957_v52 }
 0x554   : > { %2088 = vst.msk [vmem:[%s3639_s20 + $0x2c] sm:$0xf] %vm2076_vm3, %v2361_v20  ;;  %v2359_v53 = vpack.c.bf16 %v2025_v31, %v2025_v31 }
 0x556   : > { %2086 = vst.msk [vmem:[%s3639_s20 + $0x24] sm:$0xf] %vm2076_vm3, %v2359_v53 }
 0x557 PF: > { %s17_s28 = sadd.s32 1, %s2702_s28   ;;  %s3743_s24 = smov %s2694_s26 }
 0x558   : > { %p14_p7 = scmp.ge.s32.totalorder %s17_s28, 6   ;;  %s3744_s25 = smov %s2698_s27 }
 0x559   : > { %s3745_s26 = smov %s3748_s29  ;;  %s3746_s27 = smov %s3752_s30 }
 0x55a   :  { %16 = sbr.rel (!%p14_p7) target bundleno = 3 (0x3), region = 90 }

// kernel: _lambda_.13
= control target key start
LH: loop header
LB: loop body
LE: loop exit
PB: predicated region body
PF: predicated region fallthrough
CT: control target
= control target key end

     0   :  { %s2380_s24 = smov 0   ;;  %s3330_s0 = inlined_call_operand.vmem [shape: bf16[512,16], index: 0, kind: input, shape index: {}]   ;;  %s3331_s1 = inlined_call_operand.vmem [shape: f32[1,16], index: 1, kind: input, shape index: {}]   ;;  %s3332_s2 = inlined_call_operand.vmem [shape: f32[1,16], index: 2, kind: input, shape index: {}]   ;;  %s3333_s3 = inlined_call_operand.vmem [shape: bf16[16,64], index: 3, kind: input, shape index: {}]   ;;  %s3334_s4 = inlined_call_operand.vmem [shape: f32[1,64], index: 4, kind: input, shape index: {}]   ;;  %s3335_s5 = inlined_call_operand.vmem [shape: bf16[64,16], index: 5, kind: input, shape index: {}]   ;;  %s3336_s6 = inlined_call_operand.vmem [shape: f32[1,16], index: 6, kind: input, shape index: {}]   ;;  %s3337_s7 = inlined_call_operand.vmem [shape: bf16[512,16], index: 7, kind: output, shape index: {}]  }
   0x1 LB: > { %s1885_s25 = sadd.s32 4294967295, %s2338_s24   ;;  %p1889_p0 = scmp.ge.s32.totalorder %s2338_s24, 1  ;;  %s2338_s24 = sphi %s2380_s24, %s17_s24  }
   0x2   : > { %p238_p1 = scmp.lt.s32.totalorder %s2338_s24, 3 }
   0x4   : > { %p239_p2 = pnand %p1889_p0, %p238_p1 }
   0x6   : > { %242 = sbr.rel (%p239_p2) target bundleno = 851 (0x353), region = 48 }
   0xb   : > { %s1890_s26 = sshll.u32 %s1885_s25, 5  ;;  %vm347_vm0 = vcmask 130048   ;;  %vm1426_vm1 = vcmask 523264   ;;  %vm1796_vm2 = vcmask 125952  }
   0xc   : > { %p271_p3 = scmp.lt.s32.totalorder %s1890_s26, 63 }
   0xe   : > { %s3405_s26 = smov (!%p271_p3, %s1890_s26), 63 }
   0xf   : > { %s1891_s27 = sshll.u32 %s3405_s26, 2 }
  0x10   : > { %s2396_s30 = scalar_lea.vmem %s3330_s0, %s1891_s27  ;;  %s3200_s8 = scalar_lea.vmem %s3337_s7, %s1891_s27 }
  0x11   : > { %v2002_v0 = vld [vmem:[%s2396_s30] sm:$0xff]   ;;  %v2065_v1 = vld [vmem:[%s2396_s30 + $0x8] sm:$0xff]   ;;  %v2066_v6 = vld [vmem:[%s2396_s30 + $0x10] sm:$0xff]  }
  0x12   : > { %v2400_v2 = vunpack.c.l.bf16 %v2002_v0  ;;  %v2402_v3 = vunpack.c.l.bf16 %v2065_v1  ;;  %v2404_v4 = vunpack.c.h.bf16 %v2002_v0  ;;  %v2406_v5 = vunpack.c.h.bf16 %v2065_v1  ;;  %v2067_v13 = vld [vmem:[%s2396_s30 + $0x18] sm:$0xff]   ;;  %v2068_v18 = vld [vmem:[%s2396_s30 + $0x20] sm:$0xff]   ;;  %v2069_v23 = vld [vmem:[%s2396_s30 + $0x28] sm:$0xff]  }
  0x13   : > { %v2417_v11 = vunpack.c.l.bf16 %v2066_v6  ;;  %v2419_v12 = vunpack.c.h.bf16 %v2066_v6  ;;  %v2426_v16 = vunpack.c.l.bf16 %v2067_v13  ;;  %v2428_v17 = vunpack.c.h.bf16 %v2067_v13  ;;  %v2070_v28 = vld [vmem:[%s2396_s30 + $0x30] sm:$0xff]   ;;  %v2071_v33 = vld [vmem:[%s2396_s30 + $0x38] sm:$0xff]   ;;  %v2072_v38 = vld [vmem:[%s2396_s30 + $0x40] sm:$0xff]  }
  0x14   : > { %v348_v7 = vsel %vm347_vm0, %v2400_v2, 0.0  ;;  %v354_v8 = vsel %vm347_vm0, %v2402_v3, 0.0  ;;  %v351_v9 = vsel %vm347_vm0, %v2404_v4, 0.0  ;;  %v357_v10 = vsel %vm347_vm0, %v2406_v5, 0.0  ;;  %v2073_v43 = vld [vmem:[%s2396_s30 + $0x48] sm:$0xff]   ;;  %v2074_v48 = vld [vmem:[%s2396_s30 + $0x50] sm:$0xff]  }
  0x15   : > { %349 = vadd.xlane.f32.xlu0 %v348_v7  ;;  %355 = vadd.xlane.f32.xlu1 %v354_v8  ;;  %v360_v14 = vsel %vm347_vm0, %v2417_v11, 0.0  ;;  %v363_v15 = vsel %vm347_vm0, %v2419_v12, 0.0  ;;  %v366_v19 = vsel %vm347_vm0, %v2426_v16, 0.0  ;;  %v369_v20 = vsel %vm347_vm0, %v2428_v17, 0.0  ;;  %v2075_v53 = vld [vmem:[%s2396_s30 + $0x58] sm:$0xff]   ;;  %v2076_v58 = vld [vmem:[%s2396_s30 + $0x60] sm:$0xff]  }
  0x16   : > { %v2435_v21 = vunpack.c.l.bf16 %v2068_v18  ;;  %v2437_v22 = vunpack.c.h.bf16 %v2068_v18  ;;  %v2444_v26 = vunpack.c.l.bf16 %v2069_v23  ;;  %v2446_v27 = vunpack.c.h.bf16 %v2069_v23  ;;  %v2077_v63 = vld [vmem:[%s2396_s30 + $0x68] sm:$0xff]   ;;  %v2078_v8 = vld [vmem:[%s2396_s30 + $0x70] sm:$0xff]  }
  0x17   : > { %v2453_v31 = vunpack.c.l.bf16 %v2070_v28  ;;  %v2455_v32 = vunpack.c.h.bf16 %v2070_v28  ;;  %v2462_v36 = vunpack.c.l.bf16 %v2071_v33  ;;  %v2464_v37 = vunpack.c.h.bf16 %v2071_v33 }
  0x18   : > { %3360 = vst [vmem:[#allocation2_spill] sm:$0xff] %v2437_v22  ;;  %v372_v24 = vsel %vm347_vm0, %v2435_v21, 0.0  ;;  %v375_v25 = vsel %vm347_vm0, %v2437_v22, 0.0  ;;  %3361 = vst [vmem:[#allocation3_spill] sm:$0xff] %v2446_v27  ;;  %v378_v29 = vsel %vm347_vm0, %v2444_v26, 0.0  ;;  %v381_v30 = vsel %vm347_vm0, %v2446_v27, 0.0 }
  0x19   : > { %352 = vadd.xlane.f32.xlu0 %v351_v9  ;;  %358 = vadd.xlane.f32.xlu1 %v357_v10  ;;  %3362 = vst [vmem:[#allocation4_spill] sm:$0xff] %v2453_v31  ;;  %3363 = vst [vmem:[#allocation5_spill] sm:$0xff] %v2455_v32  ;;  %v384_v34 = vsel %vm347_vm0, %v2453_v31, 0.0  ;;  %v387_v35 = vsel %vm347_vm0, %v2455_v32, 0.0  ;;  %v390_v39 = vsel %vm347_vm0, %v2462_v36, 0.0  ;;  %v393_v40 = vsel %vm347_vm0, %v2464_v37, 0.0 }
  0x1a   : > { %3364 = vst [vmem:[#allocation6_spill] sm:$0xff] %v2462_v36  ;;  %3365 = vst [vmem:[#allocation7_spill] sm:$0xff] %v2464_v37  ;;  %v2471_v41 = vunpack.c.l.bf16 %v2072_v38  ;;  %v2473_v42 = vunpack.c.h.bf16 %v2072_v38  ;;  %v2480_v46 = vunpack.c.l.bf16 %v2073_v43  ;;  %v2482_v47 = vunpack.c.h.bf16 %v2073_v43 }
  0x1b   : > { %v2489_v51 = vunpack.c.l.bf16 %v2074_v48  ;;  %v2491_v52 = vunpack.c.h.bf16 %v2074_v48  ;;  %v2498_v56 = vunpack.c.l.bf16 %v2075_v53  ;;  %v2500_v57 = vunpack.c.h.bf16 %v2075_v53 }
  0x1c   : > { %3366 = vst [vmem:[#allocation8_spill] sm:$0xff] %v2471_v41  ;;  %3367 = vst [vmem:[#allocation9_spill] sm:$0xff] %v2473_v42  ;;  %v396_v44 = vsel %vm347_vm0, %v2471_v41, 0.0  ;;  %v399_v45 = vsel %vm347_vm0, %v2473_v42, 0.0  ;;  %v402_v49 = vsel %vm347_vm0, %v2480_v46, 0.0  ;;  %v405_v50 = vsel %vm347_vm0, %v2482_v47, 0.0 }
  0x1d   : > { %361 = vadd.xlane.f32.xlu0 %v360_v14  ;;  %364 = vadd.xlane.f32.xlu1 %v363_v15  ;;  %3368 = vst [vmem:[#allocation10_spill] sm:$0xff] %v2480_v46  ;;  %3369 = vst [vmem:[#allocation11_spill] sm:$0xff] %v2482_v47  ;;  %v408_v54 = vsel %vm347_vm0, %v2489_v51, 0.0  ;;  %v411_v55 = vsel %vm347_vm0, %v2491_v52, 0.0  ;;  %v414_v59 = vsel %vm347_vm0, %v2498_v56, 0.0  ;;  %v417_v60 = vsel %vm347_vm0, %v2500_v57, 0.0 }
  0x1e   : > { %3370 = vst [vmem:[#allocation12_spill] sm:$0xff] %v2489_v51  ;;  %3371 = vst [vmem:[#allocation13_spill] sm:$0xff] %v2491_v52  ;;  %v2507_v61 = vunpack.c.l.bf16 %v2076_v58  ;;  %v2509_v62 = vunpack.c.h.bf16 %v2076_v58  ;;  %v2516_v6 = vunpack.c.l.bf16 %v2077_v63  ;;  %v2518_v7 = vunpack.c.h.bf16 %v2077_v63  ;;  %v2079_v15 = vld [vmem:[%s2396_s30 + $0x78] sm:$0xff]  }
  0x1f   : > { %3372 = vst [vmem:[#allocation14_spill] sm:$0xff] %v2498_v56  ;;  %3373 = vst [vmem:[#allocation15_spill] sm:$0xff] %v2500_v57  ;;  %v2525_v13 = vunpack.c.l.bf16 %v2078_v8  ;;  %v2527_v14 = vunpack.c.h.bf16 %v2078_v8  ;;  %v2536_v23 = vunpack.c.h.bf16 %v2079_v15 }
  0x20   : > { %3374 = vst [vmem:[#allocation16_spill] sm:$0xff] %v2507_v61  ;;  %3375 = vst [vmem:[#allocation17_spill] sm:$0xff] %v2509_v62  ;;  %v420_v0 = vsel %vm347_vm0, %v2507_v61, 0.0  ;;  %v423_v1 = vsel %vm347_vm0, %v2509_v62, 0.0  ;;  %v426_v9 = vsel %vm347_vm0, %v2516_v6, 0.0  ;;  %v429_v10 = vsel %vm347_vm0, %v2518_v7, 0.0 }
  0x21   : > { %367 = vadd.xlane.f32.xlu0 %v366_v19  ;;  %370 = vadd.xlane.f32.xlu1 %v369_v20  ;;  %3376 = vst [vmem:[#allocation18_spill] sm:$0xff] %v2516_v6  ;;  %3377 = vst [vmem:[#allocation19_spill] sm:$0xff] %v2518_v7  ;;  %v432_v18 = vsel %vm347_vm0, %v2525_v13, 0.0  ;;  %v435_v19 = vsel %vm347_vm0, %v2527_v14, 0.0  ;;  %v2534_v20 = vunpack.c.l.bf16 %v2079_v15 }
  0x22   : > { %3378 = vst [vmem:[#allocation20_spill] sm:$0xff] %v2525_v13  ;;  %3379 = vst [vmem:[#allocation21_spill] sm:$0xff] %v2527_v14 }
  0x23   : > { %3380 = vst [vmem:[#allocation22_spill] sm:$0xff] %v2534_v20  ;;  %3381 = vst [vmem:[#allocation23_spill] sm:$0xff] %v2536_v23 }
  0x25   : > { %373 = vadd.xlane.f32.xlu0 %v372_v24  ;;  %376 = vadd.xlane.f32.xlu1 %v375_v25  ;;  %v438_v24 = vsel %vm347_vm0, %v2534_v20, 0.0  ;;  %v441_v25 = vsel %vm347_vm0, %v2536_v23, 0.0 }
  0x29   : > { %379 = vadd.xlane.f32.xlu0 %v378_v29  ;;  %382 = vadd.xlane.f32.xlu1 %v381_v30 }
  0x2d   : > { %385 = vadd.xlane.f32.xlu0 %v384_v34  ;;  %388 = vadd.xlane.f32.xlu1 %v387_v35 }
  0x31   : > { %391 = vadd.xlane.f32.xlu0 %v390_v39  ;;  %394 = vadd.xlane.f32.xlu1 %v393_v40 }
  0x35   : > { %397 = vadd.xlane.f32.xlu0 %v396_v44  ;;  %400 = vadd.xlane.f32.xlu1 %v399_v45 }
  0x39   : > { %403 = vadd.xlane.f32.xlu0 %v402_v49  ;;  %406 = vadd.xlane.f32.xlu1 %v405_v50 }
  0x3d   : > { %409 = vadd.xlane.f32.xlu0 %v408_v54  ;;  %412 = vadd.xlane.f32.xlu1 %v411_v55 }
  0x41   : > { %415 = vadd.xlane.f32.xlu0 %v414_v59  ;;  %418 = vadd.xlane.f32.xlu1 %v417_v60 }
  0x45   : > { %421 = vadd.xlane.f32.xlu0 %v420_v0  ;;  %424 = vadd.xlane.f32.xlu1 %v423_v1 }
  0x49   : > { %427 = vadd.xlane.f32.xlu0 %v426_v9  ;;  %430 = vadd.xlane.f32.xlu1 %v429_v10 }
  0x4d   : > { %433 = vadd.xlane.f32.xlu0 %v432_v18  ;;  %436 = vadd.xlane.f32.xlu1 %v435_v19 }
  0x51   : > { %439 = vadd.xlane.f32.xlu0 %v438_v24  ;;  %442 = vadd.xlane.f32.xlu1 %v441_v25 }
  0x9e   : > { %v350_v28 = vpop.xlane.xlu0 %349  ;;  %v356_v29 = vpop.xlane.xlu1 %355 }
  0x9f   : > { %v445_v30 = vmul.f32 0.0625, %v350_v28  ;;  %v447_v33 = vmul.f32 0.0625, %v356_v29 }
  0xa1   : > { %v2543_v34 = vsub.f32 %v2400_v2, %v445_v30  ;;  %v2546_v35 = vsub.f32 %v2402_v3, %v447_v33 }
  0xa2   : > { %v353_v38 = vpop.xlane.xlu0 %352  ;;  %v359_v39 = vpop.xlane.xlu1 %358 }
  0xa3   : > { %v446_v40 = vmul.f32 0.0625, %v353_v38  ;;  %v448_v43 = vmul.f32 0.0625, %v359_v39  ;;  %v509_v44 = vmul.f32 %v2543_v34, %v2543_v34  ;;  %v511_v45 = vmul.f32 %v2546_v35, %v2546_v35 }
  0xa5   : > { %v2553_v48 = vsub.f32 %v2404_v4, %v446_v40  ;;  %v2556_v49 = vsub.f32 %v2406_v5, %v448_v43  ;;  %v541_v50 = vsel %vm347_vm0, %v509_v44, 0.0  ;;  %v547_v55 = vsel %vm347_vm0, %v511_v45, 0.0 }
  0xa6   : > { %542 = vadd.xlane.f32.xlu0 %v541_v50  ;;  %v362_v53 = vpop.xlane.xlu0 %361  ;;  %v365_v54 = vpop.xlane.xlu1 %364 }
  0xa7   : > { %v449_v58 = vmul.f32 0.0625, %v362_v53  ;;  %v450_v59 = vmul.f32 0.0625, %v365_v54  ;;  %v510_v60 = vmul.f32 %v2553_v48, %v2553_v48  ;;  %v512_v63 = vmul.f32 %v2556_v49, %v2556_v49 }
  0xa9   : > { %v2565_v0 = vsub.f32 %v2417_v11, %v449_v58  ;;  %v2568_v1 = vsub.f32 %v2419_v12, %v450_v59  ;;  %v544_v8 = vsel %vm347_vm0, %v510_v60, 0.0  ;;  %v550_v15 = vsel %vm347_vm0, %v512_v63, 0.0 }
  0xaa   : > { %548 = vadd.xlane.f32.xlu0 %v547_v55  ;;  %545 = vadd.xlane.f32.xlu1 %v544_v8  ;;  %v368_v9 = vpop.xlane.xlu0 %367  ;;  %v371_v10 = vpop.xlane.xlu1 %370 }
  0xab   : > { %v451_v18 = vmul.f32 0.0625, %v368_v9  ;;  %v452_v19 = vmul.f32 0.0625, %v371_v10  ;;  %v513_v24 = vmul.f32 %v2565_v0, %v2565_v0  ;;  %v514_v25 = vmul.f32 %v2568_v1, %v2568_v1 }
  0xad   : > { %v2577_v28 = vsub.f32 %v2426_v16, %v451_v18  ;;  %v2580_v29 = vsub.f32 %v2428_v17, %v452_v19  ;;  %v553_v30 = vsel %vm347_vm0, %v513_v24, 0.0  ;;  %v556_v39 = vsel %vm347_vm0, %v514_v25, 0.0 }
  0xae   : > { %551 = vadd.xlane.f32.xlu1 %v550_v15  ;;  %554 = vadd.xlane.f32.xlu0 %v553_v30  ;;  %v374_v33 = vpop.xlane.xlu0 %373  ;;  %v377_v38 = vpop.xlane.xlu1 %376 }
  0xaf   : > { %v453_v40 = vmul.f32 0.0625, %v374_v33  ;;  %v454_v43 = vmul.f32 0.0625, %v377_v38  ;;  %v515_v44 = vmul.f32 %v2577_v28, %v2577_v28  ;;  %v516_v45 = vmul.f32 %v2580_v29, %v2580_v29 }
  0xb1   : > { %v2589_v50 = vsub.f32 %v2435_v21, %v453_v40  ;;  %v2592_v53 = vsub.f32 %v2437_v22, %v454_v43  ;;  %v559_v54 = vsel %vm347_vm0, %v515_v44, 0.0  ;;  %v562_v59 = vsel %vm347_vm0, %v516_v45, 0.0 }
  0xb2   : > { %557 = vadd.xlane.f32.xlu1 %v556_v39  ;;  %560 = vadd.xlane.f32.xlu0 %v559_v54  ;;  %v380_v55 = vpop.xlane.xlu0 %379  ;;  %v383_v58 = vpop.xlane.xlu1 %382 }
  0xb3   : > { %v455_v60 = vmul.f32 0.0625, %v380_v55  ;;  %v456_v63 = vmul.f32 0.0625, %v383_v58  ;;  %v517_v8 = vmul.f32 %v2589_v50, %v2589_v50  ;;  %v518_v9 = vmul.f32 %v2592_v53, %v2592_v53 }
  0xb5   : > { %v2601_v10 = vsub.f32 %v2444_v26, %v455_v60  ;;  %v2604_v15 = vsub.f32 %v2446_v27, %v456_v63  ;;  %v565_v18 = vsel %vm347_vm0, %v517_v8, 0.0  ;;  %v568_v25 = vsel %vm347_vm0, %v518_v9, 0.0 }
  0xb6   : > { %563 = vadd.xlane.f32.xlu1 %v562_v59  ;;  %566 = vadd.xlane.f32.xlu0 %v565_v18  ;;  %v386_v19 = vpop.xlane.xlu0 %385  ;;  %v389_v24 = vpop.xlane.xlu1 %388 }
  0xb7   : > { %v457_v30 = vmul.f32 0.0625, %v386_v19  ;;  %v458_v33 = vmul.f32 0.0625, %v389_v24  ;;  %v519_v38 = vmul.f32 %v2601_v10, %v2601_v10  ;;  %v520_v39 = vmul.f32 %v2604_v15, %v2604_v15 }
  0xb9   : > { %v2613_v40 = vsub.f32 %v2453_v31, %v457_v30  ;;  %v2616_v43 = vsub.f32 %v2455_v32, %v458_v33  ;;  %v571_v44 = vsel %vm347_vm0, %v519_v38, 0.0  ;;  %v574_v55 = vsel %vm347_vm0, %v520_v39, 0.0 }
  0xba   : > { %569 = vadd.xlane.f32.xlu1 %v568_v25  ;;  %572 = vadd.xlane.f32.xlu0 %v571_v44  ;;  %v392_v45 = vpop.xlane.xlu0 %391  ;;  %v395_v54 = vpop.xlane.xlu1 %394 }
  0xbb   : > { %v459_v58 = vmul.f32 0.0625, %v392_v45  ;;  %v460_v59 = vmul.f32 0.0625, %v395_v54  ;;  %v521_v60 = vmul.f32 %v2613_v40, %v2613_v40  ;;  %v522_v63 = vmul.f32 %v2616_v43, %v2616_v43 }
  0xbd   : > { %v2625_v8 = vsub.f32 %v2462_v36, %v459_v58  ;;  %v2628_v9 = vsub.f32 %v2464_v37, %v460_v59  ;;  %v577_v18 = vsel %vm347_vm0, %v521_v60, 0.0  ;;  %v580_v25 = vsel %vm347_vm0, %v522_v63, 0.0 }
  0xbe   : > { %575 = vadd.xlane.f32.xlu1 %v574_v55  ;;  %578 = vadd.xlane.f32.xlu0 %v577_v18  ;;  %v398_v19 = vpop.xlane.xlu0 %397  ;;  %v401_v24 = vpop.xlane.xlu1 %400 }
  0xbf   : > { %v461_v30 = vmul.f32 0.0625, %v398_v19  ;;  %v462_v33 = vmul.f32 0.0625, %v401_v24  ;;  %v523_v38 = vmul.f32 %v2625_v8, %v2625_v8  ;;  %v524_v39 = vmul.f32 %v2628_v9, %v2628_v9 }
  0xc1   : > { %v2637_v44 = vsub.f32 %v2471_v41, %v461_v30  ;;  %v2640_v45 = vsub.f32 %v2473_v42, %v462_v33  ;;  %v583_v54 = vsel %vm347_vm0, %v523_v38, 0.0  ;;  %v586_v59 = vsel %vm347_vm0, %v524_v39, 0.0 }
  0xc2   : > { %581 = vadd.xlane.f32.xlu1 %v580_v25  ;;  %584 = vadd.xlane.f32.xlu0 %v583_v54  ;;  %v404_v55 = vpop.xlane.xlu0 %403  ;;  %v407_v58 = vpop.xlane.xlu1 %406 }
  0xc3   : > { %v463_v60 = vmul.f32 0.0625, %v404_v55  ;;  %v464_v63 = vmul.f32 0.0625, %v407_v58  ;;  %v525_v18 = vmul.f32 %v2637_v44, %v2637_v44  ;;  %v526_v19 = vmul.f32 %v2640_v45, %v2640_v45 }
  0xc5   : > { %v2649_v24 = vsub.f32 %v2480_v46, %v463_v60  ;;  %v2652_v30 = vsub.f32 %v2482_v47, %v464_v63  ;;  %v589_v25 = vsel %vm347_vm0, %v525_v18, 0.0  ;;  %v592_v39 = vsel %vm347_vm0, %v526_v19, 0.0 }
  0xc6   : > { %587 = vadd.xlane.f32.xlu1 %v586_v59  ;;  %590 = vadd.xlane.f32.xlu0 %v589_v25  ;;  %v410_v33 = vpop.xlane.xlu0 %409  ;;  %v413_v38 = vpop.xlane.xlu1 %412 }
  0xc7   : > { %v465_v54 = vmul.f32 0.0625, %v410_v33  ;;  %v466_v55 = vmul.f32 0.0625, %v413_v38  ;;  %v527_v58 = vmul.f32 %v2649_v24, %v2649_v24  ;;  %v528_v60 = vmul.f32 %v2652_v30, %v2652_v30 }
  0xc9   : > { %v2661_v42 = vsub.f32 %v2489_v51, %v465_v54  ;;  %v2664_v63 = vsub.f32 %v2491_v52, %v466_v55  ;;  %v595_v59 = vsel %vm347_vm0, %v527_v58, 0.0  ;;  %v598_v25 = vsel %vm347_vm0, %v528_v60, 0.0  ;;  %v2199_v58 = vld [vmem:[%s3333_s3] sm:$0xff]  }
  0xca   : > { %593 = vadd.xlane.f32.xlu1 %v592_v39  ;;  %596 = vadd.xlane.f32.xlu0 %v595_v59  ;;  %v416_v18 = vpop.xlane.xlu0 %415  ;;  %v419_v19 = vpop.xlane.xlu1 %418 }
  0xcb   : > { %v467_v33 = vmul.f32 0.0625, %v416_v18  ;;  %v468_v38 = vmul.f32 0.0625, %v419_v19  ;;  %v529_v47 = vmul.f32 %v2661_v42, %v2661_v42  ;;  %v530_v54 = vmul.f32 %v2664_v63, %v2664_v63  ;;  %2117 = vmatprep.subr.bf16.mxu0 %v2199_v58 }
  0xcc   : > { %2118 = vmatpush3.bf16.msra.mxu0 %v2199_v58 }
  0xcd   : > { %v2673_v51 = vsub.f32 %v2498_v56, %v467_v33  ;;  %v2676_v55 = vsub.f32 %v2500_v57, %v468_v38  ;;  %v601_v39 = vsel %vm347_vm0, %v529_v47, 0.0  ;;  %v604_v18 = vsel %vm347_vm0, %v530_v54, 0.0 }
  0xce   : > { %599 = vadd.xlane.f32.xlu1 %v598_v25  ;;  %602 = vadd.xlane.f32.xlu0 %v601_v39  ;;  %v422_v60 = vpop.xlane.xlu0 %421  ;;  %v425_v59 = vpop.xlane.xlu1 %424 }
  0xcf   : > { %v469_v19 = vmul.f32 0.0625, %v422_v60  ;;  %v470_v52 = vmul.f32 0.0625, %v425_v59  ;;  %v531_v33 = vmul.f32 %v2673_v51, %v2673_v51  ;;  %v532_v38 = vmul.f32 %v2676_v55, %v2676_v55 }
  0xd1   : > { %v2688_v47 = vsub.f32 %v2507_v61, %v469_v19  ;;  %v2691_v25 = vsub.f32 %v2509_v62, %v470_v52  ;;  %v607_v39 = vsel %vm347_vm0, %v531_v33, 0.0  ;;  %v610_v59 = vsel %vm347_vm0, %v532_v38, 0.0 }
  0xd2   : > { %605 = vadd.xlane.f32.xlu1 %v604_v18  ;;  %608 = vadd.xlane.f32.xlu0 %v607_v39  ;;  %v428_v54 = vpop.xlane.xlu0 %427  ;;  %v431_v60 = vpop.xlane.xlu1 %430 }
  0xd3   : > { %v471_v57 = vmul.f32 0.0625, %v428_v54  ;;  %v472_v56 = vmul.f32 0.0625, %v431_v60  ;;  %v533_v41 = vmul.f32 %v2688_v47, %v2688_v47  ;;  %v534_v58 = vmul.f32 %v2691_v25, %v2691_v25 }
  0xd5   : > { %v2700_v19 = vsub.f32 %v2516_v6, %v471_v57  ;;  %v2703_v52 = vsub.f32 %v2518_v7, %v472_v56  ;;  %v613_v18 = vsel %vm347_vm0, %v533_v41, 0.0  ;;  %v616_v39 = vsel %vm347_vm0, %v534_v58, 0.0 }
  0xd6   : > { %611 = vadd.xlane.f32.xlu1 %v610_v59  ;;  %614 = vadd.xlane.f32.xlu0 %v613_v18  ;;  %v434_v33 = vpop.xlane.xlu0 %433  ;;  %v437_v38 = vpop.xlane.xlu1 %436 }
  0xd7   : > { %v473_v54 = vmul.f32 0.0625, %v434_v33  ;;  %v474_v60 = vmul.f32 0.0625, %v437_v38  ;;  %v535_v62 = vmul.f32 %v2700_v19, %v2700_v19  ;;  %v536_v57 = vmul.f32 %v2703_v52, %v2703_v52 }
  0xd9   : > { %v2712_v61 = vsub.f32 %v2525_v13, %v473_v54  ;;  %v2715_v56 = vsub.f32 %v2527_v14, %v474_v60  ;;  %v619_v41 = vsel %vm347_vm0, %v535_v62, 0.0  ;;  %v622_v18 = vsel %vm347_vm0, %v536_v57, 0.0 }
  0xda   : > { %617 = vadd.xlane.f32.xlu1 %v616_v39  ;;  %620 = vadd.xlane.f32.xlu0 %v619_v41  ;;  %v440_v59 = vpop.xlane.xlu0 %439  ;;  %v443_v58 = vpop.xlane.xlu1 %442 }
  0xdb   : > { %v475_v33 = vmul.f32 0.0625, %v440_v59  ;;  %v476_v38 = vmul.f32 0.0625, %v443_v58  ;;  %v537_v7 = vmul.f32 %v2712_v61, %v2712_v61  ;;  %v538_v54 = vmul.f32 %v2715_v56, %v2715_v56 }
  0xdd   : > { %v2724_v13 = vsub.f32 %v2534_v20, %v475_v33  ;;  %v2727_v60 = vsub.f32 %v2536_v23, %v476_v38  ;;  %v625_v62 = vsel %vm347_vm0, %v537_v7, 0.0  ;;  %v628_v39 = vsel %vm347_vm0, %v538_v54, 0.0 }
  0xde   : > { %623 = vadd.xlane.f32.xlu1 %v622_v18  ;;  %626 = vadd.xlane.f32.xlu0 %v625_v62 }
  0xdf   : > { %v539_v57 = vmul.f32 %v2724_v13, %v2724_v13  ;;  %v540_v41 = vmul.f32 %v2727_v60, %v2727_v60 }
  0xe1   : > { %v631_v59 = vsel %vm347_vm0, %v539_v57, 0.0  ;;  %v634_v58 = vsel %vm347_vm0, %v540_v41, 0.0 }
  0xe2   : > { %629 = vadd.xlane.f32.xlu1 %v628_v39  ;;  %632 = vadd.xlane.f32.xlu0 %v631_v59 }
  0xe6   : > { %635 = vadd.xlane.f32.xlu1 %v634_v58 }
 0x12f   : > { %v543_v33 = vpop.xlane.xlu0 %542 }
 0x130   : > { %v637_v38 = vmul.f32 0.0625, %v543_v33 }
 0x132   : > { %v669_v7 = vadd.f32 1e-05, %v637_v38 }
 0x133   : > { %v546_v18 = vpop.xlane.xlu1 %545  ;;  %v549_v62 = vpop.xlane.xlu0 %548 }
 0x134   : > { %2204 = vrsqrt.f32 %v669_v7  ;;  %v638_v54 = vmul.f32 0.0625, %v546_v18  ;;  %v639_v14 = vmul.f32 0.0625, %v549_v62 }
 0x136   : > { %v670_v23 = vadd.f32 1e-05, %v638_v54  ;;  %v671_v20 = vadd.f32 1e-05, %v639_v14 }
 0x137   : > { %v552_v6 = vpop.xlane.xlu1 %551  ;;  %v555_v46 = vpop.xlane.xlu0 %554 }
 0x138   : > { %2206 = vrsqrt.f32 %v670_v23  ;;  %v640_v32 = vmul.f32 0.0625, %v552_v6  ;;  %v641_v57 = vmul.f32 0.0625, %v555_v46 }
 0x139   : > { %2208 = vrsqrt.f32 %v671_v20  ;;  %v2741_v20 = vld [vmem:[%s3331_s1] ss:$0 sm:$0xff] }
 0x13a   : > { %v672_v39 = vadd.f32 1e-05, %v640_v32  ;;  %v673_v59 = vadd.f32 1e-05, %v641_v57 }
 0x13b   : > { %v558_v41 = vpop.xlane.xlu1 %557  ;;  %v561_v58 = vpop.xlane.xlu0 %560 }
 0x13c   : > { %2210 = vrsqrt.f32 %v672_v39  ;;  %v642_v33 = vmul.f32 0.0625, %v558_v41  ;;  %v643_v38 = vmul.f32 0.0625, %v561_v58 }
 0x13d   : > { %2212 = vrsqrt.f32 %v673_v59 }
 0x13e   : > { %v674_v37 = vadd.f32 1e-05, %v642_v33  ;;  %v675_v7 = vadd.f32 1e-05, %v643_v38 }
 0x13f   : > { %v564_v18 = vpop.xlane.xlu1 %563  ;;  %v567_v62 = vpop.xlane.xlu0 %566 }
 0x140   : > { %2214 = vrsqrt.f32 %v674_v37  ;;  %v644_v14 = vmul.f32 0.0625, %v564_v18  ;;  %v645_v54 = vmul.f32 0.0625, %v567_v62 }
 0x141   : > { %v2205_v31 = vpop.eup %2204  ;;  %2216 = vrsqrt.f32 %v675_v7 }
 0x142   : > { %v676_v6 = vadd.f32 1e-05, %v644_v14  ;;  %v677_v46 = vadd.f32 1e-05, %v645_v54  ;;  %v733_v32 = vmul.f32 %v2205_v31, %v2543_v34  ;;  %v2748_v31 = vld [vmem:[%s3332_s2] ss:$0 sm:$0xff] }
 0x143   : > { %v570_v23 = vpop.xlane.xlu1 %569  ;;  %v573_v57 = vpop.xlane.xlu0 %572 }
 0x144   : > { %2218 = vrsqrt.f32 %v676_v6  ;;  %v646_v39 = vmul.f32 0.0625, %v570_v23  ;;  %v647_v59 = vmul.f32 0.0625, %v573_v57  ;;  %v772_v37 = vmul.f32 %v2741_v20, %v733_v32 }
 0x145   : > { %v2207_v41 = vpop.eup %2206  ;;  %2220 = vrsqrt.f32 %v677_v46 }
 0x146   : > { %v2209_v58 = vpop.eup %2208  ;;  %v678_v33 = vadd.f32 1e-05, %v646_v39  ;;  %v679_v38 = vadd.f32 1e-05, %v647_v59  ;;  %v734_v7 = vmul.f32 %v2207_v41, %v2553_v48  ;;  %v811_v32 = vadd.f32 %v2748_v31, %v772_v37 }
 0x147   : > { %v576_v34 = vpop.xlane.xlu1 %575  ;;  %v579_v18 = vpop.xlane.xlu0 %578  ;;  %v735_v62 = vmul.f32 %v2209_v58, %v2546_v35 }
 0x148   : > { %2222 = vrsqrt.f32 %v678_v33  ;;  %v648_v14 = vmul.f32 0.0625, %v576_v34  ;;  %v649_v54 = vmul.f32 0.0625, %v579_v18  ;;  %v773_v6 = vmul.f32 %v2741_v20, %v734_v7 }
 0x149   : > { %v2211_v46 = vpop.eup %2210  ;;  %2224 = vrsqrt.f32 %v679_v38  ;;  %v774_v35 = vmul.f32 %v2741_v20, %v735_v62 }
 0x14a   : > { %v2213_v23 = vpop.eup %2212  ;;  %v680_v48 = vadd.f32 1e-05, %v648_v14  ;;  %v681_v57 = vadd.f32 1e-05, %v649_v54  ;;  %v812_v39 = vadd.f32 %v2748_v31, %v773_v6  ;;  %v736_v59 = vmul.f32 %v2211_v46, %v2556_v49 }
 0x14b   : > { %v582_v41 = vpop.xlane.xlu1 %581  ;;  %v585_v36 = vpop.xlane.xlu0 %584  ;;  %v737_v58 = vmul.f32 %v2213_v23, %v2565_v0  ;;  %v813_v0 = vadd.f32 %v2748_v31, %v774_v35 }
 0x14c   : > { %2226 = vrsqrt.f32 %v680_v48  ;;  %v650_v33 = vmul.f32 0.0625, %v582_v41  ;;  %v651_v7 = vmul.f32 0.0625, %v585_v36  ;;  %v843_v34 = vpack.c.bf16 %v812_v39, %v811_v32 }
 0x14d   : > { %v2215_v38 = vpop.eup %2214  ;;  %2228 = vrsqrt.f32 %v681_v57  ;;  %v775_v37 = vmul.f32 %v2741_v20, %v736_v59  ;;  %v776_v18 = vmul.f32 %v2741_v20, %v737_v58 }
 0x14e   : > { %v2217_v14 = vpop.eup %2216  ;;  %v682_v54 = vadd.f32 1e-05, %v650_v33  ;;  %v683_v6 = vadd.f32 1e-05, %v651_v7  ;;  %2119 = vmatprep.mubr.msk.bf16.mxu0 %vm347_vm0, %v843_v34  ;;  %v738_v49 = vmul.f32 %v2215_v38, %v2568_v1 }
 0x14f   : > { %v588_v62 = vpop.xlane.xlu1 %587  ;;  %v591_v46 = vpop.xlane.xlu0 %590  ;;  %v814_v36 = vadd.f32 %v2748_v31, %v775_v37  ;;  %v739_v32 = vmul.f32 %v2217_v14, %v2577_v28  ;;  %v815_v41 = vadd.f32 %v2748_v31, %v776_v18 }
 0x150   : > { %2230 = vrsqrt.f32 %v682_v54  ;;  %v652_v23 = vmul.f32 0.0625, %v588_v62  ;;  %v653_v48 = vmul.f32 0.0625, %v591_v46  ;;  %v777_v57 = vmul.f32 %v2741_v20, %v738_v49 }
 0x151   : > { %v2219_v39 = vpop.eup %2218  ;;  %2232 = vrsqrt.f32 %v683_v6  ;;  %v844_v59 = vpack.c.bf16 %v814_v36, %v813_v0  ;;  %v778_v38 = vmul.f32 %v2741_v20, %v739_v32 }
 0x152   : > { %v2221_v58 = vpop.eup %2220  ;;  %v684_v1 = vadd.f32 1e-05, %v652_v23  ;;  %v685_v33 = vadd.f32 1e-05, %v653_v48  ;;  %v816_v7 = vadd.f32 %v2748_v31, %v777_v57  ;;  %v740_v35 = vmul.f32 %v2219_v39, %v2580_v29 }
 0x153   : > { %2120 = vmatmul.mubr.msk.bf16.vlgmr.msra.gmra.mxu0 %vm347_vm0, %v844_v59  ;;  %v594_v28 = vpop.xlane.xlu1 %593  ;;  %v597_v34 = vpop.xlane.xlu0 %596  ;;  %v741_v37 = vmul.f32 %v2221_v58, %v2589_v50  ;;  %v817_v50 = vadd.f32 %v2748_v31, %v778_v38 }
 0x154   : > { %2234 = vrsqrt.f32 %v684_v1  ;;  %v654_v14 = vmul.f32 0.0625, %v594_v28  ;;  %v655_v54 = vmul.f32 0.0625, %v597_v34  ;;  %v845_v6 = vpack.c.bf16 %v816_v7, %v815_v41 }
 0x155   : > { %v2223_v18 = vpop.eup %2222  ;;  %2236 = vrsqrt.f32 %v685_v33  ;;  %v779_v49 = vmul.f32 %v2741_v20, %v740_v35  ;;  %v780_v62 = vmul.f32 %v2741_v20, %v741_v37 }
 0x156   : > { %v2225_v46 = vpop.eup %2224  ;;  %v686_v29 = vadd.f32 1e-05, %v654_v14  ;;  %v687_v0 = vadd.f32 1e-05, %v655_v54  ;;  %2123 = vmatprep.mubr.msk.bf16.mxu0 %vm347_vm0, %v845_v6  ;;  %v742_v36 = vmul.f32 %v2223_v18, %v2592_v53 }
 0x157   : > { %v600_v32 = vpop.xlane.xlu1 %599  ;;  %v603_v23 = vpop.xlane.xlu0 %602  ;;  %v818_v48 = vadd.f32 %v2748_v31, %v779_v49  ;;  %v743_v57 = vmul.f32 %v2225_v46, %v2601_v10  ;;  %v819_v33 = vadd.f32 %v2748_v31, %v780_v62 }
 0x158   : > { %2238 = vrsqrt.f32 %v686_v29  ;;  %v656_v39 = vmul.f32 0.0625, %v600_v32  ;;  %v657_v59 = vmul.f32 0.0625, %v603_v23  ;;  %v781_v41 = vmul.f32 %v2741_v20, %v742_v36 }
 0x159   : > { %v2227_v58 = vpop.eup %2226  ;;  %2240 = vrsqrt.f32 %v687_v0  ;;  %v846_v1 = vpack.c.bf16 %v818_v48, %v817_v50  ;;  %v782_v37 = vmul.f32 %v2741_v20, %v743_v57 }
 0x15a   : > { %v2229_v7 = vpop.eup %2228  ;;  %v688_v53 = vadd.f32 1e-05, %v656_v39  ;;  %v689_v35 = vadd.f32 1e-05, %v657_v59  ;;  %v820_v28 = vadd.f32 %v2748_v31, %v781_v41  ;;  %v744_v34 = vmul.f32 %v2227_v58, %v2604_v15 }
 0x15b   : > { %2124 = vmatmul.mubr.msk.bf16.gmra.mxu0 %vm347_vm0, %v846_v1  ;;  %v606_v10 = vpop.xlane.xlu1 %605  ;;  %v609_v38 = vpop.xlane.xlu0 %608  ;;  %v745_v14 = vmul.f32 %v2229_v7, %v2613_v40  ;;  %v821_v40 = vadd.f32 %v2748_v31, %v782_v37 }
 0x15c   : > { %2242 = vrsqrt.f32 %v688_v53  ;;  %v658_v54 = vmul.f32 0.0625, %v606_v10  ;;  %v659_v6 = vmul.f32 0.0625, %v609_v38  ;;  %v847_v18 = vpack.c.bf16 %v820_v28, %v819_v33 }
 0x15d   : > { %v2231_v49 = vpop.eup %2230  ;;  %2244 = vrsqrt.f32 %v689_v35  ;;  %v783_v62 = vmul.f32 %v2741_v20, %v744_v34  ;;  %v784_v46 = vmul.f32 %v2741_v20, %v745_v14 }
 0x15e   : > { %v2233_v29 = vpop.eup %2232  ;;  %v690_v15 = vadd.f32 1e-05, %v658_v54  ;;  %v691_v0 = vadd.f32 1e-05, %v659_v6  ;;  %2127 = vmatprep.mubr.msk.bf16.mxu0 %vm347_vm0, %v847_v18  ;;  %v746_v36 = vmul.f32 %v2231_v49, %v2616_v43 }
 0x15f   : > { %v612_v32 = vpop.xlane.xlu1 %611  ;;  %v615_v23 = vpop.xlane.xlu0 %614  ;;  %v822_v50 = vadd.f32 %v2748_v31, %v783_v62  ;;  %v747_v48 = vmul.f32 %v2233_v29, %v2625_v8  ;;  %v823_v1 = vadd.f32 %v2748_v31, %v784_v46 }
 0x160   : > { %2246 = vrsqrt.f32 %v690_v15  ;;  %v660_v57 = vmul.f32 0.0625, %v612_v32  ;;  %v661_v39 = vmul.f32 0.0625, %v615_v23  ;;  %v785_v59 = vmul.f32 %v2741_v20, %v746_v36 }
 0x161   : > { %v2235_v41 = vpop.eup %2234  ;;  %2248 = vrsqrt.f32 %v691_v0  ;;  %v848_v58 = vpack.c.bf16 %v822_v50, %v821_v40  ;;  %v786_v34 = vmul.f32 %v2741_v20, %v747_v48 }
 0x162   : > { %v2237_v33 = vpop.eup %2236  ;;  %v692_v43 = vadd.f32 1e-05, %v660_v57  ;;  %v693_v7 = vadd.f32 1e-05, %v661_v39  ;;  %v824_v53 = vadd.f32 %v2748_v31, %v785_v59  ;;  %v748_v35 = vmul.f32 %v2235_v41, %v2628_v9 }
 0x163   : > { %2128 = vmatmul.mubr.msk.bf16.gmra.mxu0 %vm347_vm0, %v848_v58  ;;  %v618_v8 = vpop.xlane.xlu1 %617  ;;  %v621_v28 = vpop.xlane.xlu0 %620  ;;  %v749_v10 = vmul.f32 %v2237_v33, %v2637_v44  ;;  %v825_v44 = vadd.f32 %v2748_v31, %v786_v34 }
 0x164   : > { %2250 = vrsqrt.f32 %v692_v43  ;;  %v662_v38 = vmul.f32 0.0625, %v618_v8  ;;  %v663_v37 = vmul.f32 0.0625, %v621_v28  ;;  %v849_v14 = vpack.c.bf16 %v824_v53, %v823_v1 }
 0x165   : > { %v2239_v54 = vpop.eup %2238  ;;  %2252 = vrsqrt.f32 %v693_v7  ;;  %v787_v6 = vmul.f32 %v2741_v20, %v748_v35  ;;  %v788_v18 = vmul.f32 %v2741_v20, %v749_v10 }
 0x166   : > { %v2241_v49 = vpop.eup %2240  ;;  %v694_v9 = vadd.f32 1e-05, %v662_v38  ;;  %v695_v62 = vadd.f32 1e-05, %v663_v37  ;;  %2131 = vmatprep.mubr.msk.bf16.mxu0 %vm347_vm0, %v849_v14  ;;  %v750_v46 = vmul.f32 %v2239_v54, %v2640_v45 }
 0x167   : > { %v624_v29 = vpop.xlane.xlu1 %623  ;;  %v627_v15 = vpop.xlane.xlu0 %626  ;;  %v826_v0 = vadd.f32 %v2748_v31, %v787_v6  ;;  %v751_v36 = vmul.f32 %v2241_v49, %v2649_v24  ;;  %v827_v57 = vadd.f32 %v2748_v31, %v788_v18 }
 0x168   : > { %2254 = vrsqrt.f32 %v694_v9  ;;  %v664_v32 = vmul.f32 0.0625, %v624_v29  ;;  %v665_v23 = vmul.f32 0.0625, %v627_v15  ;;  %v789_v40 = vmul.f32 %v2741_v20, %v750_v46 }
 0x169   : > { %v2243_v50 = vpop.eup %2242  ;;  %2256 = vrsqrt.f32 %v695_v62  ;;  %v850_v48 = vpack.c.bf16 %v826_v0, %v825_v44  ;;  %v790_v33 = vmul.f32 %v2741_v20, %v751_v36 }
 0x16a   : > { %v2245_v39 = vpop.eup %2244  ;;  %v696_v45 = vadd.f32 1e-05, %v664_v32  ;;  %v697_v59 = vadd.f32 1e-05, %v665_v23  ;;  %v828_v41 = vadd.f32 %v2748_v31, %v789_v40  ;;  %v752_v58 = vmul.f32 %v2243_v50, %v2652_v30 }
 0x16b   : > { %2132 = vmatmul.mubr.msk.bf16.gmra.mxu0 %vm347_vm0, %v850_v48  ;;  %v630_v24 = vpop.xlane.xlu1 %629  ;;  %v633_v1 = vpop.xlane.xlu0 %632  ;;  %v753_v43 = vmul.f32 %v2245_v39, %v2661_v42  ;;  %v829_v42 = vadd.f32 %v2748_v31, %v790_v33 }
 0x16c   : > { %2258 = vrsqrt.f32 %v696_v45  ;;  %v666_v7 = vmul.f32 0.0625, %v630_v24  ;;  %v667_v53 = vmul.f32 0.0625, %v633_v1  ;;  %v851_v35 = vpack.c.bf16 %v828_v41, %v827_v57 }
 0x16d   : > { %v2247_v8 = vpop.eup %2246  ;;  %2260 = vrsqrt.f32 %v697_v59  ;;  %v791_v28 = vmul.f32 %v2741_v20, %v752_v58  ;;  %v792_v34 = vmul.f32 %v2741_v20, %v753_v43 }
 0x16e   : > { %v2249_v10 = vpop.eup %2248  ;;  %v698_v30 = vadd.f32 1e-05, %v666_v7  ;;  %v699_v38 = vadd.f32 1e-05, %v667_v53  ;;  %2135 = vmatprep.mubr.msk.bf16.mxu0 %vm347_vm0, %v851_v35  ;;  %v754_v37 = vmul.f32 %v2247_v8, %v2664_v63 }
 0x16f   : > { %v636_v14 = vpop.xlane.xlu1 %635  ;;  %v830_v54 = vadd.f32 %v2748_v31, %v791_v28  ;;  %v755_v6 = vmul.f32 %v2249_v10, %v2673_v51  ;;  %v831_v46 = vadd.f32 %v2748_v31, %v792_v34 }
 0x170   : > { %2262 = vrsqrt.f32 %v698_v30  ;;  %v668_v18 = vmul.f32 0.0625, %v636_v14  ;;  %v793_v49 = vmul.f32 %v2741_v20, %v754_v37 }
 0x171   : > { %v2251_v9 = vpop.eup %2250  ;;  %2264 = vrsqrt.f32 %v699_v38  ;;  %v852_v62 = vpack.c.bf16 %v830_v54, %v829_v42  ;;  %v794_v0 = vmul.f32 %v2741_v20, %v755_v6 }
 0x172   : > { %v2253_v29 = vpop.eup %2252  ;;  %v700_v15 = vadd.f32 1e-05, %v668_v18  ;;  %v832_v63 = vadd.f32 %v2748_v31, %v793_v49  ;;  %v756_v44 = vmul.f32 %v2251_v9, %v2676_v55  ;;  %v2201_v49 = vld [vmem:[%s3335_s5 + $0x10] sm:$0xff]   ;;  %v2874_v9 = vld [vmem:[%s3334_s4] ss:$0 sm:$0xff] }
 0x173   : > { %2136 = vmatmul.mubr.msk.bf16.gmra.mxu0 %vm347_vm0, %v852_v62  ;;  %v757_v51 = vmul.f32 %v2253_v29, %v2688_v47  ;;  %v833_v50 = vadd.f32 %v2748_v31, %v794_v0 }
 0x174   : > { %2266 = vrsqrt.f32 %v700_v15  ;;  %v853_v36 = vpack.c.bf16 %v832_v63, %v831_v46  ;;  %v795_v32 = vmul.f32 %v2741_v20, %v756_v44 }
 0x175   : > { %v2255_v23 = vpop.eup %2254  ;;  %v796_v57 = vmul.f32 %v2741_v20, %v757_v51 }
 0x176   : > { %v2257_v40 = vpop.eup %2256  ;;  %2139 = vmatprep.mubr.msk.bf16.mxu0 %vm347_vm0, %v853_v36  ;;  %v834_v48 = vadd.f32 %v2748_v31, %v795_v32  ;;  %v758_v55 = vmul.f32 %v2255_v23, %v2691_v25 }
 0x177   : > { %v759_v39 = vmul.f32 %v2257_v40, %v2700_v19  ;;  %v835_v58 = vadd.f32 %v2748_v31, %v796_v57 }
 0x178   : > { %v854_v45 = vpack.c.bf16 %v834_v48, %v833_v50  ;;  %v797_v47 = vmul.f32 %v2741_v20, %v758_v55 }
 0x179   : > { %v2259_v59 = vpop.eup %2258  ;;  %v798_v33 = vmul.f32 %v2741_v20, %v759_v39 }
 0x17a   : > { %v2261_v41 = vpop.eup %2260  ;;  %v836_v24 = vadd.f32 %v2748_v31, %v797_v47  ;;  %v760_v1 = vmul.f32 %v2259_v59, %v2703_v52 }
 0x17b   : > { %2140 = vmatmul.mubr.msk.bf16.gmra.mxu0 %vm347_vm0, %v854_v45  ;;  %v761_v25 = vmul.f32 %v2261_v41, %v2712_v61  ;;  %v837_v35 = vadd.f32 %v2748_v31, %v798_v33 }
 0x17c   : > { %v855_v43 = vpack.c.bf16 %v836_v24, %v835_v58  ;;  %v799_v19 = vmul.f32 %v2741_v20, %v760_v1 }
 0x17d   : > { %v2263_v7 = vpop.eup %2262  ;;  %v800_v52 = vmul.f32 %v2741_v20, %v761_v25 }
 0x17e   : > { %v2265_v53 = vpop.eup %2264  ;;  %2143 = vmatprep.mubr.msk.bf16.mxu0 %vm347_vm0, %v855_v43  ;;  %v838_v8 = vadd.f32 %v2748_v31, %v799_v19  ;;  %v762_v28 = vmul.f32 %v2263_v7, %v2715_v56 }
 0x17f   : > { %v763_v34 = vmul.f32 %v2265_v53, %v2724_v13  ;;  %v839_v38 = vadd.f32 %v2748_v31, %v800_v52 }
 0x180   : > { %v856_v10 = vpack.c.bf16 %v838_v8, %v837_v35  ;;  %v801_v61 = vmul.f32 %v2741_v20, %v762_v28 }
 0x181   : > { %v2267_v30 = vpop.eup %2266  ;;  %v802_v42 = vmul.f32 %v2741_v20, %v763_v34 }
 0x182   : > { %v840_v37 = vadd.f32 %v2748_v31, %v801_v61  ;;  %v764_v14 = vmul.f32 %v2267_v30, %v2727_v60  ;;  %v2200_v60 = vld [vmem:[%s3335_s5 + $0x18] sm:$0xff]  }
 0x183   : > { %2144 = vmatmul.mubr.msk.bf16.gmra.mxu0 %vm347_vm0, %v856_v10  ;;  %v841_v13 = vadd.f32 %v2748_v31, %v802_v42  ;;  %2151 = vmatprep.subr.bf16.mxu1 %v2200_v60 }
 0x184   : > { %v857_v54 = vpack.c.bf16 %v840_v37, %v839_v38  ;;  %v803_v56 = vmul.f32 %v2741_v20, %v764_v14  ;;  %2152 = vmatpush3.bf16.msra.mxu1 %v2200_v60  ;;  %v2202_v20 = vld [vmem:[%s3335_s5 + $0x8] sm:$0xff]  }
 0x185   : > { %2153 = vmatprep.subr.bf16.mxu1 %v2201_v49 }
 0x186   : > { %2147 = vmatprep.mubr.msk.bf16.mxu0 %vm347_vm0, %v857_v54  ;;  %v842_v6 = vadd.f32 %v2748_v31, %v803_v56  ;;  %v2203_v31 = vld [vmem:[%s3335_s5] sm:$0xff]  }
 0x188   : > { %v858_v18 = vpack.c.bf16 %v842_v6, %v841_v13  ;;  %2154 = vmatpush3.bf16.msra.mxu1 %v2201_v49 }
 0x189   : > { %2155 = vmatprep.subr.bf16.mxu1 %v2202_v20 }
 0x18b   : > { %2148 = vmatmul.mubr.msk.bf16.gmra.mxu0 %vm347_vm0, %v858_v18 }
 0x18c   : > { %2156 = vmatpush3.bf16.msra.mxu1 %v2202_v20 }
 0x18d   : > { %2157 = vmatprep.subr.bf16.mxu1 %v2203_v31 }
 0x190   : > { %2158 = vmatpush3.bf16.msra.mxu1 %v2203_v31 }
 0x213   : > { %v2121_v62 = vpop.f32.mrf.mxu0 }
 0x214   : > { %v2877_v46 = vadd.f32 %v2121_v62, %v2874_v9 }
 0x215   : > { %v956_v29 = vpop.f32.mrf.mxu0 }
 0x216   : > { %v1085_v15 = vmul.f32 %v2877_v46, %v2877_v46  ;;  %v2882_v63 = vadd.f32 %v2874_v9, %v956_v29 }
 0x217   : > { %v2122_v44 = vpop.f32.mrf.mxu0 }
 0x218   : > { %v1117_v0 = vmul.f32 %v1085_v15, %v2877_v46  ;;  %v1083_v51 = vmul.f32 %v2882_v63, %v2882_v63  ;;  %v2888_v36 = vadd.f32 %v2122_v44, %v2874_v9 }
 0x219   : > { %v959_v32 = vpop.f32.mrf.mxu0 }
 0x21a   : > { %v1149_v23 = vmul.f32 0.044715, %v1117_v0  ;;  %v1115_v40 = vmul.f32 %v1083_v51, %v2882_v63  ;;  %v1086_v50 = vmul.f32 %v2888_v36, %v2888_v36  ;;  %v2894_v48 = vadd.f32 %v2874_v9, %v959_v32 }
 0x21b   : > { %v2125_v55 = vpop.f32.mrf.mxu0 }
 0x21c   : > { %v1181_v57 = vadd.f32 %v1149_v23, %v2877_v46  ;;  %v1147_v39 = vmul.f32 0.044715, %v1115_v40  ;;  %v1118_v45 = vmul.f32 %v1086_v50, %v2888_v36  ;;  %v1084_v47 = vmul.f32 %v2894_v48, %v2894_v48 }
 0x21d   : > { %v2901_v59 = vadd.f32 %v2125_v55, %v2874_v9  ;;  %v972_v41 = vpop.f32.mrf.mxu0 }
 0x21e   : > { %v1179_v58 = vadd.f32 %v1147_v39, %v2882_v63  ;;  %v1150_v24 = vmul.f32 0.044715, %v1118_v45  ;;  %v1116_v1 = vmul.f32 %v1084_v47, %v2894_v48  ;;  %v2908_v25 = vadd.f32 %v2874_v9, %v972_v41 }
 0x21f   : > { %v1089_v33 = vmul.f32 %v2901_v59, %v2901_v59  ;;  %v2126_v43 = vpop.f32.mrf.mxu0  ;;  %v1213_v19 = vmul.f32 0.7978846, %v1181_v57 }
 0x220   : > { %v1182_v7 = vadd.f32 %v1150_v24, %v2888_v36  ;;  %v1148_v53 = vmul.f32 0.044715, %v1116_v1  ;;  %v1211_v35 = vmul.f32 0.7978846, %v1179_v58  ;;  %v1087_v28 = vmul.f32 %v2908_v25, %v2908_v25 }
 0x221   : > { %v1121_v8 = vmul.f32 %v1089_v33, %v2901_v59  ;;  %v2915_v52 = vadd.f32 %v2126_v43, %v2874_v9  ;;  %v975_v34 = vpop.f32.mrf.mxu0  ;;  %2268 = vtanh.f32 %v1213_v19 }
 0x222   : > { %v1214_v10 = vmul.f32 0.7978846, %v1182_v7  ;;  %v1180_v61 = vadd.f32 %v1148_v53, %v2894_v48  ;;  %v2919_v30 = vadd.f32 %v2874_v9, %v975_v34  ;;  %v1119_v37 = vmul.f32 %v1087_v28, %v2908_v25 }
 0x223   : > { %v1153_v38 = vmul.f32 0.044715, %v1121_v8  ;;  %v1090_v14 = vmul.f32 %v2915_v52, %v2915_v52  ;;  %v2129_v42 = vpop.f32.mrf.mxu0  ;;  %2270 = vtanh.f32 %v1211_v35 }
 0x224   : > { %v1212_v54 = vmul.f32 0.7978846, %v1180_v61  ;;  %v1088_v56 = vmul.f32 %v2919_v30, %v2919_v30  ;;  %v2927_v13 = vadd.f32 %v2129_v42, %v2874_v9  ;;  %v1151_v18 = vmul.f32 0.044715, %v1119_v37 }
 0x225   : > { %v1185_v6 = vadd.f32 %v1153_v38, %v2901_v59  ;;  %v1122_v60 = vmul.f32 %v1090_v14, %v2915_v52  ;;  %v988_v49 = vpop.f32.mrf.mxu0  ;;  %2272 = vtanh.f32 %v1214_v10 }
 0x226   : > { %v1120_v20 = vmul.f32 %v1088_v56, %v2919_v30  ;;  %v1093_v31 = vmul.f32 %v2927_v13, %v2927_v13  ;;  %v2935_v62 = vadd.f32 %v2874_v9, %v988_v49  ;;  %v1183_v15 = vadd.f32 %v1151_v18, %v2908_v25 }
 0x227   : > { %v1217_v29 = vmul.f32 0.7978846, %v1185_v6  ;;  %v1154_v44 = vmul.f32 0.044715, %v1122_v60  ;;  %v2130_v0 = vpop.f32.mrf.mxu0  ;;  %2274 = vtanh.f32 %v1212_v54 }
 0x228   : > { %v1152_v51 = vmul.f32 0.044715, %v1120_v20  ;;  %v1125_v32 = vmul.f32 %v1093_v31, %v2927_v13  ;;  %v1091_v23 = vmul.f32 %v2935_v62, %v2935_v62  ;;  %v2942_v40 = vadd.f32 %v2130_v0, %v2874_v9 }
 0x229   : > { %2276 = vtanh.f32 %v1217_v29  ;;  %v1215_v50 = vmul.f32 0.7978846, %v1183_v15  ;;  %v1186_v55 = vadd.f32 %v1154_v44, %v2915_v52  ;;  %v991_v57 = vpop.f32.mrf.mxu0 }
 0x22a   : > { %v1184_v39 = vadd.f32 %v1152_v51, %v2919_v30  ;;  %v1157_v45 = vmul.f32 0.044715, %v1125_v32  ;;  %v1123_v47 = vmul.f32 %v1091_v23, %v2935_v62  ;;  %v1094_v41 = vmul.f32 %v2942_v40, %v2942_v40 }
 0x22b   : > { %2278 = vtanh.f32 %v1215_v50  ;;  %v1218_v58 = vmul.f32 0.7978846, %v1186_v55  ;;  %v2950_v24 = vadd.f32 %v2874_v9, %v991_v57  ;;  %v2133_v1 = vpop.f32.mrf.mxu0 }
 0x22c   : > { %v1216_v33 = vmul.f32 0.7978846, %v1184_v39  ;;  %v1189_v43 = vadd.f32 %v1157_v45, %v2927_v13  ;;  %v1155_v19 = vmul.f32 0.044715, %v1123_v47  ;;  %v1126_v7 = vmul.f32 %v1094_v41, %v2942_v40 }
 0x22d   : > { %2280 = vtanh.f32 %v1218_v58  ;;  %v1092_v53 = vmul.f32 %v2950_v24, %v2950_v24  ;;  %v2957_v35 = vadd.f32 %v2133_v1, %v2874_v9  ;;  %v1004_v8 = vpop.f32.mrf.mxu0 }
 0x22e   : > { %2282 = vtanh.f32 %v1216_v33  ;;  %v1221_v28 = vmul.f32 0.7978846, %v1189_v43  ;;  %v1187_v34 = vadd.f32 %v1155_v19, %v2935_v62  ;;  %v1158_v10 = vmul.f32 0.044715, %v1126_v7  ;;  %v2269_v56 = vpop.eup %2268 }
 0x22f   : > { %v1124_v61 = vmul.f32 %v1092_v53, %v2950_v24  ;;  %v1097_v38 = vmul.f32 %v2957_v35, %v2957_v35  ;;  %v2964_v37 = vadd.f32 %v2874_v9, %v1004_v8  ;;  %v2134_v14 = vpop.f32.mrf.mxu0  ;;  %v1277_v55 = vadd.f32 1.0, %v2269_v56 }
 0x230   : > { %2284 = vtanh.f32 %v1221_v28  ;;  %v1219_v42 = vmul.f32 0.7978846, %v1187_v34  ;;  %v2967_v54 = vadd.f32 %v2134_v14, %v2874_v9  ;;  %v1190_v6 = vadd.f32 %v1158_v10, %v2942_v40  ;;  %v2973_v31 = vpop.eup %2270 }
 0x231   : > { %v1156_v18 = vmul.f32 0.044715, %v1124_v61  ;;  %v1129_v60 = vmul.f32 %v1097_v38, %v2957_v35  ;;  %v1095_v49 = vmul.f32 %v2964_v37, %v2964_v37  ;;  %v1007_v20 = vpop.f32.mrf.mxu0  ;;  %v1309_v56 = vmul.f32 0.5, %v1277_v55 }
 0x232   : > { %2286 = vtanh.f32 %v1219_v42  ;;  %v1098_v29 = vmul.f32 %v2967_v54, %v2967_v54  ;;  %v2273_v15 = vpop.eup %2272  ;;  %v1222_v44 = vmul.f32 0.7978846, %v1190_v6  ;;  %v2983_v39 = vadd.f32 %v2874_v9, %v1007_v20 }
 0x233   : > { %v1188_v0 = vadd.f32 %v1156_v18, %v2950_v24  ;;  %v1161_v51 = vmul.f32 0.044715, %v1129_v60  ;;  %v1127_v32 = vmul.f32 %v1095_v49, %v2964_v37  ;;  %v2137_v23 = vpop.f32.mrf.mxu0  ;;  %v1278_v43 = vadd.f32 1.0, %v2273_v15 }
 0x234   : > { %v2979_v50 = vpop.eup %2274  ;;  %v1130_v57 = vmul.f32 %v1098_v29, %v2967_v54  ;;  %v2986_v45 = vadd.f32 %v2137_v23, %v2874_v9  ;;  %2288 = vtanh.f32 %v1222_v44  ;;  %v1096_v7 = vmul.f32 %v2983_v39, %v2983_v39 }
 0x235   : > { %v1220_v47 = vmul.f32 0.7978846, %v1188_v0  ;;  %v1193_v41 = vadd.f32 %v1161_v51, %v2957_v35  ;;  %v1159_v58 = vmul.f32 0.044715, %v1127_v32  ;;  %v1020_v1 = vpop.f32.mrf.mxu0  ;;  %v1310_v20 = vmul.f32 0.5, %v1278_v43 }
 0x236   : > { %v2277_v33 = vpop.eup %2276  ;;  %v1162_v19 = vmul.f32 0.044715, %v1130_v57  ;;  %v1101_v53 = vmul.f32 %v2986_v45, %v2986_v45  ;;  %v1128_v14 = vmul.f32 %v1096_v7, %v2983_v39  ;;  %v2997_v42 = vadd.f32 %v2874_v9, %v1020_v1 }
 0x237   : > { %v1281_v8 = vadd.f32 1.0, %v2277_v33  ;;  %2290 = vtanh.f32 %v1220_v47  ;;  %v1191_v28 = vadd.f32 %v1159_v58, %v2964_v37  ;;  %v2138_v34 = vpop.f32.mrf.mxu0  ;;  %v1225_v61 = vmul.f32 0.7978846, %v1193_v41 }
 0x238   : > { %v2279_v10 = vpop.eup %2278  ;;  %v1194_v38 = vadd.f32 %v1162_v19, %v2967_v54  ;;  %v1133_v18 = vmul.f32 %v1101_v53, %v2986_v45  ;;  %v1160_v15 = vmul.f32 0.044715, %v1128_v14  ;;  %v1099_v44 = vmul.f32 %v2997_v42, %v2997_v42 }
 0x239   : > { %v1223_v6 = vmul.f32 0.7978846, %v1191_v28  ;;  %v1023_v60 = vpop.f32.mrf.mxu0  ;;  %v1313_v29 = vmul.f32 0.5, %v1281_v8  ;;  %v1279_v32 = vadd.f32 1.0, %v2279_v10  ;;  %2292 = vtanh.f32 %v1225_v61 }
 0x23a   : > { %v2281_v49 = vpop.eup %2280  ;;  %v1226_v23 = vmul.f32 0.7978846, %v1194_v38  ;;  %v1192_v57 = vadd.f32 %v1160_v15, %v2983_v39  ;;  %v1165_v55 = vmul.f32 0.044715, %v1133_v18  ;;  %v1131_v41 = vmul.f32 %v1099_v44, %v2997_v42 }
 0x23b   : > { %v2283_v0 = vpop.eup %2282  ;;  %v2141_v51 = vpop.f32.mrf.mxu0  ;;  %2294 = vtanh.f32 %v1223_v6  ;;  %v3005_v58 = vadd.f32 %v2138_v34, %v2874_v9  ;;  %v3008_v33 = vmul.f32 %v1309_v56, %v2877_v46  ;;  %v3011_v43 = vmul.f32 %v1310_v20, %v2888_v36 }
 0x23c   : > { %v3014_v19 = vmul.f32 %v1313_v29, %v2901_v59  ;;  %v1224_v53 = vmul.f32 0.7978846, %v1192_v57  ;;  %v1163_v8 = vmul.f32 0.044715, %v1131_v41  ;;  %v3019_v10 = vadd.f32 %v2874_v9, %v1023_v60 }
 0x23d   : > { %v2285_v47 = vpop.eup %2284  ;;  %v1036_v1 = vpop.f32.mrf.mxu0  ;;  %v1102_v28 = vmul.f32 %v3005_v58, %v3005_v58  ;;  %v1311_v61 = vmul.f32 0.5, %v1279_v32  ;;  %v1282_v38 = vadd.f32 1.0, %v2281_v49  ;;  %v1280_v46 = vadd.f32 1.0, %v2283_v0 }
 0x23e   : > { %2296 = vtanh.f32 %v1226_v23  ;;  %v1197_v36 = vadd.f32 %v1165_v55, %v2986_v45  ;;  %v1195_v14 = vadd.f32 %v1163_v8, %v2997_v42  ;;  %v1100_v56 = vmul.f32 %v3019_v10, %v3019_v10 }
 0x23f   : > { %v2287_v7 = vpop.eup %2286  ;;  %v2142_v34 = vpop.f32.mrf.mxu0  ;;  %v1134_v59 = vmul.f32 %v1102_v28, %v3005_v58  ;;  %v1285_v20 = vadd.f32 1.0, %v2285_v47  ;;  %v3027_v29 = vadd.f32 %v2141_v51, %v2874_v9  ;;  %v1275_v49 = vadd.f32 1.0, %v2973_v31 }
 0x240   : > { %v1283_v60 = vadd.f32 1.0, %v2287_v7  ;;  %2298 = vtanh.f32 %v1224_v53  ;;  %v1227_v15 = vmul.f32 0.7978846, %v1195_v14  ;;  %v1132_v0 = vmul.f32 %v1100_v56, %v3019_v10 }
 0x241   : > { %v1039_v6 = vpop.f32.mrf.mxu0  ;;  %v2289_v18 = vpop.eup %2288  ;;  %v1166_v44 = vmul.f32 0.044715, %v1134_v59  ;;  %v3032_v57 = vmul.f32 %v1311_v61, %v2908_v25  ;;  %v1105_v55 = vmul.f32 %v3027_v29, %v3027_v29  ;;  %v1276_v47 = vadd.f32 1.0, %v2979_v50 }
 0x242   : > { %v1307_v41 = vmul.f32 0.5, %v1275_v49  ;;  %v1314_v51 = vmul.f32 0.5, %v1282_v38  ;;  %v1312_v7 = vmul.f32 0.5, %v1280_v46  ;;  %v1286_v8 = vadd.f32 1.0, %v2289_v18 }
 0x243   : > { %v2145_v32 = vpop.f32.mrf.mxu0  ;;  %v1229_v31 = vmul.f32 0.7978846, %v1197_v36  ;;  %v1198_v28 = vadd.f32 %v1166_v44, %v3005_v58  ;;  %v1164_v14 = vmul.f32 0.044715, %v1132_v0  ;;  %v1137_v59 = vmul.f32 %v1105_v55, %v3027_v29 }
 0x244   : > { %v2291_v23 = vpop.eup %2290  ;;  %v1308_v56 = vmul.f32 0.5, %v1276_v47  ;;  %v1317_v22 = vmul.f32 0.5, %v1285_v20  ;;  %v1315_v25 = vmul.f32 0.5, %v1283_v60  ;;  %2300 = vtanh.f32 %v1227_v15 }
 0x245   : > { %v1052_v53 = vpop.f32.mrf.mxu0  ;;  %v1284_v61 = vadd.f32 1.0, %v2291_v23  ;;  %v1196_v27 = vadd.f32 %v1164_v14, %v3019_v10  ;;  %v1339_v50 = vmul.f32 %v1307_v41, %v2882_v63  ;;  %v3043_v46 = vadd.f32 %v2874_v9, %v1036_v1 }
 0x246   : > { %v1340_v38 = vmul.f32 %v1308_v56, %v2894_v48  ;;  %v2293_v18 = vpop.eup %2292  ;;  %v1346_v49 = vmul.f32 %v1314_v51, %v2915_v52  ;;  %v1344_v44 = vmul.f32 %v1312_v7, %v2919_v30  ;;  %v1318_v0 = vmul.f32 0.5, %v1286_v8 }
 0x247   : > { %v2146_v36 = vpop.f32.mrf.mxu0  ;;  %2302 = vtanh.f32 %v1229_v31  ;;  %v1230_v60 = vmul.f32 0.7978846, %v1198_v28  ;;  %v1228_v15 = vmul.f32 0.7978846, %v1196_v27  ;;  %v1169_v23 = vmul.f32 0.044715, %v1137_v59 }
 0x248   : > { %v2295_v20 = vpop.eup %2294  ;;  %v1371_v55 = vpack.c.bf16 %v1340_v38, %v1339_v50  ;;  %v3048_v63 = vmul.f32 %v1317_v22, %v2927_v13  ;;  %v1316_v48 = vmul.f32 0.5, %v1284_v61  ;;  %v1103_v1 = vmul.f32 %v3043_v46, %v3043_v46 }
 0x249   : > { %v1372_v47 = vpack.c.bf16 %v3011_v43, %v3008_v33  ;;  %v3055_v52 = vmul.f32 %v1315_v25, %v2935_v62  ;;  %v1289_v30 = vadd.f32 1.0, %v2293_v18  ;;  %2304 = vtanh.f32 %v1228_v15  ;;  %v1055_v41 = vpop.f32.mrf.mxu0 }
 0x24a   : > { %2159 = vmatprep.mubr.msk.bf16.mxu1 %vm1426_vm1, %v1371_v55  ;;  %v3059_v27 = vadd.f32 %v2142_v34, %v2874_v9  ;;  %v1287_v13 = vadd.f32 1.0, %v2295_v20  ;;  %v1135_v51 = vmul.f32 %v1103_v1, %v3043_v46  ;;  %v3064_v7 = vadd.f32 %v2874_v9, %v1039_v6 }
 0x24b   : > { %v2297_v22 = vpop.eup %2296  ;;  %2160 = vmatmul.mubr.msk.bf16.vlgmr.msra.gmra.mxu1 %vm1426_vm1, %v1372_v47  ;;  %v3067_v62 = vadd.f32 %v2145_v32, %v2874_v9  ;;  %v3070_v33 = vmul.f32 %v1318_v0, %v2942_v40  ;;  %2306 = vtanh.f32 %v1230_v60  ;;  %v1201_v43 = vadd.f32 %v1169_v23, %v3027_v29  ;;  %v2149_v25 = vpop.f32.mrf.mxu0 }
 0x24c   : > { %v1106_v34 = vmul.f32 %v3059_v27, %v3059_v27  ;;  %v3076_v8 = vmul.f32 %v1316_v48, %v2950_v24  ;;  %v1167_v31 = vmul.f32 0.044715, %v1135_v51  ;;  %v1104_v6 = vmul.f32 %v3064_v7, %v3064_v7 }
 0x24d   : > { %v1109_v32 = vmul.f32 %v3067_v62, %v3067_v62  ;;  %v2299_v28 = vpop.eup %2298  ;;  %v1290_v14 = vadd.f32 1.0, %v2297_v22  ;;  %v1373_v59 = vpack.c.bf16 %v1344_v44, %v3032_v57  ;;  %v3085_v56 = vadd.f32 %v2874_v9, %v1052_v53 }
 0x24e   : > { %v1138_v40 = vmul.f32 %v1106_v34, %v3059_v27  ;;  %v3087_v61 = vmul.f32 0.5, %v1289_v30  ;;  %v1319_v24 = vmul.f32 0.5, %v1287_v13  ;;  %v1199_v50 = vadd.f32 %v1167_v31, %v3043_v46  ;;  %v1068_v30 = vpop.f32.mrf.mxu0 }
 0x24f   : > { %v1136_v38 = vmul.f32 %v1104_v6, %v3064_v7  ;;  %v1233_v18 = vmul.f32 0.7978846, %v1201_v43  ;;  %v1141_v20 = vmul.f32 %v1109_v32, %v3067_v62  ;;  %2163 = vmatprep.mubr.msk.bf16.mxu1 %vm1426_vm1, %v1373_v59  ;;  %v1107_v57 = vmul.f32 %v3085_v56, %v3085_v56 }
 0x250   : > { %v1170_v0 = vmul.f32 0.044715, %v1138_v40  ;;  %v1288_v44 = vadd.f32 1.0, %v2299_v28  ;;  %v1231_v53 = vmul.f32 0.7978846, %v1199_v50  ;;  %v1374_v15 = vpack.c.bf16 %v1346_v49, %v3014_v19 }
 0x251   : > { %v1168_v60 = vmul.f32 0.044715, %v1136_v38  ;;  %v2301_v23 = vpop.eup %2300  ;;  %v1322_v55 = vmul.f32 0.5, %v1290_v14  ;;  %v1139_v1 = vmul.f32 %v1107_v57, %v3085_v56  ;;  %v3099_v47 = vadd.f32 %v2146_v36, %v2874_v9  ;;  %v2150_v14 = vpop.f32.mrf.mxu0 }
 0x252   : > { %v1202_v48 = vadd.f32 %v1170_v0, %v3059_v27  ;;  %v3102_v22 = vmul.f32 %v1319_v24, %v2964_v37  ;;  %2308 = vtanh.f32 %v1231_v53  ;;  %v3107_v19 = vadd.f32 %v2874_v9, %v1055_v41 }
 0x253   : > { %v1200_v13 = vadd.f32 %v1168_v60, %v3064_v7  ;;  %2164 = vmatmul.mubr.msk.bf16.gmra.mxu1 %vm1426_vm1, %v1374_v15  ;;  %v1173_v43 = vmul.f32 0.044715, %v1141_v20  ;;  %v1171_v34 = vmul.f32 0.044715, %v1139_v1  ;;  %v1110_v36 = vmul.f32 %v3099_v47, %v3099_v47 }
 0x254   : > { %v2303_v49 = vpop.eup %2302  ;;  %v1234_v51 = vmul.f32 0.7978846, %v1202_v48  ;;  %v1320_v31 = vmul.f32 0.5, %v1288_v44  ;;  %2310 = vtanh.f32 %v1233_v18  ;;  %v1108_v37 = vmul.f32 %v3107_v19, %v3107_v19 }
 0x255   : > { %v1232_v6 = vmul.f32 0.7978846, %v1200_v13  ;;  %v1291_v32 = vadd.f32 1.0, %v2301_v23  ;;  %v1203_v28 = vadd.f32 %v1171_v34, %v3085_v56  ;;  %v1142_v41 = vmul.f32 %v1110_v36, %v3099_v47 }
 0x256   : > { %2312 = vtanh.f32 %v1234_v51  ;;  %v2305_v40 = vpop.eup %2304  ;;  %v3116_v59 = vmul.f32 %v1322_v55, %v2967_v54  ;;  %v1140_v24 = vmul.f32 %v1108_v37, %v3107_v19  ;;  %v3120_v50 = vadd.f32 %v2149_v25, %v2874_v9  ;;  %v1071_v55 = vpop.f32.mrf.mxu0 }
 0x257   : > { %2314 = vtanh.f32 %v1232_v6  ;;  %v1292_v38 = vadd.f32 1.0, %v2305_v40  ;;  %v1205_v18 = vadd.f32 %v1173_v43, %v3067_v62  ;;  %v1235_v0 = vmul.f32 0.7978846, %v1203_v28 }
 0x258   : > { %v1174_v20 = vmul.f32 0.044715, %v1142_v41  ;;  %v2307_v57 = vpop.eup %2306  ;;  %v1352_v44 = vmul.f32 %v1320_v31, %v2983_v39  ;;  %v1172_v53 = vmul.f32 0.044715, %v1140_v24  ;;  %v1113_v60 = vmul.f32 %v3120_v50, %v3120_v50 }
 0x259   : > { %v1375_v54 = vpack.c.bf16 %v3076_v8, %v3055_v52  ;;  %v1323_v15 = vmul.f32 0.5, %v1291_v32  ;;  %v1324_v23 = vmul.f32 0.5, %v1292_v38  ;;  %2316 = vtanh.f32 %v1235_v0 }
 0x25a   : > { %v1206_v25 = vadd.f32 %v1174_v20, %v3099_v47  ;;  %v1204_v48 = vadd.f32 %v1172_v53, %v3107_v19  ;;  %v1145_v1 = vmul.f32 %v1113_v60, %v3120_v50  ;;  %v3133_v39 = vadd.f32 %v2874_v9, %v1068_v30 }
 0x25b   : > { %2167 = vmatprep.mubr.msk.bf16.mxu1 %vm1426_vm1, %v1375_v54  ;;  %v1376_v13 = vpack.c.bf16 %v3070_v33, %v3048_v63  ;;  %v1294_v51 = vadd.f32 1.0, %v2307_v57  ;;  %v1237_v52 = vmul.f32 0.7978846, %v1205_v18  ;;  %v3138_v43 = vadd.f32 %v2150_v14, %v2874_v9 }
 0x25c   : > { %v1238_v8 = vmul.f32 0.7978846, %v1206_v25  ;;  %v1236_v34 = vmul.f32 0.7978846, %v1204_v48  ;;  %v1177_v36 = vmul.f32 0.044715, %v1145_v1  ;;  %v1111_v31 = vmul.f32 %v3133_v39, %v3133_v39 }
 0x25d   : > { %2168 = vmatmul.mubr.msk.bf16.gmra.mxu1 %vm1426_vm1, %v1376_v13  ;;  %v3144_v6 = vadd.f32 %v2874_v9, %v1071_v55  ;;  %v1356_v30 = vmul.f32 %v1324_v23, %v3019_v10  ;;  %v1114_v63 = vmul.f32 %v3138_v43, %v3138_v43  ;;  %v1377_v33 = vpack.c.bf16 %v1352_v44, %v3102_v22 }
 0x25e   : > { %2318 = vtanh.f32 %v1238_v8  ;;  %v1209_v37 = vadd.f32 %v1177_v36, %v3120_v50  ;;  %v1143_v32 = vmul.f32 %v1111_v31, %v3133_v39  ;;  %v1353_v9 = vmul.f32 %v3087_v61, %v2957_v35 }
 0x25f   : > { %2320 = vtanh.f32 %v1236_v34  ;;  %v1112_v28 = vmul.f32 %v3144_v6, %v3144_v6  ;;  %v2309_v41 = vpop.eup %2308  ;;  %v1293_v14 = vadd.f32 1.0, %v2303_v49  ;;  %v1355_v10 = vmul.f32 %v1323_v15, %v2997_v42  ;;  %2171 = vmatprep.mubr.msk.bf16.mxu1 %vm1426_vm1, %v1377_v33 }
 0x260   : > { %v1146_v40 = vmul.f32 %v1114_v63, %v3138_v43  ;;  %v1295_v22 = vadd.f32 1.0, %v2309_v41  ;;  %2322 = vtanh.f32 %v1237_v52  ;;  %v1175_v24 = vmul.f32 0.044715, %v1143_v32 }
 0x261   : > { %v1144_v38 = vmul.f32 %v1112_v28, %v3144_v6  ;;  %v2311_v18 = vpop.eup %2310  ;;  %v1326_v0 = vmul.f32 0.5, %v1294_v51  ;;  %v1241_v20 = vmul.f32 0.7978846, %v1209_v37  ;;  %v1379_v44 = vpack.c.bf16 %v1356_v30, %v1355_v10 }
 0x262   : > { %v1178_v57 = vmul.f32 0.044715, %v1146_v40  ;;  %v1207_v35 = vadd.f32 %v1175_v24, %v3133_v39  ;;  %v1378_v42 = vpack.c.bf16 %v3116_v59, %v1353_v9  ;;  %v1325_v60 = vmul.f32 0.5, %v1293_v14 }
 0x263   : > { %v2313_v53 = vpop.eup %2312  ;;  %v1176_v61 = vmul.f32 0.044715, %v1144_v38  ;;  %v1327_v15 = vmul.f32 0.5, %v1295_v22  ;;  %v1358_v48 = vmul.f32 %v1326_v0, %v3005_v58  ;;  %2324 = vtanh.f32 %v1241_v20 }
 0x264   : > { %v2315_v49 = vpop.eup %2314  ;;  %v1210_v54 = vadd.f32 %v1178_v57, %v3138_v43  ;;  %v1239_v25 = vmul.f32 0.7978846, %v1207_v35  ;;  %v1298_v51 = vadd.f32 1.0, %v2313_v53  ;;  %v1357_v8 = vmul.f32 %v1325_v60, %v2986_v45 }
 0x265   : > { %v1296_v23 = vadd.f32 1.0, %v2315_v49  ;;  %v1208_v55 = vadd.f32 %v1176_v61, %v3144_v6  ;;  %2172 = vmatmul.mubr.msk.bf16.gmra.mxu1 %vm1426_vm1, %v1378_v42  ;;  %v1297_v34 = vadd.f32 1.0, %v2311_v18  ;;  %v1359_v36 = vmul.f32 %v1327_v15, %v3043_v46 }
 0x266   : > { %v1242_v1 = vmul.f32 0.7978846, %v1210_v54  ;;  %2175 = vmatprep.mubr.msk.bf16.mxu1 %vm1426_vm1, %v1379_v44  ;;  %v2317_v13 = vpop.eup %2316  ;;  %2326 = vtanh.f32 %v1239_v25  ;;  %v1330_v63 = vmul.f32 0.5, %v1298_v51  ;;  %v1380_v33 = vpack.c.bf16 %v1358_v48, %v1357_v8 }
 0x267   : > { %v1328_v59 = vmul.f32 0.5, %v1296_v23  ;;  %v1240_v52 = vmul.f32 0.7978846, %v1208_v55  ;;  %v1299_v30 = vadd.f32 1.0, %v2317_v13  ;;  %v1329_v28 = vmul.f32 0.5, %v1297_v34 }
 0x268   : > { %2328 = vtanh.f32 %v1242_v1  ;;  %v1362_v45 = vmul.f32 %v1330_v63, %v3059_v27 }
 0x269   : > { %v1360_v31 = vmul.f32 %v1328_v59, %v3064_v7  ;;  %2330 = vtanh.f32 %v1240_v52  ;;  %v1331_v41 = vmul.f32 0.5, %v1299_v30  ;;  %v1361_v7 = vmul.f32 %v1329_v28, %v3027_v29 }
 0x26b   : > { %v2319_v58 = vpop.eup %2318  ;;  %v1381_v37 = vpack.c.bf16 %v1360_v31, %v1359_v36  ;;  %v1363_v22 = vmul.f32 %v1331_v41, %v3085_v56  ;;  %v1382_v0 = vpack.c.bf16 %v1362_v45, %v1361_v7 }
 0x26c   : > { %v2321_v32 = vpop.eup %2320  ;;  %v1302_v46 = vadd.f32 1.0, %v2319_v58 }
 0x26d   : > { %v1300_v9 = vadd.f32 1.0, %v2321_v32  ;;  %2176 = vmatmul.mubr.msk.bf16.gmra.mxu1 %vm1426_vm1, %v1380_v33  ;;  %v2323_v14 = vpop.eup %2322 }
 0x26e   : > { %2179 = vmatprep.mubr.msk.bf16.mxu1 %vm1426_vm1, %v1381_v37  ;;  %v1301_v40 = vadd.f32 1.0, %v2323_v14  ;;  %v1334_v18 = vmul.f32 0.5, %v1302_v46 }
 0x26f   : > { %v1332_v10 = vmul.f32 0.5, %v1300_v9 }
 0x270   : > { %v2325_v38 = vpop.eup %2324  ;;  %v1333_v53 = vmul.f32 0.5, %v1301_v40  ;;  %v1366_v29 = vmul.f32 %v1334_v18, %v3099_v47 }
 0x271   : > { %v1364_v24 = vmul.f32 %v1332_v10, %v3107_v19  ;;  %v1305_v49 = vadd.f32 1.0, %v2325_v38 }
 0x272   : > { %v1365_v19 = vmul.f32 %v1333_v53, %v3067_v62 }
 0x273   : > { %v1383_v20 = vpack.c.bf16 %v1364_v24, %v1363_v22  ;;  %v2327_v57 = vpop.eup %2326  ;;  %v1337_v55 = vmul.f32 0.5, %v1305_v49 }
 0x274   : > { %v1303_v35 = vadd.f32 1.0, %v2327_v57  ;;  %v1384_v25 = vpack.c.bf16 %v1366_v29, %v1365_v19 }
 0x275   : > { %v2329_v44 = vpop.eup %2328  ;;  %2180 = vmatmul.mubr.msk.bf16.gmra.mxu1 %vm1426_vm1, %v1382_v0  ;;  %v1369_v1 = vmul.f32 %v1337_v55, %v3120_v50  ;;  %v3385_v55 = vld [vmem:[#allocation4_spill] sm:$0xff] }
 0x276   : > { %v2331_v27 = vpop.eup %2330  ;;  %2183 = vmatprep.mubr.msk.bf16.mxu1 %vm1426_vm1, %v1383_v20  ;;  %v1335_v61 = vmul.f32 0.5, %v1303_v35  ;;  %v1306_v42 = vadd.f32 1.0, %v2329_v44  ;;  %v3382_v35 = vld [vmem:[#allocation3_spill] sm:$0xff] }
 0x277   : > { %v1304_v56 = vadd.f32 1.0, %v2331_v27 }
 0x278   : > { %v1367_v54 = vmul.f32 %v1335_v61, %v3133_v39  ;;  %v1338_v15 = vmul.f32 0.5, %v1306_v42  ;;  %v3190_v39 = vld [vmem:[%s3336_s6] ss:$0 sm:$0xff] }
 0x279   : > { %v1336_v60 = vmul.f32 0.5, %v1304_v56  ;;  %v3383_v42 = vld [vmem:[#allocation2_spill] sm:$0xff] }
 0x27a   : > { %v1370_v47 = vmul.f32 %v1338_v15, %v3138_v43 }
 0x27b   : > { %v1368_v23 = vmul.f32 %v1336_v60, %v3144_v6  ;;  %v3384_v60 = vld [vmem:[#allocation6_spill] sm:$0xff] }
 0x27c   : > { %v1386_v62 = vpack.c.bf16 %v1370_v47, %v1369_v1 }
 0x27d   : > { %2184 = vmatmul.mubr.msk.bf16.gmra.mxu1 %vm1426_vm1, %v1384_v25  ;;  %v1385_v48 = vpack.c.bf16 %v1368_v23, %v1367_v54 }
 0x27f   : > { %2187 = vmatprep.mubr.msk.bf16.mxu1 %vm1426_vm1, %v1385_v48 }
 0x285   : > { %2188 = vmatmul.mubr.msk.bf16.gmra.mxu1 %vm1426_vm1, %v1386_v62 }
 0x30b   : > { %v2161_v6 = vpop.f32.mrf.mxu1 }
 0x30c   : > { %v1518_v13 = vadd.f32 %v2161_v6, %v3190_v39  ;;  %v3386_v6 = vld [vmem:[#allocation7_spill] sm:$0xff] }
 0x30d   : > { %v1509_v51 = vpop.f32.mrf.mxu1 }
 0x30e   : > { %v1638_v59 = vadd.f32 %v2402_v3, %v1518_v13  ;;  %v1510_v43 = vadd.f32 %v3190_v39, %v1509_v51 }
 0x30f   : > { %v2162_v50 = vpop.f32.mrf.mxu1 }
 0x310   : > { %v1971_v52 = vpack.c.bf16 %v1638_v59, %v1638_v59  ;;  %v1636_v8 = vadd.f32 %v2400_v2, %v1510_v43  ;;  %v1521_v34 = vadd.f32 %v2162_v50, %v3190_v39  ;;  %v3387_v50 = vld [vmem:[#allocation5_spill] sm:$0xff] }
 0x311   : > { %v1512_v36 = vpop.f32.mrf.mxu1 }
 0x312   : > { %1799 = vst.msk [vmem:[%s3200_s8 + $0x8] sm:$0xf] %vm1796_vm2, %v1971_v52  ;;  %v1969_v3 = vpack.c.bf16 %v1636_v8, %v1636_v8  ;;  %v1639_v31 = vadd.f32 %v2406_v5, %v1521_v34  ;;  %v1513_v30 = vadd.f32 %v3190_v39, %v1512_v36 }
 0x313   : > { %v2165_v58 = vpop.f32.mrf.mxu1 }
 0x314   : > { %1797 = vst.msk [vmem:[%s3200_s8] sm:$0xf] %vm1796_vm2, %v1969_v3  ;;  %v1972_v63 = vpack.c.bf16 %v1639_v31, %v1639_v31  ;;  %v1637_v33 = vadd.f32 %v2404_v4, %v1513_v30  ;;  %v1534_v2 = vadd.f32 %v2165_v58, %v3190_v39  ;;  %v3388_v3 = vld [vmem:[#allocation10_spill] sm:$0xff] }
 0x315   : > { %v1525_v37 = vpop.f32.mrf.mxu1 }
 0x316   : > { %1800 = vst.msk [vmem:[%s3200_s8 + $0xc] sm:$0xf] %vm1796_vm2, %v1972_v63  ;;  %v1970_v32 = vpack.c.bf16 %v1637_v33, %v1637_v33  ;;  %v1642_v28 = vadd.f32 %v2426_v16, %v1534_v2  ;;  %v1526_v5 = vadd.f32 %v3190_v39, %v1525_v37  ;;  %v3389_v33 = vld [vmem:[#allocation8_spill] sm:$0xff] }
 0x317   : > { %v2166_v41 = vpop.f32.mrf.mxu1 }
 0x318   : > { %1798 = vst.msk [vmem:[%s3200_s8 + $0x4] sm:$0xf] %vm1796_vm2, %v1970_v32  ;;  %v1975_v9 = vpack.c.bf16 %v1642_v28, %v1642_v28  ;;  %v1640_v14 = vadd.f32 %v2417_v11, %v1526_v5  ;;  %v1537_v4 = vadd.f32 %v2166_v41, %v3190_v39  ;;  %v3390_v5 = vld [vmem:[#allocation11_spill] sm:$0xff] }
 0x319   : > { %v1528_v45 = vpop.f32.mrf.mxu1 }
 0x31a   : > { %1803 = vst.msk [vmem:[%s3200_s8 + $0x18] sm:$0xf] %vm1796_vm2, %v1975_v9  ;;  %v1973_v46 = vpack.c.bf16 %v1640_v14, %v1640_v14  ;;  %v1643_v10 = vadd.f32 %v2428_v17, %v1537_v4  ;;  %v1529_v16 = vadd.f32 %v3190_v39, %v1528_v45  ;;  %v3391_v45 = vld [vmem:[#allocation9_spill] sm:$0xff] }
 0x31c   : > { %1801 = vst.msk [vmem:[%s3200_s8 + $0x10] sm:$0xf] %vm1796_vm2, %v1973_v46  ;;  %v1976_v7 = vpack.c.bf16 %v1643_v10, %v1643_v10  ;;  %v1641_v40 = vadd.f32 %v2419_v12, %v1529_v16 }
 0x31d   : > { %v2169_v22 = vpop.f32.mrf.mxu1 }
 0x31e   : > { %1804 = vst.msk [vmem:[%s3200_s8 + $0x1c] sm:$0xf] %vm1796_vm2, %v1976_v7  ;;  %v1974_v11 = vpack.c.bf16 %v1641_v40, %v1641_v40  ;;  %v1550_v24 = vadd.f32 %v2169_v22, %v3190_v39  ;;  %v3392_v40 = vld [vmem:[#allocation14_spill] sm:$0xff] }
 0x31f   : > { %v1541_v38 = vpop.f32.mrf.mxu1 }
 0x320   : > { %1802 = vst.msk [vmem:[%s3200_s8 + $0x14] sm:$0xf] %vm1796_vm2, %v1974_v11  ;;  %v1646_v17 = vadd.f32 %v2444_v26, %v1550_v24  ;;  %v1542_v18 = vadd.f32 %v3190_v39, %v1541_v38 }
 0x321   : > { %v2170_v0 = vpop.f32.mrf.mxu1 }
 0x322   : > { %v1979_v20 = vpack.c.bf16 %v1646_v17, %v1646_v17  ;;  %v1644_v57 = vadd.f32 %v2435_v21, %v1542_v18  ;;  %v1553_v12 = vadd.f32 %v2170_v0, %v3190_v39  ;;  %v3393_v17 = vld [vmem:[#allocation12_spill] sm:$0xff] }
 0x323   : > { %v1544_v44 = vpop.f32.mrf.mxu1 }
 0x324   : > { %1807 = vst.msk [vmem:[%s3200_s8 + $0x28] sm:$0xf] %vm1796_vm2, %v1979_v20  ;;  %v1977_v53 = vpack.c.bf16 %v1644_v57, %v1644_v57  ;;  %v1647_v27 = vadd.f32 %v3382_v35, %v1553_v12  ;;  %v1545_v29 = vadd.f32 %v3190_v39, %v1544_v44  ;;  %v3394_v12 = vld [vmem:[#allocation15_spill] sm:$0xff] }
 0x325   : > { %v2173_v61 = vpop.f32.mrf.mxu1 }
 0x326   : > { %1805 = vst.msk [vmem:[%s3200_s8 + $0x20] sm:$0xf] %vm1796_vm2, %v1977_v53  ;;  %v1980_v26 = vpack.c.bf16 %v1647_v27, %v1647_v27  ;;  %v1645_v56 = vadd.f32 %v3383_v42, %v1545_v29  ;;  %v1566_v21 = vadd.f32 %v2173_v61, %v3190_v39  ;;  %v3395_v29 = vld [vmem:[#allocation13_spill] sm:$0xff] }
 0x327   : > { %v1557_v19 = vpop.f32.mrf.mxu1 }
 0x328   : > { %1808 = vst.msk [vmem:[%s3200_s8 + $0x2c] sm:$0xf] %vm1796_vm2, %v1980_v26  ;;  %v1978_v49 = vpack.c.bf16 %v1645_v56, %v1645_v56  ;;  %v1650_v54 = vadd.f32 %v3384_v60, %v1566_v21  ;;  %v1558_v15 = vadd.f32 %v3190_v39, %v1557_v19  ;;  %v3396_v21 = vld [vmem:[#allocation18_spill] sm:$0xff] }
 0x329   : > { %v2174_v23 = vpop.f32.mrf.mxu1 }
 0x32a   : > { %1806 = vst.msk [vmem:[%s3200_s8 + $0x24] sm:$0xf] %vm1796_vm2, %v1978_v49  ;;  %v1983_v25 = vpack.c.bf16 %v1650_v54, %v1650_v54  ;;  %v1648_v48 = vadd.f32 %v3385_v55, %v1558_v15  ;;  %v1569_v47 = vadd.f32 %v2174_v23, %v3190_v39  ;;  %v3397_v15 = vld [vmem:[#allocation16_spill] sm:$0xff] }
 0x32b   : > { %v1560_v1 = vpop.f32.mrf.mxu1 }
 0x32c   : > { %1811 = vst.msk [vmem:[%s3200_s8 + $0x38] sm:$0xf] %vm1796_vm2, %v1983_v25  ;;  %v1981_v62 = vpack.c.bf16 %v1648_v48, %v1648_v48  ;;  %v1651_v13 = vadd.f32 %v3386_v6, %v1569_v47  ;;  %v1561_v51 = vadd.f32 %v3190_v39, %v1560_v1  ;;  %v3398_v47 = vld [vmem:[#allocation19_spill] sm:$0xff] }
 0x32d   : > { %v2177_v59 = vpop.f32.mrf.mxu1 }
 0x32e   : > { %1809 = vst.msk [vmem:[%s3200_s8 + $0x30] sm:$0xf] %vm1796_vm2, %v1981_v62  ;;  %v1984_v43 = vpack.c.bf16 %v1651_v13, %v1651_v13  ;;  %v1649_v52 = vadd.f32 %v3387_v50, %v1561_v51  ;;  %v1582_v8 = vadd.f32 %v2177_v59, %v3190_v39  ;;  %v3399_v51 = vld [vmem:[#allocation17_spill] sm:$0xff] }
 0x32f   : > { %v1573_v34 = vpop.f32.mrf.mxu1 }
 0x330   : > { %1812 = vst.msk [vmem:[%s3200_s8 + $0x3c] sm:$0xf] %vm1796_vm2, %v1984_v43  ;;  %v1982_v36 = vpack.c.bf16 %v1649_v52, %v1649_v52  ;;  %v1654_v31 = vadd.f32 %v3388_v3, %v1582_v8  ;;  %v1574_v30 = vadd.f32 %v3190_v39, %v1573_v34  ;;  %v3400_v8 = vld [vmem:[#allocation22_spill] sm:$0xff] }
 0x331   : > { %v2178_v58 = vpop.f32.mrf.mxu1 }
 0x332   : > { %1810 = vst.msk [vmem:[%s3200_s8 + $0x34] sm:$0xf] %vm1796_vm2, %v1982_v36  ;;  %v1987_v63 = vpack.c.bf16 %v1654_v31, %v1654_v31  ;;  %v1652_v2 = vadd.f32 %v3389_v33, %v1574_v30  ;;  %v1585_v37 = vadd.f32 %v2178_v58, %v3190_v39  ;;  %v3401_v30 = vld [vmem:[#allocation20_spill] sm:$0xff] }
 0x333   : > { %v1576_v32 = vpop.f32.mrf.mxu1 }
 0x334   : > { %1815 = vst.msk [vmem:[%s3200_s8 + $0x48] sm:$0xf] %vm1796_vm2, %v1987_v63  ;;  %v1985_v28 = vpack.c.bf16 %v1652_v2, %v1652_v2  ;;  %v1655_v41 = vadd.f32 %v3390_v5, %v1585_v37  ;;  %v1577_v9 = vadd.f32 %v3190_v39, %v1576_v32  ;;  %v3402_v37 = vld [vmem:[#allocation23_spill] sm:$0xff] }
 0x335   : > { %v2181_v14 = vpop.f32.mrf.mxu1 }
 0x336   : > { %1813 = vst.msk [vmem:[%s3200_s8 + $0x40] sm:$0xf] %vm1796_vm2, %v1985_v28  ;;  %v1988_v4 = vpack.c.bf16 %v1655_v41, %v1655_v41  ;;  %v1653_v46 = vadd.f32 %v3391_v45, %v1577_v9  ;;  %v1598_v10 = vadd.f32 %v2181_v14, %v3190_v39  ;;  %v3403_v41 = vld [vmem:[#allocation21_spill] sm:$0xff] }
 0x337   : > { %v1589_v16 = vpop.f32.mrf.mxu1 }
 0x338   : > { %1816 = vst.msk [vmem:[%s3200_s8 + $0x4c] sm:$0xf] %vm1796_vm2, %v1988_v4  ;;  %v1986_v7 = vpack.c.bf16 %v1653_v46, %v1653_v46  ;;  %v1658_v22 = vadd.f32 %v3392_v40, %v1598_v10  ;;  %v1590_v11 = vadd.f32 %v3190_v39, %v1589_v16 }
 0x339   : > { %v2182_v24 = vpop.f32.mrf.mxu1 }
 0x33a   : > { %1814 = vst.msk [vmem:[%s3200_s8 + $0x44] sm:$0xf] %vm1796_vm2, %v1986_v7  ;;  %v1991_v38 = vpack.c.bf16 %v1658_v22, %v1658_v22  ;;  %v1656_v18 = vadd.f32 %v3393_v17, %v1590_v11  ;;  %v1601_v0 = vadd.f32 %v2182_v24, %v3190_v39 }
 0x33b   : > { %v1592_v20 = vpop.f32.mrf.mxu1 }
 0x33c   : > { %1819 = vst.msk [vmem:[%s3200_s8 + $0x58] sm:$0xf] %vm1796_vm2, %v1991_v38  ;;  %v1989_v57 = vpack.c.bf16 %v1656_v18, %v1656_v18  ;;  %v1659_v44 = vadd.f32 %v3394_v12, %v1601_v0  ;;  %v1593_v53 = vadd.f32 %v3190_v39, %v1592_v20 }
 0x33d   : > { %v2185_v35 = vpop.f32.mrf.mxu1 }
 0x33e   : > { %1817 = vst.msk [vmem:[%s3200_s8 + $0x50] sm:$0xf] %vm1796_vm2, %v1989_v57  ;;  %v1992_v27 = vpack.c.bf16 %v1659_v44, %v1659_v44  ;;  %v1657_v61 = vadd.f32 %v3395_v29, %v1593_v53  ;;  %v1614_v26 = vadd.f32 %v2185_v35, %v3190_v39 }
 0x33f   : > { %v1605_v42 = vpop.f32.mrf.mxu1 }
 0x340   : > { %1820 = vst.msk [vmem:[%s3200_s8 + $0x5c] sm:$0xf] %vm1796_vm2, %v1992_v27  ;;  %v1990_v56 = vpack.c.bf16 %v1657_v61, %v1657_v61  ;;  %v1662_v19 = vadd.f32 %v3396_v21, %v1614_v26  ;;  %v1606_v49 = vadd.f32 %v3190_v39, %v1605_v42 }
 0x341   : > { %v2186_v60 = vpop.f32.mrf.mxu1 }
 0x342   : > { %1818 = vst.msk [vmem:[%s3200_s8 + $0x54] sm:$0xf] %vm1796_vm2, %v1990_v56  ;;  %v1995_v54 = vpack.c.bf16 %v1662_v19, %v1662_v19  ;;  %v1660_v23 = vadd.f32 %v3397_v15, %v1606_v49  ;;  %v1617_v25 = vadd.f32 %v2186_v60, %v3190_v39 }
 0x343   : > { %v1608_v55 = vpop.f32.mrf.mxu1 }
 0x344   : > { %1823 = vst.msk [vmem:[%s3200_s8 + $0x68] sm:$0xf] %vm1796_vm2, %v1995_v54  ;;  %v1993_v48 = vpack.c.bf16 %v1660_v23, %v1660_v23  ;;  %v1663_v1 = vadd.f32 %v3398_v47, %v1617_v25  ;;  %v1609_v62 = vadd.f32 %v3190_v39, %v1608_v55 }
 0x345   : > { %v2189_v6 = vpop.f32.mrf.mxu1 }
 0x346   : > { %1821 = vst.msk [vmem:[%s3200_s8 + $0x60] sm:$0xf] %vm1796_vm2, %v1993_v48  ;;  %v1996_v13 = vpack.c.bf16 %v1663_v1, %v1663_v1  ;;  %v1661_v59 = vadd.f32 %v3399_v51, %v1609_v62  ;;  %v1630_v43 = vadd.f32 %v2189_v6, %v3190_v39 }
 0x347   : > { %v1621_v50 = vpop.f32.mrf.mxu1 }
 0x348   : > { %1824 = vst.msk [vmem:[%s3200_s8 + $0x6c] sm:$0xf] %vm1796_vm2, %v1996_v13  ;;  %v1994_v52 = vpack.c.bf16 %v1661_v59, %v1661_v59  ;;  %v1666_v34 = vadd.f32 %v3400_v8, %v1630_v43  ;;  %v1622_v36 = vadd.f32 %v3190_v39, %v1621_v50 }
 0x349   : > { %v2190_v3 = vpop.f32.mrf.mxu1 }
 0x34a   : > { %1822 = vst.msk [vmem:[%s3200_s8 + $0x64] sm:$0xf] %vm1796_vm2, %v1994_v52  ;;  %v1999_v31 = vpack.c.bf16 %v1666_v34, %v1666_v34  ;;  %v1664_v58 = vadd.f32 %v3401_v30, %v1622_v36  ;;  %v1633_v63 = vadd.f32 %v2190_v3, %v3190_v39 }
 0x34b   : > { %v1624_v33 = vpop.f32.mrf.mxu1 }
 0x34c   : > { %1827 = vst.msk [vmem:[%s3200_s8 + $0x78] sm:$0xf] %vm1796_vm2, %v1999_v31  ;;  %v1997_v2 = vpack.c.bf16 %v1664_v58, %v1664_v58  ;;  %v1667_v32 = vadd.f32 %v3402_v37, %v1633_v63  ;;  %v1625_v28 = vadd.f32 %v3190_v39, %v1624_v33 }
 0x34e   : > { %1825 = vst.msk [vmem:[%s3200_s8 + $0x70] sm:$0xf] %vm1796_vm2, %v1997_v2  ;;  %v2000_v5 = vpack.c.bf16 %v1667_v32, %v1667_v32  ;;  %v1665_v9 = vadd.f32 %v3403_v41, %v1625_v28 }
 0x350   : > { %1828 = vst.msk [vmem:[%s3200_s8 + $0x7c] sm:$0xf] %vm1796_vm2, %v2000_v5  ;;  %v1998_v14 = vpack.c.bf16 %v1665_v9, %v1665_v9 }
 0x352   : > { %1826 = vst.msk [vmem:[%s3200_s8 + $0x74] sm:$0xf] %vm1796_vm2, %v1998_v14 }
 0x353 PF: > { %s17_s24 = sadd.s32 1, %s2338_s24  }
 0x354   : > { %p14_p4 = scmp.ge.s32.totalorder %s17_s24, 4  }
 0x356   :  { %16 = sbr.rel (!%p14_p4) target bundleno = 1 (0x1), region = 78 }

// kernel: _lambda_.14
= control target key start
LH: loop header
LB: loop body
LE: loop exit
PB: predicated region body
PF: predicated region fallthrough
CT: control target
= control target key end

     0   :  { %s335_s1 = inlined_call_operand.vmem [shape: bf16[128,128], index: 1, kind: input, shape index: {}]   ;;  %s336_s0 = inlined_call_operand.vmem [shape: bf16[32,128], index: 0, kind: input, shape index: {}]   ;;  %s337_s2 = inlined_call_operand.vmem [shape: f32[1,128], index: 2, kind: input, shape index: {}]   ;;  %s338_s3 = inlined_call_operand.vmem [shape: bf16[32,128], index: 3, kind: output, shape index: {}]  }
   0x1   :  { %v266_v0 = vld [vmem:[%s335_s1 + $0x38] sm:$0xff]   ;;  %v267_v1 = vld [vmem:[%s335_s1 + $0x30] sm:$0xff]   ;;  %v268_v2 = vld [vmem:[%s335_s1 + $0x28] sm:$0xff]  }
   0x2   :  { %246 = vmatprep.subr.bf16.mxu0 %v266_v0  ;;  %v269_v3 = vld [vmem:[%s335_s1 + $0x20] sm:$0xff]   ;;  %v270_v5 = vld [vmem:[%s335_s1 + $0x18] sm:$0xff]   ;;  %v271_v6 = vld [vmem:[%s335_s1 + $0x10] sm:$0xff]  }
   0x3   :  { %247 = vmatpush3.bf16.msra.mxu0 %v266_v0  ;;  %v274_v4 = vld [vmem:[%s336_s0] sm:$0xff]   ;;  %v272_v7 = vld [vmem:[%s335_s1 + $0x8] sm:$0xff]  }
   0x4   :  { %248 = vmatprep.subr.bf16.mxu0 %v267_v1  ;;  %262 = vmatprep.mubr.bf16.mxu0 %v274_v4  ;;  %v273_v8 = vld [vmem:[%s335_s1] sm:$0xff]   ;;  %v275_v9 = vld [vmem:[%s336_s0 + $0x8] sm:$0xff]  }
   0x5   :  { %v216_v11 = vld [vmem:[%s337_s2] ss:$0 sm:$0xff] }
   0x7   :  { %249 = vmatpush3.bf16.msra.mxu0 %v267_v1 }
   0x8   :  { %250 = vmatprep.subr.bf16.mxu0 %v268_v2 }
   0xb   :  { %251 = vmatpush3.bf16.msra.mxu0 %v268_v2 }
   0xc   :  { %252 = vmatprep.subr.bf16.mxu0 %v269_v3 }
   0xf   :  { %253 = vmatpush3.bf16.msra.mxu0 %v269_v3 }
  0x10   :  { %254 = vmatprep.subr.bf16.mxu0 %v270_v5 }
  0x13   :  { %255 = vmatpush3.bf16.msra.mxu0 %v270_v5 }
  0x14   :  { %256 = vmatprep.subr.bf16.mxu0 %v271_v6 }
  0x17   :  { %257 = vmatpush3.bf16.msra.mxu0 %v271_v6 }
  0x18   :  { %258 = vmatprep.subr.bf16.mxu0 %v272_v7 }
  0x1b   :  { %259 = vmatpush3.bf16.msra.mxu0 %v272_v7 }
  0x1c   :  { %260 = vmatprep.subr.bf16.mxu0 %v273_v8 }
  0x1f   :  { %261 = vmatpush3.bf16.msra.mxu0 %v273_v8 }
  0x22   :  { %263 = vmatmul.mubr.bf16.vlgmr.msra.gmra.mxu0 %v275_v9 }
  0xe2   :  { %v264_v10 = vpop.f32.mrf.mxu0 }
  0xe3   :  { %v180_v14 = vadd.f32 %v264_v10, %v216_v11 }
  0xe4   :  { %v141_v12 = vpop.f32.mrf.mxu0 }
  0xe5   :  { %v178_v17 = vadd.f32 %v216_v11, %v141_v12 }
  0xe6   :  { %v265_v13 = vpop.f32.mrf.mxu0 }
  0xe7   :  { %v181_v15 = vadd.f32 %v265_v13, %v216_v11 }
  0xe8   :  { %v144_v16 = vpop.f32.mrf.mxu0 }
  0xe9   :  { %v233_v18 = vpack.c.bf16 %v181_v15, %v180_v14  ;;  %v179_v19 = vadd.f32 %v216_v11, %v144_v16 }
  0xeb   :  { %235 = vst [vmem:[%s338_s3 + $0x8] sm:$0xff] %v233_v18   ;;  %v228_v20 = vpack.c.bf16 %v179_v19, %v178_v17 }
  0xed   :  { %229 = vst [vmem:[%s338_s3] sm:$0xff] %v228_v20  }

// kernel: _lambda_.15
= control target key start
LH: loop header
LB: loop body
LE: loop exit
PB: predicated region body
PF: predicated region fallthrough
CT: control target
= control target key end

     0   :  { %s1005_s27 = smov 0   ;;  %s1007_s28 = smov 0   ;;  %s1099_s0 = inlined_call_operand.vmem [shape: bf16[2,32,32], index: 0, kind: input, shape index: {}]   ;;  %s1100_s1 = inlined_call_operand.vmem [shape: f32[32,32], index: 1, kind: input, shape index: {}]   ;;  %s1101_s2 = inlined_call_operand.vmem [shape: f32[1,32], index: 2, kind: input, shape index: {}]   ;;  %s1102_s3 = inlined_call_operand.vmem [shape: f32[1,32], index: 3, kind: input, shape index: {}]   ;;  %s1103_s4 = inlined_call_operand.vmem [shape: bf16[32,96], index: 4, kind: input, shape index: {}]   ;;  %s1104_s5 = inlined_call_operand.vmem [shape: f32[1,96], index: 5, kind: input, shape index: {}]   ;;  %s1105_s6 = inlined_call_operand.vmem [shape: bf16[2,32,32], index: 6, kind: output, shape index: {0}]   ;;  %s1106_s7 = inlined_call_operand.vmem [shape: bf16[2,32,32], index: 7, kind: output, shape index: {1}]   ;;  %s1107_s8 = inlined_call_operand.vmem [shape: bf16[2,32,32], index: 8, kind: output, shape index: {2}]  }
   0x1   :  { %s1009_s29 = smov 0  }
   0x2 LB: > { %s31_s30 = sadd.s32 1, %s952_s28  ;;  %p847_p0 = scmp.ge.s32.totalorder %s956_s29, 1  ;;  %s956_s29 = sphi %s1009_s29, %s19_s29   ;;  %s952_s28 = sphi %s1007_s28, %s1109_s28   ;;  %s948_s27 = sphi %s1005_s27, %s1108_s27  }
   0x3   : > { %p33_p1 = scmp.ge.s32.totalorder %s31_s30, 2  ;;  %p303_p2 = scmp.lt.s32.totalorder %s956_s29, 3 }
   0x5   : > { %s1111_s30 = smov (%p33_p1, %s31_s30), 0  ;;  %p304_p3 = pnand %p847_p0, %p303_p2 }
   0x6   : > { %p369_p4 = scmp.lt.s32.totalorder (!%p304_p3), %s948_s27, 1  ;;  %s958_s16 = smov (!%p304_p3), 96  }
   0x7   : > { %307 = sbr.rel (%p304_p3) target bundleno = 667 (0x29b), region = 44  ;;  %s959_s17 = smov (!%p304_p3), 64  }
   0xc   : > { %s1113_s27 = smov (!%p369_p4, %s948_s27), 1  ;;  %v423_v0 = vld [vmem:[%s1100_s1] sm:$0xff]  ;;  %v425_v1 = vld [vmem:[%s1100_s1 + $0x10] sm:$0xff]  ;;  %v424_v2 = vld [vmem:[%s1100_s1 + $0x8] sm:$0xff]  ;;  %vm431_vm0 = vcmask 261120   ;;  %vm603_vm1 = vcmask 257024  }
   0xd   : > { %s1023_s9 = sshll.u32 %s1113_s27, 4  ;;  %v426_v5 = vld [vmem:[%s1100_s1 + $0x18] sm:$0xff]  ;;  %v924_v38 = vld [vmem:[%s1103_s4 + $0x8] sm:$0xff]   ;;  %v925_v39 = vld [vmem:[%s1103_s4] sm:$0xff]  }
   0xe   : > { %s376_s12 = scalar_lea.vmem %s1099_s0, %s1023_s9  ;;  %890 = vmatprep.subr.bf16.mxu0 %v924_v38  ;;  %v856_v54 = vld [vmem:[%s1101_s2] ss:$0 sm:$0xff]  ;;  %s392_s15 = scalar_lea.vmem %s1105_s6, %s1023_s9 }
   0xf   : > { %v878_v3 = vld [vmem:[%s376_s12] sm:$0xff]   ;;  %v885_v4 = vld [vmem:[%s376_s12 + $0x8] sm:$0xff]   ;;  %891 = vmatpush3.bf16.msra.mxu0 %v924_v38  ;;  %s402_s20 = scalar_lea.vmem %s1106_s7, %s1023_s9  ;;  %s412_s23 = scalar_lea.vmem %s1107_s8, %s1023_s9 }
  0x10   : > { %v879_v6 = vunpack.c.l.bf16 %v878_v3  ;;  %v883_v7 = vunpack.c.l.bf16 %v885_v4  ;;  %v880_v8 = vunpack.c.h.bf16 %v878_v3  ;;  %v884_v9 = vunpack.c.h.bf16 %v885_v4  ;;  %892 = vmatprep.subr.bf16.mxu0 %v925_v39  ;;  %v857_v59 = vld [vmem:[%s1102_s3] ss:$0 sm:$0xff] }
  0x12   : > { %v427_v10 = vadd.f32 %v879_v6, %v423_v0  ;;  %v429_v11 = vadd.f32 %v883_v7, %v425_v1  ;;  %v428_v12 = vadd.f32 %v880_v8, %v424_v2  ;;  %v430_v13 = vadd.f32 %v884_v9, %v426_v5  ;;  %v858_v8 = vld [vmem:[%s1104_s5] ss:$0 sm:$0xff] }
  0x13   : > { %893 = vmatpush3.bf16.msra.mxu0 %v925_v39 }
  0x14   : > { %v432_v14 = vsel %vm431_vm0, %v427_v10, 0.0  ;;  %v438_v15 = vsel %vm431_vm0, %v429_v11, 0.0  ;;  %v435_v16 = vsel %vm431_vm0, %v428_v12, 0.0  ;;  %v441_v17 = vsel %vm431_vm0, %v430_v13, 0.0 }
  0x15   : > { %433 = vadd.xlane.f32.xlu0 %v432_v14  ;;  %439 = vadd.xlane.f32.xlu1 %v438_v15 }
  0x19   : > { %436 = vadd.xlane.f32.xlu0 %v435_v16  ;;  %442 = vadd.xlane.f32.xlu1 %v441_v17 }
  0x9e   : > { %v434_v18 = vpop.xlane.xlu0 %433  ;;  %v440_v19 = vpop.xlane.xlu1 %439 }
  0x9f   : > { %v445_v20 = vmul.f32 0.03125, %v434_v18  ;;  %v447_v21 = vmul.f32 0.03125, %v440_v19 }
  0xa1   : > { %v449_v22 = vsub.f32 %v427_v10, %v445_v20  ;;  %v451_v23 = vsub.f32 %v429_v11, %v447_v21 }
  0xa2   : > { %v437_v24 = vpop.xlane.xlu0 %436  ;;  %v443_v25 = vpop.xlane.xlu1 %442 }
  0xa3   : > { %v446_v26 = vmul.f32 0.03125, %v437_v24  ;;  %v448_v27 = vmul.f32 0.03125, %v443_v25  ;;  %v453_v28 = vmul.f32 %v449_v22, %v449_v22  ;;  %v455_v29 = vmul.f32 %v451_v23, %v451_v23 }
  0xa5   : > { %v450_v30 = vsub.f32 %v428_v12, %v446_v26  ;;  %v452_v31 = vsub.f32 %v430_v13, %v448_v27  ;;  %v457_v32 = vsel %vm431_vm0, %v453_v28, 0.0  ;;  %v463_v33 = vsel %vm431_vm0, %v455_v29, 0.0 }
  0xa6   : > { %458 = vadd.xlane.f32.xlu0 %v457_v32 }
  0xa7   : > { %v454_v34 = vmul.f32 %v450_v30, %v450_v30  ;;  %v456_v35 = vmul.f32 %v452_v31, %v452_v31 }
  0xa9   : > { %v460_v36 = vsel %vm431_vm0, %v454_v34, 0.0  ;;  %v466_v37 = vsel %vm431_vm0, %v456_v35, 0.0 }
  0xaa   : > { %464 = vadd.xlane.f32.xlu0 %v463_v33  ;;  %461 = vadd.xlane.f32.xlu1 %v460_v36 }
  0xae   : > { %467 = vadd.xlane.f32.xlu1 %v466_v37 }
 0x12f   : > { %v459_v40 = vpop.xlane.xlu0 %458 }
 0x130   : > { %v469_v41 = vmul.f32 0.03125, %v459_v40 }
 0x132   : > { %v473_v42 = vadd.f32 1e-05, %v469_v41 }
 0x133   : > { %v462_v43 = vpop.xlane.xlu1 %461  ;;  %v465_v44 = vpop.xlane.xlu0 %464 }
 0x134   : > { %926 = vrsqrt.f32 %v473_v42  ;;  %v470_v45 = vmul.f32 0.03125, %v462_v43  ;;  %v471_v46 = vmul.f32 0.03125, %v465_v44 }
 0x136   : > { %v474_v47 = vadd.f32 1e-05, %v470_v45  ;;  %v475_v48 = vadd.f32 1e-05, %v471_v46 }
 0x137   : > { %v468_v49 = vpop.xlane.xlu1 %467 }
 0x138   : > { %928 = vrsqrt.f32 %v474_v47  ;;  %v472_v50 = vmul.f32 0.03125, %v468_v49 }
 0x139   : > { %930 = vrsqrt.f32 %v475_v48 }
 0x13a   : > { %v476_v51 = vadd.f32 1e-05, %v472_v50 }
 0x13c   : > { %932 = vrsqrt.f32 %v476_v51 }
 0x141   : > { %v927_v52 = vpop.eup %926 }
 0x142   : > { %v481_v53 = vmul.f32 %v927_v52, %v449_v22 }
 0x144   : > { %v492_v58 = vmul.f32 %v856_v54, %v481_v53 }
 0x145   : > { %v929_v55 = vpop.eup %928 }
 0x146   : > { %v931_v56 = vpop.eup %930  ;;  %v482_v57 = vmul.f32 %v929_v55, %v450_v30  ;;  %v503_v63 = vadd.f32 %v857_v59, %v492_v58 }
 0x147   : > { %v483_v60 = vmul.f32 %v931_v56, %v451_v23 }
 0x148   : > { %v493_v61 = vmul.f32 %v856_v54, %v482_v57 }
 0x149   : > { %v933_v62 = vpop.eup %932  ;;  %v494_v2 = vmul.f32 %v856_v54, %v483_v60 }
 0x14a   : > { %v504_v0 = vadd.f32 %v857_v59, %v493_v61  ;;  %v484_v1 = vmul.f32 %v933_v62, %v452_v31 }
 0x14b   : > { %v505_v5 = vadd.f32 %v857_v59, %v494_v2 }
 0x14c   : > { %v507_v3 = vpack.c.bf16 %v504_v0, %v503_v63  ;;  %v495_v4 = vmul.f32 %v856_v54, %v484_v1 }
 0x14e   : > { %894 = vmatprep.mubr.msk.bf16.mxu0 %vm431_vm0, %v507_v3  ;;  %v506_v6 = vadd.f32 %v857_v59, %v495_v4 }
 0x150   : > { %v508_v7 = vpack.c.bf16 %v506_v6, %v505_v5 }
 0x152   : > { %895 = vmatmul.mubr.msk.bf16.vlgmr.msra.gmra.mxu0 %vm431_vm0, %v508_v7 }
 0x212   : > { %v896_v9 = vpop.f32.mrf.mxu0 }
 0x213   : > { %v581_v10 = vadd.f32 %v896_v9, %v858_v8 }
 0x214   : > { %v572_v11 = vpop.f32.mrf.mxu0 }
 0x215   : > { %v875_v12 = vpack.c.bf16 %v581_v10, %v581_v10  ;;  %v573_v13 = vadd.f32 %v858_v8, %v572_v11 }
 0x216   : > { %v897_v14 = vpop.f32.mrf.mxu0 }
 0x217   : > { %606 = vst.msk [vmem:[%s392_s15 + $0x8] sm:$0xf] %vm603_vm1, %v875_v12  ;;  %v873_v15 = vpack.c.bf16 %v573_v13, %v573_v13  ;;  %v584_v16 = vadd.f32 %v897_v14, %v858_v8  ;;  %612 = vrot.lane.b32.xlu1 %v875_v12, %s958_s16 }
 0x218   : > { %v575_v17 = vpop.f32.mrf.mxu0 }
 0x219   : > { %604 = vst.msk [vmem:[%s392_s15] sm:$0xf] %vm603_vm1, %v873_v15  ;;  %v876_v18 = vpack.c.bf16 %v584_v16, %v584_v16  ;;  %v576_v19 = vadd.f32 %v858_v8, %v575_v17  ;;  %608 = vrot.lane.b32.xlu0 %v873_v15, %s958_s16 }
 0x21b   : > { %607 = vst.msk [vmem:[%s392_s15 + $0xc] sm:$0xf] %vm603_vm1, %v876_v18  ;;  %v874_v20 = vpack.c.bf16 %v576_v19, %v576_v19  ;;  %614 = vrot.lane.b32.xlu1 %v876_v18, %s958_s16 }
 0x21d   : > { %605 = vst.msk [vmem:[%s392_s15 + $0x4] sm:$0xf] %vm603_vm1, %v874_v20  ;;  %624 = vrot.lane.b32.xlu0 %v873_v15, %s959_s17 }
 0x21f   : > { %610 = vrot.lane.b32.xlu1 %v874_v20, %s958_s16 }
 0x221   : > { %628 = vrot.lane.b32.xlu0 %v875_v12, %s959_s17 }
 0x223   : > { %626 = vrot.lane.b32.xlu1 %v874_v20, %s959_s17 }
 0x227   : > { %630 = vrot.lane.b32.xlu1 %v876_v18, %s959_s17 }
 0x289   : > { %v613_v21 = vpop.permute.xlu1 %612 }
 0x28a   : > { %622 = vst.msk [vmem:[%s402_s20 + $0x8] sm:$0xf] %vm603_vm1, %v613_v21 }
 0x28b   : > { %v609_v22 = vpop.permute.xlu0 %608 }
 0x28c   : > { %620 = vst.msk [vmem:[%s402_s20] sm:$0xf] %vm603_vm1, %v609_v22 }
 0x28d   : > { %v615_v23 = vpop.permute.xlu1 %614 }
 0x28e   : > { %623 = vst.msk [vmem:[%s402_s20 + $0xc] sm:$0xf] %vm603_vm1, %v615_v23 }
 0x28f   : > { %v625_v24 = vpop.permute.xlu0 %624 }
 0x290   : > { %636 = vst.msk [vmem:[%s412_s23] sm:$0xf] %vm603_vm1, %v625_v24 }
 0x291   : > { %v611_v25 = vpop.permute.xlu1 %610 }
 0x292   : > { %621 = vst.msk [vmem:[%s402_s20 + $0x4] sm:$0xf] %vm603_vm1, %v611_v25 }
 0x293   : > { %v629_v26 = vpop.permute.xlu0 %628 }
 0x294   : > { %638 = vst.msk [vmem:[%s412_s23 + $0x8] sm:$0xf] %vm603_vm1, %v629_v26 }
 0x295   : > { %v627_v27 = vpop.permute.xlu1 %626 }
 0x296   : > { %637 = vst.msk [vmem:[%s412_s23 + $0x4] sm:$0xf] %vm603_vm1, %v627_v27 }
 0x299   : > { %v631_v28 = vpop.permute.xlu1 %630 }
 0x29a   : > { %639 = vst.msk [vmem:[%s412_s23 + $0xc] sm:$0xf] %vm603_vm1, %v631_v28 }
 0x29b PF: > { %s19_s29 = sadd.s32 1, %s956_s29   ;;  %s1108_s27 = smov %s952_s28 }
 0x29c   : > { %p16_p5 = scmp.ge.s32.totalorder %s19_s29, 4   ;;  %s1109_s28 = smov %s1111_s30 }
 0x29e   :  { %18 = sbr.rel (!%p16_p5) target bundleno = 2 (0x2), region = 101 }

// kernel: _lambda_.16
= control target key start
LH: loop header
LB: loop body
LE: loop exit
PB: predicated region body
PF: predicated region fallthrough
CT: control target
= control target key end

     0   :  { %s1973_s24 = smov 0   ;;  %s1975_s25 = smov 0   ;;  %s2321_s0 = inlined_call_operand.vmem [shape: bf16[2,32,32], index: 0, kind: input, shape index: {}]   ;;  %s2322_s1 = inlined_call_operand.vmem [shape: f32[32,32], index: 1, kind: input, shape index: {}]   ;;  %s2323_s2 = inlined_call_operand.vmem [shape: bf16[2,32,32], index: 2, kind: input, shape index: {}]   ;;  %s2324_s3 = inlined_call_operand.vmem [shape: bf16[2,32,32], index: 3, kind: input, shape index: {}]   ;;  %s2325_s4 = inlined_call_operand.vmem [shape: bf16[2,32,32], index: 4, kind: input, shape index: {}]   ;;  %s2326_s5 = inlined_call_operand.vmem [shape: bf16[32,32], index: 5, kind: input, shape index: {}]   ;;  %s2327_s6 = inlined_call_operand.vmem [shape: f32[1,32], index: 6, kind: input, shape index: {}]   ;;  %s2328_s7 = inlined_call_operand.vmem [shape: bf16[2,32,32], index: 7, kind: output, shape index: {}]  }
   0x1   :  { %s1977_s26 = smov 0  }
   0x2 LB: > { %s29_s27 = sadd.s32 1, %s1921_s25  ;;  %p1575_p0 = scmp.ge.s32.totalorder %s1925_s26, 1  ;;  %s1925_s26 = sphi %s1977_s26, %s17_s26   ;;  %s1921_s25 = sphi %s1975_s25, %s2330_s25   ;;  %s1917_s24 = sphi %s1973_s24, %s2329_s24  }
   0x3   : > { %p31_p1 = scmp.ge.s32.totalorder %s29_s27, 2  ;;  %p306_p2 = scmp.lt.s32.totalorder %s1925_s26, 3 }
   0x5   : > { %s2332_s27 = smov (%p31_p1, %s29_s27), 0  ;;  %p307_p3 = pnand %p1575_p0, %p306_p2 }
   0x6   : > { %p371_p4 = scmp.lt.s32.totalorder (!%p307_p3), %s1917_s24, 1  ;;  %s1927_s12 = smov (!%p307_p3), 120  }
   0x7   : > { %310 = sbr.rel (%p307_p3) target bundleno = 1226 (0x4ca), region = 48  ;;  %s1928_s13 = smov (!%p307_p3), 112  }
   0x8   : > { %s1929_s14 = smov (!%p307_p3), 104   ;;  %s1930_s20 = smov (!%p307_p3), 8  }
   0x9   : > { %s1931_s23 = smov (!%p307_p3), 16  }
   0xc   : > { %s2334_s24 = smov (!%p371_p4, %s1917_s24), 1  ;;  %vm525_vm0 = vcmask 64512   ;;  %vm806_vm1 = vcmask 261120   ;;  %vm1295_vm2 = vcmask 130048   ;;  %vm1300_vm3 = vcmask 195584  }
   0xd   : > { %s1991_s28 = sshll.u32 %s2334_s24, 4  ;;  %s1932_s24 = smov 24   ;;  %vm1421_vm4 = vcmask 257024  }
   0xe   : > { %s400_s8 = scalar_lea.vmem %s2324_s3, %s1991_s28  ;;  %s394_s11 = scalar_lea.vmem %s2323_s2, %s1991_s28 }
   0xf   : > { %v423_v0 = vld [vmem:[%s400_s8 + $0x8] sm:$0xf]  ;;  %v421_v1 = vld [vmem:[%s400_s8] sm:$0xf]  ;;  %v424_v2 = vld [vmem:[%s400_s8 + $0xc] sm:$0xf]  ;;  %s405_s17 = scalar_lea.vmem %s2325_s4, %s1991_s28  ;;  %s414_s21 = scalar_lea.vmem %s2328_s7, %s1991_s28 }
  0x10   : > { %465 = vrot.lane.b32.xlu0 %v423_v0, %s1927_s12  ;;  %461 = vrot.lane.b32.xlu1 %v421_v1, %s1927_s12  ;;  %v1589_v3 = vcombine.low %v423_v0, %v424_v2  ;;  %v422_v4 = vld [vmem:[%s400_s8 + $0x4] sm:$0xf]  ;;  %v417_v7 = vld [vmem:[%s394_s11] sm:$0xf]  ;;  %s378_s8 = scalar_lea.vmem %s2321_s0, %s1991_s28 }
  0x11   : > { %v1588_v5 = vcombine.low %v421_v1, %v422_v4  ;;  %v418_v6 = vld [vmem:[%s394_s11 + $0x4] sm:$0xf]  ;;  %v419_v11 = vld [vmem:[%s394_s11 + $0x8] sm:$0xf]  ;;  %v420_v12 = vld [vmem:[%s394_s11 + $0xc] sm:$0xf] }
  0x12   : > { %1763 = vmatprep.subr.msk.bf16.mxu0 %vm525_vm0, %v1589_v3  ;;  %v536_v8 = vsel %vm525_vm0, %v1589_v3, 0  ;;  %v1586_v9 = vcombine.low %v417_v7, %v418_v6  ;;  %v1587_v13 = vcombine.low %v419_v11, %v420_v12  ;;  %v2035_v14 = vld [vmem:[%s405_s17 + $0x8] sm:$0xf]  ;;  %v2037_v15 = vld [vmem:[%s405_s17 + $0xc] sm:$0xf] }
  0x13   : > { %1692 = vmatpush3.bf16.xpose.msra.mxu0 %v536_v8  ;;  %v533_v10 = vsel %vm525_vm0, %v1588_v5, 0  ;;  %v2043_v16 = vld [vmem:[%s405_s17] sm:$0xf]  ;;  %v2049_v17 = vld [vmem:[%s405_s17 + $0x4] sm:$0xf] }
  0x14   : > { %467 = vrot.lane.b32.xlu0 %v424_v2, %s1927_s12  ;;  %463 = vrot.lane.b32.xlu1 %v422_v4, %s1927_s12 }
  0x15   : > { %1764 = vmatprep.subr.msk.bf16.mxu0 %vm525_vm0, %v1588_v5  ;;  %1695 = vmatprep.mubr.msk.bf16.mxu0 %vm525_vm0, %v1586_v9 }
  0x18   : > { %473 = vrot.lane.b32.xlu0 %v423_v0, %s1928_s13  ;;  %475 = vrot.lane.b32.xlu1 %v424_v2, %s1928_s13 }
  0x1b   : > { %1694 = vmatpush3.bf16.xpose.msra.mxu0 %v533_v10  ;;  %v1611_v10 = vcombine.low %v2035_v14, %v2037_v15 }
  0x1c   : > { %435 = vrot.lane.b32.xlu1 %v418_v6, %s1927_s12  ;;  %433 = vrot.lane.b32.xlu0 %v417_v7, %s1927_s12 }
  0x20   : > { %483 = vrot.lane.b32.xlu1 %v424_v2, %s1929_s14  ;;  %481 = vrot.lane.b32.xlu0 %v423_v0, %s1929_s14 }
  0x22   : > { %1696 = vmatmul.mubr.msk.bf16.vlgmr.msra.gmra.mxu0 %vm525_vm0, %v1587_v13 }
  0x24   : > { %439 = vrot.lane.b32.xlu1 %v420_v12, %s1927_s12  ;;  %437 = vrot.lane.b32.xlu0 %v419_v11, %s1927_s12 }
  0x28   : > { %471 = vrot.lane.b32.xlu1 %v422_v4, %s1928_s13  ;;  %469 = vrot.lane.b32.xlu0 %v421_v1, %s1928_s13 }
  0x2c   : > { %479 = vrot.lane.b32.xlu1 %v422_v4, %s1929_s14  ;;  %477 = vrot.lane.b32.xlu0 %v421_v1, %s1929_s14 }
  0x30   : > { %443 = vrot.lane.b32.xlu1 %v418_v6, %s1928_s13  ;;  %441 = vrot.lane.b32.xlu0 %v417_v7, %s1928_s13 }
  0x34   : > { %447 = vrot.lane.b32.xlu1 %v420_v12, %s1928_s13  ;;  %445 = vrot.lane.b32.xlu0 %v419_v11, %s1928_s13 }
  0x38   : > { %451 = vrot.lane.b32.xlu1 %v418_v6, %s1929_s14  ;;  %449 = vrot.lane.b32.xlu0 %v417_v7, %s1929_s14 }
  0x3c   : > { %455 = vrot.lane.b32.xlu1 %v420_v12, %s1929_s14  ;;  %453 = vrot.lane.b32.xlu0 %v419_v11, %s1929_s14  ;;  %v1610_v11 = vcombine.low %v2043_v16, %v2049_v17 }
  0x40   : > { %493 = vrot.lane.b32.xlu1 %v2035_v14, %s1927_s12  ;;  %495 = vrot.lane.b32.xlu0 %v2037_v15, %s1927_s12 }
  0x44   : > { %489 = vrot.lane.b32.xlu1 %v2043_v16, %s1927_s12  ;;  %501 = vrot.lane.b32.xlu0 %v2035_v14, %s1928_s13 }
  0x48   : > { %491 = vrot.lane.b32.xlu1 %v2049_v17, %s1927_s12 }
  0x4c   : > { %503 = vrot.lane.b32.xlu1 %v2037_v15, %s1928_s13 }
  0x82   : > { %v466_v18 = vpop.permute.xlu0 %465  ;;  %v462_v19 = vpop.permute.xlu1 %461 }
  0x86   : > { %v468_v20 = vpop.permute.xlu0 %467  ;;  %v464_v21 = vpop.permute.xlu1 %463 }
  0x87   : > { %v1595_v22 = vcombine.low %v466_v18, %v468_v20  ;;  %v1594_v23 = vcombine.low %v462_v19, %v464_v21 }
  0x89   : > { %1765 = vmatprep.subr.msk.bf16.mxu1 %vm525_vm0, %v1595_v22  ;;  %v609_v24 = vsel %vm525_vm0, %v1595_v22, 0  ;;  %v606_v32 = vsel %vm525_vm0, %v1594_v23, 0 }
  0x8a   : > { %1700 = vmatpush3.bf16.xpose.msra.mxu1 %v609_v24  ;;  %v474_v25 = vpop.permute.xlu0 %473  ;;  %v476_v26 = vpop.permute.xlu1 %475 }
  0x8b   : > { %v1601_v27 = vcombine.low %v474_v25, %v476_v26  ;;  %1766 = vmatprep.subr.msk.bf16.mxu1 %vm525_vm0, %v1594_v23 }
  0x8d   : > { %v682_v28 = vsel %vm525_vm0, %v1601_v27, 0  ;;  %1767 = vmatprep.subr.msk.bf16.mxu0 %vm525_vm0, %v1601_v27 }
  0x8e   : > { %v436_v29 = vpop.permute.xlu1 %435  ;;  %v434_v30 = vpop.permute.xlu0 %433  ;;  %1708 = vmatpush3.bf16.xpose.msra.mxu0 %v682_v28 }
  0x8f   : > { %v1592_v31 = vcombine.low %v434_v30, %v436_v29 }
  0x91   : > { %1703 = vmatprep.mubr.msk.bf16.mxu1 %vm525_vm0, %v1592_v31 }
  0x92   : > { %1702 = vmatpush3.bf16.xpose.msra.mxu1 %v606_v32  ;;  %v484_v33 = vpop.permute.xlu1 %483  ;;  %v482_v34 = vpop.permute.xlu0 %481 }
  0x93   : > { %v1607_v35 = vcombine.low %v482_v34, %v484_v33 }
  0x95   : > { %1769 = vmatprep.subr.msk.bf16.mxu1 %vm525_vm0, %v1607_v35  ;;  %v755_v39 = vsel %vm525_vm0, %v1607_v35, 0 }
  0x96   : > { %v440_v36 = vpop.permute.xlu1 %439  ;;  %v438_v37 = vpop.permute.xlu0 %437 }
  0x97   : > { %v1593_v38 = vcombine.low %v438_v37, %v440_v36 }
  0x99   : > { %1704 = vmatmul.mubr.msk.bf16.vlgmr.msra.gmra.mxu1 %vm525_vm0, %v1593_v38 }
  0x9a   : > { %v472_v40 = vpop.permute.xlu1 %471  ;;  %1716 = vmatpush3.bf16.xpose.msra.mxu1 %v755_v39  ;;  %v470_v41 = vpop.permute.xlu0 %469 }
  0x9b   : > { %v1600_v42 = vcombine.low %v470_v41, %v472_v40 }
  0x9d   : > { %v679_v43 = vsel %vm525_vm0, %v1600_v42, 0  ;;  %1768 = vmatprep.subr.msk.bf16.mxu0 %vm525_vm0, %v1600_v42 }
  0x9e   : > { %v480_v44 = vpop.permute.xlu1 %479  ;;  %v478_v45 = vpop.permute.xlu0 %477  ;;  %1710 = vmatpush3.bf16.xpose.msra.mxu0 %v679_v43 }
  0x9f   : > { %v1606_v46 = vcombine.low %v478_v45, %v480_v44  ;;  %1723 = vmatprep.subr.bf16.mxu0 %v1611_v10 }
  0xa1   : > { %v752_v47 = vsel %vm525_vm0, %v1606_v46, 0  ;;  %1770 = vmatprep.subr.msk.bf16.mxu1 %vm525_vm0, %v1606_v46 }
  0xa2   : > { %v444_v48 = vpop.permute.xlu1 %443  ;;  %1718 = vmatpush3.bf16.xpose.msra.mxu1 %v752_v47  ;;  %v442_v49 = vpop.permute.xlu0 %441 }
  0xa3   : > { %v1598_v50 = vcombine.low %v442_v49, %v444_v48 }
  0xa5   : > { %1711 = vmatprep.mubr.msk.bf16.mxu0 %vm525_vm0, %v1598_v50 }
  0xa6   : > { %v448_v51 = vpop.permute.xlu1 %447  ;;  %v446_v52 = vpop.permute.xlu0 %445 }
  0xa7   : > { %v1599_v53 = vcombine.low %v446_v52, %v448_v51 }
  0xa9   : > { %1712 = vmatmul.mubr.msk.bf16.vlgmr.msra.gmra.mxu0 %vm525_vm0, %v1599_v53 }
  0xaa   : > { %v452_v54 = vpop.permute.xlu1 %451  ;;  %v450_v55 = vpop.permute.xlu0 %449  ;;  %1724 = vmatpush3.bf16.msra.mxu0 %v1611_v10 }
  0xab   : > { %v1604_v56 = vcombine.low %v450_v55, %v452_v54  ;;  %1725 = vmatprep.subr.bf16.mxu0 %v1610_v11 }
  0xad   : > { %1719 = vmatprep.mubr.msk.bf16.mxu1 %vm525_vm0, %v1604_v56 }
  0xae   : > { %v456_v57 = vpop.permute.xlu1 %455  ;;  %v454_v58 = vpop.permute.xlu0 %453  ;;  %1726 = vmatpush3.bf16.msra.mxu0 %v1610_v11 }
  0xaf   : > { %v1605_v59 = vcombine.low %v454_v58, %v456_v57 }
  0xb1   : > { %1720 = vmatmul.mubr.msk.bf16.vlgmr.msra.gmra.mxu1 %vm525_vm0, %v1605_v59 }
  0xb2   : > { %v494_v60 = vpop.permute.xlu1 %493  ;;  %v496_v61 = vpop.permute.xlu0 %495 }
  0xb3   : > { %v1615_v62 = vcombine.low %v494_v60, %v496_v61 }
  0xb5   : > { %1731 = vmatprep.subr.bf16.mxu1 %v1615_v62 }
  0xb6   : > { %v490_v1 = vpop.permute.xlu1 %489  ;;  %1732 = vmatpush3.bf16.msra.mxu1 %v1615_v62  ;;  %v502_v12 = vpop.permute.xlu0 %501 }
  0xba   : > { %v492_v8 = vpop.permute.xlu1 %491 }
  0xbb   : > { %v1614_v9 = vcombine.low %v490_v1, %v492_v8 }
  0xbd   : > { %1733 = vmatprep.subr.bf16.mxu1 %v1614_v9 }
  0xbe   : > { %1734 = vmatpush3.bf16.msra.mxu1 %v1614_v9  ;;  %v504_v13 = vpop.permute.xlu1 %503 }
  0xbf   : > { %v2093_v18 = vcombine.low %v502_v12, %v504_v13 }
  0xc1   : > { %1739 = vmatprep.subr.bf16.mxu0 %v2093_v18 }
  0xe2   : > { %v2073_v63 = vpop.f32.mrf.mxu0 }
  0xe3   : > { %v813_v0 = vsel %vm806_vm1, %v2073_v63, -inf }
  0xe4   : > { %814 = vmax.xlane.f32.xlu0 %v813_v0  ;;  %v2077_v2 = vpop.f32.mrf.mxu0 }
  0xe5   : > { %v807_v3 = vsel %vm806_vm1, %v2077_v2, -inf }
  0xe6   : > { %v2081_v4 = vpop.f32.mrf.mxu0 }
  0xe7   : > { %v816_v7 = vsel %vm806_vm1, %v2081_v4, -inf }
  0xe8   : > { %808 = vmax.xlane.f32.xlu0 %v807_v3  ;;  %v2083_v5 = vpop.f32.mrf.mxu0 }
  0xe9   : > { %v810_v6 = vsel %vm806_vm1, %v2083_v5, -inf }
  0xea   : > { %811 = vmax.xlane.f32.xlu1 %v810_v6 }
  0xec   : > { %817 = vmax.xlane.f32.xlu0 %v816_v7 }
 0x159   : > { %v2096_v19 = vpop.f32.mrf.mxu1 }
 0x15a   : > { %v825_v20 = vsel %vm806_vm1, %v2096_v19, -inf }
 0x15b   : > { %v2100_v21 = vpop.f32.mrf.mxu1  ;;  %826 = vmax.xlane.f32.xlu1 %v825_v20 }
 0x15c   : > { %v819_v28 = vsel %vm806_vm1, %v2100_v21, -inf }
 0x15d   : > { %v2102_v22 = vpop.f32.mrf.mxu1 }
 0x15e   : > { %v828_v23 = vsel %vm806_vm1, %v2102_v22, -inf }
 0x15f   : > { %829 = vmax.xlane.f32.xlu0 %v828_v23  ;;  %v2118_v30 = vpop.f32.mrf.mxu1 }
 0x160   : > { %v822_v33 = vsel %vm806_vm1, %v2118_v30, -inf }
 0x169   : > { %v2106_v24 = vpop.f32.mrf.mxu0 }
 0x16a   : > { %v837_v25 = vsel %vm806_vm1, %v2106_v24, -inf }
 0x16b   : > { %838 = vmax.xlane.f32.xlu1 %v837_v25  ;;  %v2110_v26 = vpop.f32.mrf.mxu0 }
 0x16c   : > { %v831_v32 = vsel %vm806_vm1, %v2110_v26, -inf }
 0x16d   : > { %v2112_v27 = vpop.f32.mrf.mxu0  ;;  %v815_v43 = vpop.xlane.xlu0 %814 }
 0x16e   : > { %v840_v29 = vsel %vm806_vm1, %v2112_v27, -inf  ;;  %v857_v45 = vsub.f32 %v2073_v63, %v815_v43 }
 0x16f   : > { %820 = vmax.xlane.f32.xlu1 %v819_v28  ;;  %841 = vmax.xlane.f32.xlu0 %v840_v29  ;;  %v2126_v34 = vpop.f32.mrf.mxu0 }
 0x170   : > { %v834_v37 = vsel %vm806_vm1, %v2126_v34, -inf  ;;  %v875_v48 = vmul.f32 1.442695, %v857_v45 }
 0x171   : > { %v2120_v31 = vpop.f32.mrf.mxu1  ;;  %v809_v44 = vpop.xlane.xlu0 %808 }
 0x172   : > { %v849_v36 = vsel %vm806_vm1, %v2120_v31, -inf  ;;  %v855_v47 = vsub.f32 %v2077_v2, %v809_v44  ;;  %1839 = vpow2.f32 %v875_v48 }
 0x173   : > { %v2128_v35 = vpop.f32.mrf.mxu1  ;;  %832 = vmax.xlane.f32.xlu1 %v831_v32  ;;  %823 = vmax.xlane.f32.xlu0 %v822_v33 }
 0x174   : > { %v843_v39 = vsel %vm806_vm1, %v2128_v35, -inf  ;;  %v871_v50 = vmul.f32 1.442695, %v855_v47 }
 0x175   : > { %v2134_v38 = vpop.f32.mrf.mxu1  ;;  %v818_v46 = vpop.xlane.xlu0 %817 }
 0x176   : > { %v852_v40 = vsel %vm806_vm1, %v2134_v38, -inf  ;;  %v858_v49 = vsub.f32 %v2081_v4, %v818_v46  ;;  %1841 = vpow2.f32 %v871_v50 }
 0x177   : > { %850 = vmax.xlane.f32.xlu1 %v849_v36  ;;  %835 = vmax.xlane.f32.xlu0 %v834_v37  ;;  %v2140_v41 = vpop.f32.mrf.mxu1 }
 0x178   : > { %v846_v42 = vsel %vm806_vm1, %v2140_v41, -inf  ;;  %v877_v52 = vmul.f32 1.442695, %v858_v49 }
 0x17a   : > { %1843 = vpow2.f32 %v877_v52 }
 0x17b   : > { %844 = vmax.xlane.f32.xlu1 %v843_v39  ;;  %853 = vmax.xlane.f32.xlu0 %v852_v40 }
 0x17f   : > { %847 = vmax.xlane.f32.xlu0 %v846_v42  ;;  %v2156_v53 = vpop.eup %1839 }
 0x180   : > { %v909_v55 = vsel %vm806_vm1, %v2156_v53, 0.0 }
 0x183   : > { %v2158_v54 = vpop.eup %1841 }
 0x184   : > { %v903_v57 = vsel %vm806_vm1, %v2158_v54, 0.0 }
 0x187   : > { %v2162_v56 = vpop.eup %1843 }
 0x188   : > { %v912_v58 = vsel %vm806_vm1, %v2162_v56, 0.0 }
 0x18c   : > { %511 = vrot.lane.b32.xlu1 %v2037_v15, %s1929_s14  ;;  %v812_v15 = vpop.xlane.xlu1 %811 }
 0x18d   : > { %v856_v51 = vsub.f32 %v2083_v5, %v812_v15 }
 0x190   : > { %499 = vrot.lane.b32.xlu1 %v2049_v17, %s1928_s13 }
 0x195   : > { %509 = vrot.lane.b32.xlu0 %v2035_v14, %s1929_s14  ;;  %v873_v14 = vmul.f32 1.442695, %v856_v51 }
 0x197   : > { %1845 = vpow2.f32 %v873_v14 }
 0x199   : > { %497 = vrot.lane.b32.xlu0 %v2043_v16, %s1928_s13 }
 0x1a4   : > { %v2168_v59 = vpop.eup %1845 }
 0x1a5   : > { %v906_v60 = vsel %vm806_vm1, %v2168_v59, 0.0 }
 0x1b4   : > { %910 = vadd.xlane.f32.xlu1 %v909_v55 }
 0x1b8   : > { %904 = vadd.xlane.f32.xlu1 %v903_v57  ;;  %913 = vadd.xlane.f32.xlu0 %v912_v58 }
 0x1bc   : > { %907 = vadd.xlane.f32.xlu0 %v906_v60 }
 0x1e4   : > { %v827_v61 = vpop.xlane.xlu1 %826 }
 0x1e5   : > { %v861_v62 = vsub.f32 %v2096_v19, %v827_v61 }
 0x1e7   : > { %v883_v63 = vmul.f32 1.442695, %v861_v62 }
 0x1e8   : > { %v830_v0 = vpop.xlane.xlu0 %829 }
 0x1e9   : > { %1847 = vpow2.f32 %v883_v63  ;;  %v862_v1 = vsub.f32 %v2102_v22, %v830_v0 }
 0x1eb   : > { %v885_v2 = vmul.f32 1.442695, %v862_v1 }
 0x1ed   : > { %1849 = vpow2.f32 %v885_v2 }
 0x1f4   : > { %v839_v3 = vpop.xlane.xlu1 %838 }
 0x1f5   : > { %v865_v4 = vsub.f32 %v2106_v24, %v839_v3 }
 0x1f6   : > { %v2175_v5 = vpop.eup %1847 }
 0x1f7   : > { %v891_v6 = vmul.f32 1.442695, %v865_v4  ;;  %v921_v7 = vsel %vm806_vm1, %v2175_v5, 0.0 }
 0x1f8   : > { %v821_v8 = vpop.xlane.xlu1 %820  ;;  %922 = vadd.xlane.f32.xlu1 %v921_v7  ;;  %v842_v9 = vpop.xlane.xlu0 %841 }
 0x1f9   : > { %1851 = vpow2.f32 %v891_v6  ;;  %v859_v10 = vsub.f32 %v2100_v21, %v821_v8  ;;  %v866_v11 = vsub.f32 %v2112_v27, %v842_v9 }
 0x1fa   : > { %v2181_v12 = vpop.eup %1849 }
 0x1fb   : > { %v879_v13 = vmul.f32 1.442695, %v859_v10  ;;  %v893_v19 = vmul.f32 1.442695, %v866_v11  ;;  %v924_v20 = vsel %vm806_vm1, %v2181_v12, 0.0 }
 0x1fc   : > { %v833_v22 = vpop.xlane.xlu1 %832  ;;  %v824_v23 = vpop.xlane.xlu0 %823  ;;  %925 = vadd.xlane.f32.xlu0 %v924_v20 }
 0x1fd   : > { %1853 = vpow2.f32 %v879_v13  ;;  %v863_v24 = vsub.f32 %v2110_v26, %v833_v22  ;;  %v860_v25 = vsub.f32 %v2118_v30, %v824_v23 }
 0x1fe   : > { %1855 = vpow2.f32 %v893_v19 }
 0x1ff   : > { %v887_v28 = vmul.f32 1.442695, %v863_v24  ;;  %v881_v21 = vmul.f32 1.442695, %v860_v25 }
 0x200   : > { %v851_v29 = vpop.xlane.xlu1 %850  ;;  %v836_v27 = vpop.xlane.xlu0 %835 }
 0x201   : > { %1857 = vpow2.f32 %v887_v28  ;;  %v869_v32 = vsub.f32 %v2120_v31, %v851_v29  ;;  %v864_v33 = vsub.f32 %v2126_v34, %v836_v27 }
 0x202   : > { %1859 = vpow2.f32 %v881_v21 }
 0x203   : > { %v899_v36 = vmul.f32 1.442695, %v869_v32  ;;  %v889_v37 = vmul.f32 1.442695, %v864_v33 }
 0x204   : > { %v845_v39 = vpop.xlane.xlu1 %844  ;;  %v854_v40 = vpop.xlane.xlu0 %853 }
 0x205   : > { %1861 = vpow2.f32 %v899_v36  ;;  %v867_v26 = vsub.f32 %v2128_v35, %v845_v39  ;;  %v870_v30 = vsub.f32 %v2134_v38, %v854_v40 }
 0x206   : > { %v2191_v42 = vpop.eup %1851  ;;  %1863 = vpow2.f32 %v889_v37 }
 0x207   : > { %v895_v43 = vmul.f32 1.442695, %v867_v26  ;;  %v901_v44 = vmul.f32 1.442695, %v870_v30  ;;  %v933_v31 = vsel %vm806_vm1, %v2191_v42, 0.0 }
 0x208   : > { %934 = vadd.xlane.f32.xlu1 %v933_v31  ;;  %v848_v34 = vpop.xlane.xlu0 %847  ;;  %v512_v49 = vpop.permute.xlu1 %511 }
 0x209   : > { %1865 = vpow2.f32 %v895_v43  ;;  %v868_v45 = vsub.f32 %v2140_v41, %v848_v34 }
 0x20a   : > { %v2196_v46 = vpop.eup %1853  ;;  %1867 = vpow2.f32 %v901_v44 }
 0x20b   : > { %v2198_v47 = vpop.eup %1855  ;;  %v897_v35 = vmul.f32 1.442695, %v868_v45  ;;  %v915_v38 = vsel %vm806_vm1, %v2196_v46, 0.0 }
 0x20c   : > { %916 = vadd.xlane.f32.xlu1 %v915_v38  ;;  %v936_v48 = vsel %vm806_vm1, %v2198_v47, 0.0  ;;  %v510_v15 = vpop.permute.xlu0 %509  ;;  %v500_v3 = vpop.permute.xlu1 %499 }
 0x20d   : > { %1869 = vpow2.f32 %v897_v35  ;;  %937 = vadd.xlane.f32.xlu0 %v936_v48  ;;  %v2204_v50 = vcombine.low %v510_v15, %v512_v49 }
 0x20e   : > { %v2206_v41 = vpop.eup %1857 }
 0x20f   : > { %v2208_v51 = vpop.eup %1859  ;;  %v927_v52 = vsel %vm806_vm1, %v2206_v41, 0.0  ;;  %1747 = vmatprep.subr.bf16.mxu1 %v2204_v50 }
 0x210   : > { %928 = vadd.xlane.f32.xlu1 %v927_v52  ;;  %v918_v14 = vsel %vm806_vm1, %v2208_v51, 0.0  ;;  %v498_v4 = vpop.permute.xlu0 %497 }
 0x211   : > { %919 = vadd.xlane.f32.xlu0 %v918_v14  ;;  %v1618_v25 = vcombine.low %v498_v4, %v500_v3 }
 0x212   : > { %v2215_v55 = vpop.eup %1861 }
 0x213   : > { %v2217_v57 = vpop.eup %1863  ;;  %v945_v58 = vsel %vm806_vm1, %v2215_v55, 0.0 }
 0x214   : > { %946 = vadd.xlane.f32.xlu1 %v945_v58  ;;  %v930_v60 = vsel %vm806_vm1, %v2217_v57, 0.0 }
 0x215   : > { %931 = vadd.xlane.f32.xlu0 %v930_v60 }
 0x216   : > { %v2223_v61 = vpop.eup %1865 }
 0x217   : > { %v2225_v62 = vpop.eup %1867  ;;  %v939_v63 = vsel %vm806_vm1, %v2223_v61, 0.0 }
 0x218   : > { %940 = vadd.xlane.f32.xlu1 %v939_v63  ;;  %v948_v0 = vsel %vm806_vm1, %v2225_v62, 0.0 }
 0x219   : > { %949 = vadd.xlane.f32.xlu0 %v948_v0 }
 0x21a   : > { %v2231_v1 = vpop.eup %1869 }
 0x21b   : > { %v942_v2 = vsel %vm806_vm1, %v2231_v1, 0.0 }
 0x21d   : > { %943 = vadd.xlane.f32.xlu0 %v942_v2 }
 0x229   : > { %507 = vrot.lane.b32.xlu1 %v2049_v17, %s1929_s14 }
 0x233   : > { %505 = vrot.lane.b32.xlu0 %v2043_v16, %s1929_s14 }
 0x23d   : > { %v911_v6 = vpop.xlane.xlu1 %910 }
 0x241   : > { %v905_v7 = vpop.xlane.xlu1 %904  ;;  %v914_v8 = vpop.xlane.xlu0 %913 }
 0x242   : > { %1871 = vrcp.f32 %v914_v8 }
 0x243   : > { %1873 = vrcp.f32 %v905_v7 }
 0x244   : > { %1875 = vrcp.f32 %v911_v6 }
 0x245   : > { %v908_v9 = vpop.xlane.xlu0 %907 }
 0x246   : > { %1877 = vrcp.f32 %v908_v9 }
 0x24f   : > { %v1872_v10 = vpop.eup %1871 }
 0x250   : > { %v1874_v11 = vpop.eup %1873  ;;  %v970_v20 = vmul.f32 %v1872_v10, %v2162_v56 }
 0x251   : > { %v1876_v13 = vpop.eup %1875  ;;  %v967_v17 = vmul.f32 %v1874_v11, %v2158_v54 }
 0x252   : > { %v969_v22 = vmul.f32 %v1876_v13, %v2156_v53 }
 0x253   : > { %v1878_v19 = vpop.eup %1877 }
 0x254   : > { %v968_v16 = vmul.f32 %v1878_v19, %v2168_v59  ;;  %v984_v24 = vpack.c.bf16 %v970_v20, %v969_v22  ;;  %v1838_v22 = vld [vmem:[%s2326_s5] sm:$0xff]  }
 0x256   : > { %v983_v23 = vpack.c.bf16 %v968_v16, %v967_v17 }
 0x258   : > { %1727 = vmatprep.mubr.msk.bf16.mxu0 %vm806_vm1, %v983_v23 }
 0x259   : > { %1728 = vmatmul.mubr.msk.bf16.vlgmr.msra.gmra.mxu0 %vm806_vm1, %v984_v24 }
 0x25a   : > { %1740 = vmatpush3.bf16.msra.mxu0 %v2093_v18 }
 0x25b   : > { %1741 = vmatprep.subr.bf16.mxu0 %v1618_v25 }
 0x25e   : > { %1742 = vmatpush3.bf16.msra.mxu0 %v1618_v25 }
 0x281   : > { %v923_v28 = vpop.xlane.xlu1 %922 }
 0x285   : > { %v926_v56 = vpop.xlane.xlu0 %925 }
 0x286   : > { %1879 = vrcp.f32 %v926_v56 }
 0x291   : > { %v935_v21 = vpop.xlane.xlu1 %934 }
 0x293   : > { %v1880_v36 = vpop.eup %1879 }
 0x294   : > { %v974_v30 = vmul.f32 %v1880_v36, %v2181_v12 }
 0x295   : > { %v917_v29 = vpop.xlane.xlu1 %916 }
 0x296   : > { %v938_v54 = vpop.xlane.xlu0 %937  ;;  %1881 = vrcp.f32 %v917_v29 }
 0x297   : > { %1883 = vrcp.f32 %v923_v28 }
 0x299   : > { %v929_v59 = vpop.xlane.xlu1 %928 }
 0x29a   : > { %v920_v53 = vpop.xlane.xlu0 %919 }
 0x29b   : > { %1885 = vrcp.f32 %v920_v53 }
 0x29c   : > { %1887 = vrcp.f32 %v938_v54 }
 0x29d   : > { %1889 = vrcp.f32 %v929_v59  ;;  %v947_v27 = vpop.xlane.xlu1 %946 }
 0x29e   : > { %1891 = vrcp.f32 %v935_v21  ;;  %v932_v32 = vpop.xlane.xlu0 %931 }
 0x29f   : > { %1893 = vrcp.f32 %v932_v32 }
 0x2a1   : > { %v941_v18 = vpop.xlane.xlu1 %940 }
 0x2a2   : > { %v950_v33 = vpop.xlane.xlu0 %949 }
 0x2a3   : > { %1895 = vrcp.f32 %v950_v33  ;;  %v1882_v37 = vpop.eup %1881 }
 0x2a4   : > { %1897 = vrcp.f32 %v941_v18  ;;  %v1884_v40 = vpop.eup %1883  ;;  %v971_v44 = vmul.f32 %v1882_v37, %v2196_v46 }
 0x2a5   : > { %1899 = vrcp.f32 %v947_v27  ;;  %v508_v34 = vpop.permute.xlu1 %507  ;;  %v973_v35 = vmul.f32 %v1884_v40, %v2175_v5 }
 0x2a6   : > { %v944_v39 = vpop.xlane.xlu0 %943 }
 0x2a7   : > { %1901 = vrcp.f32 %v944_v39  ;;  %v986_v52 = vpack.c.bf16 %v974_v30, %v973_v35 }
 0x2a8   : > { %v1886_v26 = vpop.eup %1885 }
 0x2a9   : > { %v1888_v43 = vpop.eup %1887  ;;  %v972_v31 = vmul.f32 %v1886_v26, %v2208_v51 }
 0x2aa   : > { %v1890_v45 = vpop.eup %1889  ;;  %v506_v38 = vpop.permute.xlu0 %505  ;;  %v978_v58 = vmul.f32 %v1888_v43, %v2198_v47 }
 0x2ab   : > { %v1892_v48 = vpop.eup %1891  ;;  %v985_v49 = vpack.c.bf16 %v972_v31, %v971_v44  ;;  %v1622_v14 = vcombine.low %v506_v38, %v508_v34  ;;  %v975_v12 = vmul.f32 %v1890_v45, %v2206_v41 }
 0x2ac   : > { %v1894_v15 = vpop.eup %1893  ;;  %v977_v51 = vmul.f32 %v1892_v48, %v2191_v42 }
 0x2ad   : > { %1735 = vmatprep.mubr.msk.bf16.mxu1 %vm806_vm1, %v985_v49  ;;  %v976_v46 = vmul.f32 %v1894_v15, %v2217_v57 }
 0x2ae   : > { %1736 = vmatmul.mubr.msk.bf16.vlgmr.msra.gmra.mxu1 %vm806_vm1, %v986_v52  ;;  %v988_v60 = vpack.c.bf16 %v978_v58, %v977_v51 }
 0x2af   : > { %1748 = vmatpush3.bf16.msra.mxu1 %v2204_v50  ;;  %v987_v5 = vpack.c.bf16 %v976_v46, %v975_v12 }
 0x2b0   : > { %1749 = vmatprep.subr.bf16.mxu1 %v1622_v14  ;;  %v1896_v63 = vpop.eup %1895 }
 0x2b1   : > { %1743 = vmatprep.mubr.msk.bf16.mxu0 %vm806_vm1, %v987_v5  ;;  %v1898_v0 = vpop.eup %1897  ;;  %v982_v57 = vmul.f32 %v1896_v63, %v2225_v62 }
 0x2b2   : > { %1744 = vmatmul.mubr.msk.bf16.vlgmr.msra.gmra.mxu0 %vm806_vm1, %v988_v60  ;;  %v1900_v47 = vpop.eup %1899  ;;  %v979_v2 = vmul.f32 %v1898_v0, %v2223_v61  ;;  %v1837_v61 = vld [vmem:[%s2326_s5 + $0x8] sm:$0xff]  }
 0x2b3   : > { %1750 = vmatpush3.bf16.msra.mxu1 %v1622_v14  ;;  %v981_v50 = vmul.f32 %v1900_v47, %v2215_v55  ;;  %1755 = vmatprep.subr.bf16.mxu0 %v1837_v61  ;;  %v1654_v47 = vld [vmem:[%s378_s8 + $0x8] sm:$0xff]  }
 0x2b4   : > { %v1902_v41 = vpop.eup %1901  ;;  %1756 = vmatpush3.bf16.msra.mxu0 %v1837_v61 }
 0x2b5   : > { %v980_v42 = vmul.f32 %v1902_v41, %v2231_v1  ;;  %v990_v4 = vpack.c.bf16 %v982_v57, %v981_v50  ;;  %1757 = vmatprep.subr.bf16.mxu0 %v1838_v22  ;;  %v1647_v41 = vld [vmem:[%s378_s8] sm:$0xff]   ;;  %v1652_v57 = vunpack.c.l.bf16 %v1654_v47 }
 0x2b6   : > { %v1626_v50 = vld [vmem:[%s2327_s6] ss:$0 sm:$0xff] }
 0x2b7   : > { %v989_v3 = vpack.c.bf16 %v980_v42, %v979_v2  ;;  %v1395_v2 = vld [vmem:[%s2322_s1 + $0x10] sm:$0xff]  ;;  %v1648_v42 = vunpack.c.l.bf16 %v1647_v41 }
 0x2b8   : > { %1758 = vmatpush3.bf16.msra.mxu0 %v1838_v22 }
 0x2b9   : > { %1751 = vmatprep.mubr.msk.bf16.mxu1 %vm806_vm1, %v989_v3  ;;  %v1393_v3 = vld [vmem:[%s2322_s1] sm:$0xff] }
 0x2ba   : > { %1752 = vmatmul.mubr.msk.bf16.vlgmr.msra.gmra.mxu1 %vm806_vm1, %v990_v4  ;;  %v1399_v4 = vadd.f32 %v1652_v57, %v1395_v2 }
 0x319   : > { %v1729_v6 = vpop.f32.mrf.mxu0 }
 0x31b   : > { %v1039_v7 = vpop.f32.mrf.mxu0 }
 0x31d   : > { %v1730_v8 = vpop.f32.mrf.mxu0 }
 0x31f   : > { %v1042_v10 = vpop.f32.mrf.mxu0 }
 0x36e   : > { %v1737_v9 = vpop.f32.mrf.mxu1 }
 0x370   : > { %v1102_v11 = vpop.f32.mrf.mxu1 }
 0x372   : > { %v1738_v62 = vpop.f32.mrf.mxu1  ;;  %v1745_v1 = vpop.f32.mrf.mxu0 }
 0x373   : > { %v1801_v55 = vpack.i.bf16 %v1738_v62, %v1737_v9  ;;  %v1394_v62 = vld [vmem:[%s2322_s1 + $0x8] sm:$0xff] }
 0x374   : > { %v1105_v13 = vpop.f32.mrf.mxu1  ;;  %v1165_v19 = vpop.f32.mrf.mxu0 }
 0x375   : > { %v1811_v20 = vpack.i.bf16 %v1105_v13, %v1102_v11  ;;  %1802 = vrot.lane.b32.xlu1 %v1801_v55, %s1930_s20  ;;  %v1649_v11 = vunpack.c.h.bf16 %v1647_v41 }
 0x376   : > { %v1746_v17 = vpop.f32.mrf.mxu0 }
 0x377   : > { %v1806_v16 = vpack.i.bf16 %v1746_v17, %v1745_v1  ;;  %1812 = vrot.lane.b32.xlu0 %v1811_v20, %s1930_s20  ;;  %v1398_v22 = vadd.f32 %v1649_v11, %v1394_v62 }
 0x378   : > { %v1168_v23 = vpop.f32.mrf.mxu0 }
 0x379   : > { %v1816_v24 = vpack.i.bf16 %v1168_v23, %v1165_v19  ;;  %1807 = vrot.lane.b32.xlu1 %v1806_v16, %s1931_s23 }
 0x37a   : > { %v1753_v25 = vpop.f32.mrf.mxu1 }
 0x37b   : > { %1817 = vrot.lane.b32.xlu0 %v1816_v24, %s1931_s23 }
 0x37c   : > { %v1228_v28 = vpop.f32.mrf.mxu1 }
 0x37e   : > { %v1754_v21 = vpop.f32.mrf.mxu1 }
 0x37f   : > { %v1826_v56 = vpack.i.bf16 %v1754_v21, %v1753_v25 }
 0x380   : > { %v1231_v29 = vpop.f32.mrf.mxu1 }
 0x381   : > { %v1821_v54 = vpack.i.bf16 %v1231_v29, %v1228_v28  ;;  %1827 = vrot.lane.b32.xlu1 %v1826_v56, %s1932_s24 }
 0x383   : > { %1822 = vrot.lane.b32.xlu0 %v1821_v54, %s1932_s24 }
 0x3e7   : > { %v1803_v59 = vpop.permute.xlu1 %1802 }
 0x3e8   : > { %v1805_v18 = vunpack.i.h.bf16 %v1803_v59  ;;  %v1804_v33 = vunpack.i.l.bf16 %v1803_v59 }
 0x3e9   : > { %v1813_v53 = vpop.permute.xlu0 %1812 }
 0x3ea   : > { %v1815_v36 = vunpack.i.h.bf16 %v1813_v53  ;;  %v1814_v37 = vunpack.i.l.bf16 %v1813_v53  ;;  %v1294_v34 = vsel %vm525_vm0, %v1730_v8, %v1805_v18  ;;  %v1293_v45 = vsel %vm525_vm0, %v1729_v6, %v1804_v33  ;;  %v1396_v8 = vld [vmem:[%s2322_s1 + $0x18] sm:$0xff] }
 0x3eb   : > { %v1808_v27 = vpop.permute.xlu1 %1807  ;;  %v1653_v6 = vunpack.c.h.bf16 %v1654_v47 }
 0x3ec   : > { %v1810_v39 = vunpack.i.h.bf16 %v1808_v27  ;;  %v1809_v40 = vunpack.i.l.bf16 %v1808_v27  ;;  %v1292_v35 = vsel %vm525_vm0, %v1042_v10, %v1815_v36  ;;  %v1291_v38 = vsel %vm525_vm0, %v1039_v7, %v1814_v37 }
 0x3ed   : > { %v1818_v32 = vpop.permute.xlu0 %1817  ;;  %v1397_v10 = vadd.f32 %v1648_v42, %v1393_v3  ;;  %v1400_v13 = vadd.f32 %v1653_v6, %v1396_v8 }
 0x3ee   : > { %v1820_v26 = vunpack.i.h.bf16 %v1818_v32  ;;  %v1819_v30 = vunpack.i.l.bf16 %v1818_v32  ;;  %v1299_v49 = vsel %vm1295_vm2, %v1294_v34, %v1810_v39  ;;  %v1298_v15 = vsel %vm1295_vm2, %v1293_v45, %v1809_v40 }
 0x3f0   : > { %v1296_v58 = vsel %vm1295_vm2, %v1291_v38, %v1819_v30  ;;  %v1297_v12 = vsel %vm1295_vm2, %v1292_v35, %v1820_v26 }
 0x3f3   : > { %v1828_v43 = vpop.permute.xlu1 %1827 }
 0x3f4   : > { %v1830_v44 = vunpack.i.h.bf16 %v1828_v43  ;;  %v1829_v31 = vunpack.i.l.bf16 %v1828_v43 }
 0x3f5   : > { %v1823_v48 = vpop.permute.xlu0 %1822 }
 0x3f6   : > { %v1825_v52 = vunpack.i.h.bf16 %v1823_v48  ;;  %v1824_v14 = vunpack.i.l.bf16 %v1823_v48  ;;  %v1304_v46 = vsel %vm1300_vm3, %v1299_v49, %v1830_v44  ;;  %v1303_v51 = vsel %vm1300_vm3, %v1298_v15, %v1829_v31 }
 0x3f7   : > { %v1306_v0 = vpack.c.bf16 %v1304_v46, %v1303_v51 }
 0x3f8   : > { %v1301_v5 = vsel %vm1300_vm3, %v1296_v58, %v1824_v14  ;;  %v1302_v60 = vsel %vm1300_vm3, %v1297_v12, %v1825_v52 }
 0x3f9   : > { %v1305_v63 = vpack.c.bf16 %v1302_v60, %v1301_v5 }
 0x3fb   : > { %1759 = vmatprep.mubr.msk.bf16.mxu0 %vm806_vm1, %v1305_v63 }
 0x3fc   : > { %1760 = vmatmul.mubr.msk.bf16.vlgmr.msra.gmra.mxu0 %vm806_vm1, %v1306_v0 }
 0x4bc   : > { %v1761_v7 = vpop.f32.mrf.mxu0 }
 0x4bd   : > { %v1379_v9 = vadd.f32 %v1761_v7, %v1626_v50 }
 0x4be   : > { %v1370_v61 = vpop.f32.mrf.mxu0 }
 0x4bf   : > { %v1403_v1 = vadd.f32 %v1399_v4, %v1379_v9  ;;  %v1371_v55 = vadd.f32 %v1626_v50, %v1370_v61 }
 0x4c0   : > { %v1762_v19 = vpop.f32.mrf.mxu0 }
 0x4c1   : > { %v1644_v20 = vpack.c.bf16 %v1403_v1, %v1403_v1  ;;  %v1401_v17 = vadd.f32 %v1397_v10, %v1371_v55  ;;  %v1382_v16 = vadd.f32 %v1762_v19, %v1626_v50 }
 0x4c2   : > { %v1373_v23 = vpop.f32.mrf.mxu0 }
 0x4c3   : > { %1424 = vst.msk [vmem:[%s414_s21 + $0x8] sm:$0xf] %vm1421_vm4, %v1644_v20  ;;  %v1642_v24 = vpack.c.bf16 %v1401_v17, %v1401_v17  ;;  %v1404_v25 = vadd.f32 %v1400_v13, %v1382_v16  ;;  %v1374_v28 = vadd.f32 %v1626_v50, %v1373_v23 }
 0x4c5   : > { %1422 = vst.msk [vmem:[%s414_s21] sm:$0xf] %vm1421_vm4, %v1642_v24  ;;  %v1645_v21 = vpack.c.bf16 %v1404_v25, %v1404_v25  ;;  %v1402_v56 = vadd.f32 %v1398_v22, %v1374_v28 }
 0x4c7   : > { %1425 = vst.msk [vmem:[%s414_s21 + $0xc] sm:$0xf] %vm1421_vm4, %v1645_v21  ;;  %v1643_v29 = vpack.c.bf16 %v1402_v56, %v1402_v56 }
 0x4c9   : > { %1423 = vst.msk [vmem:[%s414_s21 + $0x4] sm:$0xf] %vm1421_vm4, %v1643_v29 }
 0x4ca PF: > { %s17_s26 = sadd.s32 1, %s1925_s26   ;;  %s2329_s24 = smov %s1921_s25 }
 0x4cb   : > { %p14_p5 = scmp.ge.s32.totalorder %s17_s26, 4   ;;  %s2330_s25 = smov %s2332_s27 }
 0x4cd   :  { %16 = sbr.rel (!%p14_p5) target bundleno = 2 (0x2), region = 90 }

// kernel: _lambda_.17
= control target key start
LH: loop header
LB: loop body
LE: loop exit
PB: predicated region body
PF: predicated region fallthrough
CT: control target
= control target key end

     0   :  { %vm43_vm0 = vcmask 261120   ;;  %vm535_vm1 = vcmask 257024   ;;  %s972_s0 = inlined_call_operand.vmem [shape: bf16[64,32], index: 0, kind: input, shape index: {}]   ;;  %s973_s3 = inlined_call_operand.vmem [shape: bf16[32,128], index: 3, kind: input, shape index: {}]   ;;  %s974_s1 = inlined_call_operand.vmem [shape: f32[1,32], index: 1, kind: input, shape index: {}]   ;;  %s975_s2 = inlined_call_operand.vmem [shape: f32[1,32], index: 2, kind: input, shape index: {}]   ;;  %s976_s5 = inlined_call_operand.vmem [shape: bf16[128,32], index: 5, kind: input, shape index: {}]   ;;  %s977_s4 = inlined_call_operand.vmem [shape: f32[1,128], index: 4, kind: input, shape index: {}]   ;;  %s978_s6 = inlined_call_operand.vmem [shape: f32[1,32], index: 6, kind: input, shape index: {}]   ;;  %s979_s7 = inlined_call_operand.vmem [shape: bf16[64,32], index: 7, kind: output, shape index: {}]  }
   0x1   :  { %v583_v0 = vld [vmem:[%s972_s0] sm:$0xff]   ;;  %v598_v1 = vld [vmem:[%s972_s0 + $0x8] sm:$0xff]   ;;  %v599_v6 = vld [vmem:[%s972_s0 + $0x10] sm:$0xff]  }
   0x2   :  { %v743_v2 = vunpack.c.l.bf16 %v583_v0  ;;  %v745_v3 = vunpack.c.l.bf16 %v598_v1  ;;  %v747_v4 = vunpack.c.h.bf16 %v583_v0  ;;  %v749_v5 = vunpack.c.h.bf16 %v598_v1  ;;  %v600_v13 = vld [vmem:[%s972_s0 + $0x18] sm:$0xff]   ;;  %v655_v60 = vld [vmem:[%s973_s3 + $0x8] sm:$0xff]   ;;  %v656_v61 = vld [vmem:[%s973_s3] sm:$0xff]  }
   0x3   :  { %v762_v11 = vunpack.c.l.bf16 %v599_v6  ;;  %v764_v12 = vunpack.c.h.bf16 %v599_v6  ;;  %v773_v16 = vunpack.c.l.bf16 %v600_v13  ;;  %v775_v17 = vunpack.c.h.bf16 %v600_v13  ;;  %619 = vmatprep.subr.bf16.mxu0 %v655_v60 }
   0x4   :  { %v44_v7 = vsel %vm43_vm0, %v743_v2, 0.0  ;;  %v50_v8 = vsel %vm43_vm0, %v745_v3, 0.0  ;;  %v47_v9 = vsel %vm43_vm0, %v747_v4, 0.0  ;;  %v53_v10 = vsel %vm43_vm0, %v749_v5, 0.0  ;;  %620 = vmatpush3.bf16.msra.mxu0 %v655_v60 }
   0x5   :  { %45 = vadd.xlane.f32.xlu0 %v44_v7  ;;  %51 = vadd.xlane.f32.xlu1 %v50_v8  ;;  %v56_v14 = vsel %vm43_vm0, %v762_v11, 0.0  ;;  %v59_v15 = vsel %vm43_vm0, %v764_v12, 0.0  ;;  %v62_v18 = vsel %vm43_vm0, %v773_v16, 0.0  ;;  %v65_v19 = vsel %vm43_vm0, %v775_v17, 0.0 }
   0x6   :  { %621 = vmatprep.subr.bf16.mxu0 %v656_v61 }
   0x8   :  { %622 = vmatpush3.bf16.msra.mxu0 %v656_v61 }
   0x9   :  { %48 = vadd.xlane.f32.xlu0 %v47_v9  ;;  %54 = vadd.xlane.f32.xlu1 %v53_v10 }
   0xd   :  { %57 = vadd.xlane.f32.xlu0 %v56_v14  ;;  %60 = vadd.xlane.f32.xlu1 %v59_v15 }
  0x11   :  { %63 = vadd.xlane.f32.xlu0 %v62_v18  ;;  %66 = vadd.xlane.f32.xlu1 %v65_v19 }
  0x8e   :  { %v46_v20 = vpop.xlane.xlu0 %45  ;;  %v52_v21 = vpop.xlane.xlu1 %51 }
  0x8f   :  { %v69_v22 = vmul.f32 0.03125, %v46_v20  ;;  %v71_v23 = vmul.f32 0.03125, %v52_v21 }
  0x91   :  { %v782_v24 = vsub.f32 %v743_v2, %v69_v22  ;;  %v785_v25 = vsub.f32 %v745_v3, %v71_v23 }
  0x92   :  { %v49_v26 = vpop.xlane.xlu0 %48  ;;  %v55_v27 = vpop.xlane.xlu1 %54 }
  0x93   :  { %v70_v28 = vmul.f32 0.03125, %v49_v26  ;;  %v72_v29 = vmul.f32 0.03125, %v55_v27  ;;  %v85_v30 = vmul.f32 %v782_v24, %v782_v24  ;;  %v87_v31 = vmul.f32 %v785_v25, %v785_v25 }
  0x95   :  { %v792_v32 = vsub.f32 %v747_v4, %v70_v28  ;;  %v795_v33 = vsub.f32 %v749_v5, %v72_v29  ;;  %v93_v34 = vsel %vm43_vm0, %v85_v30, 0.0  ;;  %v99_v37 = vsel %vm43_vm0, %v87_v31, 0.0 }
  0x96   :  { %94 = vadd.xlane.f32.xlu0 %v93_v34  ;;  %v58_v35 = vpop.xlane.xlu0 %57  ;;  %v61_v36 = vpop.xlane.xlu1 %60 }
  0x97   :  { %v73_v38 = vmul.f32 0.03125, %v58_v35  ;;  %v74_v39 = vmul.f32 0.03125, %v61_v36  ;;  %v86_v40 = vmul.f32 %v792_v32, %v792_v32  ;;  %v88_v41 = vmul.f32 %v795_v33, %v795_v33  ;;  %v548_v36 = vld [vmem:[%s974_s1] ss:$0 sm:$0xff] }
  0x99   :  { %v804_v42 = vsub.f32 %v762_v11, %v73_v38  ;;  %v807_v43 = vsub.f32 %v764_v12, %v74_v39  ;;  %v96_v44 = vsel %vm43_vm0, %v86_v40, 0.0  ;;  %v102_v47 = vsel %vm43_vm0, %v88_v41, 0.0  ;;  %v549_v41 = vld [vmem:[%s975_s2] ss:$0 sm:$0xff] }
  0x9a   :  { %100 = vadd.xlane.f32.xlu0 %v99_v37  ;;  %97 = vadd.xlane.f32.xlu1 %v96_v44  ;;  %v64_v45 = vpop.xlane.xlu0 %63  ;;  %v67_v46 = vpop.xlane.xlu1 %66 }
  0x9b   :  { %v75_v48 = vmul.f32 0.03125, %v64_v45  ;;  %v76_v49 = vmul.f32 0.03125, %v67_v46  ;;  %v89_v50 = vmul.f32 %v804_v42, %v804_v42  ;;  %v90_v51 = vmul.f32 %v807_v43, %v807_v43 }
  0x9d   :  { %v816_v52 = vsub.f32 %v773_v16, %v75_v48  ;;  %v819_v53 = vsub.f32 %v775_v17, %v76_v49  ;;  %v105_v54 = vsel %vm43_vm0, %v89_v50, 0.0  ;;  %v108_v55 = vsel %vm43_vm0, %v90_v51, 0.0 }
  0x9e   :  { %103 = vadd.xlane.f32.xlu1 %v102_v47  ;;  %106 = vadd.xlane.f32.xlu0 %v105_v54 }
  0x9f   :  { %v91_v56 = vmul.f32 %v816_v52, %v816_v52  ;;  %v92_v57 = vmul.f32 %v819_v53, %v819_v53 }
  0xa1   :  { %v111_v58 = vsel %vm43_vm0, %v91_v56, 0.0  ;;  %v114_v59 = vsel %vm43_vm0, %v92_v57, 0.0 }
  0xa2   :  { %109 = vadd.xlane.f32.xlu1 %v108_v55  ;;  %112 = vadd.xlane.f32.xlu0 %v111_v58 }
  0xa6   :  { %115 = vadd.xlane.f32.xlu1 %v114_v59 }
 0x11f   :  { %v95_v62 = vpop.xlane.xlu0 %94 }
 0x120   :  { %v117_v63 = vmul.f32 0.03125, %v95_v62 }
 0x122   :  { %v125_v0 = vadd.f32 1e-05, %v117_v63 }
 0x123   :  { %v98_v1 = vpop.xlane.xlu1 %97  ;;  %v101_v6 = vpop.xlane.xlu0 %100 }
 0x124   :  { %665 = vrsqrt.f32 %v125_v0  ;;  %v118_v7 = vmul.f32 0.03125, %v98_v1  ;;  %v119_v8 = vmul.f32 0.03125, %v101_v6 }
 0x126   :  { %v126_v9 = vadd.f32 1e-05, %v118_v7  ;;  %v127_v10 = vadd.f32 1e-05, %v119_v8 }
 0x127   :  { %v104_v13 = vpop.xlane.xlu1 %103  ;;  %v107_v14 = vpop.xlane.xlu0 %106 }
 0x128   :  { %667 = vrsqrt.f32 %v126_v9  ;;  %v120_v15 = vmul.f32 0.03125, %v104_v13  ;;  %v121_v18 = vmul.f32 0.03125, %v107_v14  ;;  %v660_v13 = vld [vmem:[%s976_s5 + $0x20] sm:$0xff]   ;;  %v661_v14 = vld [vmem:[%s976_s5 + $0x18] sm:$0xff]  }
 0x129   :  { %669 = vrsqrt.f32 %v127_v10  ;;  %v659_v10 = vld [vmem:[%s976_s5 + $0x28] sm:$0xff]  }
 0x12a   :  { %v128_v19 = vadd.f32 1e-05, %v120_v15  ;;  %v129_v20 = vadd.f32 1e-05, %v121_v18  ;;  %v662_v15 = vld [vmem:[%s976_s5 + $0x10] sm:$0xff]   ;;  %v663_v18 = vld [vmem:[%s976_s5 + $0x8] sm:$0xff]  }
 0x12b   :  { %v110_v21 = vpop.xlane.xlu1 %109  ;;  %v113_v22 = vpop.xlane.xlu0 %112 }
 0x12c   :  { %671 = vrsqrt.f32 %v128_v19  ;;  %v122_v23 = vmul.f32 0.03125, %v110_v21  ;;  %v123_v26 = vmul.f32 0.03125, %v113_v22  ;;  %v664_v19 = vld [vmem:[%s976_s5] sm:$0xff]  }
 0x12d   :  { %673 = vrsqrt.f32 %v129_v20  ;;  %v550_v20 = vld [vmem:[%s977_s4] ss:$0 sm:$0xff] }
 0x12e   :  { %v130_v27 = vadd.f32 1e-05, %v122_v23  ;;  %v131_v28 = vadd.f32 1e-05, %v123_v26 }
 0x12f   :  { %v116_v29 = vpop.xlane.xlu1 %115 }
 0x130   :  { %675 = vrsqrt.f32 %v130_v27  ;;  %v124_v30 = vmul.f32 0.03125, %v116_v29 }
 0x131   :  { %v666_v31 = vpop.eup %665  ;;  %677 = vrsqrt.f32 %v131_v28 }
 0x132   :  { %v132_v34 = vadd.f32 1e-05, %v124_v30  ;;  %v141_v35 = vmul.f32 %v666_v31, %v782_v24 }
 0x134   :  { %679 = vrsqrt.f32 %v132_v34  ;;  %v156_v40 = vmul.f32 %v548_v36, %v141_v35 }
 0x135   :  { %v668_v37 = vpop.eup %667 }
 0x136   :  { %v670_v38 = vpop.eup %669  ;;  %v142_v39 = vmul.f32 %v668_v37, %v792_v32  ;;  %v171_v24 = vadd.f32 %v549_v41, %v156_v40 }
 0x137   :  { %v143_v44 = vmul.f32 %v670_v38, %v785_v25 }
 0x138   :  { %v157_v45 = vmul.f32 %v548_v36, %v142_v39 }
 0x139   :  { %v672_v46 = vpop.eup %671  ;;  %v158_v50 = vmul.f32 %v548_v36, %v143_v44 }
 0x13a   :  { %v674_v47 = vpop.eup %673  ;;  %v172_v48 = vadd.f32 %v549_v41, %v157_v45  ;;  %v144_v49 = vmul.f32 %v672_v46, %v795_v33 }
 0x13b   :  { %v145_v51 = vmul.f32 %v674_v47, %v804_v42  ;;  %v173_v57 = vadd.f32 %v549_v41, %v158_v50 }
 0x13c   :  { %v179_v54 = vpack.c.bf16 %v172_v48, %v171_v24  ;;  %v159_v55 = vmul.f32 %v548_v36, %v144_v49 }
 0x13d   :  { %v676_v32 = vpop.eup %675  ;;  %v160_v59 = vmul.f32 %v548_v36, %v145_v51 }
 0x13e   :  { %v678_v56 = vpop.eup %677  ;;  %623 = vmatprep.mubr.msk.bf16.mxu0 %vm43_vm0, %v179_v54  ;;  %v174_v58 = vadd.f32 %v549_v41, %v159_v55  ;;  %v146_v25 = vmul.f32 %v676_v32, %v807_v43 }
 0x13f   :  { %v147_v60 = vmul.f32 %v678_v56, %v816_v52  ;;  %v175_v33 = vadd.f32 %v549_v41, %v160_v59  ;;  %v657_v52 = vld [vmem:[%s976_s5 + $0x38] sm:$0xff]  }
 0x140   :  { %v180_v61 = vpack.c.bf16 %v174_v58, %v173_v57  ;;  %v161_v62 = vmul.f32 %v548_v36, %v146_v25  ;;  %631 = vmatprep.subr.bf16.mxu1 %v657_v52 }
 0x141   :  { %v680_v63 = vpop.eup %679  ;;  %v162_v1 = vmul.f32 %v548_v36, %v147_v60  ;;  %632 = vmatpush3.bf16.msra.mxu1 %v657_v52 }
 0x142   :  { %624 = vmatmul.mubr.msk.bf16.vlgmr.msra.gmra.mxu0 %vm43_vm0, %v180_v61  ;;  %v176_v42 = vadd.f32 %v549_v41, %v161_v62  ;;  %v148_v0 = vmul.f32 %v680_v63, %v819_v53  ;;  %v658_v53 = vld [vmem:[%s976_s5 + $0x30] sm:$0xff]  }
 0x143   :  { %v177_v8 = vadd.f32 %v549_v41, %v162_v1  ;;  %633 = vmatprep.subr.bf16.mxu1 %v658_v53 }
 0x144   :  { %v181_v6 = vpack.c.bf16 %v176_v42, %v175_v33  ;;  %v163_v7 = vmul.f32 %v548_v36, %v148_v0 }
 0x145   :  { %634 = vmatpush3.bf16.msra.mxu1 %v658_v53 }
 0x146   :  { %627 = vmatprep.mubr.msk.bf16.mxu0 %vm43_vm0, %v181_v6  ;;  %v178_v9 = vadd.f32 %v549_v41, %v163_v7  ;;  %635 = vmatprep.subr.bf16.mxu1 %v659_v10 }
 0x148   :  { %v182_v43 = vpack.c.bf16 %v178_v9, %v177_v8 }
 0x149   :  { %636 = vmatpush3.bf16.msra.mxu1 %v659_v10 }
 0x14a   :  { %628 = vmatmul.mubr.msk.bf16.gmra.mxu0 %vm43_vm0, %v182_v43  ;;  %637 = vmatprep.subr.bf16.mxu1 %v660_v13 }
 0x14d   :  { %638 = vmatpush3.bf16.msra.mxu1 %v660_v13 }
 0x14e   :  { %639 = vmatprep.subr.bf16.mxu1 %v661_v14 }
 0x151   :  { %640 = vmatpush3.bf16.msra.mxu1 %v661_v14 }
 0x152   :  { %641 = vmatprep.subr.bf16.mxu1 %v662_v15 }
 0x155   :  { %642 = vmatpush3.bf16.msra.mxu1 %v662_v15 }
 0x156   :  { %643 = vmatprep.subr.bf16.mxu1 %v663_v18 }
 0x159   :  { %644 = vmatpush3.bf16.msra.mxu1 %v663_v18 }
 0x15a   :  { %645 = vmatprep.subr.bf16.mxu1 %v664_v19 }
 0x15d   :  { %646 = vmatpush3.bf16.msra.mxu1 %v664_v19 }
 0x202   :  { %v625_v21 = vpop.f32.mrf.mxu0 }
 0x203   :  { %v880_v22 = vadd.f32 %v625_v21, %v550_v20 }
 0x204   :  { %v252_v23 = vpop.f32.mrf.mxu0 }
 0x205   :  { %v285_v26 = vmul.f32 %v880_v22, %v880_v22  ;;  %v884_v27 = vadd.f32 %v550_v20, %v252_v23 }
 0x206   :  { %v626_v28 = vpop.f32.mrf.mxu0 }
 0x207   :  { %v293_v29 = vmul.f32 %v285_v26, %v880_v22  ;;  %v283_v30 = vmul.f32 %v884_v27, %v884_v27  ;;  %v889_v31 = vadd.f32 %v626_v28, %v550_v20 }
 0x208   :  { %v255_v34 = vpop.f32.mrf.mxu0 }
 0x209   :  { %v301_v35 = vmul.f32 0.044715, %v293_v29  ;;  %v291_v36 = vmul.f32 %v283_v30, %v884_v27  ;;  %v286_v37 = vmul.f32 %v889_v31, %v889_v31  ;;  %v894_v38 = vadd.f32 %v550_v20, %v255_v34 }
 0x20a   :  { %v629_v39 = vpop.f32.mrf.mxu0 }
 0x20b   :  { %v309_v40 = vadd.f32 %v301_v35, %v880_v22  ;;  %v299_v41 = vmul.f32 0.044715, %v291_v36  ;;  %v294_v44 = vmul.f32 %v286_v37, %v889_v31  ;;  %v284_v45 = vmul.f32 %v894_v38, %v894_v38 }
 0x20c   :  { %v900_v46 = vadd.f32 %v629_v39, %v550_v20  ;;  %v268_v47 = vpop.f32.mrf.mxu0 }
 0x20d   :  { %v317_v24 = vmul.f32 0.7978846, %v309_v40  ;;  %v307_v48 = vadd.f32 %v299_v41, %v884_v27  ;;  %v302_v49 = vmul.f32 0.044715, %v294_v44  ;;  %v292_v50 = vmul.f32 %v284_v45, %v894_v38 }
 0x20e   :  { %v289_v51 = vmul.f32 %v900_v46, %v900_v46  ;;  %v906_v54 = vadd.f32 %v550_v20, %v268_v47  ;;  %v630_v55 = vpop.f32.mrf.mxu0 }
 0x20f   :  { %v310_v32 = vadd.f32 %v302_v49, %v889_v31  ;;  %v300_v56 = vmul.f32 0.044715, %v292_v50  ;;  %v909_v57 = vadd.f32 %v630_v55, %v550_v20  ;;  %681 = vtanh.f32 %v317_v24 }
 0x210   :  { %v297_v58 = vmul.f32 %v289_v51, %v900_v46  ;;  %v287_v25 = vmul.f32 %v906_v54, %v906_v54  ;;  %v271_v59 = vpop.f32.mrf.mxu0  ;;  %v315_v60 = vmul.f32 0.7978846, %v307_v48 }
 0x211   :  { %v318_v61 = vmul.f32 0.7978846, %v310_v32  ;;  %v308_v62 = vadd.f32 %v300_v56, %v894_v38  ;;  %v290_v63 = vmul.f32 %v909_v57, %v909_v57  ;;  %v272_v33 = vadd.f32 %v550_v20, %v271_v59 }
 0x212   :  { %v305_v42 = vmul.f32 0.044715, %v297_v58  ;;  %v295_v0 = vmul.f32 %v287_v25, %v906_v54  ;;  %683 = vtanh.f32 %v315_v60 }
 0x213   :  { %685 = vtanh.f32 %v318_v61  ;;  %v298_v1 = vmul.f32 %v290_v63, %v909_v57  ;;  %v288_v6 = vmul.f32 %v272_v33, %v272_v33  ;;  %v316_v7 = vmul.f32 0.7978846, %v308_v62 }
 0x214   :  { %v313_v8 = vadd.f32 %v305_v42, %v900_v46  ;;  %v303_v9 = vmul.f32 0.044715, %v295_v0  ;;  %v557_v0 = vld [vmem:[%s978_s6] ss:$0 sm:$0xff] }
 0x215   :  { %v306_v43 = vmul.f32 0.044715, %v298_v1  ;;  %v296_v52 = vmul.f32 %v288_v6, %v272_v33  ;;  %687 = vtanh.f32 %v316_v7 }
 0x216   :  { %v321_v53 = vmul.f32 0.7978846, %v313_v8  ;;  %v311_v10 = vadd.f32 %v303_v9, %v906_v54 }
 0x217   :  { %v314_v13 = vadd.f32 %v306_v43, %v909_v57  ;;  %v304_v14 = vmul.f32 0.044715, %v296_v52 }
 0x218   :  { %689 = vtanh.f32 %v321_v53  ;;  %v319_v15 = vmul.f32 0.7978846, %v311_v10 }
 0x219   :  { %v322_v18 = vmul.f32 0.7978846, %v314_v13  ;;  %v312_v19 = vadd.f32 %v304_v14, %v272_v33 }
 0x21a   :  { %691 = vtanh.f32 %v319_v15 }
 0x21b   :  { %693 = vtanh.f32 %v322_v18  ;;  %v320_v20 = vmul.f32 0.7978846, %v312_v19 }
 0x21c   :  { %v682_v21 = vpop.eup %681 }
 0x21d   :  { %695 = vtanh.f32 %v320_v20  ;;  %v333_v29 = vadd.f32 1.0, %v682_v21 }
 0x21f   :  { %v684_v23 = vpop.eup %683  ;;  %v341_v39 = vmul.f32 0.5, %v333_v29 }
 0x220   :  { %v686_v26 = vpop.eup %685  ;;  %v331_v28 = vadd.f32 1.0, %v684_v23 }
 0x221   :  { %v334_v30 = vadd.f32 1.0, %v686_v26  ;;  %v349_v49 = vmul.f32 %v341_v39, %v880_v22 }
 0x222   :  { %v688_v34 = vpop.eup %687  ;;  %v339_v36 = vmul.f32 0.5, %v331_v28 }
 0x223   :  { %v332_v35 = vadd.f32 1.0, %v688_v34  ;;  %v342_v37 = vmul.f32 0.5, %v334_v30 }
 0x224   :  { %v347_v47 = vmul.f32 %v339_v36, %v884_v27 }
 0x225   :  { %v690_v40 = vpop.eup %689  ;;  %v340_v41 = vmul.f32 0.5, %v332_v35  ;;  %v350_v44 = vmul.f32 %v342_v37, %v889_v31 }
 0x226   :  { %v337_v51 = vadd.f32 1.0, %v690_v40 }
 0x227   :  { %v692_v45 = vpop.eup %691  ;;  %v348_v24 = vmul.f32 %v340_v41, %v894_v38  ;;  %v356_v58 = vpack.c.bf16 %v350_v44, %v349_v49 }
 0x228   :  { %v694_v48 = vpop.eup %693  ;;  %v335_v50 = vadd.f32 1.0, %v692_v45  ;;  %v345_v31 = vmul.f32 0.5, %v337_v51 }
 0x229   :  { %v355_v55 = vpack.c.bf16 %v348_v24, %v347_v47  ;;  %v338_v32 = vadd.f32 1.0, %v694_v48 }
 0x22a   :  { %v696_v56 = vpop.eup %695  ;;  %v343_v59 = vmul.f32 0.5, %v335_v50  ;;  %v353_v22 = vmul.f32 %v345_v31, %v900_v46 }
 0x22b   :  { %647 = vmatprep.mubr.bf16.mxu1 %v355_v55  ;;  %v336_v25 = vadd.f32 1.0, %v696_v56  ;;  %v346_v60 = vmul.f32 0.5, %v338_v32 }
 0x22c   :  { %648 = vmatmul.mubr.bf16.vlgmr.msra.gmra.mxu1 %v356_v58  ;;  %v351_v38 = vmul.f32 %v343_v59, %v906_v54 }
 0x22d   :  { %v344_v61 = vmul.f32 0.5, %v336_v25  ;;  %v354_v27 = vmul.f32 %v346_v60, %v909_v57 }
 0x22f   :  { %v352_v62 = vmul.f32 %v344_v61, %v272_v33  ;;  %v358_v42 = vpack.c.bf16 %v354_v27, %v353_v22 }
 0x231   :  { %v357_v63 = vpack.c.bf16 %v352_v62, %v351_v38 }
 0x233   :  { %651 = vmatprep.mubr.bf16.mxu1 %v357_v63 }
 0x234   :  { %652 = vmatmul.mubr.bf16.gmra.mxu1 %v358_v42 }
 0x2ec   :  { %v649_v1 = vpop.f32.mrf.mxu1 }
 0x2ed   :  { %v473_v6 = vadd.f32 %v649_v1, %v557_v0 }
 0x2ee   :  { %v464_v7 = vpop.f32.mrf.mxu1 }
 0x2ef   :  { %v497_v8 = vadd.f32 %v745_v3, %v473_v6  ;;  %v465_v9 = vadd.f32 %v557_v0, %v464_v7 }
 0x2f0   :  { %v650_v57 = vpop.f32.mrf.mxu1 }
 0x2f1   :  { %v576_v54 = vpack.c.bf16 %v497_v8, %v497_v8  ;;  %v495_v33 = vadd.f32 %v743_v2, %v465_v9  ;;  %v476_v46 = vadd.f32 %v650_v57, %v557_v0 }
 0x2f2   :  { %v467_v43 = vpop.f32.mrf.mxu1 }
 0x2f3   :  { %538 = vst.msk [vmem:[%s979_s7 + $0x8] sm:$0xf] %vm535_vm1, %v576_v54  ;;  %v574_v52 = vpack.c.bf16 %v495_v33, %v495_v33  ;;  %v498_v53 = vadd.f32 %v749_v5, %v476_v46  ;;  %v468_v10 = vadd.f32 %v557_v0, %v467_v43 }
 0x2f4   :  { %v653_v13 = vpop.f32.mrf.mxu1 }
 0x2f5   :  { %536 = vst.msk [vmem:[%s979_s7] sm:$0xf] %vm535_vm1, %v574_v52  ;;  %v577_v3 = vpack.c.bf16 %v498_v53, %v498_v53  ;;  %v496_v2 = vadd.f32 %v747_v4, %v468_v10  ;;  %v489_v14 = vadd.f32 %v653_v13, %v557_v0 }
 0x2f6   :  { %v480_v15 = vpop.f32.mrf.mxu1 }
 0x2f7   :  { %539 = vst.msk [vmem:[%s979_s7 + $0xc] sm:$0xf] %vm535_vm1, %v577_v3  ;;  %v575_v18 = vpack.c.bf16 %v496_v2, %v496_v2  ;;  %v501_v5 = vadd.f32 %v773_v16, %v489_v14  ;;  %v481_v19 = vadd.f32 %v557_v0, %v480_v15 }
 0x2f8   :  { %v654_v20 = vpop.f32.mrf.mxu1 }
 0x2f9   :  { %537 = vst.msk [vmem:[%s979_s7 + $0x4] sm:$0xf] %vm535_vm1, %v575_v18  ;;  %v580_v21 = vpack.c.bf16 %v501_v5, %v501_v5  ;;  %v499_v4 = vadd.f32 %v762_v11, %v481_v19  ;;  %v492_v23 = vadd.f32 %v654_v20, %v557_v0 }
 0x2fa   :  { %v483_v26 = vpop.f32.mrf.mxu1 }
 0x2fb   :  { %542 = vst.msk [vmem:[%s979_s7 + $0x18] sm:$0xf] %vm535_vm1, %v580_v21  ;;  %v578_v28 = vpack.c.bf16 %v499_v4, %v499_v4  ;;  %v502_v16 = vadd.f32 %v775_v17, %v492_v23  ;;  %v484_v29 = vadd.f32 %v557_v0, %v483_v26 }
 0x2fd   :  { %540 = vst.msk [vmem:[%s979_s7 + $0x10] sm:$0xf] %vm535_vm1, %v578_v28  ;;  %v581_v30 = vpack.c.bf16 %v502_v16, %v502_v16  ;;  %v500_v34 = vadd.f32 %v764_v12, %v484_v29 }
 0x2ff   :  { %543 = vst.msk [vmem:[%s979_s7 + $0x1c] sm:$0xf] %vm535_vm1, %v581_v30  ;;  %v579_v11 = vpack.c.bf16 %v500_v34, %v500_v34 }
 0x301   :  { %541 = vst.msk [vmem:[%s979_s7 + $0x14] sm:$0xf] %vm535_vm1, %v579_v11 }

</bundles_post_ra>
